<compile_context>
chip_gen: v7x
topology: tpu7x:2x2x1
jax: 0.10.0
libtpu: 0.0.40
codegen_flags: <defaults>
</compile_context>

<pallas_src>
import jax
import jax.numpy as jnp
from jax.experimental import pallas as pl
from jax.experimental.pallas import tpu as pltpu

NUM_CLASSES = 10
CLASS_PAD = 128  # lane-dense logits / output block


def _cdiv(a, b):
    return -(-a // b)


def _round_up(n, m):
    return ((n + m - 1) // m) * m


def _vmem_capacity_bytes():
    """Per-core VMEM capacity, or None if it cannot be queried."""
    try:
        return int(pltpu.get_tpu_info().vmem_capacity_bytes)
    except Exception:
        return None


def _choose_tiling(B, tb_cap, prefer_even_grid):
    """Pick (TB, padded batch, grid steps): TB multiple of 16 (bf16 sublane
    packing), sized from the batch so padding is at most one tile."""
    steps = max(1, _cdiv(B, tb_cap))
    if prefer_even_grid and B >= 32 and steps % 2 == 1:
        steps += 1  # v7x: make sure both TensorCores get work
    TB = _round_up(_cdiv(B, steps), 16)
    G = _cdiv(B, TB)
    Bp = G * TB
    return TB, Bp, G


def mlp_svhn_kernel(x_ref, w0_ref, b0_ref, w1_ref, b1_ref, w2_ref, b2_ref,
                    out_ref):
    # ---- linear0 + relu : [TB,3072] @ [3072,512] -> f32 ----------------
    # x arrives f32; cast to bf16 right at the MXU (no wrapper convert pass).
    x_bf = x_ref[...].astype(jnp.bfloat16)
    h0 = jnp.dot(x_bf, w0_ref[...], preferred_element_type=jnp.float32)
    h0 = jnp.maximum(h0 + b0_ref[...], 0.0)

    # ---- linear1 + relu : [TB,512] @ [512,128] -> f32 ------------------
    h1 = jnp.dot(h0.astype(jnp.bfloat16), w1_ref[...],
                 preferred_element_type=jnp.float32)
    h1 = jnp.maximum(h1 + b1_ref[...], 0.0)

    # ---- linear2 : [TB,128] @ [128,128(padded)] -> f32 -----------------
    # Padded classes have zero weights and bias -1e30, so they vanish from
    # the softmax (exp underflows to 0) and the result is exact.
    logits = jnp.dot(h1.astype(jnp.bfloat16), w2_ref[...],
                     preferred_element_type=jnp.float32)
    logits = logits + b2_ref[...]

    # ---- log_softmax over the class axis, numerically stable, f32 ------
    m = jnp.max(logits, axis=-1, keepdims=True)
    shifted = logits - m
    lse = jnp.log(jnp.sum(jnp.exp(shifted), axis=-1, keepdims=True))
    out_ref[...] = shifted - lse


def mlp_svhn_forward(x, params, *, tb=None, vmem_limit_bytes=None):
    """x: [B, 3, 32, 32] float32 (NCHW). Returns log-probs [B, 10] float32."""
    w0, b0, w1, b1, w2, b2 = params
    B = x.shape[0]
    D_in = w0.shape[0]
    H0 = w0.shape[1]
    H1 = w1.shape[1]

    # Identical to torch.flatten(x, 1) for NCHW; stays f32 (no extra HBM pass).
    x_flat = x.reshape(B, -1)

    # --- generation-aware defaults ---------------------------------------
    vmem_cap = _vmem_capacity_bytes()
    if vmem_cap is None:
        default_tb, default_vmem, prefer_even = 512, 32 << 20, False
    elif vmem_cap <= (64 << 20):            # v7x-class: 64 MiB VMEM, 2 TCs
        default_tb, default_vmem, prefer_even = 1024, 48 << 20, True
    else:                                   # v5e / v6e: 128 MiB VMEM, 1 TC
        default_tb, default_vmem, prefer_even = 2048, 96 << 20, False
    if tb is None:
        tb = default_tb
    if vmem_limit_bytes is None:
        vmem_limit_bytes = default_vmem

    TB, Bp, G = _choose_tiling(B, tb, prefer_even)
    if Bp != B:
        x_flat = jnp.pad(x_flat, ((0, Bp - B), (0, 0)))

    # bf16 weights for the MXU; f32 biases. Pad the classifier to 128 lanes.
    w0b = w0.astype(jnp.bfloat16)
    w1b = w1.astype(jnp.bfloat16)
    b0r = b0.reshape(1, -1).astype(jnp.float32)
    b1r = b1.reshape(1, -1).astype(jnp.float32)
    w2p = jnp.zeros((w2.shape[0], CLASS_PAD), jnp.bfloat16)
    w2p = w2p.at[:, :NUM_CLASSES].set(w2.astype(jnp.bfloat16))
    b2p = jnp.full((1, CLASS_PAD), -1e30, jnp.float32)
    b2p = b2p.at[:, :NUM_CLASSES].set(b2.reshape(1, -1).astype(jnp.float32))

    flops = 2 * Bp * (D_in * H0 + H0 * H1 + H1 * CLASS_PAD)
    bytes_accessed = (
        Bp * D_in * 4                              # x, f32
        + w0b.size * 2 + w1b.size * 2 + w2p.size * 2
        + b0r.size * 4 + b1r.size * 4 + b2p.size * 4
        + Bp * CLASS_PAD * 4                       # out, f32
    )

    def run(single_buffer_weights):
        def tiled(shape):
            return pl.BlockSpec(shape, lambda i: (i, 0))

        if single_buffer_weights:
            # Constant index_map -> DMA'd once; one buffer is enough.
            def resident(shape):
                return pl.BlockSpec(shape, lambda i: (0, 0),
                                    pipeline_mode=pl.Buffered(1))
        else:
            def resident(shape):
                return pl.BlockSpec(shape, lambda i: (0, 0))

        return pl.pallas_call(
            mlp_svhn_kernel,
            out_shape=jax.ShapeDtypeStruct((Bp, CLASS_PAD), jnp.float32),
            grid=(G,),
            in_specs=[
                tiled((TB, D_in)),
                resident(w0b.shape), resident(b0r.shape),
                resident(w1b.shape), resident(b1r.shape),
                resident(w2p.shape), resident(b2p.shape),
            ],
            out_specs=tiled((TB, CLASS_PAD)),
            compiler_params=pltpu.CompilerParams(
                dimension_semantics=("parallel",),
                vmem_limit_bytes=vmem_limit_bytes,
            ),
            cost_estimate=pl.CostEstimate(
                flops=flops,
                transcendentals=Bp * (CLASS_PAD + 1),
                bytes_accessed=bytes_accessed,
            ),
        )(x_flat, w0b, b0r, w1b, b1r, w2p, b2p)

    try:
        out = run(single_buffer_weights=True)
    except Exception:
        # Fallback if this runtime rejects single-buffered (Buffered(1)) specs.
        out = run(single_buffer_weights=False)

    return out[:B, :NUM_CLASSES]


def init_params(key):
    """Deterministic init; weights stored as [in, out], biases as [1, out]."""
    def linear(k, fan_in, fan_out):
        kw, kb = jax.random.split(k)
        bound = 1.0 / jnp.sqrt(fan_in)
        w = jax.random.uniform(kw, (fan_in, fan_out), jnp.float32, -bound, bound)
        b = jax.random.uniform(kb, (1, fan_out), jnp.float32, -bound, bound)
        return w, b

    k0, k1, k2 = jax.random.split(key, 3)
    w0, b0 = linear(k0, 32 * 32 * 3, 512)
    w1, b1 = linear(k1, 512, 128)
    w2, b2 = linear(k2, 128, 10)
    return (w0, b0, w1, b1, w2, b2)


def reference_forward_f32(x, params):
    """Pure-JAX f32 reference identical to the PyTorch forward."""
    w0, b0, w1, b1, w2, b2 = params
    h = x.reshape(x.shape[0], -1)
    h = jnp.maximum(h @ w0 + b0, 0.0)
    h = jnp.maximum(h @ w1 + b1, 0.0)
    logits = h @ w2 + b2
    return jax.nn.log_softmax(logits, axis=1)


def reference_forward_bf16(x, params):
    """Pure-JAX reference matching the kernel's bf16-input / f32-accum math."""
    w0, b0, w1, b1, w2, b2 = params
    bf = jnp.bfloat16
    h = x.reshape(x.shape[0], -1).astype(bf)
    h = jnp.dot(h, w0.astype(bf), preferred_element_type=jnp.float32)
    h = jnp.maximum(h + b0, 0.0)
    h = jnp.dot(h.astype(bf), w1.astype(bf), preferred_element_type=jnp.float32)
    h = jnp.maximum(h + b1, 0.0)
    logits = jnp.dot(h.astype(bf), w2.astype(bf),
                     preferred_element_type=jnp.float32) + b2
    return jax.nn.log_softmax(logits, axis=1)


if __name__ == "__main__":
    key = jax.random.PRNGKey(0)
    kp, kx = jax.random.split(key)

    params = init_params(kp)
    # SVHN-shaped input (NCHW), small batch.
    x = jax.random.normal(kx, (8, 3, 32, 32), dtype=jnp.float32)

    out = mlp_svhn_forward(x, params)
    out = jax.block_until_ready(out)
    assert out.shape == (8, 10)
    assert bool(jnp.all(jnp.isfinite(out)))

    # Tight check against a reference using the same bf16-input / f32-accum math.
    ref_bf16 = reference_forward_bf16(x, params)
    assert jnp.allclose(out, ref_bf16, atol=2e-3, rtol=2e-3), \
        "mismatch vs bf16-matched reference"

    # Loose check against the full-f32 PyTorch-equivalent math (bf16 rounding).
    ref_f32 = reference_forward_f32(x, params)
    assert jnp.allclose(out, ref_f32, atol=7e-2, rtol=7e-2), \
        "mismatch vs f32 reference"

    print("KERNEL_OK")
</pallas_src>

<mosaic_0001>
module attributes {stable_mosaic.version = 11 : i64} {
  func.func @mlp_svhn_kernel(%arg0: i32, %arg1: memref<16x3072xf32, #tpu.memory_space<vmem>>, %arg2: memref<3072x512xbf16, #tpu.memory_space<vmem>>, %arg3: memref<1x512xf32, #tpu.memory_space<vmem>>, %arg4: memref<512x128xbf16, #tpu.memory_space<vmem>>, %arg5: memref<1x128xf32, #tpu.memory_space<vmem>>, %arg6: memref<128x128xbf16, #tpu.memory_space<vmem>>, %arg7: memref<1x128xf32, #tpu.memory_space<vmem>>, %arg8: memref<16x128xf32, #tpu.memory_space<vmem>>) attributes {dimension_semantics = [#tpu.dimension_semantics<parallel>], iteration_bounds = array<i64: 1>, scalar_prefetch = 0 : i64, scratch_operands = 0 : i64, tpu.core_type = #tpu.core_type<tc>, window_params = [{transform_indices = @transform_0, window_bounds = array<i64: 16, 3072>}, {pipeline_mode = #tpu.pipeline_mode<synchronous>, transform_indices = @transform_1, window_bounds = array<i64: 3072, 512>}, {pipeline_mode = #tpu.pipeline_mode<synchronous>, transform_indices = @transform_2, window_bounds = array<i64: 1, 512>}, {pipeline_mode = #tpu.pipeline_mode<synchronous>, transform_indices = @transform_3, window_bounds = array<i64: 512, 128>}, {pipeline_mode = #tpu.pipeline_mode<synchronous>, transform_indices = @transform_4, window_bounds = array<i64: 1, 128>}, {pipeline_mode = #tpu.pipeline_mode<synchronous>, transform_indices = @transform_5, window_bounds = array<i64: 128, 128>}, {pipeline_mode = #tpu.pipeline_mode<synchronous>, transform_indices = @transform_6, window_bounds = array<i64: 1, 128>}, {transform_indices = @transform_7, window_bounds = array<i64: 16, 128>}]} {
    %c0 = arith.constant 0 : index
    %c0_0 = arith.constant 0 : index
    %0 = vector.load %arg1[%c0, %c0_0] : memref<16x3072xf32, #tpu.memory_space<vmem>>, vector<16x3072xf32>
    %1 = arith.truncf %0 : vector<16x3072xf32> to vector<16x3072xbf16>
    %c0_1 = arith.constant 0 : index
    %c0_2 = arith.constant 0 : index
    %2 = vector.load %arg2[%c0_1, %c0_2] : memref<3072x512xbf16, #tpu.memory_space<vmem>>, vector<3072x512xbf16>
    %cst = arith.constant dense<0.000000e+00> : vector<16x512xf32>
    %3 = tpu.matmul %1, %2, %cst {dimension_numbers = #tpu.dot_dimension_numbers<[1], [0], [0], [1], [0, 0, 1, 1], [], []>} : vector<16x3072xbf16>, vector<3072x512xbf16>, vector<16x512xf32> -> vector<16x512xf32>
    %c0_3 = arith.constant 0 : index
    %c0_4 = arith.constant 0 : index
    %4 = vector.load %arg3[%c0_3, %c0_4] : memref<1x512xf32, #tpu.memory_space<vmem>>, vector<1x512xf32>
    %5 = vector.broadcast %4 : vector<1x512xf32> to vector<16x512xf32>
    %6 = arith.addf %3, %5 : vector<16x512xf32>
    %cst_5 = arith.constant 0.000000e+00 : f32
    %7 = vector.broadcast %cst_5 : f32 to vector<16x512xf32>
    %8 = arith.maximumf %6, %7 : vector<16x512xf32>
    %9 = arith.truncf %8 : vector<16x512xf32> to vector<16x512xbf16>
    %c0_6 = arith.constant 0 : index
    %c0_7 = arith.constant 0 : index
    %10 = vector.load %arg4[%c0_6, %c0_7] : memref<512x128xbf16, #tpu.memory_space<vmem>>, vector<512x128xbf16>
    %cst_8 = arith.constant dense<0.000000e+00> : vector<16x128xf32>
    %11 = tpu.matmul %9, %10, %cst_8 {dimension_numbers = #tpu.dot_dimension_numbers<[1], [0], [0], [1], [0, 0, 1, 1], [], []>} : vector<16x512xbf16>, vector<512x128xbf16>, vector<16x128xf32> -> vector<16x128xf32>
    %c0_9 = arith.constant 0 : index
    %c0_10 = arith.constant 0 : index
    %12 = vector.load %arg5[%c0_9, %c0_10] : memref<1x128xf32, #tpu.memory_space<vmem>>, vector<1x128xf32>
    %13 = vector.broadcast %12 : vector<1x128xf32> to vector<16x128xf32>
    %14 = arith.addf %11, %13 : vector<16x128xf32>
    %cst_11 = arith.constant 0.000000e+00 : f32
    %15 = vector.broadcast %cst_11 : f32 to vector<16x128xf32>
    %16 = arith.maximumf %14, %15 : vector<16x128xf32>
    %17 = arith.truncf %16 : vector<16x128xf32> to vector<16x128xbf16>
    %c0_12 = arith.constant 0 : index
    %c0_13 = arith.constant 0 : index
    %18 = vector.load %arg6[%c0_12, %c0_13] : memref<128x128xbf16, #tpu.memory_space<vmem>>, vector<128x128xbf16>
    %cst_14 = arith.constant dense<0.000000e+00> : vector<16x128xf32>
    %19 = tpu.matmul %17, %18, %cst_14 {dimension_numbers = #tpu.dot_dimension_numbers<[1], [0], [0], [1], [0, 0, 1, 1], [], []>} : vector<16x128xbf16>, vector<128x128xbf16>, vector<16x128xf32> -> vector<16x128xf32>
    %c0_15 = arith.constant 0 : index
    %c0_16 = arith.constant 0 : index
    %20 = vector.load %arg7[%c0_15, %c0_16] : memref<1x128xf32, #tpu.memory_space<vmem>>, vector<1x128xf32>
    %21 = vector.broadcast %20 : vector<1x128xf32> to vector<16x128xf32>
    %22 = arith.addf %19, %21 : vector<16x128xf32>
    %cst_17 = arith.constant dense<0xFF800000> : vector<16xf32>
    %23 = vector.multi_reduction <maximumf>, %22, %cst_17 [1] : vector<16x128xf32> to vector<16xf32>
    %24 = vector.shape_cast %23 : vector<16xf32> to vector<16x1xf32>
    %25 = vector.broadcast %24 : vector<16x1xf32> to vector<16x128xf32>
    %26 = arith.subf %22, %25 : vector<16x128xf32>
    %27 = math.exp %26 : vector<16x128xf32>
    %cst_18 = arith.constant dense<0.000000e+00> : vector<16xf32>
    %28 = vector.multi_reduction <add>, %27, %cst_18 [1] : vector<16x128xf32> to vector<16xf32>
    %29 = vector.shape_cast %28 : vector<16xf32> to vector<16x1xf32>
    %30 = math.log %29 : vector<16x1xf32>
    %31 = vector.broadcast %30 : vector<16x1xf32> to vector<16x128xf32>
    %32 = arith.subf %26, %31 : vector<16x128xf32>
    %c0_19 = arith.constant 0 : index
    %c0_20 = arith.constant 0 : index
    %33 = vector.load %arg8[%c0_19, %c0_20] : memref<16x128xf32, #tpu.memory_space<vmem>>, vector<16x128xf32>
    tpu.vector_store %arg8[%c0_19, %c0_20], %32 {strides = array<i32>} : memref<16x128xf32, #tpu.memory_space<vmem>>, vector<16x128xf32>,
    return
  }
  func.func @transform_0(%arg0: i32) -> (i32, i32) {
    %c0_i32 = arith.constant 0 : i32
    %c0_i32_0 = arith.constant 0 : i32
    return %arg0, %c0_i32 : i32, i32
  }
  func.func @transform_1(%arg0: i32) -> (i32, i32) {
    %c0_i32 = arith.constant 0 : i32
    %c0_i32_0 = arith.constant 0 : i32
    %c0_i32_1 = arith.constant 0 : i32
    return %c0_i32, %c0_i32_0 : i32, i32
  }
  func.func @transform_2(%arg0: i32) -> (i32, i32) {
    %c0_i32 = arith.constant 0 : i32
    %c0_i32_0 = arith.constant 0 : i32
    %c0_i32_1 = arith.constant 0 : i32
    return %c0_i32, %c0_i32_0 : i32, i32
  }
  func.func @transform_3(%arg0: i32) -> (i32, i32) {
    %c0_i32 = arith.constant 0 : i32
    %c0_i32_0 = arith.constant 0 : i32
    %c0_i32_1 = arith.constant 0 : i32
    return %c0_i32, %c0_i32_0 : i32, i32
  }
  func.func @transform_4(%arg0: i32) -> (i32, i32) {
    %c0_i32 = arith.constant 0 : i32
    %c0_i32_0 = arith.constant 0 : i32
    %c0_i32_1 = arith.constant 0 : i32
    return %c0_i32, %c0_i32_0 : i32, i32
  }
  func.func @transform_5(%arg0: i32) -> (i32, i32) {
    %c0_i32 = arith.constant 0 : i32
    %c0_i32_0 = arith.constant 0 : i32
    %c0_i32_1 = arith.constant 0 : i32
    return %c0_i32, %c0_i32_0 : i32, i32
  }
  func.func @transform_6(%arg0: i32) -> (i32, i32) {
    %c0_i32 = arith.constant 0 : i32
    %c0_i32_0 = arith.constant 0 : i32
    %c0_i32_1 = arith.constant 0 : i32
    return %c0_i32, %c0_i32_0 : i32, i32
  }
  func.func @transform_7(%arg0: i32) -> (i32, i32) {
    %c0_i32 = arith.constant 0 : i32
    %c0_i32_0 = arith.constant 0 : i32
    return %arg0, %c0_i32 : i32, i32
  }
}

module attributes {stable_mosaic.version = 11 : i64} {
  func.func @mlp_svhn_kernel(%arg0: i32, %arg1: memref<16x3072xf32, #tpu.memory_space<vmem>>, %arg2: memref<3072x512xbf16, #tpu.memory_space<vmem>>, %arg3: memref<1x512xf32, #tpu.memory_space<vmem>>, %arg4: memref<512x128xbf16, #tpu.memory_space<vmem>>, %arg5: memref<1x128xf32, #tpu.memory_space<vmem>>, %arg6: memref<128x128xbf16, #tpu.memory_space<vmem>>, %arg7: memref<1x128xf32, #tpu.memory_space<vmem>>, %arg8: memref<16x128xf32, #tpu.memory_space<vmem>>) attributes {dimension_semantics = [#tpu.dimension_semantics<parallel>], iteration_bounds = array<i64: 1>, scalar_prefetch = 0 : i64, scratch_operands = 0 : i64, tpu.core_type = #tpu.core_type<tc>, window_params = [{transform_indices = @transform_0, window_bounds = array<i64: 16, 3072>}, {pipeline_mode = #tpu.pipeline_mode<synchronous>, transform_indices = @transform_1, window_bounds = array<i64: 3072, 512>}, {pipeline_mode = #tpu.pipeline_mode<synchronous>, transform_indices = @transform_2, window_bounds = array<i64: 1, 512>}, {pipeline_mode = #tpu.pipeline_mode<synchronous>, transform_indices = @transform_3, window_bounds = array<i64: 512, 128>}, {pipeline_mode = #tpu.pipeline_mode<synchronous>, transform_indices = @transform_4, window_bounds = array<i64: 1, 128>}, {pipeline_mode = #tpu.pipeline_mode<synchronous>, transform_indices = @transform_5, window_bounds = array<i64: 128, 128>}, {pipeline_mode = #tpu.pipeline_mode<synchronous>, transform_indices = @transform_6, window_bounds = array<i64: 1, 128>}, {transform_indices = @transform_7, window_bounds = array<i64: 16, 128>}]} {
    %c0 = arith.constant 0 : index
    %c0_0 = arith.constant 0 : index
    %0 = vector.load %arg1[%c0, %c0_0] : memref<16x3072xf32, #tpu.memory_space<vmem>>, vector<16x3072xf32>
    %1 = arith.truncf %0 : vector<16x3072xf32> to vector<16x3072xbf16>
    %c0_1 = arith.constant 0 : index
    %c0_2 = arith.constant 0 : index
    %2 = vector.load %arg2[%c0_1, %c0_2] : memref<3072x512xbf16, #tpu.memory_space<vmem>>, vector<3072x512xbf16>
    %cst = arith.constant dense<0.000000e+00> : vector<16x512xf32>
    %3 = tpu.matmul %1, %2, %cst {dimension_numbers = #tpu.dot_dimension_numbers<[1], [0], [0], [1], [0, 0, 1, 1], [], []>} : vector<16x3072xbf16>, vector<3072x512xbf16>, vector<16x512xf32> -> vector<16x512xf32>
    %c0_3 = arith.constant 0 : index
    %c0_4 = arith.constant 0 : index
    %4 = vector.load %arg3[%c0_3, %c0_4] : memref<1x512xf32, #tpu.memory_space<vmem>>, vector<1x512xf32>
    %5 = vector.broadcast %4 : vector<1x512xf32> to vector<16x512xf32>
    %6 = arith.addf %3, %5 : vector<16x512xf32>
    %cst_5 = arith.constant 0.000000e+00 : f32
    %7 = vector.broadcast %cst_5 : f32 to vector<16x512xf32>
    %8 = arith.maximumf %6, %7 : vector<16x512xf32>
    %9 = arith.truncf %8 : vector<16x512xf32> to vector<16x512xbf16>
    %c0_6 = arith.constant 0 : index
    %c0_7 = arith.constant 0 : index
    %10 = vector.load %arg4[%c0_6, %c0_7] : memref<512x128xbf16, #tpu.memory_space<vmem>>, vector<512x128xbf16>
    %cst_8 = arith.constant dense<0.000000e+00> : vector<16x128xf32>
    %11 = tpu.matmul %9, %10, %cst_8 {dimension_numbers = #tpu.dot_dimension_numbers<[1], [0], [0], [1], [0, 0, 1, 1], [], []>} : vector<16x512xbf16>, vector<512x128xbf16>, vector<16x128xf32> -> vector<16x128xf32>
    %c0_9 = arith.constant 0 : index
    %c0_10 = arith.constant 0 : index
    %12 = vector.load %arg5[%c0_9, %c0_10] : memref<1x128xf32, #tpu.memory_space<vmem>>, vector<1x128xf32>
    %13 = vector.broadcast %12 : vector<1x128xf32> to vector<16x128xf32>
    %14 = arith.addf %11, %13 : vector<16x128xf32>
    %cst_11 = arith.constant 0.000000e+00 : f32
    %15 = vector.broadcast %cst_11 : f32 to vector<16x128xf32>
    %16 = arith.maximumf %14, %15 : vector<16x128xf32>
    %17 = arith.truncf %16 : vector<16x128xf32> to vector<16x128xbf16>
    %c0_12 = arith.constant 0 : index
    %c0_13 = arith.constant 0 : index
    %18 = vector.load %arg6[%c0_12, %c0_13] : memref<128x128xbf16, #tpu.memory_space<vmem>>, vector<128x128xbf16>
    %cst_14 = arith.constant dense<0.000000e+00> : vector<16x128xf32>
    %19 = tpu.matmul %17, %18, %cst_14 {dimension_numbers = #tpu.dot_dimension_numbers<[1], [0], [0], [1], [0, 0, 1, 1], [], []>} : vector<16x128xbf16>, vector<128x128xbf16>, vector<16x128xf32> -> vector<16x128xf32>
    %c0_15 = arith.constant 0 : index
    %c0_16 = arith.constant 0 : index
    %20 = vector.load %arg7[%c0_15, %c0_16] : memref<1x128xf32, #tpu.memory_space<vmem>>, vector<1x128xf32>
    %21 = vector.broadcast %20 : vector<1x128xf32> to vector<16x128xf32>
    %22 = arith.addf %19, %21 : vector<16x128xf32>
    %cst_17 = arith.constant dense<0xFF800000> : vector<16xf32>
    %23 = vector.multi_reduction <maximumf>, %22, %cst_17 [1] : vector<16x128xf32> to vector<16xf32>
    %24 = vector.shape_cast %23 : vector<16xf32> to vector<16x1xf32>
    %25 = vector.broadcast %24 : vector<16x1xf32> to vector<16x128xf32>
    %26 = arith.subf %22, %25 : vector<16x128xf32>
    %27 = math.exp %26 : vector<16x128xf32>
    %cst_18 = arith.constant dense<0.000000e+00> : vector<16xf32>
    %28 = vector.multi_reduction <add>, %27, %cst_18 [1] : vector<16x128xf32> to vector<16xf32>
    %29 = vector.shape_cast %28 : vector<16xf32> to vector<16x1xf32>
    %30 = math.log %29 : vector<16x1xf32>
    %31 = vector.broadcast %30 : vector<16x1xf32> to vector<16x128xf32>
    %32 = arith.subf %26, %31 : vector<16x128xf32>
    %c0_19 = arith.constant 0 : index
    %c0_20 = arith.constant 0 : index
    %33 = vector.load %arg8[%c0_19, %c0_20] : memref<16x128xf32, #tpu.memory_space<vmem>>, vector<16x128xf32>
    tpu.vector_store %arg8[%c0_19, %c0_20], %32 {strides = array<i32>} : memref<16x128xf32, #tpu.memory_space<vmem>>, vector<16x128xf32>,
    return
  }
  func.func @transform_0(%arg0: i32) -> (i32, i32) {
    %c0_i32 = arith.constant 0 : i32
    %c0_i32_0 = arith.constant 0 : i32
    return %arg0, %c0_i32 : i32, i32
  }
  func.func @transform_1(%arg0: i32) -> (i32, i32) {
    %c0_i32 = arith.constant 0 : i32
    %c0_i32_0 = arith.constant 0 : i32
    %c0_i32_1 = arith.constant 0 : i32
    return %c0_i32, %c0_i32_0 : i32, i32
  }
  func.func @transform_2(%arg0: i32) -> (i32, i32) {
    %c0_i32 = arith.constant 0 : i32
    %c0_i32_0 = arith.constant 0 : i32
    %c0_i32_1 = arith.constant 0 : i32
    return %c0_i32, %c0_i32_0 : i32, i32
  }
  func.func @transform_3(%arg0: i32) -> (i32, i32) {
    %c0_i32 = arith.constant 0 : i32
    %c0_i32_0 = arith.constant 0 : i32
    %c0_i32_1 = arith.constant 0 : i32
    return %c0_i32, %c0_i32_0 : i32, i32
  }
  func.func @transform_4(%arg0: i32) -> (i32, i32) {
    %c0_i32 = arith.constant 0 : i32
    %c0_i32_0 = arith.constant 0 : i32
    %c0_i32_1 = arith.constant 0 : i32
    return %c0_i32, %c0_i32_0 : i32, i32
  }
  func.func @transform_5(%arg0: i32) -> (i32, i32) {
    %c0_i32 = arith.constant 0 : i32
    %c0_i32_0 = arith.constant 0 : i32
    %c0_i32_1 = arith.constant 0 : i32
    return %c0_i32, %c0_i32_0 : i32, i32
  }
  func.func @transform_6(%arg0: i32) -> (i32, i32) {
    %c0_i32 = arith.constant 0 : i32
    %c0_i32_0 = arith.constant 0 : i32
    %c0_i32_1 = arith.constant 0 : i32
    return %c0_i32, %c0_i32_0 : i32, i32
  }
  func.func @transform_7(%arg0: i32) -> (i32, i32) {
    %c0_i32 = arith.constant 0 : i32
    %c0_i32_0 = arith.constant 0 : i32
    return %arg0, %c0_i32 : i32, i32
  }
}

</mosaic_0001>

<bundles_post_ra>
// kernel: tpu_custom_call.1
= control target key start
LH: loop header
LB: loop body
LE: loop exit
PB: predicated region body
PF: predicated region fallthrough
CT: control target
= control target key end

     0   :  { %12 = vsyncpa [#allocation3], 0  ;;  %s8918_s0 = inlined_call_operand.hbm [shape: f32[16,3072], index: 0, kind: input, shape index: {}]   ;;  %s8919_s1 = inlined_call_operand.hbm [shape: bf16[3072,512], index: 1, kind: input, shape index: {}]   ;;  %s8920_s2 = inlined_call_operand.hbm [shape: f32[1,512], index: 2, kind: input, shape index: {}]   ;;  %s8921_s3 = inlined_call_operand.hbm [shape: bf16[512,128], index: 3, kind: input, shape index: {}]   ;;  %s8922_s4 = inlined_call_operand.hbm [shape: f32[1,128], index: 4, kind: input, shape index: {}]   ;;  %s8923_s5 = inlined_call_operand.hbm [shape: bf16[128,128], index: 5, kind: input, shape index: {}]   ;;  %s8924_s6 = inlined_call_operand.hbm [shape: f32[1,128], index: 6, kind: input, shape index: {}]   ;;  %s8925_s7 = inlined_call_operand.hbm [shape: f32[16,128], index: 7, kind: output, shape index: {}]  }
   0x1   :  { %13 = vsyncpa [#allocation6], 0 }
   0x2   :  { %14 = vsyncpa [#allocation9], 0 }
   0x3   :  { %15 = vsyncpa [#allocation12], 0 }
   0x4   :  { %16 = vsyncpa [#allocation4], 0  ;;  %s8748_s24 = smov [#allocation5]   ;;  %s8562_s28 = scalar_lea.hbm %s8919_s1, 98304 }
   0x5   :  { %s34_s25 = sshll.u32 %s8748_s24, 4  ;;  %p8563_p0 = scmp.ne.s32.totalorder %s8919_s1, %s8562_s28  ;;  %s35_s25 = int_to_ptr.vmem [resolvable:$true] %s34_s25 }
   0x6   :  { %p8566_p1 = scmp.lt.u32.totalorder %s8562_s28, %s8919_s1 }
   0x8   :  { %p8568_p2 = pnand %p8566_p1, %p8563_p0 }
   0xa   :  { %8571 = shalt.err (!%p8568_p2)
}
   0xb   :  { %s8572_s10 = scalar_lea.vmem %s35_s25, 98304  ;;  %p8577_p4 = scmp.lt.s32.totalorder %s35_s25, %s35_s25 }
   0xc   :  { %p8573_p3 = scmp.ne.s32.totalorder %s35_s25, %s8572_s10  ;;  %p8578_p5 = scmp.lt.s32.totalorder %s8572_s10, %s8572_s10 }
   0xe   :  { %p8579_p6 = por %p8578_p5, %p8577_p4 }
  0x10   :  { %p8580_p7 = pnand %p8579_p6, %p8573_p3 }
  0x12   :  { %8583 = shalt.err (!%p8580_p7)
}
  0x13   :  { %s8749_s11 = smov 256   ;;  %s8750_s12 = smov 16  }
  0x14   :  { %40 = dma.hbm_to_vmem [thread:$0]  %s8919_s1, 98304, %s35_s25, [#allocation6], %s8749_s11, %s8749_s11, %s8750_s12  }
  0x15   :  { %s8751_s15 = smov [#allocation8]   ;;  %s8584_s19 = scalar_lea.hbm %s8921_s3, 4096 }
  0x16   :  { %s56_s16 = sshll.u32 %s8751_s15, 4  ;;  %p8585_p8 = scmp.ne.s32.totalorder %s8921_s3, %s8584_s19  ;;  %s57_s16 = int_to_ptr.vmem [resolvable:$true] %s56_s16 }
  0x17   :  { %p8588_p9 = scmp.lt.u32.totalorder %s8584_s19, %s8921_s3 }
  0x19   :  { %p8590_p10 = pnand %p8588_p9, %p8585_p8 }
  0x1b   :  { %8593 = shalt.err (!%p8590_p10)
}
  0x1c   :  { %s8594_s24 = scalar_lea.vmem %s57_s16, 4096  ;;  %p8599_p12 = scmp.lt.s32.totalorder %s57_s16, %s57_s16 }
  0x1d   :  { %p8595_p11 = scmp.ne.s32.totalorder %s57_s16, %s8594_s24  ;;  %p8600_p13 = scmp.lt.s32.totalorder %s8594_s24, %s8594_s24 }
  0x1f   :  { %p8601_p0 = por %p8600_p13, %p8599_p12 }
  0x21   :  { %p8602_p1 = pnand %p8601_p0, %p8595_p11 }
  0x23   :  { %8605 = shalt.err (!%p8602_p1)
}
  0x24   :  { %s8752_s1 = smov 64   ;;  %s8753_s25 = smov 4  }
  0x25   :  { %62 = dma.hbm_to_vmem [thread:$0]  %s8921_s3, 4096, %s57_s16, [#allocation9], %s8752_s1, %s8752_s1, %s8753_s25  }
  0x26   :  { %s8754_s28 = smov [#allocation11]   ;;  %s8755_s30 = smov [#allocation2]  }
  0x27   :  { %s78_s29 = sshll.u32 %s8754_s28, 4  ;;  %s22_s8 = sshll.u32 %s8755_s30, 4  ;;  %s79_s29 = int_to_ptr.vmem [resolvable:$true] %s78_s29  ;;  %s8830_s8 = int_to_ptr.vmem [resolvable:$true] %s22_s8 }
  0x28   :  { %s8606_s11 = scalar_lea.hbm %s8923_s5, 1024 }
  0x29   :  { %p8607_p2 = scmp.ne.s32.totalorder %s8923_s5, %s8606_s11  ;;  %p8610_p3 = scmp.lt.u32.totalorder %s8606_s11, %s8923_s5 }
  0x2b   :  { %p8612_p4 = pnand %p8610_p3, %p8607_p2 }
  0x2d   :  { %8615 = shalt.err (!%p8612_p4)
}
  0x2e   :  { %s8616_s3 = scalar_lea.vmem %s79_s29, 1024  ;;  %p8621_p6 = scmp.lt.s32.totalorder %s79_s29, %s79_s29 }
  0x2f   :  { %p8617_p5 = scmp.ne.s32.totalorder %s79_s29, %s8616_s3  ;;  %p8622_p7 = scmp.lt.s32.totalorder %s8616_s3, %s8616_s3 }
  0x31   :  { %p8623_p8 = por %p8622_p7, %p8621_p6 }
  0x33   :  { %p8624_p9 = pnand %p8623_p8, %p8617_p5 }
  0x35   :  { %8627 = shalt.err (!%p8624_p9)
}
  0x36   :  { %84 = dma.hbm_to_vmem [thread:$0]  %s8923_s5, 1024, %s79_s29, [#allocation12], %s8752_s1, %s8752_s1, %s8753_s25  }
  0x37   :  { %s8628_s20 = scalar_lea.hbm %s8918_s0, 6144 }
  0x38   :  { %p8629_p10 = scmp.ne.s32.totalorder %s8918_s0, %s8628_s20  ;;  %p8632_p11 = scmp.lt.u32.totalorder %s8628_s20, %s8918_s0 }
  0x3a   :  { %p8634_p12 = pnand %p8632_p11, %p8629_p10 }
  0x3c   :  { %8637 = shalt.err (!%p8634_p12)
}
  0x3d   :  { %s8638_s26 = scalar_lea.vmem %s8830_s8, 6144  ;;  %p8643_p0 = scmp.lt.s32.totalorder %s8830_s8, %s8830_s8 }
  0x3e   :  { %p8639_p13 = scmp.ne.s32.totalorder %s8830_s8, %s8638_s26  ;;  %p8644_p1 = scmp.lt.s32.totalorder %s8638_s26, %s8638_s26 }
  0x40   :  { %p8645_p2 = por %p8644_p1, %p8643_p0 }
  0x42   :  { %p8646_p3 = pnand %p8645_p2, %p8639_p13 }
  0x44   :  { %8649 = shalt.err (!%p8646_p3)
}
  0x45   :  { %s8756_s5 = smov 3072   ;;  %s8757_s1 = smov 192  }
  0x46   :  { %28 = dma.hbm_to_vmem [thread:$0]  %s8918_s0, 6144, %s8830_s8, [#allocation3], %s8756_s5, %s8756_s5, %s8757_s1  }
  0x47   :  { %s8758_s28 = smov [#allocation7]   ;;  %s8759_s30 = smov [#allocation10]  }
  0x48   :  { %s47_s29 = sshll.u32 %s8758_s28, 4  ;;  %s69_s9 = sshll.u32 %s8759_s30, 4  ;;  %s48_s29 = int_to_ptr.vmem [resolvable:$true] %s47_s29  ;;  %s70_s9 = int_to_ptr.vmem [resolvable:$true] %s69_s9 }
  0x49   :  { %s8650_s12 = scalar_lea.hbm %s8920_s2, 64 }
  0x4a   :  { %p8651_p4 = scmp.ne.s32.totalorder %s8920_s2, %s8650_s12  ;;  %p8654_p5 = scmp.lt.u32.totalorder %s8650_s12, %s8920_s2 }
  0x4c   :  { %p8656_p6 = pnand %p8654_p5, %p8651_p4 }
  0x4e   :  { %8659 = shalt.err (!%p8656_p6)
}
  0x4f   :  { %s8660_s0 = scalar_lea.vmem %s48_s29, 64  ;;  %p8665_p8 = scmp.lt.s32.totalorder %s48_s29, %s48_s29 }
  0x50   :  { %p8661_p7 = scmp.ne.s32.totalorder %s48_s29, %s8660_s0  ;;  %p8666_p9 = scmp.lt.s32.totalorder %s8660_s0, %s8660_s0 }
  0x52   :  { %p8667_p10 = por %p8666_p9, %p8665_p8 }
  0x54   :  { %p8668_p11 = pnand %p8667_p10, %p8661_p7 }
  0x56   :  { %8671 = shalt.err (!%p8668_p11)
}
  0x57   :  { %50 = dma.hbm_to_vmem [thread:$0]  %s8920_s2, 64, %s48_s29, [#allocation6]  }
  0x58   :  { %s8672_s19 = scalar_lea.hbm %s8922_s4, 16 }
  0x59   :  { %p8673_p12 = scmp.ne.s32.totalorder %s8922_s4, %s8672_s19  ;;  %p8676_p13 = scmp.lt.u32.totalorder %s8672_s19, %s8922_s4 }
  0x5b   :  { %p8678_p0 = pnand %p8676_p13, %p8673_p12 }
  0x5d   :  { %8681 = shalt.err (!%p8678_p0)
}
  0x5e   :  { %s8682_s24 = scalar_lea.vmem %s70_s9, 16  ;;  %s8686_s26 = scalar_lea.vmem %s70_s9, 32 }
  0x5f   :  { %p8683_p1 = scmp.ne.s32.totalorder %s70_s9, %s8682_s24  ;;  %p8687_p2 = scmp.lt.s32.totalorder %s70_s9, %s70_s9 }
  0x60   :  { %p8688_p3 = scmp.lt.s32.totalorder %s8686_s26, %s8682_s24 }
  0x62   :  { %p8689_p4 = por %p8688_p3, %p8687_p2 }
  0x64   :  { %p8690_p5 = pnand %p8689_p4, %p8683_p1 }
  0x66   :  { %8693 = shalt.err (!%p8690_p5)
}
  0x67   :  { %72 = dma.hbm_to_vmem [thread:$0]  %s8922_s4, 16, %s70_s9, [#allocation9]  }
  0x68   :  { %s8760_s1 = smov [#allocation13]   ;;  %s8694_s29 = scalar_lea.hbm %s8924_s6, 16 }
  0x69   :  { %s91_s25 = sshll.u32 %s8760_s1, 4  ;;  %p8695_p6 = scmp.ne.s32.totalorder %s8924_s6, %s8694_s29  ;;  %s92_s25 = int_to_ptr.vmem [resolvable:$true] %s91_s25 }
  0x6a   :  { %p8698_p7 = scmp.lt.u32.totalorder %s8694_s29, %s8924_s6 }
  0x6c   :  { %p8700_p8 = pnand %p8698_p7, %p8695_p6 }
  0x6e   :  { %8703 = shalt.err (!%p8700_p8)
}
  0x6f   :  { %s8704_s13 = scalar_lea.vmem %s92_s25, 16  ;;  %s8708_s4 = scalar_lea.vmem %s92_s25, 32 }
  0x70   :  { %p8705_p9 = scmp.ne.s32.totalorder %s92_s25, %s8704_s13  ;;  %p8709_p10 = scmp.lt.s32.totalorder %s92_s25, %s92_s25 }
  0x71   :  { %p8710_p11 = scmp.lt.s32.totalorder %s8708_s4, %s8704_s13 }
  0x73   :  { %p8711_p12 = por %p8710_p11, %p8709_p10 }
  0x75   :  { %p8712_p13 = pnand %p8711_p12, %p8705_p9 }
  0x77   :  { %8715 = shalt.err (!%p8712_p13)
}
  0x78   :  { %94 = dma.hbm_to_vmem [thread:$0]  %s8924_s6, 16, %s92_s25, [#allocation12]  }
  0x79   :  { %8738 = dma.done.wait [#allocation3], 6144  }
  0x7a   :  { %8739 = vsyncadd [#allocation3], 4294961152 }
  0x7b   :  { %8740 = dma.done.wait [#allocation6], 98368  }
  0x7c   :  { %8741 = vsyncadd [#allocation6], 4294868928 }
  0x7d   :  { %8742 = dma.done.wait [#allocation9], 4112  }
  0x7e   :  { %8743 = vsyncadd [#allocation9], 4294963184 }
  0x7f   :  { %8744 = dma.done.wait [#allocation12], 1040  }
  0x80   :  { %8745 = vsyncadd [#allocation12], 4294966256  ;;  %v7362_v0 = vld [vmem:[#allocation5 + $0x4] ss:$16 sps:$4 sm:$0xff]   ;;  %v7364_v1 = vld [vmem:[#allocation5 + $0xc] ss:$16 sps:$4 sm:$0xff]  }
  0x81   :  { %4819 = vmatprep.subr.bf16.mxu0 %v7362_v0  ;;  %v7366_v2 = vld [vmem:[#allocation5] ss:$16 sps:$4 sm:$0xff]   ;;  %v7367_v3 = vld [vmem:[#allocation5 + $0x8] ss:$16 sps:$4 sm:$0xff]   ;;  %5335 = vmatprep.subr.bf16.mxu1 %v7364_v1  ;;  %v7368_v4 = vld [vmem:[#allocation5 + $0x24] ss:$16 sps:$4 sm:$0xff]  }
  0x82   :  { %4820 = vmatpush1.bf16.msra.mxu0 %v7366_v2  ;;  %5336 = vmatpush1.bf16.msra.mxu1 %v7367_v3  ;;  %v7370_v5 = vld [vmem:[#allocation5 + $0x2c] ss:$16 sps:$4 sm:$0xff]   ;;  %v7372_v6 = vld [vmem:[#allocation5 + $0x20] ss:$16 sps:$4 sm:$0xff]   ;;  %v7373_v7 = vld [vmem:[#allocation5 + $0x28] ss:$16 sps:$4 sm:$0xff]  }
  0x83   :  { %4821 = vmatprep.subr.bf16.mxu0 %v7368_v4  ;;  %5337 = vmatprep.subr.bf16.mxu1 %v7370_v5  ;;  %v7374_v8 = vld [vmem:[#allocation5 + $0x44] ss:$16 sps:$4 sm:$0xff]   ;;  %v7376_v9 = vld [vmem:[#allocation5 + $0x4c] ss:$16 sps:$4 sm:$0xff]   ;;  %v7378_v10 = vld [vmem:[#allocation5 + $0x40] ss:$16 sps:$4 sm:$0xff]  }
  0x84   :  { %v7379_v11 = vld [vmem:[#allocation5 + $0x48] ss:$16 sps:$4 sm:$0xff]   ;;  %v7380_v12 = vld [vmem:[#allocation5 + $0x64] ss:$16 sps:$4 sm:$0xff]   ;;  %v7382_v13 = vld [vmem:[#allocation5 + $0x6c] ss:$16 sps:$4 sm:$0xff]  }
  0x85   :  { %v7384_v14 = vld [vmem:[#allocation5 + $0x60] ss:$16 sps:$4 sm:$0xff]   ;;  %v7385_v15 = vld [vmem:[#allocation5 + $0x68] ss:$16 sps:$4 sm:$0xff]   ;;  %v7386_v16 = vld [vmem:[#allocation5 + $0x84] ss:$16 sps:$4 sm:$0xff]  }
  0x86   :  { %4822 = vmatpush1.bf16.msra.mxu0 %v7372_v6  ;;  %5338 = vmatpush1.bf16.msra.mxu1 %v7373_v7  ;;  %v7388_v17 = vld [vmem:[#allocation5 + $0x8c] ss:$16 sps:$4 sm:$0xff]   ;;  %v7390_v18 = vld [vmem:[#allocation5 + $0x80] ss:$16 sps:$4 sm:$0xff]   ;;  %v7391_v19 = vld [vmem:[#allocation5 + $0x88] ss:$16 sps:$4 sm:$0xff]  }
  0x87   :  { %4823 = vmatprep.subr.bf16.mxu0 %v7374_v8  ;;  %5339 = vmatprep.subr.bf16.mxu1 %v7376_v9  ;;  %v7392_v20 = vld [vmem:[#allocation5 + $0xa4] ss:$16 sps:$4 sm:$0xff]   ;;  %v7394_v21 = vld [vmem:[#allocation5 + $0xac] ss:$16 sps:$4 sm:$0xff]   ;;  %v7396_v22 = vld [vmem:[#allocation5 + $0xa0] ss:$16 sps:$4 sm:$0xff]  }
  0x88   :  { %v7397_v23 = vld [vmem:[#allocation5 + $0xa8] ss:$16 sps:$4 sm:$0xff]   ;;  %v7398_v24 = vld [vmem:[#allocation5 + $0xc4] ss:$16 sps:$4 sm:$0xff]   ;;  %v7400_v25 = vld [vmem:[#allocation5 + $0xcc] ss:$16 sps:$4 sm:$0xff]  }
  0x89   :  { %v7402_v26 = vld [vmem:[#allocation5 + $0xc0] ss:$16 sps:$4 sm:$0xff]   ;;  %v7403_v27 = vld [vmem:[#allocation5 + $0xc8] ss:$16 sps:$4 sm:$0xff]   ;;  %v7404_v28 = vld [vmem:[#allocation5 + $0xe4] ss:$16 sps:$4 sm:$0xff]  }
  0x8a   :  { %4824 = vmatpush1.bf16.msra.mxu0 %v7378_v10  ;;  %5340 = vmatpush1.bf16.msra.mxu1 %v7379_v11  ;;  %v7406_v29 = vld [vmem:[#allocation5 + $0xec] ss:$16 sps:$4 sm:$0xff]   ;;  %v7408_v30 = vld [vmem:[#allocation5 + $0xe0] ss:$16 sps:$4 sm:$0xff]   ;;  %v7409_v31 = vld [vmem:[#allocation5 + $0xe8] ss:$16 sps:$4 sm:$0xff]  }
  0x8b   :  { %4825 = vmatprep.subr.bf16.mxu0 %v7380_v12  ;;  %5341 = vmatprep.subr.bf16.mxu1 %v7382_v13  ;;  %v7410_v32 = vld [vmem:[#allocation5 + $0x104] ss:$16 sps:$4 sm:$0xff]   ;;  %v7412_v33 = vld [vmem:[#allocation5 + $0x10c] ss:$16 sps:$4 sm:$0xff]   ;;  %v7414_v34 = vld [vmem:[#allocation5 + $0x100] ss:$16 sps:$4 sm:$0xff]  }
  0x8c   :  { %v7415_v35 = vld [vmem:[#allocation5 + $0x108] ss:$16 sps:$4 sm:$0xff]   ;;  %v7416_v36 = vld [vmem:[#allocation5 + $0x124] ss:$16 sps:$4 sm:$0xff]   ;;  %v7418_v37 = vld [vmem:[#allocation5 + $0x12c] ss:$16 sps:$4 sm:$0xff]  }
  0x8d   :  { %v7420_v38 = vld [vmem:[#allocation5 + $0x120] ss:$16 sps:$4 sm:$0xff]   ;;  %v7421_v39 = vld [vmem:[#allocation5 + $0x128] ss:$16 sps:$4 sm:$0xff]   ;;  %v7422_v40 = vld [vmem:[#allocation5 + $0x144] ss:$16 sps:$4 sm:$0xff]  }
  0x8e   :  { %4826 = vmatpush1.bf16.msra.mxu0 %v7384_v14  ;;  %5342 = vmatpush1.bf16.msra.mxu1 %v7385_v15  ;;  %v7424_v41 = vld [vmem:[#allocation5 + $0x14c] ss:$16 sps:$4 sm:$0xff]   ;;  %v7426_v42 = vld [vmem:[#allocation5 + $0x140] ss:$16 sps:$4 sm:$0xff]   ;;  %v7427_v43 = vld [vmem:[#allocation5 + $0x148] ss:$16 sps:$4 sm:$0xff]  }
  0x8f   :  { %4827 = vmatprep.subr.bf16.mxu0 %v7386_v16  ;;  %5343 = vmatprep.subr.bf16.mxu1 %v7388_v17  ;;  %v7428_v44 = vld [vmem:[#allocation5 + $0x164] ss:$16 sps:$4 sm:$0xff]   ;;  %v7430_v45 = vld [vmem:[#allocation5 + $0x16c] ss:$16 sps:$4 sm:$0xff]   ;;  %v7432_v48 = vld [vmem:[#allocation5 + $0x160] ss:$16 sps:$4 sm:$0xff]  }
  0x90   :  { %v118_v46 = vld [vmem:[#allocation2 + $0x8] sm:$0xff]  ;;  %v7434_v51 = vld [vmem:[#allocation5 + $0x184] ss:$16 sps:$4 sm:$0xff]   ;;  %v7438_v53 = vld [vmem:[#allocation5 + $0x180] ss:$16 sps:$4 sm:$0xff]   ;;  %vm8762_vm0 = vmmov 0  }
  0x91   :  { %v142_v47 = vld [vmem:[#allocation2 + $0xc8] sm:$0xff]  ;;  %v7440_v55 = vld [vmem:[#allocation5 + $0x1a4] ss:$16 sps:$4 sm:$0xff]   ;;  %v7444_v57 = vld [vmem:[#allocation5 + $0x1a0] ss:$16 sps:$4 sm:$0xff]   ;;  %s8763_s6 = smov [#allocation14]  }
  0x92   :  { %4828 = vmatpush1.bf16.msra.mxu0 %v7390_v18  ;;  %5344 = vmatpush1.bf16.msra.mxu1 %v7391_v19  ;;  %v7433_v49 = vld [vmem:[#allocation5 + $0x168] ss:$16 sps:$4 sm:$0xff]   ;;  %v166_v50 = vpack.c.bf16 %v142_v47, %v118_v46  ;;  %v7436_v52 = vld [vmem:[#allocation5 + $0x18c] ss:$16 sps:$4 sm:$0xff]   ;;  %v7446_v59 = vld [vmem:[#allocation5 + $0x1c4] ss:$16 sps:$4 sm:$0xff]  }
  0x93   :  { %4829 = vmatprep.subr.bf16.mxu0 %v7392_v20  ;;  %5345 = vmatprep.subr.bf16.mxu1 %v7394_v21  ;;  %v7439_v54 = vld [vmem:[#allocation5 + $0x188] ss:$16 sps:$4 sm:$0xff]   ;;  %v7442_v56 = vld [vmem:[#allocation5 + $0x1ac] ss:$16 sps:$4 sm:$0xff]   ;;  %v7450_v61 = vld [vmem:[#allocation5 + $0x1c0] ss:$16 sps:$4 sm:$0xff]  }
  0x94   :  { %4851 = vmatprep.mubr.bf16.mxu0 %v166_v50  ;;  %5367 = vmatprep.mubr.bf16.mxu1 %v166_v50  ;;  %v7445_v58 = vld [vmem:[#allocation5 + $0x1a8] ss:$16 sps:$4 sm:$0xff]   ;;  %v7448_v60 = vld [vmem:[#allocation5 + $0x1cc] ss:$16 sps:$4 sm:$0xff]   ;;  %v7452_v63 = vld [vmem:[#allocation5 + $0x1e4] ss:$16 sps:$4 sm:$0xff]  }
  0x95   :  { %v7451_v62 = vld [vmem:[#allocation5 + $0x1c8] ss:$16 sps:$4 sm:$0xff]   ;;  %v7454_v0 = vld [vmem:[#allocation5 + $0x1ec] ss:$16 sps:$4 sm:$0xff]   ;;  %v7456_v1 = vld [vmem:[#allocation5 + $0x1e0] ss:$16 sps:$4 sm:$0xff]  }
  0x96   :  { %4830 = vmatpush1.bf16.msra.mxu0 %v7396_v22  ;;  %5346 = vmatpush1.bf16.msra.mxu1 %v7397_v23  ;;  %v7457_v2 = vld [vmem:[#allocation5 + $0x1e8] ss:$16 sps:$4 sm:$0xff]   ;;  %v7460_v3 = vld [vmem:[#allocation5 + $0x204] ss:$16 sps:$4 sm:$0xff]   ;;  %v7463_v6 = vld [vmem:[#allocation5 + $0x20c] ss:$16 sps:$4 sm:$0xff]  }
  0x97   :  { %4831 = vmatprep.subr.bf16.mxu0 %v7398_v24  ;;  %5347 = vmatprep.subr.bf16.mxu1 %v7400_v25  ;;  %v117_v4 = vld [vmem:[#allocation2] sm:$0xff]  ;;  %v7461_v8 = vld [vmem:[#allocation5 + $0x208] ss:$16 sps:$4 sm:$0xff]   ;;  %v7469_v11 = vld [vmem:[#allocation5 + $0x22c] ss:$16 sps:$4 sm:$0xff]   ;;  %s6350_s15 = sshll.u32 %s8763_s6, 4  ;;  %s6351_s15 = int_to_ptr.vmem [resolvable:$true] %s6350_s15 }
  0x98   :  { %v141_v5 = vld [vmem:[#allocation2 + $0xc0] sm:$0xff]  ;;  %v7467_v13 = vld [vmem:[#allocation5 + $0x228] ss:$16 sps:$4 sm:$0xff]   ;;  %v7475_v15 = vld [vmem:[#allocation5 + $0x24c] ss:$16 sps:$4 sm:$0xff]   ;;  %s8716_s3 = scalar_lea.vmem %s6351_s15, 256  ;;  %p8721_p1 = scmp.lt.s32.totalorder %s6351_s15, %s6351_s15 }
  0x99   :  { %v7458_v7 = vld [vmem:[#allocation5 + $0x200] ss:$16 sps:$4 sm:$0xff]   ;;  %v165_v9 = vpack.c.bf16 %v141_v5, %v117_v4  ;;  %v7466_v10 = vld [vmem:[#allocation5 + $0x224] ss:$16 sps:$4 sm:$0xff]   ;;  %v7473_v17 = vld [vmem:[#allocation5 + $0x248] ss:$16 sps:$4 sm:$0xff]   ;;  %p8717_p0 = scmp.ne.s32.totalorder %s6351_s15, %s8716_s3  ;;  %p8722_p2 = scmp.lt.s32.totalorder %s8716_s3, %s8716_s3 }
  0x9a   :  { %4832 = vmatpush1.bf16.msra.mxu0 %v7402_v26  ;;  %5348 = vmatpush1.bf16.msra.mxu1 %v7403_v27  ;;  %v7464_v12 = vld [vmem:[#allocation5 + $0x220] ss:$16 sps:$4 sm:$0xff]   ;;  %v7472_v14 = vld [vmem:[#allocation5 + $0x244] ss:$16 sps:$4 sm:$0xff]   ;;  %v7481_v19 = vld [vmem:[#allocation5 + $0x26c] ss:$16 sps:$4 sm:$0xff]  }
  0x9b   :  { %4833 = vmatprep.subr.bf16.mxu0 %v7404_v28  ;;  %5349 = vmatprep.subr.bf16.mxu1 %v7406_v29  ;;  %v7470_v16 = vld [vmem:[#allocation5 + $0x240] ss:$16 sps:$4 sm:$0xff]   ;;  %v7478_v18 = vld [vmem:[#allocation5 + $0x264] ss:$16 sps:$4 sm:$0xff]   ;;  %v7479_v21 = vld [vmem:[#allocation5 + $0x268] ss:$16 sps:$4 sm:$0xff]   ;;  %p8723_p3 = por %p8722_p2, %p8721_p1 }
  0x9c   :  { %v7476_v20 = vld [vmem:[#allocation5 + $0x260] ss:$16 sps:$4 sm:$0xff]   ;;  %v7484_v22 = vld [vmem:[#allocation5 + $0x284] ss:$16 sps:$4 sm:$0xff]   ;;  %v7487_v23 = vld [vmem:[#allocation5 + $0x28c] ss:$16 sps:$4 sm:$0xff]  }
  0x9d   :  { %v7482_v24 = vld [vmem:[#allocation5 + $0x280] ss:$16 sps:$4 sm:$0xff]   ;;  %v7485_v25 = vld [vmem:[#allocation5 + $0x288] ss:$16 sps:$4 sm:$0xff]   ;;  %v7490_v26 = vld [vmem:[#allocation5 + $0x2a4] ss:$16 sps:$4 sm:$0xff]   ;;  %p8724_p4 = pnand %p8723_p3, %p8717_p0 }
  0x9e   :  { %4834 = vmatpush1.bf16.msra.mxu0 %v7408_v30  ;;  %5350 = vmatpush1.bf16.msra.mxu1 %v7409_v31  ;;  %v7493_v27 = vld [vmem:[#allocation5 + $0x2ac] ss:$16 sps:$4 sm:$0xff]   ;;  %v7488_v28 = vld [vmem:[#allocation5 + $0x2a0] ss:$16 sps:$4 sm:$0xff]   ;;  %v7491_v29 = vld [vmem:[#allocation5 + $0x2a8] ss:$16 sps:$4 sm:$0xff]  }
  0x9f   :  { %4835 = vmatprep.subr.bf16.mxu0 %v7410_v32  ;;  %5351 = vmatprep.subr.bf16.mxu1 %v7412_v33  ;;  %v7496_v30 = vld [vmem:[#allocation5 + $0x2c4] ss:$16 sps:$4 sm:$0xff]   ;;  %v7499_v31 = vld [vmem:[#allocation5 + $0x2cc] ss:$16 sps:$4 sm:$0xff]   ;;  %v7512_v47 = vld [vmem:[#allocation5 + $0x320] ss:$16 sps:$4 sm:$0xff]  }
  0xa0   :  { %v120_v32 = vld [vmem:[#allocation2 + $0x18] sm:$0xff]  ;;  %v7550_v5 = vld [vmem:[#allocation5 + $0x3e4] ss:$16 sps:$4 sm:$0xff]  }
  0xa1   :  { %v144_v33 = vld [vmem:[#allocation2 + $0xd8] sm:$0xff] }
  0xa2   :  { %4836 = vmatpush1.bf16.msra.mxu0 %v7414_v34  ;;  %5352 = vmatpush1.bf16.msra.mxu1 %v7415_v35  ;;  %v7494_v34 = vld [vmem:[#allocation5 + $0x2c0] ss:$16 sps:$4 sm:$0xff]   ;;  %v7497_v35 = vld [vmem:[#allocation5 + $0x2c8] ss:$16 sps:$4 sm:$0xff]   ;;  %v7517_v46 = vld [vmem:[#allocation5 + $0x32c] ss:$16 sps:$4 sm:$0xff]  }
  0xa3   :  { %4837 = vmatprep.subr.bf16.mxu0 %v7416_v36  ;;  %5353 = vmatprep.subr.bf16.mxu1 %v7418_v37  ;;  %v168_v36 = vpack.c.bf16 %v144_v33, %v120_v32  ;;  %v7502_v37 = vld [vmem:[#allocation5 + $0x2e4] ss:$16 sps:$4 sm:$0xff]   ;;  %v7523_v50 = vld [vmem:[#allocation5 + $0x34c] ss:$16 sps:$4 sm:$0xff]   ;;  %v7545_v4 = vld [vmem:[#allocation5 + $0x3c8] ss:$16 sps:$4 sm:$0xff]  }
  0xa4   :  { %v7583_v32 = vld [vmem:[#allocation5 + $0x48c] ss:$16 sps:$4 sm:$0xff]   ;;  %v7578_v33 = vld [vmem:[#allocation5 + $0x480] ss:$16 sps:$4 sm:$0xff]  }
  0xa6   :  { %4838 = vmatpush1.bf16.msra.mxu0 %v7420_v38  ;;  %5354 = vmatpush1.bf16.msra.mxu1 %v7421_v39  ;;  %v7505_v38 = vld [vmem:[#allocation5 + $0x2ec] ss:$16 sps:$4 sm:$0xff]   ;;  %v7500_v39 = vld [vmem:[#allocation5 + $0x2e0] ss:$16 sps:$4 sm:$0xff]  }
  0xa7   :  { %4839 = vmatprep.subr.bf16.mxu0 %v7422_v40  ;;  %5355 = vmatprep.subr.bf16.mxu1 %v7424_v41  ;;  %v7503_v40 = vld [vmem:[#allocation5 + $0x2e8] ss:$16 sps:$4 sm:$0xff]   ;;  %v7508_v41 = vld [vmem:[#allocation5 + $0x304] ss:$16 sps:$4 sm:$0xff]  }
  0xaa   :  { %4840 = vmatpush1.bf16.msra.mxu0 %v7426_v42  ;;  %5356 = vmatpush1.bf16.msra.mxu1 %v7427_v43  ;;  %v7511_v42 = vld [vmem:[#allocation5 + $0x30c] ss:$16 sps:$4 sm:$0xff]   ;;  %v7506_v43 = vld [vmem:[#allocation5 + $0x300] ss:$16 sps:$4 sm:$0xff]  }
  0xab   :  { %4841 = vmatprep.subr.bf16.mxu0 %v7428_v44  ;;  %5357 = vmatprep.subr.bf16.mxu1 %v7430_v45  ;;  %v7509_v44 = vld [vmem:[#allocation5 + $0x308] ss:$16 sps:$4 sm:$0xff]   ;;  %v7514_v45 = vld [vmem:[#allocation5 + $0x324] ss:$16 sps:$4 sm:$0xff]  }
  0xae   :  { %4842 = vmatpush1.bf16.msra.mxu0 %v7432_v48  ;;  %5358 = vmatpush1.bf16.msra.mxu1 %v7433_v49  ;;  %v7515_v48 = vld [vmem:[#allocation5 + $0x328] ss:$16 sps:$4 sm:$0xff]   ;;  %v7520_v49 = vld [vmem:[#allocation5 + $0x344] ss:$16 sps:$4 sm:$0xff]  }
  0xaf   :  { %4843 = vmatprep.subr.bf16.mxu0 %v7434_v51  ;;  %5359 = vmatprep.subr.bf16.mxu1 %v7436_v52  ;;  %v7518_v51 = vld [vmem:[#allocation5 + $0x340] ss:$16 sps:$4 sm:$0xff]   ;;  %v7521_v52 = vld [vmem:[#allocation5 + $0x348] ss:$16 sps:$4 sm:$0xff]  }
  0xb2   :  { %4844 = vmatpush1.bf16.msra.mxu0 %v7438_v53  ;;  %5360 = vmatpush1.bf16.msra.mxu1 %v7439_v54  ;;  %v7526_v53 = vld [vmem:[#allocation5 + $0x364] ss:$16 sps:$4 sm:$0xff]   ;;  %v7529_v54 = vld [vmem:[#allocation5 + $0x36c] ss:$16 sps:$4 sm:$0xff]  }
  0xb3   :  { %4845 = vmatprep.subr.bf16.mxu0 %v7440_v55  ;;  %5361 = vmatprep.subr.bf16.mxu1 %v7442_v56  ;;  %v7524_v55 = vld [vmem:[#allocation5 + $0x360] ss:$16 sps:$4 sm:$0xff]   ;;  %v7527_v56 = vld [vmem:[#allocation5 + $0x368] ss:$16 sps:$4 sm:$0xff]  }
  0xb6   :  { %4846 = vmatpush1.bf16.msra.mxu0 %v7444_v57  ;;  %5362 = vmatpush1.bf16.msra.mxu1 %v7445_v58  ;;  %v7532_v57 = vld [vmem:[#allocation5 + $0x384] ss:$16 sps:$4 sm:$0xff]   ;;  %v7535_v58 = vld [vmem:[#allocation5 + $0x38c] ss:$16 sps:$4 sm:$0xff]  }
  0xb7   :  { %4847 = vmatprep.subr.bf16.mxu0 %v7446_v59  ;;  %5363 = vmatprep.subr.bf16.mxu1 %v7448_v60  ;;  %v7530_v59 = vld [vmem:[#allocation5 + $0x380] ss:$16 sps:$4 sm:$0xff]   ;;  %v7533_v60 = vld [vmem:[#allocation5 + $0x388] ss:$16 sps:$4 sm:$0xff]  }
  0xba   :  { %4848 = vmatpush1.bf16.msra.mxu0 %v7450_v61  ;;  %5364 = vmatpush1.bf16.msra.mxu1 %v7451_v62  ;;  %v7538_v61 = vld [vmem:[#allocation5 + $0x3a4] ss:$16 sps:$4 sm:$0xff]   ;;  %v7541_v62 = vld [vmem:[#allocation5 + $0x3ac] ss:$16 sps:$4 sm:$0xff]  }
  0xbb   :  { %4849 = vmatprep.subr.bf16.mxu0 %v7452_v63  ;;  %5365 = vmatprep.subr.bf16.mxu1 %v7454_v0  ;;  %v7536_v63 = vld [vmem:[#allocation5 + $0x3a0] ss:$16 sps:$4 sm:$0xff]   ;;  %v7539_v0 = vld [vmem:[#allocation5 + $0x3a8] ss:$16 sps:$4 sm:$0xff]  }
  0xbe   :  { %4850 = vmatpush1.bf16.msra.mxu0 %v7456_v1  ;;  %5366 = vmatpush1.bf16.msra.mxu1 %v7457_v2  ;;  %v7544_v1 = vld [vmem:[#allocation5 + $0x3c4] ss:$16 sps:$4 sm:$0xff]   ;;  %v7547_v2 = vld [vmem:[#allocation5 + $0x3cc] ss:$16 sps:$4 sm:$0xff]  }
  0xbf   :  { %4862 = vmatprep.subr.bf16.mxu0 %v7460_v3  ;;  %5378 = vmatprep.subr.bf16.mxu1 %v7463_v6  ;;  %v7542_v3 = vld [vmem:[#allocation5 + $0x3c0] ss:$16 sps:$4 sm:$0xff]   ;;  %v7553_v6 = vld [vmem:[#allocation5 + $0x3ec] ss:$16 sps:$4 sm:$0xff]  }
  0xc1   :  { %4852 = vmatmul.mubr.bf16.vlgmr.msra.gmra.mrb[0].mxu0 %v165_v9  ;;  %5368 = vmatmul.mubr.bf16.vlgmr.msra.gmra.mrb[0].mxu1 %v165_v9  ;;  %v7556_v9 = vld [vmem:[#allocation5 + $0x404] ss:$16 sps:$4 sm:$0xff]  }
  0xc2   :  { %4863 = vmatpush1.bf16.msra.mxu0 %v7458_v7  ;;  %5379 = vmatpush1.bf16.msra.mxu1 %v7461_v8  ;;  %v7548_v7 = vld [vmem:[#allocation5 + $0x3e0] ss:$16 sps:$4 sm:$0xff]   ;;  %v7551_v8 = vld [vmem:[#allocation5 + $0x3e8] ss:$16 sps:$4 sm:$0xff]  }
  0xc3   :  { %4864 = vmatprep.subr.bf16.mxu0 %v7466_v10  ;;  %5380 = vmatprep.subr.bf16.mxu1 %v7469_v11  ;;  %v119_v10 = vld [vmem:[#allocation2 + $0x10] sm:$0xff] }
  0xc4   :  { %4894 = vmatprep.mubr.bf16.mxu0 %v168_v36  ;;  %5410 = vmatprep.mubr.bf16.mxu1 %v168_v36  ;;  %v143_v11 = vld [vmem:[#allocation2 + $0xd0] sm:$0xff]  ;;  %v7589_v36 = vld [vmem:[#allocation5 + $0x4ac] ss:$16 sps:$4 sm:$0xff]  }
  0xc6   :  { %4865 = vmatpush1.bf16.msra.mxu0 %v7464_v12  ;;  %5381 = vmatpush1.bf16.msra.mxu1 %v7467_v13  ;;  %v7559_v12 = vld [vmem:[#allocation5 + $0x40c] ss:$16 sps:$4 sm:$0xff]   ;;  %v7554_v13 = vld [vmem:[#allocation5 + $0x400] ss:$16 sps:$4 sm:$0xff]  }
  0xc7   :  { %4866 = vmatprep.subr.bf16.mxu0 %v7472_v14  ;;  %5382 = vmatprep.subr.bf16.mxu1 %v7475_v15  ;;  %v7557_v14 = vld [vmem:[#allocation5 + $0x408] ss:$16 sps:$4 sm:$0xff]   ;;  %v167_v15 = vpack.c.bf16 %v143_v11, %v119_v10  ;;  %v7646_v11 = vld [vmem:[#allocation5 + $0x5e4] ss:$16 sps:$4 sm:$0xff]  }
  0xc8   :  { %v7641_v10 = vld [vmem:[#allocation5 + $0x5c8] ss:$16 sps:$4 sm:$0xff]  }
  0xca   :  { %4867 = vmatpush1.bf16.msra.mxu0 %v7470_v16  ;;  %5383 = vmatpush1.bf16.msra.mxu1 %v7473_v17  ;;  %v7562_v16 = vld [vmem:[#allocation5 + $0x424] ss:$16 sps:$4 sm:$0xff]   ;;  %v7565_v17 = vld [vmem:[#allocation5 + $0x42c] ss:$16 sps:$4 sm:$0xff]  }
  0xcb   :  { %4868 = vmatprep.subr.bf16.mxu0 %v7478_v18  ;;  %5384 = vmatprep.subr.bf16.mxu1 %v7481_v19  ;;  %v122_v18 = vld [vmem:[#allocation2 + $0x28] sm:$0xff] }
  0xcc   :  { %v146_v19 = vld [vmem:[#allocation2 + $0xe8] sm:$0xff] }
  0xce   :  { %4869 = vmatpush1.bf16.msra.mxu0 %v7476_v20  ;;  %5385 = vmatpush1.bf16.msra.mxu1 %v7479_v21  ;;  %v7560_v20 = vld [vmem:[#allocation5 + $0x420] ss:$16 sps:$4 sm:$0xff]   ;;  %v7563_v21 = vld [vmem:[#allocation5 + $0x428] ss:$16 sps:$4 sm:$0xff]  }
  0xcf   :  { %4870 = vmatprep.subr.bf16.mxu0 %v7484_v22  ;;  %5386 = vmatprep.subr.bf16.mxu1 %v7487_v23  ;;  %v170_v22 = vpack.c.bf16 %v146_v19, %v122_v18  ;;  %v7568_v23 = vld [vmem:[#allocation5 + $0x444] ss:$16 sps:$4 sm:$0xff]   ;;  %v7655_v18 = vld [vmem:[#allocation5 + $0x60c] ss:$16 sps:$4 sm:$0xff]   ;;  %v7650_v19 = vld [vmem:[#allocation5 + $0x600] ss:$16 sps:$4 sm:$0xff]  }
  0xd2   :  { %4871 = vmatpush1.bf16.msra.mxu0 %v7482_v24  ;;  %5387 = vmatpush1.bf16.msra.mxu1 %v7485_v25  ;;  %v7571_v24 = vld [vmem:[#allocation5 + $0x44c] ss:$16 sps:$4 sm:$0xff]   ;;  %v7566_v25 = vld [vmem:[#allocation5 + $0x440] ss:$16 sps:$4 sm:$0xff]  }
  0xd3   :  { %4872 = vmatprep.subr.bf16.mxu0 %v7490_v26  ;;  %5388 = vmatprep.subr.bf16.mxu1 %v7493_v27  ;;  %v7569_v26 = vld [vmem:[#allocation5 + $0x448] ss:$16 sps:$4 sm:$0xff]   ;;  %v7574_v27 = vld [vmem:[#allocation5 + $0x464] ss:$16 sps:$4 sm:$0xff]  }
  0xd6   :  { %4873 = vmatpush1.bf16.msra.mxu0 %v7488_v28  ;;  %5389 = vmatpush1.bf16.msra.mxu1 %v7491_v29  ;;  %v7577_v28 = vld [vmem:[#allocation5 + $0x46c] ss:$16 sps:$4 sm:$0xff]   ;;  %v7572_v29 = vld [vmem:[#allocation5 + $0x460] ss:$16 sps:$4 sm:$0xff]  }
  0xd7   :  { %4874 = vmatprep.subr.bf16.mxu0 %v7496_v30  ;;  %5390 = vmatprep.subr.bf16.mxu1 %v7499_v31  ;;  %v7575_v30 = vld [vmem:[#allocation5 + $0x468] ss:$16 sps:$4 sm:$0xff]   ;;  %v7580_v31 = vld [vmem:[#allocation5 + $0x484] ss:$16 sps:$4 sm:$0xff]  }
  0xda   :  { %4875 = vmatpush1.bf16.msra.mxu0 %v7494_v34  ;;  %5391 = vmatpush1.bf16.msra.mxu1 %v7497_v35  ;;  %v7581_v34 = vld [vmem:[#allocation5 + $0x488] ss:$16 sps:$4 sm:$0xff]   ;;  %v7586_v35 = vld [vmem:[#allocation5 + $0x4a4] ss:$16 sps:$4 sm:$0xff]  }
  0xdb   :  { %4876 = vmatprep.subr.bf16.mxu0 %v7502_v37  ;;  %5392 = vmatprep.subr.bf16.mxu1 %v7505_v38  ;;  %v7584_v37 = vld [vmem:[#allocation5 + $0x4a0] ss:$16 sps:$4 sm:$0xff]   ;;  %v7587_v38 = vld [vmem:[#allocation5 + $0x4a8] ss:$16 sps:$4 sm:$0xff]  }
  0xde   :  { %4877 = vmatpush1.bf16.msra.mxu0 %v7500_v39  ;;  %5393 = vmatpush1.bf16.msra.mxu1 %v7503_v40  ;;  %v7592_v39 = vld [vmem:[#allocation5 + $0x4c4] ss:$16 sps:$4 sm:$0xff]   ;;  %v7595_v40 = vld [vmem:[#allocation5 + $0x4cc] ss:$16 sps:$4 sm:$0xff]  }
  0xdf   :  { %4878 = vmatprep.subr.bf16.mxu0 %v7508_v41  ;;  %5394 = vmatprep.subr.bf16.mxu1 %v7511_v42  ;;  %v7590_v41 = vld [vmem:[#allocation5 + $0x4c0] ss:$16 sps:$4 sm:$0xff]   ;;  %v7593_v42 = vld [vmem:[#allocation5 + $0x4c8] ss:$16 sps:$4 sm:$0xff]  }
  0xe2   :  { %4879 = vmatpush1.bf16.msra.mxu0 %v7506_v43  ;;  %5395 = vmatpush1.bf16.msra.mxu1 %v7509_v44  ;;  %v7598_v43 = vld [vmem:[#allocation5 + $0x4e4] ss:$16 sps:$4 sm:$0xff]   ;;  %v7601_v44 = vld [vmem:[#allocation5 + $0x4ec] ss:$16 sps:$4 sm:$0xff]  }
  0xe3   :  { %4880 = vmatprep.subr.bf16.mxu0 %v7514_v45  ;;  %5396 = vmatprep.subr.bf16.mxu1 %v7517_v46  ;;  %v7596_v45 = vld [vmem:[#allocation5 + $0x4e0] ss:$16 sps:$4 sm:$0xff]   ;;  %v7599_v46 = vld [vmem:[#allocation5 + $0x4e8] ss:$16 sps:$4 sm:$0xff]  }
  0xe6   :  { %4881 = vmatpush1.bf16.msra.mxu0 %v7512_v47  ;;  %5397 = vmatpush1.bf16.msra.mxu1 %v7515_v48  ;;  %v7604_v47 = vld [vmem:[#allocation5 + $0x504] ss:$16 sps:$4 sm:$0xff]   ;;  %v7607_v48 = vld [vmem:[#allocation5 + $0x50c] ss:$16 sps:$4 sm:$0xff]  }
  0xe7   :  { %4882 = vmatprep.subr.bf16.mxu0 %v7520_v49  ;;  %5398 = vmatprep.subr.bf16.mxu1 %v7523_v50  ;;  %v7602_v49 = vld [vmem:[#allocation5 + $0x500] ss:$16 sps:$4 sm:$0xff]   ;;  %v7605_v50 = vld [vmem:[#allocation5 + $0x508] ss:$16 sps:$4 sm:$0xff]  }
  0xea   :  { %4883 = vmatpush1.bf16.msra.mxu0 %v7518_v51  ;;  %5399 = vmatpush1.bf16.msra.mxu1 %v7521_v52  ;;  %v7610_v51 = vld [vmem:[#allocation5 + $0x524] ss:$16 sps:$4 sm:$0xff]   ;;  %v7613_v52 = vld [vmem:[#allocation5 + $0x52c] ss:$16 sps:$4 sm:$0xff]  }
  0xeb   :  { %4884 = vmatprep.subr.bf16.mxu0 %v7526_v53  ;;  %5400 = vmatprep.subr.bf16.mxu1 %v7529_v54  ;;  %v7608_v53 = vld [vmem:[#allocation5 + $0x520] ss:$16 sps:$4 sm:$0xff]   ;;  %v7611_v54 = vld [vmem:[#allocation5 + $0x528] ss:$16 sps:$4 sm:$0xff]  }
  0xee   :  { %4885 = vmatpush1.bf16.msra.mxu0 %v7524_v55  ;;  %5401 = vmatpush1.bf16.msra.mxu1 %v7527_v56  ;;  %v7616_v55 = vld [vmem:[#allocation5 + $0x544] ss:$16 sps:$4 sm:$0xff]   ;;  %v7619_v56 = vld [vmem:[#allocation5 + $0x54c] ss:$16 sps:$4 sm:$0xff]  }
  0xef   :  { %4886 = vmatprep.subr.bf16.mxu0 %v7532_v57  ;;  %5402 = vmatprep.subr.bf16.mxu1 %v7535_v58  ;;  %v7614_v57 = vld [vmem:[#allocation5 + $0x540] ss:$16 sps:$4 sm:$0xff]   ;;  %v7617_v58 = vld [vmem:[#allocation5 + $0x548] ss:$16 sps:$4 sm:$0xff]  }
  0xf2   :  { %4887 = vmatpush1.bf16.msra.mxu0 %v7530_v59  ;;  %5403 = vmatpush1.bf16.msra.mxu1 %v7533_v60  ;;  %v7622_v59 = vld [vmem:[#allocation5 + $0x564] ss:$16 sps:$4 sm:$0xff]   ;;  %v7625_v60 = vld [vmem:[#allocation5 + $0x56c] ss:$16 sps:$4 sm:$0xff]  }
  0xf3   :  { %4888 = vmatprep.subr.bf16.mxu0 %v7538_v61  ;;  %5404 = vmatprep.subr.bf16.mxu1 %v7541_v62  ;;  %v7620_v61 = vld [vmem:[#allocation5 + $0x560] ss:$16 sps:$4 sm:$0xff]   ;;  %v7623_v62 = vld [vmem:[#allocation5 + $0x568] ss:$16 sps:$4 sm:$0xff]  }
  0xf6   :  { %4889 = vmatpush1.bf16.msra.mxu0 %v7536_v63  ;;  %5405 = vmatpush1.bf16.msra.mxu1 %v7539_v0  ;;  %v7628_v63 = vld [vmem:[#allocation5 + $0x584] ss:$16 sps:$4 sm:$0xff]   ;;  %v7631_v0 = vld [vmem:[#allocation5 + $0x58c] ss:$16 sps:$4 sm:$0xff]  }
  0xf7   :  { %4890 = vmatprep.subr.bf16.mxu0 %v7544_v1  ;;  %5406 = vmatprep.subr.bf16.mxu1 %v7547_v2  ;;  %v7626_v1 = vld [vmem:[#allocation5 + $0x580] ss:$16 sps:$4 sm:$0xff]   ;;  %v7629_v2 = vld [vmem:[#allocation5 + $0x588] ss:$16 sps:$4 sm:$0xff]  }
  0xfa   :  { %4891 = vmatpush1.bf16.msra.mxu0 %v7542_v3  ;;  %5407 = vmatpush1.bf16.msra.mxu1 %v7545_v4  ;;  %v7634_v3 = vld [vmem:[#allocation5 + $0x5a4] ss:$16 sps:$4 sm:$0xff]   ;;  %v7637_v4 = vld [vmem:[#allocation5 + $0x5ac] ss:$16 sps:$4 sm:$0xff]  }
  0xfb   :  { %4892 = vmatprep.subr.bf16.mxu0 %v7550_v5  ;;  %5408 = vmatprep.subr.bf16.mxu1 %v7553_v6  ;;  %v7632_v5 = vld [vmem:[#allocation5 + $0x5a0] ss:$16 sps:$4 sm:$0xff]   ;;  %v7635_v6 = vld [vmem:[#allocation5 + $0x5a8] ss:$16 sps:$4 sm:$0xff]  }
  0xfe   :  { %4893 = vmatpush1.bf16.msra.mxu0 %v7548_v7  ;;  %5409 = vmatpush1.bf16.msra.mxu1 %v7551_v8  ;;  %v7640_v7 = vld [vmem:[#allocation5 + $0x5c4] ss:$16 sps:$4 sm:$0xff]   ;;  %v7643_v8 = vld [vmem:[#allocation5 + $0x5cc] ss:$16 sps:$4 sm:$0xff]  }
  0xff   :  { %4905 = vmatprep.subr.bf16.mxu0 %v7556_v9  ;;  %5421 = vmatprep.subr.bf16.mxu1 %v7559_v12  ;;  %v7638_v9 = vld [vmem:[#allocation5 + $0x5c0] ss:$16 sps:$4 sm:$0xff]   ;;  %v7649_v12 = vld [vmem:[#allocation5 + $0x5ec] ss:$16 sps:$4 sm:$0xff]  }
 0x101   :  { %4895 = vmatmul.mubr.bf16.vlgmr.msra.gmra.mrb[0].mxu0 %v167_v15  ;;  %5411 = vmatmul.mubr.bf16.vlgmr.msra.gmra.mrb[0].mxu1 %v167_v15  ;;  %v7652_v15 = vld [vmem:[#allocation5 + $0x604] ss:$16 sps:$4 sm:$0xff]  }
 0x102   :  { %4906 = vmatpush1.bf16.msra.mxu0 %v7554_v13  ;;  %5422 = vmatpush1.bf16.msra.mxu1 %v7557_v14  ;;  %v7644_v13 = vld [vmem:[#allocation5 + $0x5e0] ss:$16 sps:$4 sm:$0xff]   ;;  %v7647_v14 = vld [vmem:[#allocation5 + $0x5e8] ss:$16 sps:$4 sm:$0xff]  }
 0x103   :  { %4907 = vmatprep.subr.bf16.mxu0 %v7562_v16  ;;  %5423 = vmatprep.subr.bf16.mxu1 %v7565_v17  ;;  %v121_v16 = vld [vmem:[#allocation2 + $0x20] sm:$0xff] }
 0x104   :  { %4937 = vmatprep.mubr.bf16.mxu0 %v170_v22  ;;  %5453 = vmatprep.mubr.bf16.mxu1 %v170_v22  ;;  %v145_v17 = vld [vmem:[#allocation2 + $0xe0] sm:$0xff]  ;;  %v124_v22 = vld [vmem:[#allocation2 + $0x38] sm:$0xff] }
 0x106   :  { %4908 = vmatpush1.bf16.msra.mxu0 %v7560_v20  ;;  %5424 = vmatpush1.bf16.msra.mxu1 %v7563_v21  ;;  %v7653_v20 = vld [vmem:[#allocation5 + $0x608] ss:$16 sps:$4 sm:$0xff]   ;;  %v169_v21 = vpack.c.bf16 %v145_v17, %v121_v16  ;;  %v7742_v17 = vld [vmem:[#allocation5 + $0x7e4] ss:$16 sps:$4 sm:$0xff]  }
 0x107   :  { %4909 = vmatprep.subr.bf16.mxu0 %v7568_v23  ;;  %5425 = vmatprep.subr.bf16.mxu1 %v7571_v24  ;;  %v148_v23 = vld [vmem:[#allocation2 + $0xf8] sm:$0xff]  ;;  %v7658_v24 = vld [vmem:[#allocation5 + $0x624] ss:$16 sps:$4 sm:$0xff]  }
 0x108   :  { %v7737_v16 = vld [vmem:[#allocation5 + $0x7c8] ss:$16 sps:$4 sm:$0xff]  }
 0x10a   :  { %4910 = vmatpush1.bf16.msra.mxu0 %v7566_v25  ;;  %5426 = vmatpush1.bf16.msra.mxu1 %v7569_v26  ;;  %v7661_v25 = vld [vmem:[#allocation5 + $0x62c] ss:$16 sps:$4 sm:$0xff]   ;;  %v172_v26 = vpack.c.bf16 %v148_v23, %v124_v22  ;;  %v123_v22 = vld [vmem:[#allocation2 + $0x30] sm:$0xff] }
 0x10b   :  { %4911 = vmatprep.subr.bf16.mxu0 %v7574_v27  ;;  %5427 = vmatprep.subr.bf16.mxu1 %v7577_v28  ;;  %v7656_v27 = vld [vmem:[#allocation5 + $0x620] ss:$16 sps:$4 sm:$0xff]   ;;  %v7659_v28 = vld [vmem:[#allocation5 + $0x628] ss:$16 sps:$4 sm:$0xff]  }
 0x10c   :  { %v147_v23 = vld [vmem:[#allocation2 + $0xf0] sm:$0xff] }
 0x10e   :  { %4912 = vmatpush1.bf16.msra.mxu0 %v7572_v29  ;;  %5428 = vmatpush1.bf16.msra.mxu1 %v7575_v30  ;;  %v7664_v29 = vld [vmem:[#allocation5 + $0x644] ss:$16 sps:$4 sm:$0xff]   ;;  %v7667_v30 = vld [vmem:[#allocation5 + $0x64c] ss:$16 sps:$4 sm:$0xff]  }
 0x10f   :  { %4913 = vmatprep.subr.bf16.mxu0 %v7580_v31  ;;  %5429 = vmatprep.subr.bf16.mxu1 %v7583_v32  ;;  %v7662_v31 = vld [vmem:[#allocation5 + $0x640] ss:$16 sps:$4 sm:$0xff]   ;;  %v7665_v32 = vld [vmem:[#allocation5 + $0x648] ss:$16 sps:$4 sm:$0xff]  }
 0x112   :  { %4914 = vmatpush1.bf16.msra.mxu0 %v7578_v33  ;;  %5430 = vmatpush1.bf16.msra.mxu1 %v7581_v34  ;;  %v7670_v33 = vld [vmem:[#allocation5 + $0x664] ss:$16 sps:$4 sm:$0xff]   ;;  %v7673_v34 = vld [vmem:[#allocation5 + $0x66c] ss:$16 sps:$4 sm:$0xff]  }
 0x113   :  { %4915 = vmatprep.subr.bf16.mxu0 %v7586_v35  ;;  %5431 = vmatprep.subr.bf16.mxu1 %v7589_v36  ;;  %v7668_v35 = vld [vmem:[#allocation5 + $0x660] ss:$16 sps:$4 sm:$0xff]   ;;  %v7671_v36 = vld [vmem:[#allocation5 + $0x668] ss:$16 sps:$4 sm:$0xff]  }
 0x116   :  { %4916 = vmatpush1.bf16.msra.mxu0 %v7584_v37  ;;  %5432 = vmatpush1.bf16.msra.mxu1 %v7587_v38  ;;  %v7676_v37 = vld [vmem:[#allocation5 + $0x684] ss:$16 sps:$4 sm:$0xff]   ;;  %v7679_v38 = vld [vmem:[#allocation5 + $0x68c] ss:$16 sps:$4 sm:$0xff]  }
 0x117   :  { %4917 = vmatprep.subr.bf16.mxu0 %v7592_v39  ;;  %5433 = vmatprep.subr.bf16.mxu1 %v7595_v40  ;;  %v7674_v39 = vld [vmem:[#allocation5 + $0x680] ss:$16 sps:$4 sm:$0xff]   ;;  %v7677_v40 = vld [vmem:[#allocation5 + $0x688] ss:$16 sps:$4 sm:$0xff]  }
 0x11a   :  { %4918 = vmatpush1.bf16.msra.mxu0 %v7590_v41  ;;  %5434 = vmatpush1.bf16.msra.mxu1 %v7593_v42  ;;  %v7682_v41 = vld [vmem:[#allocation5 + $0x6a4] ss:$16 sps:$4 sm:$0xff]   ;;  %v7685_v42 = vld [vmem:[#allocation5 + $0x6ac] ss:$16 sps:$4 sm:$0xff]  }
 0x11b   :  { %4919 = vmatprep.subr.bf16.mxu0 %v7598_v43  ;;  %5435 = vmatprep.subr.bf16.mxu1 %v7601_v44  ;;  %v7680_v43 = vld [vmem:[#allocation5 + $0x6a0] ss:$16 sps:$4 sm:$0xff]   ;;  %v7683_v44 = vld [vmem:[#allocation5 + $0x6a8] ss:$16 sps:$4 sm:$0xff]  }
 0x11e   :  { %4920 = vmatpush1.bf16.msra.mxu0 %v7596_v45  ;;  %5436 = vmatpush1.bf16.msra.mxu1 %v7599_v46  ;;  %v7688_v45 = vld [vmem:[#allocation5 + $0x6c4] ss:$16 sps:$4 sm:$0xff]   ;;  %v7691_v46 = vld [vmem:[#allocation5 + $0x6cc] ss:$16 sps:$4 sm:$0xff]  }
 0x11f   :  { %4921 = vmatprep.subr.bf16.mxu0 %v7604_v47  ;;  %5437 = vmatprep.subr.bf16.mxu1 %v7607_v48  ;;  %v7686_v47 = vld [vmem:[#allocation5 + $0x6c0] ss:$16 sps:$4 sm:$0xff]   ;;  %v7689_v48 = vld [vmem:[#allocation5 + $0x6c8] ss:$16 sps:$4 sm:$0xff]  }
 0x122   :  { %4922 = vmatpush1.bf16.msra.mxu0 %v7602_v49  ;;  %5438 = vmatpush1.bf16.msra.mxu1 %v7605_v50  ;;  %v7694_v49 = vld [vmem:[#allocation5 + $0x6e4] ss:$16 sps:$4 sm:$0xff]   ;;  %v7697_v50 = vld [vmem:[#allocation5 + $0x6ec] ss:$16 sps:$4 sm:$0xff]  }
 0x123   :  { %4923 = vmatprep.subr.bf16.mxu0 %v7610_v51  ;;  %5439 = vmatprep.subr.bf16.mxu1 %v7613_v52  ;;  %v7692_v51 = vld [vmem:[#allocation5 + $0x6e0] ss:$16 sps:$4 sm:$0xff]   ;;  %v7695_v52 = vld [vmem:[#allocation5 + $0x6e8] ss:$16 sps:$4 sm:$0xff]  }
 0x126   :  { %4924 = vmatpush1.bf16.msra.mxu0 %v7608_v53  ;;  %5440 = vmatpush1.bf16.msra.mxu1 %v7611_v54  ;;  %v7700_v53 = vld [vmem:[#allocation5 + $0x704] ss:$16 sps:$4 sm:$0xff]   ;;  %v7703_v54 = vld [vmem:[#allocation5 + $0x70c] ss:$16 sps:$4 sm:$0xff]  }
 0x127   :  { %4925 = vmatprep.subr.bf16.mxu0 %v7616_v55  ;;  %5441 = vmatprep.subr.bf16.mxu1 %v7619_v56  ;;  %v7698_v55 = vld [vmem:[#allocation5 + $0x700] ss:$16 sps:$4 sm:$0xff]   ;;  %v7701_v56 = vld [vmem:[#allocation5 + $0x708] ss:$16 sps:$4 sm:$0xff]  }
 0x12a   :  { %4926 = vmatpush1.bf16.msra.mxu0 %v7614_v57  ;;  %5442 = vmatpush1.bf16.msra.mxu1 %v7617_v58  ;;  %v7706_v57 = vld [vmem:[#allocation5 + $0x724] ss:$16 sps:$4 sm:$0xff]   ;;  %v7709_v58 = vld [vmem:[#allocation5 + $0x72c] ss:$16 sps:$4 sm:$0xff]  }
 0x12b   :  { %4927 = vmatprep.subr.bf16.mxu0 %v7622_v59  ;;  %5443 = vmatprep.subr.bf16.mxu1 %v7625_v60  ;;  %v7704_v59 = vld [vmem:[#allocation5 + $0x720] ss:$16 sps:$4 sm:$0xff]   ;;  %v7707_v60 = vld [vmem:[#allocation5 + $0x728] ss:$16 sps:$4 sm:$0xff]  }
 0x12e   :  { %4928 = vmatpush1.bf16.msra.mxu0 %v7620_v61  ;;  %5444 = vmatpush1.bf16.msra.mxu1 %v7623_v62  ;;  %v7712_v61 = vld [vmem:[#allocation5 + $0x744] ss:$16 sps:$4 sm:$0xff]   ;;  %v7715_v62 = vld [vmem:[#allocation5 + $0x74c] ss:$16 sps:$4 sm:$0xff]  }
 0x12f   :  { %4929 = vmatprep.subr.bf16.mxu0 %v7628_v63  ;;  %5445 = vmatprep.subr.bf16.mxu1 %v7631_v0  ;;  %v7710_v63 = vld [vmem:[#allocation5 + $0x740] ss:$16 sps:$4 sm:$0xff]   ;;  %v7713_v0 = vld [vmem:[#allocation5 + $0x748] ss:$16 sps:$4 sm:$0xff]  }
 0x132   :  { %4930 = vmatpush1.bf16.msra.mxu0 %v7626_v1  ;;  %5446 = vmatpush1.bf16.msra.mxu1 %v7629_v2  ;;  %v7718_v1 = vld [vmem:[#allocation5 + $0x764] ss:$16 sps:$4 sm:$0xff]   ;;  %v7721_v2 = vld [vmem:[#allocation5 + $0x76c] ss:$16 sps:$4 sm:$0xff]  }
 0x133   :  { %4931 = vmatprep.subr.bf16.mxu0 %v7634_v3  ;;  %5447 = vmatprep.subr.bf16.mxu1 %v7637_v4  ;;  %v7716_v3 = vld [vmem:[#allocation5 + $0x760] ss:$16 sps:$4 sm:$0xff]   ;;  %v7719_v4 = vld [vmem:[#allocation5 + $0x768] ss:$16 sps:$4 sm:$0xff]  }
 0x136   :  { %4932 = vmatpush1.bf16.msra.mxu0 %v7632_v5  ;;  %5448 = vmatpush1.bf16.msra.mxu1 %v7635_v6  ;;  %v7724_v5 = vld [vmem:[#allocation5 + $0x784] ss:$16 sps:$4 sm:$0xff]   ;;  %v7727_v6 = vld [vmem:[#allocation5 + $0x78c] ss:$16 sps:$4 sm:$0xff]  }
 0x137   :  { %4933 = vmatprep.subr.bf16.mxu0 %v7640_v7  ;;  %5449 = vmatprep.subr.bf16.mxu1 %v7643_v8  ;;  %v7722_v7 = vld [vmem:[#allocation5 + $0x780] ss:$16 sps:$4 sm:$0xff]   ;;  %v7725_v8 = vld [vmem:[#allocation5 + $0x788] ss:$16 sps:$4 sm:$0xff]  }
 0x13a   :  { %4934 = vmatpush1.bf16.msra.mxu0 %v7638_v9  ;;  %5450 = vmatpush1.bf16.msra.mxu1 %v7641_v10  ;;  %v7730_v9 = vld [vmem:[#allocation5 + $0x7a4] ss:$16 sps:$4 sm:$0xff]   ;;  %v7733_v10 = vld [vmem:[#allocation5 + $0x7ac] ss:$16 sps:$4 sm:$0xff]  }
 0x13b   :  { %4935 = vmatprep.subr.bf16.mxu0 %v7646_v11  ;;  %5451 = vmatprep.subr.bf16.mxu1 %v7649_v12  ;;  %v7728_v11 = vld [vmem:[#allocation5 + $0x7a0] ss:$16 sps:$4 sm:$0xff]   ;;  %v7731_v12 = vld [vmem:[#allocation5 + $0x7a8] ss:$16 sps:$4 sm:$0xff]  }
 0x13e   :  { %4936 = vmatpush1.bf16.msra.mxu0 %v7644_v13  ;;  %5452 = vmatpush1.bf16.msra.mxu1 %v7647_v14  ;;  %v7736_v13 = vld [vmem:[#allocation5 + $0x7c4] ss:$16 sps:$4 sm:$0xff]   ;;  %v7739_v14 = vld [vmem:[#allocation5 + $0x7cc] ss:$16 sps:$4 sm:$0xff]  }
 0x13f   :  { %4948 = vmatprep.subr.bf16.mxu0 %v7652_v15  ;;  %5464 = vmatprep.subr.bf16.mxu1 %v7655_v18  ;;  %v7734_v15 = vld [vmem:[#allocation5 + $0x7c0] ss:$16 sps:$4 sm:$0xff]   ;;  %v7745_v18 = vld [vmem:[#allocation5 + $0x7ec] ss:$16 sps:$4 sm:$0xff]  }
 0x141   :  { %4938 = vmatmul.mubr.bf16.vlgmr.msra.gmra.mrb[0].mxu0 %v169_v21  ;;  %5454 = vmatmul.mubr.bf16.vlgmr.msra.gmra.mrb[0].mxu1 %v169_v21  ;;  %v7748_v21 = vld [vmem:[#allocation5 + $0x804] ss:$16 sps:$4 sm:$0xff]  }
 0x142   :  { %4949 = vmatpush1.bf16.msra.mxu0 %v7650_v19  ;;  %5465 = vmatpush1.bf16.msra.mxu1 %v7653_v20  ;;  %v7740_v19 = vld [vmem:[#allocation5 + $0x7e0] ss:$16 sps:$4 sm:$0xff]   ;;  %v7743_v20 = vld [vmem:[#allocation5 + $0x7e8] ss:$16 sps:$4 sm:$0xff]  }
 0x143   :  { %4950 = vmatprep.subr.bf16.mxu0 %v7658_v24  ;;  %5466 = vmatprep.subr.bf16.mxu1 %v7661_v25  ;;  %v7751_v24 = vld [vmem:[#allocation5 + $0x80c] ss:$16 sps:$4 sm:$0xff]   ;;  %v7746_v25 = vld [vmem:[#allocation5 + $0x800] ss:$16 sps:$4 sm:$0xff]  }
 0x144   :  { %4980 = vmatprep.mubr.bf16.mxu0 %v172_v26  ;;  %5496 = vmatprep.mubr.bf16.mxu1 %v172_v26  ;;  %v7749_v26 = vld [vmem:[#allocation5 + $0x808] ss:$16 sps:$4 sm:$0xff]  }
 0x146   :  { %4951 = vmatpush1.bf16.msra.mxu0 %v7656_v27  ;;  %5467 = vmatpush1.bf16.msra.mxu1 %v7659_v28  ;;  %v171_v27 = vpack.c.bf16 %v147_v23, %v123_v22  ;;  %v126_v28 = vld [vmem:[#allocation2 + $0x48] sm:$0xff]  ;;  %v7838_v23 = vld [vmem:[#allocation5 + $0x9e4] ss:$16 sps:$4 sm:$0xff]  }
 0x147   :  { %4952 = vmatprep.subr.bf16.mxu0 %v7664_v29  ;;  %5468 = vmatprep.subr.bf16.mxu1 %v7667_v30  ;;  %v150_v29 = vld [vmem:[#allocation2 + $0x108] sm:$0xff]  ;;  %v7754_v30 = vld [vmem:[#allocation5 + $0x824] ss:$16 sps:$4 sm:$0xff]  }
 0x148   :  { %v7833_v22 = vld [vmem:[#allocation5 + $0x9c8] ss:$16 sps:$4 sm:$0xff]  }
 0x14a   :  { %4953 = vmatpush1.bf16.msra.mxu0 %v7662_v31  ;;  %5469 = vmatpush1.bf16.msra.mxu1 %v7665_v32  ;;  %v7757_v31 = vld [vmem:[#allocation5 + $0x82c] ss:$16 sps:$4 sm:$0xff]   ;;  %v174_v32 = vpack.c.bf16 %v150_v29, %v126_v28  ;;  %v125_v29 = vld [vmem:[#allocation2 + $0x40] sm:$0xff] }
 0x14b   :  { %4954 = vmatprep.subr.bf16.mxu0 %v7670_v33  ;;  %5470 = vmatprep.subr.bf16.mxu1 %v7673_v34  ;;  %v7752_v33 = vld [vmem:[#allocation5 + $0x820] ss:$16 sps:$4 sm:$0xff]   ;;  %v7755_v34 = vld [vmem:[#allocation5 + $0x828] ss:$16 sps:$4 sm:$0xff]   ;;  %v7847_v28 = vld [vmem:[#allocation5 + $0xa0c] ss:$16 sps:$4 sm:$0xff]  }
 0x14e   :  { %4955 = vmatpush1.bf16.msra.mxu0 %v7668_v35  ;;  %5471 = vmatpush1.bf16.msra.mxu1 %v7671_v36  ;;  %v7760_v35 = vld [vmem:[#allocation5 + $0x844] ss:$16 sps:$4 sm:$0xff]   ;;  %v7763_v36 = vld [vmem:[#allocation5 + $0x84c] ss:$16 sps:$4 sm:$0xff]  }
 0x14f   :  { %4956 = vmatprep.subr.bf16.mxu0 %v7676_v37  ;;  %5472 = vmatprep.subr.bf16.mxu1 %v7679_v38  ;;  %v7758_v37 = vld [vmem:[#allocation5 + $0x840] ss:$16 sps:$4 sm:$0xff]   ;;  %v7761_v38 = vld [vmem:[#allocation5 + $0x848] ss:$16 sps:$4 sm:$0xff]  }
 0x152   :  { %4957 = vmatpush1.bf16.msra.mxu0 %v7674_v39  ;;  %5473 = vmatpush1.bf16.msra.mxu1 %v7677_v40  ;;  %v7766_v39 = vld [vmem:[#allocation5 + $0x864] ss:$16 sps:$4 sm:$0xff]   ;;  %v7769_v40 = vld [vmem:[#allocation5 + $0x86c] ss:$16 sps:$4 sm:$0xff]  }
 0x153   :  { %4958 = vmatprep.subr.bf16.mxu0 %v7682_v41  ;;  %5474 = vmatprep.subr.bf16.mxu1 %v7685_v42  ;;  %v7764_v41 = vld [vmem:[#allocation5 + $0x860] ss:$16 sps:$4 sm:$0xff]   ;;  %v7767_v42 = vld [vmem:[#allocation5 + $0x868] ss:$16 sps:$4 sm:$0xff]  }
 0x156   :  { %4959 = vmatpush1.bf16.msra.mxu0 %v7680_v43  ;;  %5475 = vmatpush1.bf16.msra.mxu1 %v7683_v44  ;;  %v7772_v43 = vld [vmem:[#allocation5 + $0x884] ss:$16 sps:$4 sm:$0xff]   ;;  %v7775_v44 = vld [vmem:[#allocation5 + $0x88c] ss:$16 sps:$4 sm:$0xff]  }
 0x157   :  { %4960 = vmatprep.subr.bf16.mxu0 %v7688_v45  ;;  %5476 = vmatprep.subr.bf16.mxu1 %v7691_v46  ;;  %v7770_v45 = vld [vmem:[#allocation5 + $0x880] ss:$16 sps:$4 sm:$0xff]   ;;  %v7773_v46 = vld [vmem:[#allocation5 + $0x888] ss:$16 sps:$4 sm:$0xff]  }
 0x15a   :  { %4961 = vmatpush1.bf16.msra.mxu0 %v7686_v47  ;;  %5477 = vmatpush1.bf16.msra.mxu1 %v7689_v48  ;;  %v7778_v47 = vld [vmem:[#allocation5 + $0x8a4] ss:$16 sps:$4 sm:$0xff]   ;;  %v7781_v48 = vld [vmem:[#allocation5 + $0x8ac] ss:$16 sps:$4 sm:$0xff]  }
 0x15b   :  { %4962 = vmatprep.subr.bf16.mxu0 %v7694_v49  ;;  %5478 = vmatprep.subr.bf16.mxu1 %v7697_v50  ;;  %v7776_v49 = vld [vmem:[#allocation5 + $0x8a0] ss:$16 sps:$4 sm:$0xff]   ;;  %v7779_v50 = vld [vmem:[#allocation5 + $0x8a8] ss:$16 sps:$4 sm:$0xff]  }
 0x15e   :  { %4963 = vmatpush1.bf16.msra.mxu0 %v7692_v51  ;;  %5479 = vmatpush1.bf16.msra.mxu1 %v7695_v52  ;;  %v7784_v51 = vld [vmem:[#allocation5 + $0x8c4] ss:$16 sps:$4 sm:$0xff]   ;;  %v7787_v52 = vld [vmem:[#allocation5 + $0x8cc] ss:$16 sps:$4 sm:$0xff]  }
 0x15f   :  { %4964 = vmatprep.subr.bf16.mxu0 %v7700_v53  ;;  %5480 = vmatprep.subr.bf16.mxu1 %v7703_v54  ;;  %v7782_v53 = vld [vmem:[#allocation5 + $0x8c0] ss:$16 sps:$4 sm:$0xff]   ;;  %v7785_v54 = vld [vmem:[#allocation5 + $0x8c8] ss:$16 sps:$4 sm:$0xff]  }
 0x162   :  { %4965 = vmatpush1.bf16.msra.mxu0 %v7698_v55  ;;  %5481 = vmatpush1.bf16.msra.mxu1 %v7701_v56  ;;  %v7790_v55 = vld [vmem:[#allocation5 + $0x8e4] ss:$16 sps:$4 sm:$0xff]   ;;  %v7793_v56 = vld [vmem:[#allocation5 + $0x8ec] ss:$16 sps:$4 sm:$0xff]  }
 0x163   :  { %4966 = vmatprep.subr.bf16.mxu0 %v7706_v57  ;;  %5482 = vmatprep.subr.bf16.mxu1 %v7709_v58  ;;  %v7788_v57 = vld [vmem:[#allocation5 + $0x8e0] ss:$16 sps:$4 sm:$0xff]   ;;  %v7791_v58 = vld [vmem:[#allocation5 + $0x8e8] ss:$16 sps:$4 sm:$0xff]  }
 0x166   :  { %4967 = vmatpush1.bf16.msra.mxu0 %v7704_v59  ;;  %5483 = vmatpush1.bf16.msra.mxu1 %v7707_v60  ;;  %v7796_v59 = vld [vmem:[#allocation5 + $0x904] ss:$16 sps:$4 sm:$0xff]   ;;  %v7799_v60 = vld [vmem:[#allocation5 + $0x90c] ss:$16 sps:$4 sm:$0xff]  }
 0x167   :  { %4968 = vmatprep.subr.bf16.mxu0 %v7712_v61  ;;  %5484 = vmatprep.subr.bf16.mxu1 %v7715_v62  ;;  %v7794_v61 = vld [vmem:[#allocation5 + $0x900] ss:$16 sps:$4 sm:$0xff]   ;;  %v7797_v62 = vld [vmem:[#allocation5 + $0x908] ss:$16 sps:$4 sm:$0xff]  }
 0x16a   :  { %4969 = vmatpush1.bf16.msra.mxu0 %v7710_v63  ;;  %5485 = vmatpush1.bf16.msra.mxu1 %v7713_v0  ;;  %v7802_v63 = vld [vmem:[#allocation5 + $0x924] ss:$16 sps:$4 sm:$0xff]   ;;  %v7805_v0 = vld [vmem:[#allocation5 + $0x92c] ss:$16 sps:$4 sm:$0xff]  }
 0x16b   :  { %4970 = vmatprep.subr.bf16.mxu0 %v7718_v1  ;;  %5486 = vmatprep.subr.bf16.mxu1 %v7721_v2  ;;  %v7800_v1 = vld [vmem:[#allocation5 + $0x920] ss:$16 sps:$4 sm:$0xff]   ;;  %v7803_v2 = vld [vmem:[#allocation5 + $0x928] ss:$16 sps:$4 sm:$0xff]  }
 0x16e   :  { %4971 = vmatpush1.bf16.msra.mxu0 %v7716_v3  ;;  %5487 = vmatpush1.bf16.msra.mxu1 %v7719_v4  ;;  %v7808_v3 = vld [vmem:[#allocation5 + $0x944] ss:$16 sps:$4 sm:$0xff]   ;;  %v7811_v4 = vld [vmem:[#allocation5 + $0x94c] ss:$16 sps:$4 sm:$0xff]  }
 0x16f   :  { %4972 = vmatprep.subr.bf16.mxu0 %v7724_v5  ;;  %5488 = vmatprep.subr.bf16.mxu1 %v7727_v6  ;;  %v7806_v5 = vld [vmem:[#allocation5 + $0x940] ss:$16 sps:$4 sm:$0xff]   ;;  %v7809_v6 = vld [vmem:[#allocation5 + $0x948] ss:$16 sps:$4 sm:$0xff]  }
 0x172   :  { %4973 = vmatpush1.bf16.msra.mxu0 %v7722_v7  ;;  %5489 = vmatpush1.bf16.msra.mxu1 %v7725_v8  ;;  %v7814_v7 = vld [vmem:[#allocation5 + $0x964] ss:$16 sps:$4 sm:$0xff]   ;;  %v7817_v8 = vld [vmem:[#allocation5 + $0x96c] ss:$16 sps:$4 sm:$0xff]  }
 0x173   :  { %4974 = vmatprep.subr.bf16.mxu0 %v7730_v9  ;;  %5490 = vmatprep.subr.bf16.mxu1 %v7733_v10  ;;  %v7812_v9 = vld [vmem:[#allocation5 + $0x960] ss:$16 sps:$4 sm:$0xff]   ;;  %v7815_v10 = vld [vmem:[#allocation5 + $0x968] ss:$16 sps:$4 sm:$0xff]  }
 0x176   :  { %4975 = vmatpush1.bf16.msra.mxu0 %v7728_v11  ;;  %5491 = vmatpush1.bf16.msra.mxu1 %v7731_v12  ;;  %v7820_v11 = vld [vmem:[#allocation5 + $0x984] ss:$16 sps:$4 sm:$0xff]   ;;  %v7823_v12 = vld [vmem:[#allocation5 + $0x98c] ss:$16 sps:$4 sm:$0xff]  }
 0x177   :  { %4976 = vmatprep.subr.bf16.mxu0 %v7736_v13  ;;  %5492 = vmatprep.subr.bf16.mxu1 %v7739_v14  ;;  %v7818_v13 = vld [vmem:[#allocation5 + $0x980] ss:$16 sps:$4 sm:$0xff]   ;;  %v7821_v14 = vld [vmem:[#allocation5 + $0x988] ss:$16 sps:$4 sm:$0xff]  }
 0x17a   :  { %4977 = vmatpush1.bf16.msra.mxu0 %v7734_v15  ;;  %5493 = vmatpush1.bf16.msra.mxu1 %v7737_v16  ;;  %v7826_v15 = vld [vmem:[#allocation5 + $0x9a4] ss:$16 sps:$4 sm:$0xff]   ;;  %v7829_v16 = vld [vmem:[#allocation5 + $0x9ac] ss:$16 sps:$4 sm:$0xff]  }
 0x17b   :  { %4978 = vmatprep.subr.bf16.mxu0 %v7742_v17  ;;  %5494 = vmatprep.subr.bf16.mxu1 %v7745_v18  ;;  %v7824_v17 = vld [vmem:[#allocation5 + $0x9a0] ss:$16 sps:$4 sm:$0xff]   ;;  %v7827_v18 = vld [vmem:[#allocation5 + $0x9a8] ss:$16 sps:$4 sm:$0xff]  }
 0x17e   :  { %4979 = vmatpush1.bf16.msra.mxu0 %v7740_v19  ;;  %5495 = vmatpush1.bf16.msra.mxu1 %v7743_v20  ;;  %v7832_v19 = vld [vmem:[#allocation5 + $0x9c4] ss:$16 sps:$4 sm:$0xff]   ;;  %v7835_v20 = vld [vmem:[#allocation5 + $0x9cc] ss:$16 sps:$4 sm:$0xff]  }
 0x17f   :  { %4991 = vmatprep.subr.bf16.mxu0 %v7748_v21  ;;  %5507 = vmatprep.subr.bf16.mxu1 %v7751_v24  ;;  %v7830_v21 = vld [vmem:[#allocation5 + $0x9c0] ss:$16 sps:$4 sm:$0xff]   ;;  %v7841_v24 = vld [vmem:[#allocation5 + $0x9ec] ss:$16 sps:$4 sm:$0xff]  }
 0x181   :  { %4981 = vmatmul.mubr.bf16.vlgmr.msra.gmra.mrb[0].mxu0 %v171_v27  ;;  %5497 = vmatmul.mubr.bf16.vlgmr.msra.gmra.mrb[0].mxu1 %v171_v27  ;;  %v7844_v27 = vld [vmem:[#allocation5 + $0xa04] ss:$16 sps:$4 sm:$0xff]  }
 0x182   :  { %4992 = vmatpush1.bf16.msra.mxu0 %v7746_v25  ;;  %5508 = vmatpush1.bf16.msra.mxu1 %v7749_v26  ;;  %v7836_v25 = vld [vmem:[#allocation5 + $0x9e0] ss:$16 sps:$4 sm:$0xff]   ;;  %v7839_v26 = vld [vmem:[#allocation5 + $0x9e8] ss:$16 sps:$4 sm:$0xff]  }
 0x183   :  { %4993 = vmatprep.subr.bf16.mxu0 %v7754_v30  ;;  %5509 = vmatprep.subr.bf16.mxu1 %v7757_v31  ;;  %v149_v30 = vld [vmem:[#allocation2 + $0x100] sm:$0xff]  ;;  %v128_v31 = vld [vmem:[#allocation2 + $0x58] sm:$0xff] }
 0x184   :  { %5023 = vmatprep.mubr.bf16.mxu0 %v174_v32  ;;  %5539 = vmatprep.mubr.bf16.mxu1 %v174_v32  ;;  %v152_v32 = vld [vmem:[#allocation2 + $0x118] sm:$0xff] }
 0x186   :  { %4994 = vmatpush1.bf16.msra.mxu0 %v7752_v33  ;;  %5510 = vmatpush1.bf16.msra.mxu1 %v7755_v34  ;;  %v173_v33 = vpack.c.bf16 %v149_v30, %v125_v29  ;;  %v7842_v34 = vld [vmem:[#allocation5 + $0xa00] ss:$16 sps:$4 sm:$0xff]   ;;  %v7934_v29 = vld [vmem:[#allocation5 + $0xbe4] ss:$16 sps:$4 sm:$0xff]   ;;  %v7937_v30 = vld [vmem:[#allocation5 + $0xbec] ss:$16 sps:$4 sm:$0xff]  }
 0x187   :  { %4995 = vmatprep.subr.bf16.mxu0 %v7760_v35  ;;  %5511 = vmatprep.subr.bf16.mxu1 %v7763_v36  ;;  %v7845_v35 = vld [vmem:[#allocation5 + $0xa08] ss:$16 sps:$4 sm:$0xff]   ;;  %v7850_v36 = vld [vmem:[#allocation5 + $0xa24] ss:$16 sps:$4 sm:$0xff]  }
 0x18a   :  { %4996 = vmatpush1.bf16.msra.mxu0 %v7758_v37  ;;  %5512 = vmatpush1.bf16.msra.mxu1 %v7761_v38  ;;  %v7853_v37 = vld [vmem:[#allocation5 + $0xa2c] ss:$16 sps:$4 sm:$0xff]   ;;  %v176_v38 = vpack.c.bf16 %v152_v32, %v128_v31  ;;  %v7932_v31 = vld [vmem:[#allocation5 + $0xbe0] ss:$16 sps:$4 sm:$0xff]   ;;  %v7935_v32 = vld [vmem:[#allocation5 + $0xbe8] ss:$16 sps:$4 sm:$0xff]  }
 0x18b   :  { %4997 = vmatprep.subr.bf16.mxu0 %v7766_v39  ;;  %5513 = vmatprep.subr.bf16.mxu1 %v7769_v40  ;;  %v7848_v39 = vld [vmem:[#allocation5 + $0xa20] ss:$16 sps:$4 sm:$0xff]   ;;  %v7851_v40 = vld [vmem:[#allocation5 + $0xa28] ss:$16 sps:$4 sm:$0xff]  }
 0x18e   :  { %4998 = vmatpush1.bf16.msra.mxu0 %v7764_v41  ;;  %5514 = vmatpush1.bf16.msra.mxu1 %v7767_v42  ;;  %v7856_v41 = vld [vmem:[#allocation5 + $0xa44] ss:$16 sps:$4 sm:$0xff]   ;;  %v7859_v42 = vld [vmem:[#allocation5 + $0xa4c] ss:$16 sps:$4 sm:$0xff]  }
 0x18f   :  { %4999 = vmatprep.subr.bf16.mxu0 %v7772_v43  ;;  %5515 = vmatprep.subr.bf16.mxu1 %v7775_v44  ;;  %v7854_v43 = vld [vmem:[#allocation5 + $0xa40] ss:$16 sps:$4 sm:$0xff]   ;;  %v7857_v44 = vld [vmem:[#allocation5 + $0xa48] ss:$16 sps:$4 sm:$0xff]  }
 0x192   :  { %5000 = vmatpush1.bf16.msra.mxu0 %v7770_v45  ;;  %5516 = vmatpush1.bf16.msra.mxu1 %v7773_v46  ;;  %v7862_v45 = vld [vmem:[#allocation5 + $0xa64] ss:$16 sps:$4 sm:$0xff]   ;;  %v7865_v46 = vld [vmem:[#allocation5 + $0xa6c] ss:$16 sps:$4 sm:$0xff]  }
 0x193   :  { %5001 = vmatprep.subr.bf16.mxu0 %v7778_v47  ;;  %5517 = vmatprep.subr.bf16.mxu1 %v7781_v48  ;;  %v7860_v47 = vld [vmem:[#allocation5 + $0xa60] ss:$16 sps:$4 sm:$0xff]   ;;  %v7863_v48 = vld [vmem:[#allocation5 + $0xa68] ss:$16 sps:$4 sm:$0xff]  }
 0x196   :  { %5002 = vmatpush1.bf16.msra.mxu0 %v7776_v49  ;;  %5518 = vmatpush1.bf16.msra.mxu1 %v7779_v50  ;;  %v7868_v49 = vld [vmem:[#allocation5 + $0xa84] ss:$16 sps:$4 sm:$0xff]   ;;  %v7871_v50 = vld [vmem:[#allocation5 + $0xa8c] ss:$16 sps:$4 sm:$0xff]  }
 0x197   :  { %5003 = vmatprep.subr.bf16.mxu0 %v7784_v51  ;;  %5519 = vmatprep.subr.bf16.mxu1 %v7787_v52  ;;  %v7866_v51 = vld [vmem:[#allocation5 + $0xa80] ss:$16 sps:$4 sm:$0xff]   ;;  %v7869_v52 = vld [vmem:[#allocation5 + $0xa88] ss:$16 sps:$4 sm:$0xff]  }
 0x19a   :  { %5004 = vmatpush1.bf16.msra.mxu0 %v7782_v53  ;;  %5520 = vmatpush1.bf16.msra.mxu1 %v7785_v54  ;;  %v7874_v53 = vld [vmem:[#allocation5 + $0xaa4] ss:$16 sps:$4 sm:$0xff]   ;;  %v7877_v54 = vld [vmem:[#allocation5 + $0xaac] ss:$16 sps:$4 sm:$0xff]  }
 0x19b   :  { %5005 = vmatprep.subr.bf16.mxu0 %v7790_v55  ;;  %5521 = vmatprep.subr.bf16.mxu1 %v7793_v56  ;;  %v7872_v55 = vld [vmem:[#allocation5 + $0xaa0] ss:$16 sps:$4 sm:$0xff]   ;;  %v7875_v56 = vld [vmem:[#allocation5 + $0xaa8] ss:$16 sps:$4 sm:$0xff]  }
 0x19e   :  { %5006 = vmatpush1.bf16.msra.mxu0 %v7788_v57  ;;  %5522 = vmatpush1.bf16.msra.mxu1 %v7791_v58  ;;  %v7880_v57 = vld [vmem:[#allocation5 + $0xac4] ss:$16 sps:$4 sm:$0xff]   ;;  %v7883_v58 = vld [vmem:[#allocation5 + $0xacc] ss:$16 sps:$4 sm:$0xff]  }
 0x19f   :  { %5007 = vmatprep.subr.bf16.mxu0 %v7796_v59  ;;  %5523 = vmatprep.subr.bf16.mxu1 %v7799_v60  ;;  %v7878_v59 = vld [vmem:[#allocation5 + $0xac0] ss:$16 sps:$4 sm:$0xff]   ;;  %v7881_v60 = vld [vmem:[#allocation5 + $0xac8] ss:$16 sps:$4 sm:$0xff]  }
 0x1a2   :  { %5008 = vmatpush1.bf16.msra.mxu0 %v7794_v61  ;;  %5524 = vmatpush1.bf16.msra.mxu1 %v7797_v62  ;;  %v7886_v61 = vld [vmem:[#allocation5 + $0xae4] ss:$16 sps:$4 sm:$0xff]   ;;  %v7889_v62 = vld [vmem:[#allocation5 + $0xaec] ss:$16 sps:$4 sm:$0xff]  }
 0x1a3   :  { %5009 = vmatprep.subr.bf16.mxu0 %v7802_v63  ;;  %5525 = vmatprep.subr.bf16.mxu1 %v7805_v0  ;;  %v7884_v63 = vld [vmem:[#allocation5 + $0xae0] ss:$16 sps:$4 sm:$0xff]   ;;  %v7887_v0 = vld [vmem:[#allocation5 + $0xae8] ss:$16 sps:$4 sm:$0xff]  }
 0x1a6   :  { %5010 = vmatpush1.bf16.msra.mxu0 %v7800_v1  ;;  %5526 = vmatpush1.bf16.msra.mxu1 %v7803_v2  ;;  %v7892_v1 = vld [vmem:[#allocation5 + $0xb04] ss:$16 sps:$4 sm:$0xff]   ;;  %v7895_v2 = vld [vmem:[#allocation5 + $0xb0c] ss:$16 sps:$4 sm:$0xff]  }
 0x1a7   :  { %5011 = vmatprep.subr.bf16.mxu0 %v7808_v3  ;;  %5527 = vmatprep.subr.bf16.mxu1 %v7811_v4  ;;  %v7890_v3 = vld [vmem:[#allocation5 + $0xb00] ss:$16 sps:$4 sm:$0xff]   ;;  %v7893_v4 = vld [vmem:[#allocation5 + $0xb08] ss:$16 sps:$4 sm:$0xff]  }
 0x1aa   :  { %5012 = vmatpush1.bf16.msra.mxu0 %v7806_v5  ;;  %5528 = vmatpush1.bf16.msra.mxu1 %v7809_v6  ;;  %v7898_v5 = vld [vmem:[#allocation5 + $0xb24] ss:$16 sps:$4 sm:$0xff]   ;;  %v7901_v6 = vld [vmem:[#allocation5 + $0xb2c] ss:$16 sps:$4 sm:$0xff]  }
 0x1ab   :  { %5013 = vmatprep.subr.bf16.mxu0 %v7814_v7  ;;  %5529 = vmatprep.subr.bf16.mxu1 %v7817_v8  ;;  %v7896_v7 = vld [vmem:[#allocation5 + $0xb20] ss:$16 sps:$4 sm:$0xff]   ;;  %v7899_v8 = vld [vmem:[#allocation5 + $0xb28] ss:$16 sps:$4 sm:$0xff]  }
 0x1ae   :  { %5014 = vmatpush1.bf16.msra.mxu0 %v7812_v9  ;;  %5530 = vmatpush1.bf16.msra.mxu1 %v7815_v10  ;;  %v7904_v9 = vld [vmem:[#allocation5 + $0xb44] ss:$16 sps:$4 sm:$0xff]   ;;  %v7907_v10 = vld [vmem:[#allocation5 + $0xb4c] ss:$16 sps:$4 sm:$0xff]  }
 0x1af   :  { %5015 = vmatprep.subr.bf16.mxu0 %v7820_v11  ;;  %5531 = vmatprep.subr.bf16.mxu1 %v7823_v12  ;;  %v7902_v11 = vld [vmem:[#allocation5 + $0xb40] ss:$16 sps:$4 sm:$0xff]   ;;  %v7905_v12 = vld [vmem:[#allocation5 + $0xb48] ss:$16 sps:$4 sm:$0xff]  }
 0x1b2   :  { %5016 = vmatpush1.bf16.msra.mxu0 %v7818_v13  ;;  %5532 = vmatpush1.bf16.msra.mxu1 %v7821_v14  ;;  %v7910_v13 = vld [vmem:[#allocation5 + $0xb64] ss:$16 sps:$4 sm:$0xff]   ;;  %v7913_v14 = vld [vmem:[#allocation5 + $0xb6c] ss:$16 sps:$4 sm:$0xff]  }
 0x1b3   :  { %5017 = vmatprep.subr.bf16.mxu0 %v7826_v15  ;;  %5533 = vmatprep.subr.bf16.mxu1 %v7829_v16  ;;  %v7908_v15 = vld [vmem:[#allocation5 + $0xb60] ss:$16 sps:$4 sm:$0xff]   ;;  %v7911_v16 = vld [vmem:[#allocation5 + $0xb68] ss:$16 sps:$4 sm:$0xff]  }
 0x1b6   :  { %5018 = vmatpush1.bf16.msra.mxu0 %v7824_v17  ;;  %5534 = vmatpush1.bf16.msra.mxu1 %v7827_v18  ;;  %v7916_v17 = vld [vmem:[#allocation5 + $0xb84] ss:$16 sps:$4 sm:$0xff]   ;;  %v7919_v18 = vld [vmem:[#allocation5 + $0xb8c] ss:$16 sps:$4 sm:$0xff]  }
 0x1b7   :  { %5019 = vmatprep.subr.bf16.mxu0 %v7832_v19  ;;  %5535 = vmatprep.subr.bf16.mxu1 %v7835_v20  ;;  %v7914_v19 = vld [vmem:[#allocation5 + $0xb80] ss:$16 sps:$4 sm:$0xff]   ;;  %v7917_v20 = vld [vmem:[#allocation5 + $0xb88] ss:$16 sps:$4 sm:$0xff]  }
 0x1ba   :  { %5020 = vmatpush1.bf16.msra.mxu0 %v7830_v21  ;;  %5536 = vmatpush1.bf16.msra.mxu1 %v7833_v22  ;;  %v7922_v21 = vld [vmem:[#allocation5 + $0xba4] ss:$16 sps:$4 sm:$0xff]   ;;  %v7925_v22 = vld [vmem:[#allocation5 + $0xbac] ss:$16 sps:$4 sm:$0xff]  }
 0x1bb   :  { %5021 = vmatprep.subr.bf16.mxu0 %v7838_v23  ;;  %5537 = vmatprep.subr.bf16.mxu1 %v7841_v24  ;;  %v7920_v23 = vld [vmem:[#allocation5 + $0xba0] ss:$16 sps:$4 sm:$0xff]   ;;  %v7923_v24 = vld [vmem:[#allocation5 + $0xba8] ss:$16 sps:$4 sm:$0xff]  }
 0x1be   :  { %5022 = vmatpush1.bf16.msra.mxu0 %v7836_v25  ;;  %5538 = vmatpush1.bf16.msra.mxu1 %v7839_v26  ;;  %v7928_v25 = vld [vmem:[#allocation5 + $0xbc4] ss:$16 sps:$4 sm:$0xff]   ;;  %v7931_v26 = vld [vmem:[#allocation5 + $0xbcc] ss:$16 sps:$4 sm:$0xff]  }
 0x1bf   :  { %5034 = vmatprep.subr.bf16.mxu0 %v7844_v27  ;;  %5550 = vmatprep.subr.bf16.mxu1 %v7847_v28  ;;  %v7926_v27 = vld [vmem:[#allocation5 + $0xbc0] ss:$16 sps:$4 sm:$0xff]   ;;  %v7929_v28 = vld [vmem:[#allocation5 + $0xbc8] ss:$16 sps:$4 sm:$0xff]  }
 0x1c1   :  { %5024 = vmatmul.mubr.bf16.vlgmr.msra.gmra.mrb[0].mxu0 %v173_v33  ;;  %5540 = vmatmul.mubr.bf16.vlgmr.msra.gmra.mrb[0].mxu1 %v173_v33  ;;  %v7940_v33 = vld [vmem:[#allocation5 + $0xc04] ss:$16 sps:$4 sm:$0xff]  }
 0x1c2   :  { %5035 = vmatpush1.bf16.msra.mxu0 %v7842_v34  ;;  %5551 = vmatpush1.bf16.msra.mxu1 %v7845_v35  ;;  %v7943_v34 = vld [vmem:[#allocation5 + $0xc0c] ss:$16 sps:$4 sm:$0xff]   ;;  %v127_v35 = vld [vmem:[#allocation2 + $0x50] sm:$0xff] }
 0x1c3   :  { %5036 = vmatprep.subr.bf16.mxu0 %v7850_v36  ;;  %5552 = vmatprep.subr.bf16.mxu1 %v7853_v37  ;;  %v151_v36 = vld [vmem:[#allocation2 + $0x110] sm:$0xff]  ;;  %v130_v37 = vld [vmem:[#allocation2 + $0x68] sm:$0xff] }
 0x1c4   :  { %5066 = vmatprep.mubr.bf16.mxu0 %v176_v38  ;;  %5582 = vmatprep.mubr.bf16.mxu1 %v176_v38  ;;  %v154_v38 = vld [vmem:[#allocation2 + $0x128] sm:$0xff] }
 0x1c6   :  { %5037 = vmatpush1.bf16.msra.mxu0 %v7848_v39  ;;  %5553 = vmatpush1.bf16.msra.mxu1 %v7851_v40  ;;  %v175_v39 = vpack.c.bf16 %v151_v36, %v127_v35  ;;  %v7938_v40 = vld [vmem:[#allocation5 + $0xc00] ss:$16 sps:$4 sm:$0xff]   ;;  %v8030_v35 = vld [vmem:[#allocation5 + $0xde4] ss:$16 sps:$4 sm:$0xff]   ;;  %v8033_v36 = vld [vmem:[#allocation5 + $0xdec] ss:$16 sps:$4 sm:$0xff]  }
 0x1c7   :  { %5038 = vmatprep.subr.bf16.mxu0 %v7856_v41  ;;  %5554 = vmatprep.subr.bf16.mxu1 %v7859_v42  ;;  %v7941_v41 = vld [vmem:[#allocation5 + $0xc08] ss:$16 sps:$4 sm:$0xff]   ;;  %v7946_v42 = vld [vmem:[#allocation5 + $0xc24] ss:$16 sps:$4 sm:$0xff]  }
 0x1ca   :  { %5039 = vmatpush1.bf16.msra.mxu0 %v7854_v43  ;;  %5555 = vmatpush1.bf16.msra.mxu1 %v7857_v44  ;;  %v7949_v43 = vld [vmem:[#allocation5 + $0xc2c] ss:$16 sps:$4 sm:$0xff]   ;;  %v178_v44 = vpack.c.bf16 %v154_v38, %v130_v37  ;;  %v8028_v37 = vld [vmem:[#allocation5 + $0xde0] ss:$16 sps:$4 sm:$0xff]   ;;  %v8031_v38 = vld [vmem:[#allocation5 + $0xde8] ss:$16 sps:$4 sm:$0xff]  }
 0x1cb   :  { %5040 = vmatprep.subr.bf16.mxu0 %v7862_v45  ;;  %5556 = vmatprep.subr.bf16.mxu1 %v7865_v46  ;;  %v7944_v45 = vld [vmem:[#allocation5 + $0xc20] ss:$16 sps:$4 sm:$0xff]   ;;  %v7947_v46 = vld [vmem:[#allocation5 + $0xc28] ss:$16 sps:$4 sm:$0xff]  }
 0x1ce   :  { %5041 = vmatpush1.bf16.msra.mxu0 %v7860_v47  ;;  %5557 = vmatpush1.bf16.msra.mxu1 %v7863_v48  ;;  %v7952_v47 = vld [vmem:[#allocation5 + $0xc44] ss:$16 sps:$4 sm:$0xff]   ;;  %v7955_v48 = vld [vmem:[#allocation5 + $0xc4c] ss:$16 sps:$4 sm:$0xff]  }
 0x1cf   :  { %5042 = vmatprep.subr.bf16.mxu0 %v7868_v49  ;;  %5558 = vmatprep.subr.bf16.mxu1 %v7871_v50  ;;  %v7950_v49 = vld [vmem:[#allocation5 + $0xc40] ss:$16 sps:$4 sm:$0xff]   ;;  %v7953_v50 = vld [vmem:[#allocation5 + $0xc48] ss:$16 sps:$4 sm:$0xff]  }
 0x1d2   :  { %5043 = vmatpush1.bf16.msra.mxu0 %v7866_v51  ;;  %5559 = vmatpush1.bf16.msra.mxu1 %v7869_v52  ;;  %v7958_v51 = vld [vmem:[#allocation5 + $0xc64] ss:$16 sps:$4 sm:$0xff]   ;;  %v7961_v52 = vld [vmem:[#allocation5 + $0xc6c] ss:$16 sps:$4 sm:$0xff]  }
 0x1d3   :  { %5044 = vmatprep.subr.bf16.mxu0 %v7874_v53  ;;  %5560 = vmatprep.subr.bf16.mxu1 %v7877_v54  ;;  %v7956_v53 = vld [vmem:[#allocation5 + $0xc60] ss:$16 sps:$4 sm:$0xff]   ;;  %v7959_v54 = vld [vmem:[#allocation5 + $0xc68] ss:$16 sps:$4 sm:$0xff]  }
 0x1d6   :  { %5045 = vmatpush1.bf16.msra.mxu0 %v7872_v55  ;;  %5561 = vmatpush1.bf16.msra.mxu1 %v7875_v56  ;;  %v7964_v55 = vld [vmem:[#allocation5 + $0xc84] ss:$16 sps:$4 sm:$0xff]   ;;  %v7967_v56 = vld [vmem:[#allocation5 + $0xc8c] ss:$16 sps:$4 sm:$0xff]  }
 0x1d7   :  { %5046 = vmatprep.subr.bf16.mxu0 %v7880_v57  ;;  %5562 = vmatprep.subr.bf16.mxu1 %v7883_v58  ;;  %v7962_v57 = vld [vmem:[#allocation5 + $0xc80] ss:$16 sps:$4 sm:$0xff]   ;;  %v7965_v58 = vld [vmem:[#allocation5 + $0xc88] ss:$16 sps:$4 sm:$0xff]  }
 0x1da   :  { %5047 = vmatpush1.bf16.msra.mxu0 %v7878_v59  ;;  %5563 = vmatpush1.bf16.msra.mxu1 %v7881_v60  ;;  %v7970_v59 = vld [vmem:[#allocation5 + $0xca4] ss:$16 sps:$4 sm:$0xff]   ;;  %v7973_v60 = vld [vmem:[#allocation5 + $0xcac] ss:$16 sps:$4 sm:$0xff]  }
 0x1db   :  { %5048 = vmatprep.subr.bf16.mxu0 %v7886_v61  ;;  %5564 = vmatprep.subr.bf16.mxu1 %v7889_v62  ;;  %v7968_v61 = vld [vmem:[#allocation5 + $0xca0] ss:$16 sps:$4 sm:$0xff]   ;;  %v7971_v62 = vld [vmem:[#allocation5 + $0xca8] ss:$16 sps:$4 sm:$0xff]  }
 0x1de   :  { %5049 = vmatpush1.bf16.msra.mxu0 %v7884_v63  ;;  %5565 = vmatpush1.bf16.msra.mxu1 %v7887_v0  ;;  %v7976_v63 = vld [vmem:[#allocation5 + $0xcc4] ss:$16 sps:$4 sm:$0xff]   ;;  %v7979_v0 = vld [vmem:[#allocation5 + $0xccc] ss:$16 sps:$4 sm:$0xff]  }
 0x1df   :  { %5050 = vmatprep.subr.bf16.mxu0 %v7892_v1  ;;  %5566 = vmatprep.subr.bf16.mxu1 %v7895_v2  ;;  %v7974_v1 = vld [vmem:[#allocation5 + $0xcc0] ss:$16 sps:$4 sm:$0xff]   ;;  %v7977_v2 = vld [vmem:[#allocation5 + $0xcc8] ss:$16 sps:$4 sm:$0xff]  }
 0x1e2   :  { %5051 = vmatpush1.bf16.msra.mxu0 %v7890_v3  ;;  %5567 = vmatpush1.bf16.msra.mxu1 %v7893_v4  ;;  %v7982_v3 = vld [vmem:[#allocation5 + $0xce4] ss:$16 sps:$4 sm:$0xff]   ;;  %v7985_v4 = vld [vmem:[#allocation5 + $0xcec] ss:$16 sps:$4 sm:$0xff]  }
 0x1e3   :  { %5052 = vmatprep.subr.bf16.mxu0 %v7898_v5  ;;  %5568 = vmatprep.subr.bf16.mxu1 %v7901_v6  ;;  %v7980_v5 = vld [vmem:[#allocation5 + $0xce0] ss:$16 sps:$4 sm:$0xff]   ;;  %v7983_v6 = vld [vmem:[#allocation5 + $0xce8] ss:$16 sps:$4 sm:$0xff]  }
 0x1e6   :  { %5053 = vmatpush1.bf16.msra.mxu0 %v7896_v7  ;;  %5569 = vmatpush1.bf16.msra.mxu1 %v7899_v8  ;;  %v7988_v7 = vld [vmem:[#allocation5 + $0xd04] ss:$16 sps:$4 sm:$0xff]   ;;  %v7991_v8 = vld [vmem:[#allocation5 + $0xd0c] ss:$16 sps:$4 sm:$0xff]  }
 0x1e7   :  { %5054 = vmatprep.subr.bf16.mxu0 %v7904_v9  ;;  %5570 = vmatprep.subr.bf16.mxu1 %v7907_v10  ;;  %v7986_v9 = vld [vmem:[#allocation5 + $0xd00] ss:$16 sps:$4 sm:$0xff]   ;;  %v7989_v10 = vld [vmem:[#allocation5 + $0xd08] ss:$16 sps:$4 sm:$0xff]  }
 0x1ea   :  { %5055 = vmatpush1.bf16.msra.mxu0 %v7902_v11  ;;  %5571 = vmatpush1.bf16.msra.mxu1 %v7905_v12  ;;  %v7994_v11 = vld [vmem:[#allocation5 + $0xd24] ss:$16 sps:$4 sm:$0xff]   ;;  %v7997_v12 = vld [vmem:[#allocation5 + $0xd2c] ss:$16 sps:$4 sm:$0xff]  }
 0x1eb   :  { %5056 = vmatprep.subr.bf16.mxu0 %v7910_v13  ;;  %5572 = vmatprep.subr.bf16.mxu1 %v7913_v14  ;;  %v7992_v13 = vld [vmem:[#allocation5 + $0xd20] ss:$16 sps:$4 sm:$0xff]   ;;  %v7995_v14 = vld [vmem:[#allocation5 + $0xd28] ss:$16 sps:$4 sm:$0xff]  }
 0x1ee   :  { %5057 = vmatpush1.bf16.msra.mxu0 %v7908_v15  ;;  %5573 = vmatpush1.bf16.msra.mxu1 %v7911_v16  ;;  %v8000_v15 = vld [vmem:[#allocation5 + $0xd44] ss:$16 sps:$4 sm:$0xff]   ;;  %v8003_v16 = vld [vmem:[#allocation5 + $0xd4c] ss:$16 sps:$4 sm:$0xff]  }
 0x1ef   :  { %5058 = vmatprep.subr.bf16.mxu0 %v7916_v17  ;;  %5574 = vmatprep.subr.bf16.mxu1 %v7919_v18  ;;  %v7998_v17 = vld [vmem:[#allocation5 + $0xd40] ss:$16 sps:$4 sm:$0xff]   ;;  %v8001_v18 = vld [vmem:[#allocation5 + $0xd48] ss:$16 sps:$4 sm:$0xff]  }
 0x1f2   :  { %5059 = vmatpush1.bf16.msra.mxu0 %v7914_v19  ;;  %5575 = vmatpush1.bf16.msra.mxu1 %v7917_v20  ;;  %v8006_v19 = vld [vmem:[#allocation5 + $0xd64] ss:$16 sps:$4 sm:$0xff]   ;;  %v8009_v20 = vld [vmem:[#allocation5 + $0xd6c] ss:$16 sps:$4 sm:$0xff]  }
 0x1f3   :  { %5060 = vmatprep.subr.bf16.mxu0 %v7922_v21  ;;  %5576 = vmatprep.subr.bf16.mxu1 %v7925_v22  ;;  %v8004_v21 = vld [vmem:[#allocation5 + $0xd60] ss:$16 sps:$4 sm:$0xff]   ;;  %v8007_v22 = vld [vmem:[#allocation5 + $0xd68] ss:$16 sps:$4 sm:$0xff]  }
 0x1f6   :  { %5061 = vmatpush1.bf16.msra.mxu0 %v7920_v23  ;;  %5577 = vmatpush1.bf16.msra.mxu1 %v7923_v24  ;;  %v8012_v23 = vld [vmem:[#allocation5 + $0xd84] ss:$16 sps:$4 sm:$0xff]   ;;  %v8015_v24 = vld [vmem:[#allocation5 + $0xd8c] ss:$16 sps:$4 sm:$0xff]  }
 0x1f7   :  { %5062 = vmatprep.subr.bf16.mxu0 %v7928_v25  ;;  %5578 = vmatprep.subr.bf16.mxu1 %v7931_v26  ;;  %v8010_v25 = vld [vmem:[#allocation5 + $0xd80] ss:$16 sps:$4 sm:$0xff]   ;;  %v8013_v26 = vld [vmem:[#allocation5 + $0xd88] ss:$16 sps:$4 sm:$0xff]  }
 0x1fa   :  { %5063 = vmatpush1.bf16.msra.mxu0 %v7926_v27  ;;  %5579 = vmatpush1.bf16.msra.mxu1 %v7929_v28  ;;  %v8018_v27 = vld [vmem:[#allocation5 + $0xda4] ss:$16 sps:$4 sm:$0xff]   ;;  %v8021_v28 = vld [vmem:[#allocation5 + $0xdac] ss:$16 sps:$4 sm:$0xff]  }
 0x1fb   :  { %5064 = vmatprep.subr.bf16.mxu0 %v7934_v29  ;;  %5580 = vmatprep.subr.bf16.mxu1 %v7937_v30  ;;  %v8016_v29 = vld [vmem:[#allocation5 + $0xda0] ss:$16 sps:$4 sm:$0xff]   ;;  %v8019_v30 = vld [vmem:[#allocation5 + $0xda8] ss:$16 sps:$4 sm:$0xff]  }
 0x1fe   :  { %5065 = vmatpush1.bf16.msra.mxu0 %v7932_v31  ;;  %5581 = vmatpush1.bf16.msra.mxu1 %v7935_v32  ;;  %v8024_v31 = vld [vmem:[#allocation5 + $0xdc4] ss:$16 sps:$4 sm:$0xff]   ;;  %v8027_v32 = vld [vmem:[#allocation5 + $0xdcc] ss:$16 sps:$4 sm:$0xff]  }
 0x1ff   :  { %5077 = vmatprep.subr.bf16.mxu0 %v7940_v33  ;;  %5593 = vmatprep.subr.bf16.mxu1 %v7943_v34  ;;  %v8022_v33 = vld [vmem:[#allocation5 + $0xdc0] ss:$16 sps:$4 sm:$0xff]   ;;  %v8025_v34 = vld [vmem:[#allocation5 + $0xdc8] ss:$16 sps:$4 sm:$0xff]  }
 0x201   :  { %5067 = vmatmul.mubr.bf16.vlgmr.msra.gmra.mrb[0].mxu0 %v175_v39  ;;  %5583 = vmatmul.mubr.bf16.vlgmr.msra.gmra.mrb[0].mxu1 %v175_v39  ;;  %v8036_v39 = vld [vmem:[#allocation5 + $0xe04] ss:$16 sps:$4 sm:$0xff]  }
 0x202   :  { %5078 = vmatpush1.bf16.msra.mxu0 %v7938_v40  ;;  %5594 = vmatpush1.bf16.msra.mxu1 %v7941_v41  ;;  %v8039_v40 = vld [vmem:[#allocation5 + $0xe0c] ss:$16 sps:$4 sm:$0xff]   ;;  %v129_v41 = vld [vmem:[#allocation2 + $0x60] sm:$0xff] }
 0x203   :  { %5079 = vmatprep.subr.bf16.mxu0 %v7946_v42  ;;  %5595 = vmatprep.subr.bf16.mxu1 %v7949_v43  ;;  %v153_v42 = vld [vmem:[#allocation2 + $0x120] sm:$0xff]  ;;  %v132_v43 = vld [vmem:[#allocation2 + $0x78] sm:$0xff] }
 0x204   :  { %5109 = vmatprep.mubr.bf16.mxu0 %v178_v44  ;;  %5625 = vmatprep.mubr.bf16.mxu1 %v178_v44  ;;  %v156_v44 = vld [vmem:[#allocation2 + $0x138] sm:$0xff] }
 0x206   :  { %5080 = vmatpush1.bf16.msra.mxu0 %v7944_v45  ;;  %5596 = vmatpush1.bf16.msra.mxu1 %v7947_v46  ;;  %v177_v45 = vpack.c.bf16 %v153_v42, %v129_v41  ;;  %v8034_v46 = vld [vmem:[#allocation5 + $0xe00] ss:$16 sps:$4 sm:$0xff]   ;;  %v8126_v41 = vld [vmem:[#allocation5 + $0xfe4] ss:$16 sps:$4 sm:$0xff]   ;;  %v8129_v42 = vld [vmem:[#allocation5 + $0xfec] ss:$16 sps:$4 sm:$0xff]  }
 0x207   :  { %5081 = vmatprep.subr.bf16.mxu0 %v7952_v47  ;;  %5597 = vmatprep.subr.bf16.mxu1 %v7955_v48  ;;  %v8037_v47 = vld [vmem:[#allocation5 + $0xe08] ss:$16 sps:$4 sm:$0xff]   ;;  %v8042_v48 = vld [vmem:[#allocation5 + $0xe24] ss:$16 sps:$4 sm:$0xff]  }
 0x20a   :  { %5082 = vmatpush1.bf16.msra.mxu0 %v7950_v49  ;;  %5598 = vmatpush1.bf16.msra.mxu1 %v7953_v50  ;;  %v8045_v49 = vld [vmem:[#allocation5 + $0xe2c] ss:$16 sps:$4 sm:$0xff]   ;;  %v180_v50 = vpack.c.bf16 %v156_v44, %v132_v43  ;;  %v8124_v43 = vld [vmem:[#allocation5 + $0xfe0] ss:$16 sps:$4 sm:$0xff]   ;;  %v8127_v44 = vld [vmem:[#allocation5 + $0xfe8] ss:$16 sps:$4 sm:$0xff]  }
 0x20b   :  { %5083 = vmatprep.subr.bf16.mxu0 %v7958_v51  ;;  %5599 = vmatprep.subr.bf16.mxu1 %v7961_v52  ;;  %v8040_v51 = vld [vmem:[#allocation5 + $0xe20] ss:$16 sps:$4 sm:$0xff]   ;;  %v8043_v52 = vld [vmem:[#allocation5 + $0xe28] ss:$16 sps:$4 sm:$0xff]  }
 0x20e   :  { %5084 = vmatpush1.bf16.msra.mxu0 %v7956_v53  ;;  %5600 = vmatpush1.bf16.msra.mxu1 %v7959_v54  ;;  %v8048_v53 = vld [vmem:[#allocation5 + $0xe44] ss:$16 sps:$4 sm:$0xff]   ;;  %v8051_v54 = vld [vmem:[#allocation5 + $0xe4c] ss:$16 sps:$4 sm:$0xff]  }
 0x20f   :  { %5085 = vmatprep.subr.bf16.mxu0 %v7964_v55  ;;  %5601 = vmatprep.subr.bf16.mxu1 %v7967_v56  ;;  %v8046_v55 = vld [vmem:[#allocation5 + $0xe40] ss:$16 sps:$4 sm:$0xff]   ;;  %v8049_v56 = vld [vmem:[#allocation5 + $0xe48] ss:$16 sps:$4 sm:$0xff]  }
 0x212   :  { %5086 = vmatpush1.bf16.msra.mxu0 %v7962_v57  ;;  %5602 = vmatpush1.bf16.msra.mxu1 %v7965_v58  ;;  %v8054_v57 = vld [vmem:[#allocation5 + $0xe64] ss:$16 sps:$4 sm:$0xff]   ;;  %v8057_v58 = vld [vmem:[#allocation5 + $0xe6c] ss:$16 sps:$4 sm:$0xff]  }
 0x213   :  { %5087 = vmatprep.subr.bf16.mxu0 %v7970_v59  ;;  %5603 = vmatprep.subr.bf16.mxu1 %v7973_v60  ;;  %v8052_v59 = vld [vmem:[#allocation5 + $0xe60] ss:$16 sps:$4 sm:$0xff]   ;;  %v8055_v60 = vld [vmem:[#allocation5 + $0xe68] ss:$16 sps:$4 sm:$0xff]  }
 0x216   :  { %5088 = vmatpush1.bf16.msra.mxu0 %v7968_v61  ;;  %5604 = vmatpush1.bf16.msra.mxu1 %v7971_v62  ;;  %v8060_v61 = vld [vmem:[#allocation5 + $0xe84] ss:$16 sps:$4 sm:$0xff]   ;;  %v8063_v62 = vld [vmem:[#allocation5 + $0xe8c] ss:$16 sps:$4 sm:$0xff]  }
 0x217   :  { %5089 = vmatprep.subr.bf16.mxu0 %v7976_v63  ;;  %5605 = vmatprep.subr.bf16.mxu1 %v7979_v0  ;;  %v8058_v63 = vld [vmem:[#allocation5 + $0xe80] ss:$16 sps:$4 sm:$0xff]   ;;  %v8061_v0 = vld [vmem:[#allocation5 + $0xe88] ss:$16 sps:$4 sm:$0xff]  }
 0x21a   :  { %5090 = vmatpush1.bf16.msra.mxu0 %v7974_v1  ;;  %5606 = vmatpush1.bf16.msra.mxu1 %v7977_v2  ;;  %v8066_v1 = vld [vmem:[#allocation5 + $0xea4] ss:$16 sps:$4 sm:$0xff]   ;;  %v8069_v2 = vld [vmem:[#allocation5 + $0xeac] ss:$16 sps:$4 sm:$0xff]  }
 0x21b   :  { %5091 = vmatprep.subr.bf16.mxu0 %v7982_v3  ;;  %5607 = vmatprep.subr.bf16.mxu1 %v7985_v4  ;;  %v8064_v3 = vld [vmem:[#allocation5 + $0xea0] ss:$16 sps:$4 sm:$0xff]   ;;  %v8067_v4 = vld [vmem:[#allocation5 + $0xea8] ss:$16 sps:$4 sm:$0xff]  }
 0x21e   :  { %5092 = vmatpush1.bf16.msra.mxu0 %v7980_v5  ;;  %5608 = vmatpush1.bf16.msra.mxu1 %v7983_v6  ;;  %v8072_v5 = vld [vmem:[#allocation5 + $0xec4] ss:$16 sps:$4 sm:$0xff]   ;;  %v8075_v6 = vld [vmem:[#allocation5 + $0xecc] ss:$16 sps:$4 sm:$0xff]  }
 0x21f   :  { %5093 = vmatprep.subr.bf16.mxu0 %v7988_v7  ;;  %5609 = vmatprep.subr.bf16.mxu1 %v7991_v8  ;;  %v8070_v7 = vld [vmem:[#allocation5 + $0xec0] ss:$16 sps:$4 sm:$0xff]   ;;  %v8073_v8 = vld [vmem:[#allocation5 + $0xec8] ss:$16 sps:$4 sm:$0xff]  }
 0x222   :  { %5094 = vmatpush1.bf16.msra.mxu0 %v7986_v9  ;;  %5610 = vmatpush1.bf16.msra.mxu1 %v7989_v10  ;;  %v8078_v9 = vld [vmem:[#allocation5 + $0xee4] ss:$16 sps:$4 sm:$0xff]   ;;  %v8081_v10 = vld [vmem:[#allocation5 + $0xeec] ss:$16 sps:$4 sm:$0xff]  }
 0x223   :  { %5095 = vmatprep.subr.bf16.mxu0 %v7994_v11  ;;  %5611 = vmatprep.subr.bf16.mxu1 %v7997_v12  ;;  %v8076_v11 = vld [vmem:[#allocation5 + $0xee0] ss:$16 sps:$4 sm:$0xff]   ;;  %v8079_v12 = vld [vmem:[#allocation5 + $0xee8] ss:$16 sps:$4 sm:$0xff]  }
 0x226   :  { %5096 = vmatpush1.bf16.msra.mxu0 %v7992_v13  ;;  %5612 = vmatpush1.bf16.msra.mxu1 %v7995_v14  ;;  %v8084_v13 = vld [vmem:[#allocation5 + $0xf04] ss:$16 sps:$4 sm:$0xff]   ;;  %v8087_v14 = vld [vmem:[#allocation5 + $0xf0c] ss:$16 sps:$4 sm:$0xff]  }
 0x227   :  { %5097 = vmatprep.subr.bf16.mxu0 %v8000_v15  ;;  %5613 = vmatprep.subr.bf16.mxu1 %v8003_v16  ;;  %v8082_v15 = vld [vmem:[#allocation5 + $0xf00] ss:$16 sps:$4 sm:$0xff]   ;;  %v8085_v16 = vld [vmem:[#allocation5 + $0xf08] ss:$16 sps:$4 sm:$0xff]  }
 0x22a   :  { %5098 = vmatpush1.bf16.msra.mxu0 %v7998_v17  ;;  %5614 = vmatpush1.bf16.msra.mxu1 %v8001_v18  ;;  %v8090_v17 = vld [vmem:[#allocation5 + $0xf24] ss:$16 sps:$4 sm:$0xff]   ;;  %v8093_v18 = vld [vmem:[#allocation5 + $0xf2c] ss:$16 sps:$4 sm:$0xff]  }
 0x22b   :  { %5099 = vmatprep.subr.bf16.mxu0 %v8006_v19  ;;  %5615 = vmatprep.subr.bf16.mxu1 %v8009_v20  ;;  %v8088_v19 = vld [vmem:[#allocation5 + $0xf20] ss:$16 sps:$4 sm:$0xff]   ;;  %v8091_v20 = vld [vmem:[#allocation5 + $0xf28] ss:$16 sps:$4 sm:$0xff]  }
 0x22e   :  { %5100 = vmatpush1.bf16.msra.mxu0 %v8004_v21  ;;  %5616 = vmatpush1.bf16.msra.mxu1 %v8007_v22  ;;  %v8096_v21 = vld [vmem:[#allocation5 + $0xf44] ss:$16 sps:$4 sm:$0xff]   ;;  %v8099_v22 = vld [vmem:[#allocation5 + $0xf4c] ss:$16 sps:$4 sm:$0xff]  }
 0x22f   :  { %5101 = vmatprep.subr.bf16.mxu0 %v8012_v23  ;;  %5617 = vmatprep.subr.bf16.mxu1 %v8015_v24  ;;  %v8094_v23 = vld [vmem:[#allocation5 + $0xf40] ss:$16 sps:$4 sm:$0xff]   ;;  %v8097_v24 = vld [vmem:[#allocation5 + $0xf48] ss:$16 sps:$4 sm:$0xff]  }
 0x232   :  { %5102 = vmatpush1.bf16.msra.mxu0 %v8010_v25  ;;  %5618 = vmatpush1.bf16.msra.mxu1 %v8013_v26  ;;  %v8102_v25 = vld [vmem:[#allocation5 + $0xf64] ss:$16 sps:$4 sm:$0xff]   ;;  %v8105_v26 = vld [vmem:[#allocation5 + $0xf6c] ss:$16 sps:$4 sm:$0xff]  }
 0x233   :  { %5103 = vmatprep.subr.bf16.mxu0 %v8018_v27  ;;  %5619 = vmatprep.subr.bf16.mxu1 %v8021_v28  ;;  %v8100_v27 = vld [vmem:[#allocation5 + $0xf60] ss:$16 sps:$4 sm:$0xff]   ;;  %v8103_v28 = vld [vmem:[#allocation5 + $0xf68] ss:$16 sps:$4 sm:$0xff]  }
 0x236   :  { %5104 = vmatpush1.bf16.msra.mxu0 %v8016_v29  ;;  %5620 = vmatpush1.bf16.msra.mxu1 %v8019_v30  ;;  %v8108_v29 = vld [vmem:[#allocation5 + $0xf84] ss:$16 sps:$4 sm:$0xff]   ;;  %v8111_v30 = vld [vmem:[#allocation5 + $0xf8c] ss:$16 sps:$4 sm:$0xff]  }
 0x237   :  { %5105 = vmatprep.subr.bf16.mxu0 %v8024_v31  ;;  %5621 = vmatprep.subr.bf16.mxu1 %v8027_v32  ;;  %v8106_v31 = vld [vmem:[#allocation5 + $0xf80] ss:$16 sps:$4 sm:$0xff]   ;;  %v8109_v32 = vld [vmem:[#allocation5 + $0xf88] ss:$16 sps:$4 sm:$0xff]  }
 0x23a   :  { %5106 = vmatpush1.bf16.msra.mxu0 %v8022_v33  ;;  %5622 = vmatpush1.bf16.msra.mxu1 %v8025_v34  ;;  %v8114_v33 = vld [vmem:[#allocation5 + $0xfa4] ss:$16 sps:$4 sm:$0xff]   ;;  %v8117_v34 = vld [vmem:[#allocation5 + $0xfac] ss:$16 sps:$4 sm:$0xff]  }
 0x23b   :  { %5107 = vmatprep.subr.bf16.mxu0 %v8030_v35  ;;  %5623 = vmatprep.subr.bf16.mxu1 %v8033_v36  ;;  %v8112_v35 = vld [vmem:[#allocation5 + $0xfa0] ss:$16 sps:$4 sm:$0xff]   ;;  %v8115_v36 = vld [vmem:[#allocation5 + $0xfa8] ss:$16 sps:$4 sm:$0xff]  }
 0x23e   :  { %5108 = vmatpush1.bf16.msra.mxu0 %v8028_v37  ;;  %5624 = vmatpush1.bf16.msra.mxu1 %v8031_v38  ;;  %v8120_v37 = vld [vmem:[#allocation5 + $0xfc4] ss:$16 sps:$4 sm:$0xff]   ;;  %v8123_v38 = vld [vmem:[#allocation5 + $0xfcc] ss:$16 sps:$4 sm:$0xff]  }
 0x23f   :  { %5120 = vmatprep.subr.bf16.mxu0 %v8036_v39  ;;  %5636 = vmatprep.subr.bf16.mxu1 %v8039_v40  ;;  %v8118_v39 = vld [vmem:[#allocation5 + $0xfc0] ss:$16 sps:$4 sm:$0xff]   ;;  %v8121_v40 = vld [vmem:[#allocation5 + $0xfc8] ss:$16 sps:$4 sm:$0xff]  }
 0x241   :  { %5110 = vmatmul.mubr.bf16.vlgmr.msra.gmra.mrb[0].mxu0 %v177_v45  ;;  %5626 = vmatmul.mubr.bf16.vlgmr.msra.gmra.mrb[0].mxu1 %v177_v45  ;;  %v131_v45 = vld [vmem:[#allocation2 + $0x70] sm:$0xff] }
 0x242   :  { %5121 = vmatpush1.bf16.msra.mxu0 %v8034_v46  ;;  %5637 = vmatpush1.bf16.msra.mxu1 %v8037_v47  ;;  %v155_v46 = vld [vmem:[#allocation2 + $0x130] sm:$0xff] }
 0x243   :  { %5122 = vmatprep.subr.bf16.mxu0 %v8042_v48  ;;  %5638 = vmatprep.subr.bf16.mxu1 %v8045_v49  ;;  %v8132_v47 = vld [vmem:[#allocation5 + $0x1004] ss:$16 sps:$4 sm:$0xff]   ;;  %v8135_v48 = vld [vmem:[#allocation5 + $0x100c] ss:$16 sps:$4 sm:$0xff]   ;;  %v179_v49 = vpack.c.bf16 %v155_v46, %v131_v45  ;;  %v8214_v45 = vld [vmem:[#allocation5 + $0x11c0] ss:$16 sps:$4 sm:$0xff]  }
 0x244   :  { %5152 = vmatprep.mubr.bf16.mxu0 %v180_v50  ;;  %5668 = vmatprep.mubr.bf16.mxu1 %v180_v50  ;;  %v134_v50 = vld [vmem:[#allocation2 + $0x88] sm:$0xff] }
 0x245   :  { %v8217_v46 = vld [vmem:[#allocation5 + $0x11c8] ss:$16 sps:$4 sm:$0xff]  }
 0x246   :  { %5123 = vmatpush1.bf16.msra.mxu0 %v8040_v51  ;;  %5639 = vmatpush1.bf16.msra.mxu1 %v8043_v52  ;;  %v158_v51 = vld [vmem:[#allocation2 + $0x148] sm:$0xff]  ;;  %v8130_v52 = vld [vmem:[#allocation5 + $0x1000] ss:$16 sps:$4 sm:$0xff]  }
 0x247   :  { %5124 = vmatprep.subr.bf16.mxu0 %v8048_v53  ;;  %5640 = vmatprep.subr.bf16.mxu1 %v8051_v54  ;;  %v8133_v53 = vld [vmem:[#allocation5 + $0x1008] ss:$16 sps:$4 sm:$0xff]   ;;  %v8138_v54 = vld [vmem:[#allocation5 + $0x1024] ss:$16 sps:$4 sm:$0xff]  }
 0x24a   :  { %5125 = vmatpush1.bf16.msra.mxu0 %v8046_v55  ;;  %5641 = vmatpush1.bf16.msra.mxu1 %v8049_v56  ;;  %v8141_v55 = vld [vmem:[#allocation5 + $0x102c] ss:$16 sps:$4 sm:$0xff]   ;;  %v182_v56 = vpack.c.bf16 %v158_v51, %v134_v50  ;;  %v8223_v50 = vld [vmem:[#allocation5 + $0x11e8] ss:$16 sps:$4 sm:$0xff]   ;;  %v133_v51 = vld [vmem:[#allocation2 + $0x80] sm:$0xff] }
 0x24b   :  { %5126 = vmatprep.subr.bf16.mxu0 %v8054_v57  ;;  %5642 = vmatprep.subr.bf16.mxu1 %v8057_v58  ;;  %v8136_v57 = vld [vmem:[#allocation5 + $0x1020] ss:$16 sps:$4 sm:$0xff]   ;;  %v8139_v58 = vld [vmem:[#allocation5 + $0x1028] ss:$16 sps:$4 sm:$0xff]  }
 0x24e   :  { %5127 = vmatpush1.bf16.msra.mxu0 %v8052_v59  ;;  %5643 = vmatpush1.bf16.msra.mxu1 %v8055_v60  ;;  %v8144_v59 = vld [vmem:[#allocation5 + $0x1044] ss:$16 sps:$4 sm:$0xff]   ;;  %v8147_v60 = vld [vmem:[#allocation5 + $0x104c] ss:$16 sps:$4 sm:$0xff]  }
 0x24f   :  { %5128 = vmatprep.subr.bf16.mxu0 %v8060_v61  ;;  %5644 = vmatprep.subr.bf16.mxu1 %v8063_v62  ;;  %v8142_v61 = vld [vmem:[#allocation5 + $0x1040] ss:$16 sps:$4 sm:$0xff]   ;;  %v8145_v62 = vld [vmem:[#allocation5 + $0x1048] ss:$16 sps:$4 sm:$0xff]  }
 0x252   :  { %5129 = vmatpush1.bf16.msra.mxu0 %v8058_v63  ;;  %5645 = vmatpush1.bf16.msra.mxu1 %v8061_v0  ;;  %v8150_v63 = vld [vmem:[#allocation5 + $0x1064] ss:$16 sps:$4 sm:$0xff]   ;;  %v8153_v0 = vld [vmem:[#allocation5 + $0x106c] ss:$16 sps:$4 sm:$0xff]  }
 0x253   :  { %5130 = vmatprep.subr.bf16.mxu0 %v8066_v1  ;;  %5646 = vmatprep.subr.bf16.mxu1 %v8069_v2  ;;  %v8148_v1 = vld [vmem:[#allocation5 + $0x1060] ss:$16 sps:$4 sm:$0xff]   ;;  %v8151_v2 = vld [vmem:[#allocation5 + $0x1068] ss:$16 sps:$4 sm:$0xff]  }
 0x256   :  { %5131 = vmatpush1.bf16.msra.mxu0 %v8064_v3  ;;  %5647 = vmatpush1.bf16.msra.mxu1 %v8067_v4  ;;  %v8156_v3 = vld [vmem:[#allocation5 + $0x1084] ss:$16 sps:$4 sm:$0xff]   ;;  %v8159_v4 = vld [vmem:[#allocation5 + $0x108c] ss:$16 sps:$4 sm:$0xff]  }
 0x257   :  { %5132 = vmatprep.subr.bf16.mxu0 %v8072_v5  ;;  %5648 = vmatprep.subr.bf16.mxu1 %v8075_v6  ;;  %v8154_v5 = vld [vmem:[#allocation5 + $0x1080] ss:$16 sps:$4 sm:$0xff]   ;;  %v8157_v6 = vld [vmem:[#allocation5 + $0x1088] ss:$16 sps:$4 sm:$0xff]  }
 0x25a   :  { %5133 = vmatpush1.bf16.msra.mxu0 %v8070_v7  ;;  %5649 = vmatpush1.bf16.msra.mxu1 %v8073_v8  ;;  %v8162_v7 = vld [vmem:[#allocation5 + $0x10a4] ss:$16 sps:$4 sm:$0xff]   ;;  %v8165_v8 = vld [vmem:[#allocation5 + $0x10ac] ss:$16 sps:$4 sm:$0xff]  }
 0x25b   :  { %5134 = vmatprep.subr.bf16.mxu0 %v8078_v9  ;;  %5650 = vmatprep.subr.bf16.mxu1 %v8081_v10  ;;  %v8160_v9 = vld [vmem:[#allocation5 + $0x10a0] ss:$16 sps:$4 sm:$0xff]   ;;  %v8163_v10 = vld [vmem:[#allocation5 + $0x10a8] ss:$16 sps:$4 sm:$0xff]  }
 0x25e   :  { %5135 = vmatpush1.bf16.msra.mxu0 %v8076_v11  ;;  %5651 = vmatpush1.bf16.msra.mxu1 %v8079_v12  ;;  %v8168_v11 = vld [vmem:[#allocation5 + $0x10c4] ss:$16 sps:$4 sm:$0xff]   ;;  %v8171_v12 = vld [vmem:[#allocation5 + $0x10cc] ss:$16 sps:$4 sm:$0xff]  }
 0x25f   :  { %5136 = vmatprep.subr.bf16.mxu0 %v8084_v13  ;;  %5652 = vmatprep.subr.bf16.mxu1 %v8087_v14  ;;  %v8166_v13 = vld [vmem:[#allocation5 + $0x10c0] ss:$16 sps:$4 sm:$0xff]   ;;  %v8169_v14 = vld [vmem:[#allocation5 + $0x10c8] ss:$16 sps:$4 sm:$0xff]  }
 0x262   :  { %5137 = vmatpush1.bf16.msra.mxu0 %v8082_v15  ;;  %5653 = vmatpush1.bf16.msra.mxu1 %v8085_v16  ;;  %v8174_v15 = vld [vmem:[#allocation5 + $0x10e4] ss:$16 sps:$4 sm:$0xff]   ;;  %v8177_v16 = vld [vmem:[#allocation5 + $0x10ec] ss:$16 sps:$4 sm:$0xff]  }
 0x263   :  { %5138 = vmatprep.subr.bf16.mxu0 %v8090_v17  ;;  %5654 = vmatprep.subr.bf16.mxu1 %v8093_v18  ;;  %v8172_v17 = vld [vmem:[#allocation5 + $0x10e0] ss:$16 sps:$4 sm:$0xff]   ;;  %v8175_v18 = vld [vmem:[#allocation5 + $0x10e8] ss:$16 sps:$4 sm:$0xff]  }
 0x266   :  { %5139 = vmatpush1.bf16.msra.mxu0 %v8088_v19  ;;  %5655 = vmatpush1.bf16.msra.mxu1 %v8091_v20  ;;  %v8180_v19 = vld [vmem:[#allocation5 + $0x1104] ss:$16 sps:$4 sm:$0xff]   ;;  %v8183_v20 = vld [vmem:[#allocation5 + $0x110c] ss:$16 sps:$4 sm:$0xff]  }
 0x267   :  { %5140 = vmatprep.subr.bf16.mxu0 %v8096_v21  ;;  %5656 = vmatprep.subr.bf16.mxu1 %v8099_v22  ;;  %v8178_v21 = vld [vmem:[#allocation5 + $0x1100] ss:$16 sps:$4 sm:$0xff]   ;;  %v8181_v22 = vld [vmem:[#allocation5 + $0x1108] ss:$16 sps:$4 sm:$0xff]  }
 0x26a   :  { %5141 = vmatpush1.bf16.msra.mxu0 %v8094_v23  ;;  %5657 = vmatpush1.bf16.msra.mxu1 %v8097_v24  ;;  %v8186_v23 = vld [vmem:[#allocation5 + $0x1124] ss:$16 sps:$4 sm:$0xff]   ;;  %v8189_v24 = vld [vmem:[#allocation5 + $0x112c] ss:$16 sps:$4 sm:$0xff]  }
 0x26b   :  { %5142 = vmatprep.subr.bf16.mxu0 %v8102_v25  ;;  %5658 = vmatprep.subr.bf16.mxu1 %v8105_v26  ;;  %v8184_v25 = vld [vmem:[#allocation5 + $0x1120] ss:$16 sps:$4 sm:$0xff]   ;;  %v8187_v26 = vld [vmem:[#allocation5 + $0x1128] ss:$16 sps:$4 sm:$0xff]  }
 0x26e   :  { %5143 = vmatpush1.bf16.msra.mxu0 %v8100_v27  ;;  %5659 = vmatpush1.bf16.msra.mxu1 %v8103_v28  ;;  %v8192_v27 = vld [vmem:[#allocation5 + $0x1144] ss:$16 sps:$4 sm:$0xff]   ;;  %v8195_v28 = vld [vmem:[#allocation5 + $0x114c] ss:$16 sps:$4 sm:$0xff]  }
 0x26f   :  { %5144 = vmatprep.subr.bf16.mxu0 %v8108_v29  ;;  %5660 = vmatprep.subr.bf16.mxu1 %v8111_v30  ;;  %v8190_v29 = vld [vmem:[#allocation5 + $0x1140] ss:$16 sps:$4 sm:$0xff]   ;;  %v8193_v30 = vld [vmem:[#allocation5 + $0x1148] ss:$16 sps:$4 sm:$0xff]  }
 0x272   :  { %5145 = vmatpush1.bf16.msra.mxu0 %v8106_v31  ;;  %5661 = vmatpush1.bf16.msra.mxu1 %v8109_v32  ;;  %v8198_v31 = vld [vmem:[#allocation5 + $0x1164] ss:$16 sps:$4 sm:$0xff]   ;;  %v8201_v32 = vld [vmem:[#allocation5 + $0x116c] ss:$16 sps:$4 sm:$0xff]  }
 0x273   :  { %5146 = vmatprep.subr.bf16.mxu0 %v8114_v33  ;;  %5662 = vmatprep.subr.bf16.mxu1 %v8117_v34  ;;  %v8196_v33 = vld [vmem:[#allocation5 + $0x1160] ss:$16 sps:$4 sm:$0xff]   ;;  %v8199_v34 = vld [vmem:[#allocation5 + $0x1168] ss:$16 sps:$4 sm:$0xff]  }
 0x276   :  { %5147 = vmatpush1.bf16.msra.mxu0 %v8112_v35  ;;  %5663 = vmatpush1.bf16.msra.mxu1 %v8115_v36  ;;  %v8204_v35 = vld [vmem:[#allocation5 + $0x1184] ss:$16 sps:$4 sm:$0xff]   ;;  %v8207_v36 = vld [vmem:[#allocation5 + $0x118c] ss:$16 sps:$4 sm:$0xff]  }
 0x277   :  { %5148 = vmatprep.subr.bf16.mxu0 %v8120_v37  ;;  %5664 = vmatprep.subr.bf16.mxu1 %v8123_v38  ;;  %v8202_v37 = vld [vmem:[#allocation5 + $0x1180] ss:$16 sps:$4 sm:$0xff]   ;;  %v8205_v38 = vld [vmem:[#allocation5 + $0x1188] ss:$16 sps:$4 sm:$0xff]  }
 0x27a   :  { %5149 = vmatpush1.bf16.msra.mxu0 %v8118_v39  ;;  %5665 = vmatpush1.bf16.msra.mxu1 %v8121_v40  ;;  %v8210_v39 = vld [vmem:[#allocation5 + $0x11a4] ss:$16 sps:$4 sm:$0xff]   ;;  %v8213_v40 = vld [vmem:[#allocation5 + $0x11ac] ss:$16 sps:$4 sm:$0xff]  }
 0x27b   :  { %5150 = vmatprep.subr.bf16.mxu0 %v8126_v41  ;;  %5666 = vmatprep.subr.bf16.mxu1 %v8129_v42  ;;  %v8208_v41 = vld [vmem:[#allocation5 + $0x11a0] ss:$16 sps:$4 sm:$0xff]   ;;  %v8211_v42 = vld [vmem:[#allocation5 + $0x11a8] ss:$16 sps:$4 sm:$0xff]  }
 0x27e   :  { %5151 = vmatpush1.bf16.msra.mxu0 %v8124_v43  ;;  %5667 = vmatpush1.bf16.msra.mxu1 %v8127_v44  ;;  %v8216_v43 = vld [vmem:[#allocation5 + $0x11c4] ss:$16 sps:$4 sm:$0xff]   ;;  %v8219_v44 = vld [vmem:[#allocation5 + $0x11cc] ss:$16 sps:$4 sm:$0xff]  }
 0x27f   :  { %5163 = vmatprep.subr.bf16.mxu0 %v8132_v47  ;;  %5679 = vmatprep.subr.bf16.mxu1 %v8135_v48  ;;  %v8222_v47 = vld [vmem:[#allocation5 + $0x11e4] ss:$16 sps:$4 sm:$0xff]   ;;  %v8225_v48 = vld [vmem:[#allocation5 + $0x11ec] ss:$16 sps:$4 sm:$0xff]  }
 0x281   :  { %5153 = vmatmul.mubr.bf16.vlgmr.msra.gmra.mrb[0].mxu0 %v179_v49  ;;  %5669 = vmatmul.mubr.bf16.vlgmr.msra.gmra.mrb[0].mxu1 %v179_v49  ;;  %v8220_v49 = vld [vmem:[#allocation5 + $0x11e0] ss:$16 sps:$4 sm:$0xff]  }
 0x282   :  { %5164 = vmatpush1.bf16.msra.mxu0 %v8130_v52  ;;  %5680 = vmatpush1.bf16.msra.mxu1 %v8133_v53  ;;  %v157_v52 = vld [vmem:[#allocation2 + $0x140] sm:$0xff] }
 0x283   :  { %5165 = vmatprep.subr.bf16.mxu0 %v8138_v54  ;;  %5681 = vmatprep.subr.bf16.mxu1 %v8141_v55  ;;  %v8228_v53 = vld [vmem:[#allocation5 + $0x1204] ss:$16 sps:$4 sm:$0xff]   ;;  %v8231_v54 = vld [vmem:[#allocation5 + $0x120c] ss:$16 sps:$4 sm:$0xff]   ;;  %v181_v55 = vpack.c.bf16 %v157_v52, %v133_v51  ;;  %v8310_v51 = vld [vmem:[#allocation5 + $0x13c0] ss:$16 sps:$4 sm:$0xff]  }
 0x284   :  { %5195 = vmatprep.mubr.bf16.mxu0 %v182_v56  ;;  %5711 = vmatprep.mubr.bf16.mxu1 %v182_v56  ;;  %v136_v56 = vld [vmem:[#allocation2 + $0x98] sm:$0xff] }
 0x285   :  { %v8313_v52 = vld [vmem:[#allocation5 + $0x13c8] ss:$16 sps:$4 sm:$0xff]  }
 0x286   :  { %5166 = vmatpush1.bf16.msra.mxu0 %v8136_v57  ;;  %5682 = vmatpush1.bf16.msra.mxu1 %v8139_v58  ;;  %v160_v57 = vld [vmem:[#allocation2 + $0x158] sm:$0xff]  ;;  %v8226_v58 = vld [vmem:[#allocation5 + $0x1200] ss:$16 sps:$4 sm:$0xff]  }
 0x287   :  { %5167 = vmatprep.subr.bf16.mxu0 %v8144_v59  ;;  %5683 = vmatprep.subr.bf16.mxu1 %v8147_v60  ;;  %v8229_v59 = vld [vmem:[#allocation5 + $0x1208] ss:$16 sps:$4 sm:$0xff]   ;;  %v8234_v60 = vld [vmem:[#allocation5 + $0x1224] ss:$16 sps:$4 sm:$0xff]  }
 0x28a   :  { %5168 = vmatpush1.bf16.msra.mxu0 %v8142_v61  ;;  %5684 = vmatpush1.bf16.msra.mxu1 %v8145_v62  ;;  %v8237_v61 = vld [vmem:[#allocation5 + $0x122c] ss:$16 sps:$4 sm:$0xff]   ;;  %v184_v62 = vpack.c.bf16 %v160_v57, %v136_v56  ;;  %v8319_v56 = vld [vmem:[#allocation5 + $0x13e8] ss:$16 sps:$4 sm:$0xff]   ;;  %v135_v57 = vld [vmem:[#allocation2 + $0x90] sm:$0xff] }
 0x28b   :  { %5169 = vmatprep.subr.bf16.mxu0 %v8150_v63  ;;  %5685 = vmatprep.subr.bf16.mxu1 %v8153_v0  ;;  %v8232_v63 = vld [vmem:[#allocation5 + $0x1220] ss:$16 sps:$4 sm:$0xff]   ;;  %v8235_v0 = vld [vmem:[#allocation5 + $0x1228] ss:$16 sps:$4 sm:$0xff]  }
 0x28e   :  { %5170 = vmatpush1.bf16.msra.mxu0 %v8148_v1  ;;  %5686 = vmatpush1.bf16.msra.mxu1 %v8151_v2  ;;  %v8240_v1 = vld [vmem:[#allocation5 + $0x1244] ss:$16 sps:$4 sm:$0xff]   ;;  %v8243_v2 = vld [vmem:[#allocation5 + $0x124c] ss:$16 sps:$4 sm:$0xff]  }
 0x28f   :  { %5171 = vmatprep.subr.bf16.mxu0 %v8156_v3  ;;  %5687 = vmatprep.subr.bf16.mxu1 %v8159_v4  ;;  %v8238_v3 = vld [vmem:[#allocation5 + $0x1240] ss:$16 sps:$4 sm:$0xff]   ;;  %v8241_v4 = vld [vmem:[#allocation5 + $0x1248] ss:$16 sps:$4 sm:$0xff]  }
 0x292   :  { %5172 = vmatpush1.bf16.msra.mxu0 %v8154_v5  ;;  %5688 = vmatpush1.bf16.msra.mxu1 %v8157_v6  ;;  %v8246_v5 = vld [vmem:[#allocation5 + $0x1264] ss:$16 sps:$4 sm:$0xff]   ;;  %v8249_v6 = vld [vmem:[#allocation5 + $0x126c] ss:$16 sps:$4 sm:$0xff]  }
 0x293   :  { %5173 = vmatprep.subr.bf16.mxu0 %v8162_v7  ;;  %5689 = vmatprep.subr.bf16.mxu1 %v8165_v8  ;;  %v8244_v7 = vld [vmem:[#allocation5 + $0x1260] ss:$16 sps:$4 sm:$0xff]   ;;  %v8247_v8 = vld [vmem:[#allocation5 + $0x1268] ss:$16 sps:$4 sm:$0xff]  }
 0x296   :  { %5174 = vmatpush1.bf16.msra.mxu0 %v8160_v9  ;;  %5690 = vmatpush1.bf16.msra.mxu1 %v8163_v10  ;;  %v8252_v9 = vld [vmem:[#allocation5 + $0x1284] ss:$16 sps:$4 sm:$0xff]   ;;  %v8255_v10 = vld [vmem:[#allocation5 + $0x128c] ss:$16 sps:$4 sm:$0xff]  }
 0x297   :  { %5175 = vmatprep.subr.bf16.mxu0 %v8168_v11  ;;  %5691 = vmatprep.subr.bf16.mxu1 %v8171_v12  ;;  %v8250_v11 = vld [vmem:[#allocation5 + $0x1280] ss:$16 sps:$4 sm:$0xff]   ;;  %v8253_v12 = vld [vmem:[#allocation5 + $0x1288] ss:$16 sps:$4 sm:$0xff]  }
 0x29a   :  { %5176 = vmatpush1.bf16.msra.mxu0 %v8166_v13  ;;  %5692 = vmatpush1.bf16.msra.mxu1 %v8169_v14  ;;  %v8258_v13 = vld [vmem:[#allocation5 + $0x12a4] ss:$16 sps:$4 sm:$0xff]   ;;  %v8261_v14 = vld [vmem:[#allocation5 + $0x12ac] ss:$16 sps:$4 sm:$0xff]  }
 0x29b   :  { %5177 = vmatprep.subr.bf16.mxu0 %v8174_v15  ;;  %5693 = vmatprep.subr.bf16.mxu1 %v8177_v16  ;;  %v8256_v15 = vld [vmem:[#allocation5 + $0x12a0] ss:$16 sps:$4 sm:$0xff]   ;;  %v8259_v16 = vld [vmem:[#allocation5 + $0x12a8] ss:$16 sps:$4 sm:$0xff]  }
 0x29e   :  { %5178 = vmatpush1.bf16.msra.mxu0 %v8172_v17  ;;  %5694 = vmatpush1.bf16.msra.mxu1 %v8175_v18  ;;  %v8264_v17 = vld [vmem:[#allocation5 + $0x12c4] ss:$16 sps:$4 sm:$0xff]   ;;  %v8267_v18 = vld [vmem:[#allocation5 + $0x12cc] ss:$16 sps:$4 sm:$0xff]  }
 0x29f   :  { %5179 = vmatprep.subr.bf16.mxu0 %v8180_v19  ;;  %5695 = vmatprep.subr.bf16.mxu1 %v8183_v20  ;;  %v8262_v19 = vld [vmem:[#allocation5 + $0x12c0] ss:$16 sps:$4 sm:$0xff]   ;;  %v8265_v20 = vld [vmem:[#allocation5 + $0x12c8] ss:$16 sps:$4 sm:$0xff]  }
 0x2a2   :  { %5180 = vmatpush1.bf16.msra.mxu0 %v8178_v21  ;;  %5696 = vmatpush1.bf16.msra.mxu1 %v8181_v22  ;;  %v8270_v21 = vld [vmem:[#allocation5 + $0x12e4] ss:$16 sps:$4 sm:$0xff]   ;;  %v8273_v22 = vld [vmem:[#allocation5 + $0x12ec] ss:$16 sps:$4 sm:$0xff]  }
 0x2a3   :  { %5181 = vmatprep.subr.bf16.mxu0 %v8186_v23  ;;  %5697 = vmatprep.subr.bf16.mxu1 %v8189_v24  ;;  %v8268_v23 = vld [vmem:[#allocation5 + $0x12e0] ss:$16 sps:$4 sm:$0xff]   ;;  %v8271_v24 = vld [vmem:[#allocation5 + $0x12e8] ss:$16 sps:$4 sm:$0xff]  }
 0x2a6   :  { %5182 = vmatpush1.bf16.msra.mxu0 %v8184_v25  ;;  %5698 = vmatpush1.bf16.msra.mxu1 %v8187_v26  ;;  %v8276_v25 = vld [vmem:[#allocation5 + $0x1304] ss:$16 sps:$4 sm:$0xff]   ;;  %v8279_v26 = vld [vmem:[#allocation5 + $0x130c] ss:$16 sps:$4 sm:$0xff]  }
 0x2a7   :  { %5183 = vmatprep.subr.bf16.mxu0 %v8192_v27  ;;  %5699 = vmatprep.subr.bf16.mxu1 %v8195_v28  ;;  %v8274_v27 = vld [vmem:[#allocation5 + $0x1300] ss:$16 sps:$4 sm:$0xff]   ;;  %v8277_v28 = vld [vmem:[#allocation5 + $0x1308] ss:$16 sps:$4 sm:$0xff]  }
 0x2aa   :  { %5184 = vmatpush1.bf16.msra.mxu0 %v8190_v29  ;;  %5700 = vmatpush1.bf16.msra.mxu1 %v8193_v30  ;;  %v8282_v29 = vld [vmem:[#allocation5 + $0x1324] ss:$16 sps:$4 sm:$0xff]   ;;  %v8285_v30 = vld [vmem:[#allocation5 + $0x132c] ss:$16 sps:$4 sm:$0xff]  }
 0x2ab   :  { %5185 = vmatprep.subr.bf16.mxu0 %v8198_v31  ;;  %5701 = vmatprep.subr.bf16.mxu1 %v8201_v32  ;;  %v8280_v31 = vld [vmem:[#allocation5 + $0x1320] ss:$16 sps:$4 sm:$0xff]   ;;  %v8283_v32 = vld [vmem:[#allocation5 + $0x1328] ss:$16 sps:$4 sm:$0xff]  }
 0x2ae   :  { %5186 = vmatpush1.bf16.msra.mxu0 %v8196_v33  ;;  %5702 = vmatpush1.bf16.msra.mxu1 %v8199_v34  ;;  %v8288_v33 = vld [vmem:[#allocation5 + $0x1344] ss:$16 sps:$4 sm:$0xff]   ;;  %v8291_v34 = vld [vmem:[#allocation5 + $0x134c] ss:$16 sps:$4 sm:$0xff]  }
 0x2af   :  { %5187 = vmatprep.subr.bf16.mxu0 %v8204_v35  ;;  %5703 = vmatprep.subr.bf16.mxu1 %v8207_v36  ;;  %v8286_v35 = vld [vmem:[#allocation5 + $0x1340] ss:$16 sps:$4 sm:$0xff]   ;;  %v8289_v36 = vld [vmem:[#allocation5 + $0x1348] ss:$16 sps:$4 sm:$0xff]  }
 0x2b2   :  { %5188 = vmatpush1.bf16.msra.mxu0 %v8202_v37  ;;  %5704 = vmatpush1.bf16.msra.mxu1 %v8205_v38  ;;  %v8294_v37 = vld [vmem:[#allocation5 + $0x1364] ss:$16 sps:$4 sm:$0xff]   ;;  %v8297_v38 = vld [vmem:[#allocation5 + $0x136c] ss:$16 sps:$4 sm:$0xff]  }
 0x2b3   :  { %5189 = vmatprep.subr.bf16.mxu0 %v8210_v39  ;;  %5705 = vmatprep.subr.bf16.mxu1 %v8213_v40  ;;  %v8292_v39 = vld [vmem:[#allocation5 + $0x1360] ss:$16 sps:$4 sm:$0xff]   ;;  %v8295_v40 = vld [vmem:[#allocation5 + $0x1368] ss:$16 sps:$4 sm:$0xff]  }
 0x2b6   :  { %5190 = vmatpush1.bf16.msra.mxu0 %v8208_v41  ;;  %5706 = vmatpush1.bf16.msra.mxu1 %v8211_v42  ;;  %v8300_v41 = vld [vmem:[#allocation5 + $0x1384] ss:$16 sps:$4 sm:$0xff]   ;;  %v8303_v42 = vld [vmem:[#allocation5 + $0x138c] ss:$16 sps:$4 sm:$0xff]  }
 0x2b7   :  { %5191 = vmatprep.subr.bf16.mxu0 %v8216_v43  ;;  %5707 = vmatprep.subr.bf16.mxu1 %v8219_v44  ;;  %v8298_v43 = vld [vmem:[#allocation5 + $0x1380] ss:$16 sps:$4 sm:$0xff]   ;;  %v8301_v44 = vld [vmem:[#allocation5 + $0x1388] ss:$16 sps:$4 sm:$0xff]  }
 0x2ba   :  { %5192 = vmatpush1.bf16.msra.mxu0 %v8214_v45  ;;  %5708 = vmatpush1.bf16.msra.mxu1 %v8217_v46  ;;  %v8306_v45 = vld [vmem:[#allocation5 + $0x13a4] ss:$16 sps:$4 sm:$0xff]   ;;  %v8309_v46 = vld [vmem:[#allocation5 + $0x13ac] ss:$16 sps:$4 sm:$0xff]  }
 0x2bb   :  { %5193 = vmatprep.subr.bf16.mxu0 %v8222_v47  ;;  %5709 = vmatprep.subr.bf16.mxu1 %v8225_v48  ;;  %v8304_v47 = vld [vmem:[#allocation5 + $0x13a0] ss:$16 sps:$4 sm:$0xff]   ;;  %v8307_v48 = vld [vmem:[#allocation5 + $0x13a8] ss:$16 sps:$4 sm:$0xff]  }
 0x2be   :  { %5194 = vmatpush1.bf16.msra.mxu0 %v8220_v49  ;;  %5710 = vmatpush1.bf16.msra.mxu1 %v8223_v50  ;;  %v8312_v49 = vld [vmem:[#allocation5 + $0x13c4] ss:$16 sps:$4 sm:$0xff]   ;;  %v8315_v50 = vld [vmem:[#allocation5 + $0x13cc] ss:$16 sps:$4 sm:$0xff]  }
 0x2bf   :  { %5206 = vmatprep.subr.bf16.mxu0 %v8228_v53  ;;  %5722 = vmatprep.subr.bf16.mxu1 %v8231_v54  ;;  %v8318_v53 = vld [vmem:[#allocation5 + $0x13e4] ss:$16 sps:$4 sm:$0xff]   ;;  %v8321_v54 = vld [vmem:[#allocation5 + $0x13ec] ss:$16 sps:$4 sm:$0xff]  }
 0x2c1   :  { %5196 = vmatmul.mubr.bf16.vlgmr.msra.gmra.mrb[0].mxu0 %v181_v55  ;;  %5712 = vmatmul.mubr.bf16.vlgmr.msra.gmra.mrb[0].mxu1 %v181_v55  ;;  %v8316_v55 = vld [vmem:[#allocation5 + $0x13e0] ss:$16 sps:$4 sm:$0xff]  }
 0x2c2   :  { %5207 = vmatpush1.bf16.msra.mxu0 %v8226_v58  ;;  %5723 = vmatpush1.bf16.msra.mxu1 %v8229_v59  ;;  %v159_v58 = vld [vmem:[#allocation2 + $0x150] sm:$0xff] }
 0x2c3   :  { %5208 = vmatprep.subr.bf16.mxu0 %v8234_v60  ;;  %5724 = vmatprep.subr.bf16.mxu1 %v8237_v61  ;;  %v8324_v59 = vld [vmem:[#allocation5 + $0x1404] ss:$16 sps:$4 sm:$0xff]   ;;  %v8327_v60 = vld [vmem:[#allocation5 + $0x140c] ss:$16 sps:$4 sm:$0xff]   ;;  %v183_v61 = vpack.c.bf16 %v159_v58, %v135_v57  ;;  %v8406_v57 = vld [vmem:[#allocation5 + $0x15c0] ss:$16 sps:$4 sm:$0xff]  }
 0x2c4   :  { %5238 = vmatprep.mubr.bf16.mxu0 %v184_v62  ;;  %5754 = vmatprep.mubr.bf16.mxu1 %v184_v62  ;;  %v138_v62 = vld [vmem:[#allocation2 + $0xa8] sm:$0xff] }
 0x2c5   :  { %v8409_v58 = vld [vmem:[#allocation5 + $0x15c8] ss:$16 sps:$4 sm:$0xff]  }
 0x2c6   :  { %5209 = vmatpush1.bf16.msra.mxu0 %v8232_v63  ;;  %5725 = vmatpush1.bf16.msra.mxu1 %v8235_v0  ;;  %v162_v63 = vld [vmem:[#allocation2 + $0x168] sm:$0xff]  ;;  %v8322_v0 = vld [vmem:[#allocation5 + $0x1400] ss:$16 sps:$4 sm:$0xff]  }
 0x2c7   :  { %5210 = vmatprep.subr.bf16.mxu0 %v8240_v1  ;;  %5726 = vmatprep.subr.bf16.mxu1 %v8243_v2  ;;  %v8325_v1 = vld [vmem:[#allocation5 + $0x1408] ss:$16 sps:$4 sm:$0xff]   ;;  %v8330_v2 = vld [vmem:[#allocation5 + $0x1424] ss:$16 sps:$4 sm:$0xff]  }
 0x2ca   :  { %5211 = vmatpush1.bf16.msra.mxu0 %v8238_v3  ;;  %5727 = vmatpush1.bf16.msra.mxu1 %v8241_v4  ;;  %v8333_v3 = vld [vmem:[#allocation5 + $0x142c] ss:$16 sps:$4 sm:$0xff]   ;;  %v186_v4 = vpack.c.bf16 %v162_v63, %v138_v62  ;;  %v8415_v62 = vld [vmem:[#allocation5 + $0x15e8] ss:$16 sps:$4 sm:$0xff]   ;;  %v137_v63 = vld [vmem:[#allocation2 + $0xa0] sm:$0xff] }
 0x2cb   :  { %5212 = vmatprep.subr.bf16.mxu0 %v8246_v5  ;;  %5728 = vmatprep.subr.bf16.mxu1 %v8249_v6  ;;  %v8328_v5 = vld [vmem:[#allocation5 + $0x1420] ss:$16 sps:$4 sm:$0xff]   ;;  %v8331_v6 = vld [vmem:[#allocation5 + $0x1428] ss:$16 sps:$4 sm:$0xff]  }
 0x2ce   :  { %5213 = vmatpush1.bf16.msra.mxu0 %v8244_v7  ;;  %5729 = vmatpush1.bf16.msra.mxu1 %v8247_v8  ;;  %v8336_v7 = vld [vmem:[#allocation5 + $0x1444] ss:$16 sps:$4 sm:$0xff]   ;;  %v8339_v8 = vld [vmem:[#allocation5 + $0x144c] ss:$16 sps:$4 sm:$0xff]  }
 0x2cf   :  { %5214 = vmatprep.subr.bf16.mxu0 %v8252_v9  ;;  %5730 = vmatprep.subr.bf16.mxu1 %v8255_v10  ;;  %v8334_v9 = vld [vmem:[#allocation5 + $0x1440] ss:$16 sps:$4 sm:$0xff]   ;;  %v8337_v10 = vld [vmem:[#allocation5 + $0x1448] ss:$16 sps:$4 sm:$0xff]  }
 0x2d2   :  { %5215 = vmatpush1.bf16.msra.mxu0 %v8250_v11  ;;  %5731 = vmatpush1.bf16.msra.mxu1 %v8253_v12  ;;  %v8342_v11 = vld [vmem:[#allocation5 + $0x1464] ss:$16 sps:$4 sm:$0xff]   ;;  %v8345_v12 = vld [vmem:[#allocation5 + $0x146c] ss:$16 sps:$4 sm:$0xff]  }
 0x2d3   :  { %5216 = vmatprep.subr.bf16.mxu0 %v8258_v13  ;;  %5732 = vmatprep.subr.bf16.mxu1 %v8261_v14  ;;  %v8340_v13 = vld [vmem:[#allocation5 + $0x1460] ss:$16 sps:$4 sm:$0xff]   ;;  %v8343_v14 = vld [vmem:[#allocation5 + $0x1468] ss:$16 sps:$4 sm:$0xff]  }
 0x2d6   :  { %5217 = vmatpush1.bf16.msra.mxu0 %v8256_v15  ;;  %5733 = vmatpush1.bf16.msra.mxu1 %v8259_v16  ;;  %v8348_v15 = vld [vmem:[#allocation5 + $0x1484] ss:$16 sps:$4 sm:$0xff]   ;;  %v8351_v16 = vld [vmem:[#allocation5 + $0x148c] ss:$16 sps:$4 sm:$0xff]  }
 0x2d7   :  { %5218 = vmatprep.subr.bf16.mxu0 %v8264_v17  ;;  %5734 = vmatprep.subr.bf16.mxu1 %v8267_v18  ;;  %v8346_v17 = vld [vmem:[#allocation5 + $0x1480] ss:$16 sps:$4 sm:$0xff]   ;;  %v8349_v18 = vld [vmem:[#allocation5 + $0x1488] ss:$16 sps:$4 sm:$0xff]  }
 0x2da   :  { %5219 = vmatpush1.bf16.msra.mxu0 %v8262_v19  ;;  %5735 = vmatpush1.bf16.msra.mxu1 %v8265_v20  ;;  %v8354_v19 = vld [vmem:[#allocation5 + $0x14a4] ss:$16 sps:$4 sm:$0xff]   ;;  %v8357_v20 = vld [vmem:[#allocation5 + $0x14ac] ss:$16 sps:$4 sm:$0xff]  }
 0x2db   :  { %5220 = vmatprep.subr.bf16.mxu0 %v8270_v21  ;;  %5736 = vmatprep.subr.bf16.mxu1 %v8273_v22  ;;  %v8352_v21 = vld [vmem:[#allocation5 + $0x14a0] ss:$16 sps:$4 sm:$0xff]   ;;  %v8355_v22 = vld [vmem:[#allocation5 + $0x14a8] ss:$16 sps:$4 sm:$0xff]  }
 0x2de   :  { %5221 = vmatpush1.bf16.msra.mxu0 %v8268_v23  ;;  %5737 = vmatpush1.bf16.msra.mxu1 %v8271_v24  ;;  %v8360_v23 = vld [vmem:[#allocation5 + $0x14c4] ss:$16 sps:$4 sm:$0xff]   ;;  %v8363_v24 = vld [vmem:[#allocation5 + $0x14cc] ss:$16 sps:$4 sm:$0xff]  }
 0x2df   :  { %5222 = vmatprep.subr.bf16.mxu0 %v8276_v25  ;;  %5738 = vmatprep.subr.bf16.mxu1 %v8279_v26  ;;  %v8358_v25 = vld [vmem:[#allocation5 + $0x14c0] ss:$16 sps:$4 sm:$0xff]   ;;  %v8361_v26 = vld [vmem:[#allocation5 + $0x14c8] ss:$16 sps:$4 sm:$0xff]  }
 0x2e2   :  { %5223 = vmatpush1.bf16.msra.mxu0 %v8274_v27  ;;  %5739 = vmatpush1.bf16.msra.mxu1 %v8277_v28  ;;  %v8366_v27 = vld [vmem:[#allocation5 + $0x14e4] ss:$16 sps:$4 sm:$0xff]   ;;  %v8369_v28 = vld [vmem:[#allocation5 + $0x14ec] ss:$16 sps:$4 sm:$0xff]  }
 0x2e3   :  { %5224 = vmatprep.subr.bf16.mxu0 %v8282_v29  ;;  %5740 = vmatprep.subr.bf16.mxu1 %v8285_v30  ;;  %v8364_v29 = vld [vmem:[#allocation5 + $0x14e0] ss:$16 sps:$4 sm:$0xff]   ;;  %v8367_v30 = vld [vmem:[#allocation5 + $0x14e8] ss:$16 sps:$4 sm:$0xff]  }
 0x2e6   :  { %5225 = vmatpush1.bf16.msra.mxu0 %v8280_v31  ;;  %5741 = vmatpush1.bf16.msra.mxu1 %v8283_v32  ;;  %v8372_v31 = vld [vmem:[#allocation5 + $0x1504] ss:$16 sps:$4 sm:$0xff]   ;;  %v8375_v32 = vld [vmem:[#allocation5 + $0x150c] ss:$16 sps:$4 sm:$0xff]  }
 0x2e7   :  { %5226 = vmatprep.subr.bf16.mxu0 %v8288_v33  ;;  %5742 = vmatprep.subr.bf16.mxu1 %v8291_v34  ;;  %v8370_v33 = vld [vmem:[#allocation5 + $0x1500] ss:$16 sps:$4 sm:$0xff]   ;;  %v8373_v34 = vld [vmem:[#allocation5 + $0x1508] ss:$16 sps:$4 sm:$0xff]  }
 0x2ea   :  { %5227 = vmatpush1.bf16.msra.mxu0 %v8286_v35  ;;  %5743 = vmatpush1.bf16.msra.mxu1 %v8289_v36  ;;  %v8378_v35 = vld [vmem:[#allocation5 + $0x1524] ss:$16 sps:$4 sm:$0xff]   ;;  %v8381_v36 = vld [vmem:[#allocation5 + $0x152c] ss:$16 sps:$4 sm:$0xff]  }
 0x2eb   :  { %5228 = vmatprep.subr.bf16.mxu0 %v8294_v37  ;;  %5744 = vmatprep.subr.bf16.mxu1 %v8297_v38  ;;  %v8376_v37 = vld [vmem:[#allocation5 + $0x1520] ss:$16 sps:$4 sm:$0xff]   ;;  %v8379_v38 = vld [vmem:[#allocation5 + $0x1528] ss:$16 sps:$4 sm:$0xff]  }
 0x2ee   :  { %5229 = vmatpush1.bf16.msra.mxu0 %v8292_v39  ;;  %5745 = vmatpush1.bf16.msra.mxu1 %v8295_v40  ;;  %v8384_v39 = vld [vmem:[#allocation5 + $0x1544] ss:$16 sps:$4 sm:$0xff]   ;;  %v8387_v40 = vld [vmem:[#allocation5 + $0x154c] ss:$16 sps:$4 sm:$0xff]  }
 0x2ef   :  { %5230 = vmatprep.subr.bf16.mxu0 %v8300_v41  ;;  %5746 = vmatprep.subr.bf16.mxu1 %v8303_v42  ;;  %v8382_v41 = vld [vmem:[#allocation5 + $0x1540] ss:$16 sps:$4 sm:$0xff]   ;;  %v8385_v42 = vld [vmem:[#allocation5 + $0x1548] ss:$16 sps:$4 sm:$0xff]  }
 0x2f2   :  { %5231 = vmatpush1.bf16.msra.mxu0 %v8298_v43  ;;  %5747 = vmatpush1.bf16.msra.mxu1 %v8301_v44  ;;  %v8390_v43 = vld [vmem:[#allocation5 + $0x1564] ss:$16 sps:$4 sm:$0xff]   ;;  %v8393_v44 = vld [vmem:[#allocation5 + $0x156c] ss:$16 sps:$4 sm:$0xff]  }
 0x2f3   :  { %5232 = vmatprep.subr.bf16.mxu0 %v8306_v45  ;;  %5748 = vmatprep.subr.bf16.mxu1 %v8309_v46  ;;  %v8388_v45 = vld [vmem:[#allocation5 + $0x1560] ss:$16 sps:$4 sm:$0xff]   ;;  %v8391_v46 = vld [vmem:[#allocation5 + $0x1568] ss:$16 sps:$4 sm:$0xff]  }
 0x2f6   :  { %5233 = vmatpush1.bf16.msra.mxu0 %v8304_v47  ;;  %5749 = vmatpush1.bf16.msra.mxu1 %v8307_v48  ;;  %v8396_v47 = vld [vmem:[#allocation5 + $0x1584] ss:$16 sps:$4 sm:$0xff]   ;;  %v8399_v48 = vld [vmem:[#allocation5 + $0x158c] ss:$16 sps:$4 sm:$0xff]  }
 0x2f7   :  { %5234 = vmatprep.subr.bf16.mxu0 %v8312_v49  ;;  %5750 = vmatprep.subr.bf16.mxu1 %v8315_v50  ;;  %v8394_v49 = vld [vmem:[#allocation5 + $0x1580] ss:$16 sps:$4 sm:$0xff]   ;;  %v8397_v50 = vld [vmem:[#allocation5 + $0x1588] ss:$16 sps:$4 sm:$0xff]  }
 0x2fa   :  { %5235 = vmatpush1.bf16.msra.mxu0 %v8310_v51  ;;  %5751 = vmatpush1.bf16.msra.mxu1 %v8313_v52  ;;  %v8402_v51 = vld [vmem:[#allocation5 + $0x15a4] ss:$16 sps:$4 sm:$0xff]   ;;  %v8405_v52 = vld [vmem:[#allocation5 + $0x15ac] ss:$16 sps:$4 sm:$0xff]  }
 0x2fb   :  { %5236 = vmatprep.subr.bf16.mxu0 %v8318_v53  ;;  %5752 = vmatprep.subr.bf16.mxu1 %v8321_v54  ;;  %v8400_v53 = vld [vmem:[#allocation5 + $0x15a0] ss:$16 sps:$4 sm:$0xff]   ;;  %v8403_v54 = vld [vmem:[#allocation5 + $0x15a8] ss:$16 sps:$4 sm:$0xff]  }
 0x2fe   :  { %5237 = vmatpush1.bf16.msra.mxu0 %v8316_v55  ;;  %5753 = vmatpush1.bf16.msra.mxu1 %v8319_v56  ;;  %v8408_v55 = vld [vmem:[#allocation5 + $0x15c4] ss:$16 sps:$4 sm:$0xff]   ;;  %v8411_v56 = vld [vmem:[#allocation5 + $0x15cc] ss:$16 sps:$4 sm:$0xff]  }
 0x2ff   :  { %5249 = vmatprep.subr.bf16.mxu0 %v8324_v59  ;;  %5765 = vmatprep.subr.bf16.mxu1 %v8327_v60  ;;  %v8414_v59 = vld [vmem:[#allocation5 + $0x15e4] ss:$16 sps:$4 sm:$0xff]   ;;  %v8417_v60 = vld [vmem:[#allocation5 + $0x15ec] ss:$16 sps:$4 sm:$0xff]  }
 0x301   :  { %5239 = vmatmul.mubr.bf16.vlgmr.msra.gmra.mrb[0].mxu0 %v183_v61  ;;  %5755 = vmatmul.mubr.bf16.vlgmr.msra.gmra.mrb[0].mxu1 %v183_v61  ;;  %v8412_v61 = vld [vmem:[#allocation5 + $0x15e0] ss:$16 sps:$4 sm:$0xff]  }
 0x302   :  { %5250 = vmatpush1.bf16.msra.mxu0 %v8322_v0  ;;  %5766 = vmatpush1.bf16.msra.mxu1 %v8325_v1  ;;  %v161_v0 = vld [vmem:[#allocation2 + $0x160] sm:$0xff] }
 0x303   :  { %5251 = vmatprep.subr.bf16.mxu0 %v8330_v2  ;;  %5767 = vmatprep.subr.bf16.mxu1 %v8333_v3  ;;  %v8420_v1 = vld [vmem:[#allocation5 + $0x1604] ss:$16 sps:$4 sm:$0xff]   ;;  %v8423_v2 = vld [vmem:[#allocation5 + $0x160c] ss:$16 sps:$4 sm:$0xff]   ;;  %v185_v3 = vpack.c.bf16 %v161_v0, %v137_v63  ;;  %v8502_v63 = vld [vmem:[#allocation5 + $0x17c0] ss:$16 sps:$4 sm:$0xff]  }
 0x304   :  { %5281 = vmatprep.mubr.bf16.mxu0 %v186_v4  ;;  %5797 = vmatprep.mubr.bf16.mxu1 %v186_v4  ;;  %v140_v4 = vld [vmem:[#allocation2 + $0xb8] sm:$0xff] }
 0x305   :  { %v8505_v0 = vld [vmem:[#allocation5 + $0x17c8] ss:$16 sps:$4 sm:$0xff]  }
 0x306   :  { %5252 = vmatpush1.bf16.msra.mxu0 %v8328_v5  ;;  %5768 = vmatpush1.bf16.msra.mxu1 %v8331_v6  ;;  %v164_v5 = vld [vmem:[#allocation2 + $0x178] sm:$0xff]  ;;  %v8418_v6 = vld [vmem:[#allocation5 + $0x1600] ss:$16 sps:$4 sm:$0xff]  }
 0x307   :  { %5253 = vmatprep.subr.bf16.mxu0 %v8336_v7  ;;  %5769 = vmatprep.subr.bf16.mxu1 %v8339_v8  ;;  %v8421_v7 = vld [vmem:[#allocation5 + $0x1608] ss:$16 sps:$4 sm:$0xff]   ;;  %v8426_v8 = vld [vmem:[#allocation5 + $0x1624] ss:$16 sps:$4 sm:$0xff]  }
 0x30a   :  { %5254 = vmatpush1.bf16.msra.mxu0 %v8334_v9  ;;  %5770 = vmatpush1.bf16.msra.mxu1 %v8337_v10  ;;  %v8429_v9 = vld [vmem:[#allocation5 + $0x162c] ss:$16 sps:$4 sm:$0xff]   ;;  %v188_v10 = vpack.c.bf16 %v164_v5, %v140_v4  ;;  %v8511_v4 = vld [vmem:[#allocation5 + $0x17e8] ss:$16 sps:$4 sm:$0xff]   ;;  %v139_v5 = vld [vmem:[#allocation2 + $0xb0] sm:$0xff] }
 0x30b   :  { %5255 = vmatprep.subr.bf16.mxu0 %v8342_v11  ;;  %5771 = vmatprep.subr.bf16.mxu1 %v8345_v12  ;;  %v8424_v11 = vld [vmem:[#allocation5 + $0x1620] ss:$16 sps:$4 sm:$0xff]   ;;  %v8427_v12 = vld [vmem:[#allocation5 + $0x1628] ss:$16 sps:$4 sm:$0xff]  }
 0x30e   :  { %5256 = vmatpush1.bf16.msra.mxu0 %v8340_v13  ;;  %5772 = vmatpush1.bf16.msra.mxu1 %v8343_v14  ;;  %v8432_v13 = vld [vmem:[#allocation5 + $0x1644] ss:$16 sps:$4 sm:$0xff]   ;;  %v8435_v14 = vld [vmem:[#allocation5 + $0x164c] ss:$16 sps:$4 sm:$0xff]  }
 0x30f   :  { %5257 = vmatprep.subr.bf16.mxu0 %v8348_v15  ;;  %5773 = vmatprep.subr.bf16.mxu1 %v8351_v16  ;;  %v8430_v15 = vld [vmem:[#allocation5 + $0x1640] ss:$16 sps:$4 sm:$0xff]   ;;  %v8433_v16 = vld [vmem:[#allocation5 + $0x1648] ss:$16 sps:$4 sm:$0xff]  }
 0x312   :  { %5258 = vmatpush1.bf16.msra.mxu0 %v8346_v17  ;;  %5774 = vmatpush1.bf16.msra.mxu1 %v8349_v18  ;;  %v8438_v17 = vld [vmem:[#allocation5 + $0x1664] ss:$16 sps:$4 sm:$0xff]   ;;  %v8441_v18 = vld [vmem:[#allocation5 + $0x166c] ss:$16 sps:$4 sm:$0xff]  }
 0x313   :  { %5259 = vmatprep.subr.bf16.mxu0 %v8354_v19  ;;  %5775 = vmatprep.subr.bf16.mxu1 %v8357_v20  ;;  %v8436_v19 = vld [vmem:[#allocation5 + $0x1660] ss:$16 sps:$4 sm:$0xff]   ;;  %v8439_v20 = vld [vmem:[#allocation5 + $0x1668] ss:$16 sps:$4 sm:$0xff]  }
 0x316   :  { %5260 = vmatpush1.bf16.msra.mxu0 %v8352_v21  ;;  %5776 = vmatpush1.bf16.msra.mxu1 %v8355_v22  ;;  %v8444_v21 = vld [vmem:[#allocation5 + $0x1684] ss:$16 sps:$4 sm:$0xff]   ;;  %v8447_v22 = vld [vmem:[#allocation5 + $0x168c] ss:$16 sps:$4 sm:$0xff]  }
 0x317   :  { %5261 = vmatprep.subr.bf16.mxu0 %v8360_v23  ;;  %5777 = vmatprep.subr.bf16.mxu1 %v8363_v24  ;;  %v8442_v23 = vld [vmem:[#allocation5 + $0x1680] ss:$16 sps:$4 sm:$0xff]   ;;  %v8445_v24 = vld [vmem:[#allocation5 + $0x1688] ss:$16 sps:$4 sm:$0xff]  }
 0x31a   :  { %5262 = vmatpush1.bf16.msra.mxu0 %v8358_v25  ;;  %5778 = vmatpush1.bf16.msra.mxu1 %v8361_v26  ;;  %v8450_v25 = vld [vmem:[#allocation5 + $0x16a4] ss:$16 sps:$4 sm:$0xff]   ;;  %v8453_v26 = vld [vmem:[#allocation5 + $0x16ac] ss:$16 sps:$4 sm:$0xff]  }
 0x31b   :  { %5263 = vmatprep.subr.bf16.mxu0 %v8366_v27  ;;  %5779 = vmatprep.subr.bf16.mxu1 %v8369_v28  ;;  %v8448_v27 = vld [vmem:[#allocation5 + $0x16a0] ss:$16 sps:$4 sm:$0xff]   ;;  %v8451_v28 = vld [vmem:[#allocation5 + $0x16a8] ss:$16 sps:$4 sm:$0xff]  }
 0x31e   :  { %5264 = vmatpush1.bf16.msra.mxu0 %v8364_v29  ;;  %5780 = vmatpush1.bf16.msra.mxu1 %v8367_v30  ;;  %v8456_v29 = vld [vmem:[#allocation5 + $0x16c4] ss:$16 sps:$4 sm:$0xff]   ;;  %v8459_v30 = vld [vmem:[#allocation5 + $0x16cc] ss:$16 sps:$4 sm:$0xff]  }
 0x31f   :  { %5265 = vmatprep.subr.bf16.mxu0 %v8372_v31  ;;  %5781 = vmatprep.subr.bf16.mxu1 %v8375_v32  ;;  %v8454_v31 = vld [vmem:[#allocation5 + $0x16c0] ss:$16 sps:$4 sm:$0xff]   ;;  %v8457_v32 = vld [vmem:[#allocation5 + $0x16c8] ss:$16 sps:$4 sm:$0xff]  }
 0x322   :  { %5266 = vmatpush1.bf16.msra.mxu0 %v8370_v33  ;;  %5782 = vmatpush1.bf16.msra.mxu1 %v8373_v34  ;;  %v8462_v33 = vld [vmem:[#allocation5 + $0x16e4] ss:$16 sps:$4 sm:$0xff]   ;;  %v8465_v34 = vld [vmem:[#allocation5 + $0x16ec] ss:$16 sps:$4 sm:$0xff]  }
 0x323   :  { %5267 = vmatprep.subr.bf16.mxu0 %v8378_v35  ;;  %5783 = vmatprep.subr.bf16.mxu1 %v8381_v36  ;;  %v8460_v35 = vld [vmem:[#allocation5 + $0x16e0] ss:$16 sps:$4 sm:$0xff]   ;;  %v8463_v36 = vld [vmem:[#allocation5 + $0x16e8] ss:$16 sps:$4 sm:$0xff]  }
 0x326   :  { %5268 = vmatpush1.bf16.msra.mxu0 %v8376_v37  ;;  %5784 = vmatpush1.bf16.msra.mxu1 %v8379_v38  ;;  %v8468_v37 = vld [vmem:[#allocation5 + $0x1704] ss:$16 sps:$4 sm:$0xff]   ;;  %v8471_v38 = vld [vmem:[#allocation5 + $0x170c] ss:$16 sps:$4 sm:$0xff]  }
 0x327   :  { %5269 = vmatprep.subr.bf16.mxu0 %v8384_v39  ;;  %5785 = vmatprep.subr.bf16.mxu1 %v8387_v40  ;;  %v8466_v39 = vld [vmem:[#allocation5 + $0x1700] ss:$16 sps:$4 sm:$0xff]   ;;  %v8469_v40 = vld [vmem:[#allocation5 + $0x1708] ss:$16 sps:$4 sm:$0xff]  }
 0x32a   :  { %5270 = vmatpush1.bf16.msra.mxu0 %v8382_v41  ;;  %5786 = vmatpush1.bf16.msra.mxu1 %v8385_v42  ;;  %v8474_v41 = vld [vmem:[#allocation5 + $0x1724] ss:$16 sps:$4 sm:$0xff]   ;;  %v8477_v42 = vld [vmem:[#allocation5 + $0x172c] ss:$16 sps:$4 sm:$0xff]  }
 0x32b   :  { %5271 = vmatprep.subr.bf16.mxu0 %v8390_v43  ;;  %5787 = vmatprep.subr.bf16.mxu1 %v8393_v44  ;;  %v8472_v43 = vld [vmem:[#allocation5 + $0x1720] ss:$16 sps:$4 sm:$0xff]   ;;  %v8475_v44 = vld [vmem:[#allocation5 + $0x1728] ss:$16 sps:$4 sm:$0xff]  }
 0x32e   :  { %5272 = vmatpush1.bf16.msra.mxu0 %v8388_v45  ;;  %5788 = vmatpush1.bf16.msra.mxu1 %v8391_v46  ;;  %v8480_v45 = vld [vmem:[#allocation5 + $0x1744] ss:$16 sps:$4 sm:$0xff]   ;;  %v8483_v46 = vld [vmem:[#allocation5 + $0x174c] ss:$16 sps:$4 sm:$0xff]  }
 0x32f   :  { %5273 = vmatprep.subr.bf16.mxu0 %v8396_v47  ;;  %5789 = vmatprep.subr.bf16.mxu1 %v8399_v48  ;;  %v8478_v47 = vld [vmem:[#allocation5 + $0x1740] ss:$16 sps:$4 sm:$0xff]   ;;  %v8481_v48 = vld [vmem:[#allocation5 + $0x1748] ss:$16 sps:$4 sm:$0xff]  }
 0x332   :  { %5274 = vmatpush1.bf16.msra.mxu0 %v8394_v49  ;;  %5790 = vmatpush1.bf16.msra.mxu1 %v8397_v50  ;;  %v8486_v49 = vld [vmem:[#allocation5 + $0x1764] ss:$16 sps:$4 sm:$0xff]   ;;  %v8489_v50 = vld [vmem:[#allocation5 + $0x176c] ss:$16 sps:$4 sm:$0xff]  }
 0x333   :  { %5275 = vmatprep.subr.bf16.mxu0 %v8402_v51  ;;  %5791 = vmatprep.subr.bf16.mxu1 %v8405_v52  ;;  %v8484_v51 = vld [vmem:[#allocation5 + $0x1760] ss:$16 sps:$4 sm:$0xff]   ;;  %v8487_v52 = vld [vmem:[#allocation5 + $0x1768] ss:$16 sps:$4 sm:$0xff]  }
 0x336   :  { %5276 = vmatpush1.bf16.msra.mxu0 %v8400_v53  ;;  %5792 = vmatpush1.bf16.msra.mxu1 %v8403_v54  ;;  %v8492_v53 = vld [vmem:[#allocation5 + $0x1784] ss:$16 sps:$4 sm:$0xff]   ;;  %v8495_v54 = vld [vmem:[#allocation5 + $0x178c] ss:$16 sps:$4 sm:$0xff]  }
 0x337   :  { %5277 = vmatprep.subr.bf16.mxu0 %v8408_v55  ;;  %5793 = vmatprep.subr.bf16.mxu1 %v8411_v56  ;;  %v8490_v55 = vld [vmem:[#allocation5 + $0x1780] ss:$16 sps:$4 sm:$0xff]   ;;  %v8493_v56 = vld [vmem:[#allocation5 + $0x1788] ss:$16 sps:$4 sm:$0xff]  }
 0x33a   :  { %5278 = vmatpush1.bf16.msra.mxu0 %v8406_v57  ;;  %5794 = vmatpush1.bf16.msra.mxu1 %v8409_v58  ;;  %v8498_v57 = vld [vmem:[#allocation5 + $0x17a4] ss:$16 sps:$4 sm:$0xff]   ;;  %v8501_v58 = vld [vmem:[#allocation5 + $0x17ac] ss:$16 sps:$4 sm:$0xff]  }
 0x33b   :  { %5279 = vmatprep.subr.bf16.mxu0 %v8414_v59  ;;  %5795 = vmatprep.subr.bf16.mxu1 %v8417_v60  ;;  %v8496_v59 = vld [vmem:[#allocation5 + $0x17a0] ss:$16 sps:$4 sm:$0xff]   ;;  %v8499_v60 = vld [vmem:[#allocation5 + $0x17a8] ss:$16 sps:$4 sm:$0xff]  }
 0x33e   :  { %5280 = vmatpush1.bf16.msra.mxu0 %v8412_v61  ;;  %5796 = vmatpush1.bf16.msra.mxu1 %v8415_v62  ;;  %v8504_v61 = vld [vmem:[#allocation5 + $0x17c4] ss:$16 sps:$4 sm:$0xff]   ;;  %v8507_v62 = vld [vmem:[#allocation5 + $0x17cc] ss:$16 sps:$4 sm:$0xff]  }
 0x33f   :  { %5292 = vmatprep.subr.bf16.mxu0 %v8420_v1  ;;  %5808 = vmatprep.subr.bf16.mxu1 %v8423_v2  ;;  %v8510_v1 = vld [vmem:[#allocation5 + $0x17e4] ss:$16 sps:$4 sm:$0xff]   ;;  %v8513_v2 = vld [vmem:[#allocation5 + $0x17ec] ss:$16 sps:$4 sm:$0xff]  }
 0x341   :  { %5282 = vmatmul.mubr.bf16.vlgmr.msra.gmra.mrb[0].mxu0 %v185_v3  ;;  %5798 = vmatmul.mubr.bf16.vlgmr.msra.gmra.mrb[0].mxu1 %v185_v3  ;;  %v8508_v3 = vld [vmem:[#allocation5 + $0x17e0] ss:$16 sps:$4 sm:$0xff]  }
 0x342   :  { %5293 = vmatpush1.bf16.msra.mxu0 %v8418_v6  ;;  %5809 = vmatpush1.bf16.msra.mxu1 %v8421_v7  ;;  %v163_v6 = vld [vmem:[#allocation2 + $0x170] sm:$0xff]  ;;  %v8514_v7 = vld [vmem:[#allocation8 + $0x40] sm:$0xff]  }
 0x343   :  { %5294 = vmatprep.subr.bf16.mxu0 %v8426_v8  ;;  %5810 = vmatprep.subr.bf16.mxu1 %v8429_v9  ;;  %v8515_v8 = vld [vmem:[#allocation8 + $0xc0] sm:$0xff]   ;;  %v187_v9 = vpack.c.bf16 %v163_v6, %v139_v5 }
 0x344   :  { %5324 = vmatprep.mubr.bf16.mxu0 %v188_v10  ;;  %5840 = vmatprep.mubr.bf16.mxu1 %v188_v10  ;;  %v8516_v10 = vld [vmem:[#allocation8] sm:$0xff]  }
 0x346   :  { %5295 = vmatpush1.bf16.msra.mxu0 %v8424_v11  ;;  %5811 = vmatpush1.bf16.msra.mxu1 %v8427_v12  ;;  %v8517_v11 = vld [vmem:[#allocation8 + $0x80] sm:$0xff]   ;;  %v8518_v12 = vld [vmem:[#allocation8 + $0x48] sm:$0xff]  }
 0x347   :  { %5296 = vmatprep.subr.bf16.mxu0 %v8432_v13  ;;  %5812 = vmatprep.subr.bf16.mxu1 %v8435_v14  ;;  %v8519_v13 = vld [vmem:[#allocation8 + $0xc8] sm:$0xff]  }
 0x348   :  { %v8520_v14 = vld [vmem:[#allocation8 + $0x8] sm:$0xff]  }
 0x34a   :  { %5297 = vmatpush1.bf16.msra.mxu0 %v8430_v15  ;;  %5813 = vmatpush1.bf16.msra.mxu1 %v8433_v16  ;;  %v8521_v15 = vld [vmem:[#allocation8 + $0x88] sm:$0xff]   ;;  %v8522_v16 = vld [vmem:[#allocation8 + $0x50] sm:$0xff]  }
 0x34b   :  { %5298 = vmatprep.subr.bf16.mxu0 %v8438_v17  ;;  %5814 = vmatprep.subr.bf16.mxu1 %v8441_v18  ;;  %v8523_v17 = vld [vmem:[#allocation8 + $0xd0] sm:$0xff]  }
 0x34c   :  { %v8524_v18 = vld [vmem:[#allocation8 + $0x10] sm:$0xff]  }
 0x34e   :  { %5299 = vmatpush1.bf16.msra.mxu0 %v8436_v19  ;;  %5815 = vmatpush1.bf16.msra.mxu1 %v8439_v20  ;;  %v8525_v19 = vld [vmem:[#allocation8 + $0x90] sm:$0xff]   ;;  %v8526_v20 = vld [vmem:[#allocation8 + $0x58] sm:$0xff]  }
 0x34f   :  { %5300 = vmatprep.subr.bf16.mxu0 %v8444_v21  ;;  %5816 = vmatprep.subr.bf16.mxu1 %v8447_v22  ;;  %v8527_v21 = vld [vmem:[#allocation8 + $0xd8] sm:$0xff]  }
 0x350   :  { %v8528_v22 = vld [vmem:[#allocation8 + $0x18] sm:$0xff]  }
 0x352   :  { %5301 = vmatpush1.bf16.msra.mxu0 %v8442_v23  ;;  %5817 = vmatpush1.bf16.msra.mxu1 %v8445_v24  ;;  %v8529_v23 = vld [vmem:[#allocation8 + $0x98] sm:$0xff]   ;;  %v8530_v24 = vld [vmem:[#allocation8 + $0x60] sm:$0xff]  }
 0x353   :  { %5302 = vmatprep.subr.bf16.mxu0 %v8450_v25  ;;  %5818 = vmatprep.subr.bf16.mxu1 %v8453_v26  ;;  %v8531_v25 = vld [vmem:[#allocation8 + $0xe0] sm:$0xff]  }
 0x354   :  { %v8532_v26 = vld [vmem:[#allocation8 + $0x20] sm:$0xff]  }
 0x356   :  { %5303 = vmatpush1.bf16.msra.mxu0 %v8448_v27  ;;  %5819 = vmatpush1.bf16.msra.mxu1 %v8451_v28  ;;  %v8533_v27 = vld [vmem:[#allocation8 + $0xa0] sm:$0xff]   ;;  %v8534_v28 = vld [vmem:[#allocation8 + $0x68] sm:$0xff]  }
 0x357   :  { %5304 = vmatprep.subr.bf16.mxu0 %v8456_v29  ;;  %5820 = vmatprep.subr.bf16.mxu1 %v8459_v30  ;;  %v8535_v29 = vld [vmem:[#allocation8 + $0xe8] sm:$0xff]  }
 0x358   :  { %v8536_v30 = vld [vmem:[#allocation8 + $0x28] sm:$0xff]  }
 0x35a   :  { %5305 = vmatpush1.bf16.msra.mxu0 %v8454_v31  ;;  %5821 = vmatpush1.bf16.msra.mxu1 %v8457_v32  ;;  %v8537_v31 = vld [vmem:[#allocation8 + $0xa8] sm:$0xff]   ;;  %v8538_v32 = vld [vmem:[#allocation8 + $0x70] sm:$0xff]  }
 0x35b   :  { %5306 = vmatprep.subr.bf16.mxu0 %v8462_v33  ;;  %5822 = vmatprep.subr.bf16.mxu1 %v8465_v34  ;;  %v8539_v33 = vld [vmem:[#allocation8 + $0xf0] sm:$0xff]  }
 0x35c   :  { %v8540_v34 = vld [vmem:[#allocation8 + $0x30] sm:$0xff]  }
 0x35e   :  { %5307 = vmatpush1.bf16.msra.mxu0 %v8460_v35  ;;  %5823 = vmatpush1.bf16.msra.mxu1 %v8463_v36  ;;  %v8541_v35 = vld [vmem:[#allocation8 + $0xb0] sm:$0xff]   ;;  %v8542_v36 = vld [vmem:[#allocation8 + $0x78] sm:$0xff]  }
 0x35f   :  { %5308 = vmatprep.subr.bf16.mxu0 %v8468_v37  ;;  %5824 = vmatprep.subr.bf16.mxu1 %v8471_v38  ;;  %v8543_v37 = vld [vmem:[#allocation8 + $0xf8] sm:$0xff]  }
 0x360   :  { %v8544_v38 = vld [vmem:[#allocation8 + $0x38] sm:$0xff]  }
 0x362   :  { %5309 = vmatpush1.bf16.msra.mxu0 %v8466_v39  ;;  %5825 = vmatpush1.bf16.msra.mxu1 %v8469_v40  ;;  %v8545_v39 = vld [vmem:[#allocation8 + $0xb8] sm:$0xff]   ;;  %v8761_v40 = vmov 0.0  }
 0x363   :  { %5310 = vmatprep.subr.bf16.mxu0 %v8474_v41  ;;  %5826 = vmatprep.subr.bf16.mxu1 %v8477_v42  ;;  %v959_v41 = vlaneseq }
 0x365   :  { %v960_v42 = vshrl.u32 %v959_v41, 7 }
 0x366   :  { %5311 = vmatpush1.bf16.msra.mxu0 %v8472_v43  ;;  %5827 = vmatpush1.bf16.msra.mxu1 %v8475_v44 }
 0x367   :  { %5312 = vmatprep.subr.bf16.mxu0 %v8480_v45  ;;  %5828 = vmatprep.subr.bf16.mxu1 %v8483_v46  ;;  %v961_v43 = vsub.s32 0, %v960_v42  ;;  %v969_v44 = vsub.s32 2, %v960_v42  ;;  %v957_v45 = vld [vmem:[#allocation7] sm:$0xf]  ;;  %v965_v46 = vsub.s32 1, %v960_v42 }
 0x36a   :  { %5313 = vmatpush1.bf16.msra.mxu0 %v8478_v47  ;;  %5829 = vmatpush1.bf16.msra.mxu1 %v8481_v48  ;;  %v973_v47 = vsub.s32 3, %v960_v42  ;;  %v962_v48 = vrot.slane %v957_v45, %v961_v43 }
 0x36b   :  { %5314 = vmatprep.subr.bf16.mxu0 %v8486_v49  ;;  %5830 = vmatprep.subr.bf16.mxu1 %v8489_v50  ;;  %v970_v49 = vrot.slane %v957_v45, %v969_v44  ;;  %v966_v50 = vrot.slane %v957_v45, %v965_v46  ;;  %v7166_v44 = vld [vmem:[#allocation13] ss:$0 sm:$0xff] }
 0x36e   :  { %5315 = vmatpush1.bf16.msra.mxu0 %v8484_v51  ;;  %5831 = vmatpush1.bf16.msra.mxu1 %v8487_v52  ;;  %v974_v51 = vrot.slane %v957_v45, %v973_v47 }
 0x36f   :  { %5316 = vmatprep.subr.bf16.mxu0 %v8492_v53  ;;  %5832 = vmatprep.subr.bf16.mxu1 %v8495_v54 }
 0x372   :  { %5317 = vmatpush1.bf16.msra.mxu0 %v8490_v55  ;;  %5833 = vmatpush1.bf16.msra.mxu1 %v8493_v56 }
 0x373   :  { %5318 = vmatprep.subr.bf16.mxu0 %v8498_v57  ;;  %5834 = vmatprep.subr.bf16.mxu1 %v8501_v58 }
 0x376   :  { %5319 = vmatpush1.bf16.msra.mxu0 %v8496_v59  ;;  %5835 = vmatpush1.bf16.msra.mxu1 %v8499_v60 }
 0x377   :  { %5320 = vmatprep.subr.bf16.mxu0 %v8504_v61  ;;  %5836 = vmatprep.subr.bf16.mxu1 %v8507_v62 }
 0x37a   :  { %5321 = vmatpush1.bf16.msra.mxu0 %v8502_v63  ;;  %5837 = vmatpush1.bf16.msra.mxu1 %v8505_v0 }
 0x37b   :  { %5322 = vmatprep.subr.bf16.mxu0 %v8510_v1  ;;  %5838 = vmatprep.subr.bf16.mxu1 %v8513_v2 }
 0x37e   :  { %5323 = vmatpush1.bf16.msra.mxu0 %v8508_v3  ;;  %5839 = vmatpush1.bf16.msra.mxu1 %v8511_v4 }
 0x37f   :  { %7175 = vmatprep.subr.bf16.mxu0 %v8514_v7  ;;  %7197 = vmatprep.subr.bf16.mxu1 %v8515_v8 }
 0x381   :  { %5325 = vmatmul.mubr.bf16.vlgmr.msra.gmra.mrb[0].mxu0 %v187_v9  ;;  %5841 = vmatmul.mubr.bf16.vlgmr.msra.gmra.mrb[0].mxu1 %v187_v9 }
 0x382   :  { %7176 = vmatpush3.bf16.msra.mxu0 %v8516_v10  ;;  %7198 = vmatpush3.bf16.msra.mxu1 %v8517_v11 }
 0x383   :  { %7177 = vmatprep.subr.bf16.mxu0 %v8518_v12  ;;  %7199 = vmatprep.subr.bf16.mxu1 %v8519_v13 }
 0x386   :  { %7178 = vmatpush3.bf16.msra.mxu0 %v8520_v14  ;;  %7200 = vmatpush3.bf16.msra.mxu1 %v8521_v15 }
 0x387   :  { %7179 = vmatprep.subr.bf16.mxu0 %v8522_v16  ;;  %7201 = vmatprep.subr.bf16.mxu1 %v8523_v17  ;;  %v8546_v16 = vld [vmem:[#allocation11] sm:$0xff]   ;;  %v8547_v17 = vld [vmem:[#allocation11 + $0x8] sm:$0xff]  }
 0x38a   :  { %7180 = vmatpush3.bf16.msra.mxu0 %v8524_v18  ;;  %7202 = vmatpush3.bf16.msra.mxu1 %v8525_v19  ;;  %v8548_v18 = vld [vmem:[#allocation11 + $0x10] sm:$0xff]   ;;  %v8549_v19 = vld [vmem:[#allocation11 + $0x18] sm:$0xff]  }
 0x38b   :  { %7181 = vmatprep.subr.bf16.mxu0 %v8526_v20  ;;  %7203 = vmatprep.subr.bf16.mxu1 %v8527_v21  ;;  %v8550_v20 = vld [vmem:[#allocation11 + $0x20] sm:$0xff]   ;;  %v8551_v21 = vld [vmem:[#allocation11 + $0x28] sm:$0xff]  }
 0x38e   :  { %7182 = vmatpush3.bf16.msra.mxu0 %v8528_v22  ;;  %7204 = vmatpush3.bf16.msra.mxu1 %v8529_v23  ;;  %v8552_v22 = vld [vmem:[#allocation11 + $0x30] sm:$0xff]   ;;  %v8553_v23 = vld [vmem:[#allocation11 + $0x38] sm:$0xff]  }
 0x38f   :  { %7183 = vmatprep.subr.bf16.mxu0 %v8530_v24  ;;  %7205 = vmatprep.subr.bf16.mxu1 %v8531_v25 }
 0x392   :  { %7184 = vmatpush3.bf16.msra.mxu0 %v8532_v26  ;;  %7206 = vmatpush3.bf16.msra.mxu1 %v8533_v27  ;;  %v7133_v26 = vld [vmem:[#allocation10] ss:$0 sm:$0xff] }
 0x393   :  { %7185 = vmatprep.subr.bf16.mxu0 %v8534_v28  ;;  %7207 = vmatprep.subr.bf16.mxu1 %v8535_v29 }
 0x396   :  { %7186 = vmatpush3.bf16.msra.mxu0 %v8536_v30  ;;  %7208 = vmatpush3.bf16.msra.mxu1 %v8537_v31 }
 0x397   :  { %7187 = vmatprep.subr.bf16.mxu0 %v8538_v32  ;;  %7209 = vmatprep.subr.bf16.mxu1 %v8539_v33 }
 0x39a   :  { %7188 = vmatpush3.bf16.msra.mxu0 %v8540_v34  ;;  %7210 = vmatpush3.bf16.msra.mxu1 %v8541_v35 }
 0x39b   :  { %7189 = vmatprep.subr.bf16.mxu0 %v8542_v36  ;;  %7211 = vmatprep.subr.bf16.mxu1 %v8543_v37 }
 0x39e   :  { %7190 = vmatpush3.bf16.msra.mxu0 %v8544_v38  ;;  %7212 = vmatpush3.bf16.msra.mxu1 %v8545_v39 }
 0x39f   :  { %7228 = vmatprep.subr.bf16.mxu0 %v8761_v40 }
 0x454   :  { %v5326_v52 = vpop.f32.mrb[0].mxu0  ;;  %v5842_v53 = vpop.f32.mrb[0].mxu1 }
 0x455   :  { %v7248_v54 = vadd.f32 %v5326_v52, %v962_v48  ;;  %v7252_v55 = vadd.f32 %v5842_v53, %v970_v49  ;;  %v5328_v56 = vpop.f32.mrb[1].mxu0  ;;  %v5844_v57 = vpop.f32.mrb[1].mxu1 }
 0x456   :  { %v7249_v58 = vadd.f32 %v5328_v56, %v966_v50  ;;  %v7253_v59 = vadd.f32 %v5844_v57, %v974_v51  ;;  %v5330_v60 = vpop.f32.mrb[2].mxu0  ;;  %v5846_v61 = vpop.f32.mrb[2].mxu1 }
 0x457   :  { %v7250_v62 = vadd.f32 %v5330_v60, %v962_v48  ;;  %v7254_v63 = vadd.f32 %v5846_v61, %v970_v49  ;;  %v5332_v0 = vpop.f32.mrb[3].mxu0  ;;  %v5848_v1 = vpop.f32.mrb[3].mxu1  ;;  %v5851_v4 = vmax.f32 %v7248_v54, 0.0  ;;  %v5853_v5 = vmax.f32 %v7252_v55, 0.0 }
 0x458   :  { %v7251_v2 = vadd.f32 %v5332_v0, %v966_v50  ;;  %v7255_v3 = vadd.f32 %v5848_v1, %v974_v51  ;;  %v5852_v8 = vmax.f32 %v7249_v58, 0.0  ;;  %v5854_v9 = vmax.f32 %v7253_v59, 0.0 }
 0x459   :  { %v5855_v6 = vmax.f32 %v7250_v62, 0.0  ;;  %v5857_v7 = vmax.f32 %v7254_v63, 0.0 }
 0x45a   :  { %v5856_v10 = vmax.f32 %v7251_v2, 0.0  ;;  %v5858_v11 = vmax.f32 %v7255_v3, 0.0 }
 0x45b   :  { %v5859_v12 = vpack.c.bf16 %v5855_v6, %v5851_v4  ;;  %v5861_v13 = vpack.c.bf16 %v5857_v7, %v5853_v5 }
 0x45c   :  { %v5860_v14 = vpack.c.bf16 %v5856_v10, %v5852_v8  ;;  %v5862_v15 = vpack.c.bf16 %v5858_v11, %v5854_v9 }
 0x45e   :  { %6158 = vmatprep.mubr.bf16.mxu0 %v5860_v14  ;;  %6199 = vmatprep.mubr.bf16.mxu1 %v5862_v15 }
 0x45f   :  { %6159 = vmatmul.mubr.bf16.vlgmr.msra.gmra.mrb[4].mxu0 %v5859_v12  ;;  %6200 = vmatmul.mubr.bf16.vlgmr.msra.gmra.mrb[4].mxu1 %v5861_v13 }
 0x460   :  { %7229 = vmatpush3.bf16.msra.mxu0 %v8546_v16  ;;  %7244 = vmatprep.mubr.msk.bf16.mxu0 %vm8762_vm0, %v8761_v40 }
 0x461   :  { %7230 = vmatprep.subr.bf16.mxu0 %v8761_v40 }
 0x464   :  { %7231 = vmatpush3.bf16.msra.mxu0 %v8547_v17 }
 0x465   :  { %7232 = vmatprep.subr.bf16.mxu0 %v8761_v40 }
 0x468   :  { %7233 = vmatpush3.bf16.msra.mxu0 %v8548_v18 }
 0x469   :  { %7234 = vmatprep.subr.bf16.mxu0 %v8761_v40 }
 0x46c   :  { %7235 = vmatpush3.bf16.msra.mxu0 %v8549_v19 }
 0x46d   :  { %7236 = vmatprep.subr.bf16.mxu0 %v8761_v40 }
 0x470   :  { %7237 = vmatpush3.bf16.msra.mxu0 %v8550_v20 }
 0x471   :  { %7238 = vmatprep.subr.bf16.mxu0 %v8761_v40 }
 0x474   :  { %7239 = vmatpush3.bf16.msra.mxu0 %v8551_v21 }
 0x475   :  { %7240 = vmatprep.subr.bf16.mxu0 %v8761_v40 }
 0x478   :  { %7241 = vmatpush3.bf16.msra.mxu0 %v8552_v22 }
 0x479   :  { %7242 = vmatprep.subr.bf16.mxu0 %v8761_v40 }
 0x47c   :  { %7243 = vmatpush3.bf16.msra.mxu0 %v8553_v23 }
 0x532   :  { %v7191_v24 = vpop.f32.mrb[4].mxu0  ;;  %v7213_v25 = vpop.f32.mrb[4].mxu1 }
 0x533   :  { %v7192_v27 = vpop.f32.mrb[5].mxu0  ;;  %v7214_v28 = vpop.f32.mrb[5].mxu1 }
 0x534   :  { %v7193_v29 = vadd.f32 %v7192_v27, %v7191_v24  ;;  %v7215_v30 = vadd.f32 %v7214_v28, %v7213_v25  ;;  %v7194_v31 = vpop.f32.mrb[6].mxu0  ;;  %v7216_v32 = vpop.f32.mrb[6].mxu1 }
 0x535   :  { %v7195_v33 = vpop.f32.mrb[7].mxu0  ;;  %v7217_v34 = vpop.f32.mrb[7].mxu1 }
 0x536   :  { %v6161_v35 = vadd.f32 %v7193_v29, %v7133_v26  ;;  %v7196_v36 = vadd.f32 %v7195_v33, %v7194_v31  ;;  %v7218_v37 = vadd.f32 %v7217_v34, %v7216_v32 }
 0x538   :  { %v6202_v38 = vadd.f32 %v7215_v30, %v6161_v35  ;;  %v6164_v39 = vadd.f32 %v7196_v36, %v7133_v26 }
 0x53a   :  { %v6205_v41 = vadd.f32 %v7218_v37, %v6164_v39  ;;  %v6208_v42 = vmax.f32 %v6202_v38, 0.0 }
 0x53c   :  { %v6209_v43 = vmax.f32 %v6205_v41, 0.0 }
 0x53e   :  { %v6210_v40 = vpack.c.bf16 %v6209_v43, %v6208_v42 }
 0x540   :  { %7245 = vmatmul.mubr.bf16.vlgmr.msra.gmra.mrb[8].mxu0 %v6210_v40 }
 0x613   :  { %v6316_v45 = vpop.f32.mrb[8].mxu0 }
 0x614   :  { %v6317_v46 = vadd.f32 %v7166_v44, %v6316_v45  ;;  %v7246_v47 = vpop.f32.mrb[9].mxu0 }
 0x615   :  { %v6319_v48 = vpop.f32.mrb[10].mxu0 }
 0x616   :  { %6323 = vmax.xlane.f32.xlu0 %v6317_v46  ;;  %v7247_v49 = vpop.f32.mrb[11].mxu0  ;;  %v6320_v50 = vadd.f32 %v7166_v44, %v6319_v48 }
 0x61a   :  { %6325 = vmax.xlane.f32.xlu0 %v6320_v50 }
 0x6a3   :  { %v6324_v51 = vpop.xlane.xlu0 %6323 }
 0x6a4   :  { %v6327_v52 = vsub.f32 %v6317_v46, %v6324_v51 }
 0x6a6   :  { %v6329_v53 = vmul.f32 1.442695, %v6327_v52 }
 0x6a7   :  { %v6326_v54 = vpop.xlane.xlu0 %6325 }
 0x6a8   :  { %v6328_v55 = vsub.f32 %v6320_v50, %v6326_v54  ;;  %8554 = vpow2.f32 %v6329_v53 }
 0x6aa   :  { %v6331_v56 = vmul.f32 1.442695, %v6328_v55 }
 0x6ac   :  { %8556 = vpow2.f32 %v6331_v56 }
 0x6b2   :  { %v8555_v57 = vpop.eup %8554 }
 0x6b3   :  { %6333 = vadd.xlane.f32.xlu1 %v8555_v57 }
 0x6b6   :  { %v8557_v58 = vpop.eup %8556 }
 0x6b7   :  { %6335 = vadd.xlane.f32.xlu1 %v8557_v58 }
 0x740   :  { %v6334_v59 = vpop.xlane.xlu1 %6333 }
 0x741   :  { %8558 = vlog2.f32 %v6334_v59 }
 0x744   :  { %v6336_v60 = vpop.xlane.xlu1 %6335 }
 0x745   :  { %8560 = vlog2.f32 %v6336_v60 }
 0x74b   :  { %v8559_v61 = vpop.eup %8558 }
 0x74c   :  { %v6338_v62 = vmul.f32 0.6931472, %v8559_v61 }
 0x74e   :  { %v6341_v63 = vsub.f32 %v6327_v52, %v6338_v62 }
 0x74f   :  { %v8561_v0 = vpop.eup %8560 }
 0x750   :  { %6343 = vst [vmem:[#allocation14] sm:$0xff] %v6341_v63  ;;  %v6340_v1 = vmul.f32 0.6931472, %v8561_v0 }
 0x752   :  { %v6342_v2 = vsub.f32 %v6328_v55, %v6340_v1 }
 0x754   :  { %6344 = vst [vmem:[#allocation14 + $0x8] sm:$0xff] %v6342_v2 }
 0x755   :  { %8727 = shalt.err (!%p8724_p4)
}
 0x756   :  { %s8728_s16 = scalar_lea.hbm %s8925_s7, 256 }
 0x757   :  { %p8729_p5 = scmp.ne.s32.totalorder %s8925_s7, %s8728_s16  ;;  %p8732_p6 = scmp.lt.u32.totalorder %s8728_s16, %s8925_s7 }
 0x759   :  { %p8734_p7 = pnand %p8732_p6, %p8729_p5 }
 0x75b   :  { %8737 = shalt.err (!%p8734_p7)
}
 0x75c   :  { %s8764_s21 = smov 128   ;;  %s8765_s22 = smov 8  }
 0x75d   :  { %6356 = dma.vmem_to_hbm [thread:$0]  %s6351_s15, 256, %s8925_s7, [#allocation4], %s8764_s21, %s8764_s21, %s8765_s22  }
 0x75e   :  { %8746 = dma.done.wait [#allocation4], 256  }
 0x75f   :  { %8747 = vsyncadd [#allocation4], 4294967040 }
 0x760   :  { %6360 = vsyncpa [#allocation3], 1 }
 0x761   :  { %6361 = vsyncpa [#allocation6], 1 }
 0x762   :  { %6362 = vsyncpa [#allocation9], 1 }
 0x763   :  { %6363 = vsyncpa [#allocation12], 1 }
 0x764   :  { %6364 = vsyncpa [#allocation4], 1 }

// kernel: tpu_custom_call.1
= control target key start
LH: loop header
LB: loop body
LE: loop exit
PB: predicated region body
PF: predicated region fallthrough
CT: control target
= control target key end

     0   :  { %12 = vsyncpa [#allocation3], 0  ;;  %s8918_s0 = inlined_call_operand.hbm [shape: f32[16,3072], index: 0, kind: input, shape index: {}]   ;;  %s8919_s1 = inlined_call_operand.hbm [shape: bf16[3072,512], index: 1, kind: input, shape index: {}]   ;;  %s8920_s2 = inlined_call_operand.hbm [shape: f32[1,512], index: 2, kind: input, shape index: {}]   ;;  %s8921_s3 = inlined_call_operand.hbm [shape: bf16[512,128], index: 3, kind: input, shape index: {}]   ;;  %s8922_s4 = inlined_call_operand.hbm [shape: f32[1,128], index: 4, kind: input, shape index: {}]   ;;  %s8923_s5 = inlined_call_operand.hbm [shape: bf16[128,128], index: 5, kind: input, shape index: {}]   ;;  %s8924_s6 = inlined_call_operand.hbm [shape: f32[1,128], index: 6, kind: input, shape index: {}]   ;;  %s8925_s7 = inlined_call_operand.hbm [shape: f32[16,128], index: 7, kind: output, shape index: {}]  }
   0x1   :  { %13 = vsyncpa [#allocation6], 0 }
   0x2   :  { %14 = vsyncpa [#allocation9], 0 }
   0x3   :  { %15 = vsyncpa [#allocation12], 0 }
   0x4   :  { %16 = vsyncpa [#allocation4], 0  ;;  %s8748_s24 = smov [#allocation5]   ;;  %s8562_s28 = scalar_lea.hbm %s8919_s1, 98304 }
   0x5   :  { %s34_s25 = sshll.u32 %s8748_s24, 4  ;;  %p8563_p0 = scmp.ne.s32.totalorder %s8919_s1, %s8562_s28  ;;  %s35_s25 = int_to_ptr.vmem [resolvable:$true] %s34_s25 }
   0x6   :  { %p8566_p1 = scmp.lt.u32.totalorder %s8562_s28, %s8919_s1 }
   0x8   :  { %p8568_p2 = pnand %p8566_p1, %p8563_p0 }
   0xa   :  { %8571 = shalt.err (!%p8568_p2)
}
   0xb   :  { %s8572_s10 = scalar_lea.vmem %s35_s25, 98304  ;;  %p8577_p4 = scmp.lt.s32.totalorder %s35_s25, %s35_s25 }
   0xc   :  { %p8573_p3 = scmp.ne.s32.totalorder %s35_s25, %s8572_s10  ;;  %p8578_p5 = scmp.lt.s32.totalorder %s8572_s10, %s8572_s10 }
   0xe   :  { %p8579_p6 = por %p8578_p5, %p8577_p4 }
  0x10   :  { %p8580_p7 = pnand %p8579_p6, %p8573_p3 }
  0x12   :  { %8583 = shalt.err (!%p8580_p7)
}
  0x13   :  { %s8749_s11 = smov 256   ;;  %s8750_s12 = smov 16  }
  0x14   :  { %40 = dma.hbm_to_vmem [thread:$0]  %s8919_s1, 98304, %s35_s25, [#allocation6], %s8749_s11, %s8749_s11, %s8750_s12  }
  0x15   :  { %s8751_s15 = smov [#allocation8]   ;;  %s8584_s19 = scalar_lea.hbm %s8921_s3, 4096 }
  0x16   :  { %s56_s16 = sshll.u32 %s8751_s15, 4  ;;  %p8585_p8 = scmp.ne.s32.totalorder %s8921_s3, %s8584_s19  ;;  %s57_s16 = int_to_ptr.vmem [resolvable:$true] %s56_s16 }
  0x17   :  { %p8588_p9 = scmp.lt.u32.totalorder %s8584_s19, %s8921_s3 }
  0x19   :  { %p8590_p10 = pnand %p8588_p9, %p8585_p8 }
  0x1b   :  { %8593 = shalt.err (!%p8590_p10)
}
  0x1c   :  { %s8594_s24 = scalar_lea.vmem %s57_s16, 4096  ;;  %p8599_p12 = scmp.lt.s32.totalorder %s57_s16, %s57_s16 }
  0x1d   :  { %p8595_p11 = scmp.ne.s32.totalorder %s57_s16, %s8594_s24  ;;  %p8600_p13 = scmp.lt.s32.totalorder %s8594_s24, %s8594_s24 }
  0x1f   :  { %p8601_p0 = por %p8600_p13, %p8599_p12 }
  0x21   :  { %p8602_p1 = pnand %p8601_p0, %p8595_p11 }
  0x23   :  { %8605 = shalt.err (!%p8602_p1)
}
  0x24   :  { %s8752_s1 = smov 64   ;;  %s8753_s25 = smov 4  }
  0x25   :  { %62 = dma.hbm_to_vmem [thread:$0]  %s8921_s3, 4096, %s57_s16, [#allocation9], %s8752_s1, %s8752_s1, %s8753_s25  }
  0x26   :  { %s8754_s28 = smov [#allocation11]   ;;  %s8755_s30 = smov [#allocation2]  }
  0x27   :  { %s78_s29 = sshll.u32 %s8754_s28, 4  ;;  %s22_s8 = sshll.u32 %s8755_s30, 4  ;;  %s79_s29 = int_to_ptr.vmem [resolvable:$true] %s78_s29  ;;  %s8830_s8 = int_to_ptr.vmem [resolvable:$true] %s22_s8 }
  0x28   :  { %s8606_s11 = scalar_lea.hbm %s8923_s5, 1024 }
  0x29   :  { %p8607_p2 = scmp.ne.s32.totalorder %s8923_s5, %s8606_s11  ;;  %p8610_p3 = scmp.lt.u32.totalorder %s8606_s11, %s8923_s5 }
  0x2b   :  { %p8612_p4 = pnand %p8610_p3, %p8607_p2 }
  0x2d   :  { %8615 = shalt.err (!%p8612_p4)
}
  0x2e   :  { %s8616_s3 = scalar_lea.vmem %s79_s29, 1024  ;;  %p8621_p6 = scmp.lt.s32.totalorder %s79_s29, %s79_s29 }
  0x2f   :  { %p8617_p5 = scmp.ne.s32.totalorder %s79_s29, %s8616_s3  ;;  %p8622_p7 = scmp.lt.s32.totalorder %s8616_s3, %s8616_s3 }
  0x31   :  { %p8623_p8 = por %p8622_p7, %p8621_p6 }
  0x33   :  { %p8624_p9 = pnand %p8623_p8, %p8617_p5 }
  0x35   :  { %8627 = shalt.err (!%p8624_p9)
}
  0x36   :  { %84 = dma.hbm_to_vmem [thread:$0]  %s8923_s5, 1024, %s79_s29, [#allocation12], %s8752_s1, %s8752_s1, %s8753_s25  }
  0x37   :  { %s8628_s20 = scalar_lea.hbm %s8918_s0, 6144 }
  0x38   :  { %p8629_p10 = scmp.ne.s32.totalorder %s8918_s0, %s8628_s20  ;;  %p8632_p11 = scmp.lt.u32.totalorder %s8628_s20, %s8918_s0 }
  0x3a   :  { %p8634_p12 = pnand %p8632_p11, %p8629_p10 }
  0x3c   :  { %8637 = shalt.err (!%p8634_p12)
}
  0x3d   :  { %s8638_s26 = scalar_lea.vmem %s8830_s8, 6144  ;;  %p8643_p0 = scmp.lt.s32.totalorder %s8830_s8, %s8830_s8 }
  0x3e   :  { %p8639_p13 = scmp.ne.s32.totalorder %s8830_s8, %s8638_s26  ;;  %p8644_p1 = scmp.lt.s32.totalorder %s8638_s26, %s8638_s26 }
  0x40   :  { %p8645_p2 = por %p8644_p1, %p8643_p0 }
  0x42   :  { %p8646_p3 = pnand %p8645_p2, %p8639_p13 }
  0x44   :  { %8649 = shalt.err (!%p8646_p3)
}
  0x45   :  { %s8756_s5 = smov 3072   ;;  %s8757_s1 = smov 192  }
  0x46   :  { %28 = dma.hbm_to_vmem [thread:$0]  %s8918_s0, 6144, %s8830_s8, [#allocation3], %s8756_s5, %s8756_s5, %s8757_s1  }
  0x47   :  { %s8758_s28 = smov [#allocation7]   ;;  %s8759_s30 = smov [#allocation10]  }
  0x48   :  { %s47_s29 = sshll.u32 %s8758_s28, 4  ;;  %s69_s9 = sshll.u32 %s8759_s30, 4  ;;  %s48_s29 = int_to_ptr.vmem [resolvable:$true] %s47_s29  ;;  %s70_s9 = int_to_ptr.vmem [resolvable:$true] %s69_s9 }
  0x49   :  { %s8650_s12 = scalar_lea.hbm %s8920_s2, 64 }
  0x4a   :  { %p8651_p4 = scmp.ne.s32.totalorder %s8920_s2, %s8650_s12  ;;  %p8654_p5 = scmp.lt.u32.totalorder %s8650_s12, %s8920_s2 }
  0x4c   :  { %p8656_p6 = pnand %p8654_p5, %p8651_p4 }
  0x4e   :  { %8659 = shalt.err (!%p8656_p6)
}
  0x4f   :  { %s8660_s0 = scalar_lea.vmem %s48_s29, 64  ;;  %p8665_p8 = scmp.lt.s32.totalorder %s48_s29, %s48_s29 }
  0x50   :  { %p8661_p7 = scmp.ne.s32.totalorder %s48_s29, %s8660_s0  ;;  %p8666_p9 = scmp.lt.s32.totalorder %s8660_s0, %s8660_s0 }
  0x52   :  { %p8667_p10 = por %p8666_p9, %p8665_p8 }
  0x54   :  { %p8668_p11 = pnand %p8667_p10, %p8661_p7 }
  0x56   :  { %8671 = shalt.err (!%p8668_p11)
}
  0x57   :  { %50 = dma.hbm_to_vmem [thread:$0]  %s8920_s2, 64, %s48_s29, [#allocation6]  }
  0x58   :  { %s8672_s19 = scalar_lea.hbm %s8922_s4, 16 }
  0x59   :  { %p8673_p12 = scmp.ne.s32.totalorder %s8922_s4, %s8672_s19  ;;  %p8676_p13 = scmp.lt.u32.totalorder %s8672_s19, %s8922_s4 }
  0x5b   :  { %p8678_p0 = pnand %p8676_p13, %p8673_p12 }
  0x5d   :  { %8681 = shalt.err (!%p8678_p0)
}
  0x5e   :  { %s8682_s24 = scalar_lea.vmem %s70_s9, 16  ;;  %s8686_s26 = scalar_lea.vmem %s70_s9, 32 }
  0x5f   :  { %p8683_p1 = scmp.ne.s32.totalorder %s70_s9, %s8682_s24  ;;  %p8687_p2 = scmp.lt.s32.totalorder %s70_s9, %s70_s9 }
  0x60   :  { %p8688_p3 = scmp.lt.s32.totalorder %s8686_s26, %s8682_s24 }
  0x62   :  { %p8689_p4 = por %p8688_p3, %p8687_p2 }
  0x64   :  { %p8690_p5 = pnand %p8689_p4, %p8683_p1 }
  0x66   :  { %8693 = shalt.err (!%p8690_p5)
}
  0x67   :  { %72 = dma.hbm_to_vmem [thread:$0]  %s8922_s4, 16, %s70_s9, [#allocation9]  }
  0x68   :  { %s8760_s1 = smov [#allocation13]   ;;  %s8694_s29 = scalar_lea.hbm %s8924_s6, 16 }
  0x69   :  { %s91_s25 = sshll.u32 %s8760_s1, 4  ;;  %p8695_p6 = scmp.ne.s32.totalorder %s8924_s6, %s8694_s29  ;;  %s92_s25 = int_to_ptr.vmem [resolvable:$true] %s91_s25 }
  0x6a   :  { %p8698_p7 = scmp.lt.u32.totalorder %s8694_s29, %s8924_s6 }
  0x6c   :  { %p8700_p8 = pnand %p8698_p7, %p8695_p6 }
  0x6e   :  { %8703 = shalt.err (!%p8700_p8)
}
  0x6f   :  { %s8704_s13 = scalar_lea.vmem %s92_s25, 16  ;;  %s8708_s4 = scalar_lea.vmem %s92_s25, 32 }
  0x70   :  { %p8705_p9 = scmp.ne.s32.totalorder %s92_s25, %s8704_s13  ;;  %p8709_p10 = scmp.lt.s32.totalorder %s92_s25, %s92_s25 }
  0x71   :  { %p8710_p11 = scmp.lt.s32.totalorder %s8708_s4, %s8704_s13 }
  0x73   :  { %p8711_p12 = por %p8710_p11, %p8709_p10 }
  0x75   :  { %p8712_p13 = pnand %p8711_p12, %p8705_p9 }
  0x77   :  { %8715 = shalt.err (!%p8712_p13)
}
  0x78   :  { %94 = dma.hbm_to_vmem [thread:$0]  %s8924_s6, 16, %s92_s25, [#allocation12]  }
  0x79   :  { %8738 = dma.done.wait [#allocation3], 6144  }
  0x7a   :  { %8739 = vsyncadd [#allocation3], 4294961152 }
  0x7b   :  { %8740 = dma.done.wait [#allocation6], 98368  }
  0x7c   :  { %8741 = vsyncadd [#allocation6], 4294868928 }
  0x7d   :  { %8742 = dma.done.wait [#allocation9], 4112  }
  0x7e   :  { %8743 = vsyncadd [#allocation9], 4294963184 }
  0x7f   :  { %8744 = dma.done.wait [#allocation12], 1040  }
  0x80   :  { %8745 = vsyncadd [#allocation12], 4294966256  ;;  %v7362_v0 = vld [vmem:[#allocation5 + $0x4] ss:$16 sps:$4 sm:$0xff]   ;;  %v7364_v1 = vld [vmem:[#allocation5 + $0xc] ss:$16 sps:$4 sm:$0xff]  }
  0x81   :  { %4819 = vmatprep.subr.bf16.mxu0 %v7362_v0  ;;  %v7366_v2 = vld [vmem:[#allocation5] ss:$16 sps:$4 sm:$0xff]   ;;  %v7367_v3 = vld [vmem:[#allocation5 + $0x8] ss:$16 sps:$4 sm:$0xff]   ;;  %5335 = vmatprep.subr.bf16.mxu1 %v7364_v1  ;;  %v7368_v4 = vld [vmem:[#allocation5 + $0x24] ss:$16 sps:$4 sm:$0xff]  }
  0x82   :  { %4820 = vmatpush1.bf16.msra.mxu0 %v7366_v2  ;;  %5336 = vmatpush1.bf16.msra.mxu1 %v7367_v3  ;;  %v7370_v5 = vld [vmem:[#allocation5 + $0x2c] ss:$16 sps:$4 sm:$0xff]   ;;  %v7372_v6 = vld [vmem:[#allocation5 + $0x20] ss:$16 sps:$4 sm:$0xff]   ;;  %v7373_v7 = vld [vmem:[#allocation5 + $0x28] ss:$16 sps:$4 sm:$0xff]  }
  0x83   :  { %4821 = vmatprep.subr.bf16.mxu0 %v7368_v4  ;;  %5337 = vmatprep.subr.bf16.mxu1 %v7370_v5  ;;  %v7374_v8 = vld [vmem:[#allocation5 + $0x44] ss:$16 sps:$4 sm:$0xff]   ;;  %v7376_v9 = vld [vmem:[#allocation5 + $0x4c] ss:$16 sps:$4 sm:$0xff]   ;;  %v7378_v10 = vld [vmem:[#allocation5 + $0x40] ss:$16 sps:$4 sm:$0xff]  }
  0x84   :  { %v7379_v11 = vld [vmem:[#allocation5 + $0x48] ss:$16 sps:$4 sm:$0xff]   ;;  %v7380_v12 = vld [vmem:[#allocation5 + $0x64] ss:$16 sps:$4 sm:$0xff]   ;;  %v7382_v13 = vld [vmem:[#allocation5 + $0x6c] ss:$16 sps:$4 sm:$0xff]  }
  0x85   :  { %v7384_v14 = vld [vmem:[#allocation5 + $0x60] ss:$16 sps:$4 sm:$0xff]   ;;  %v7385_v15 = vld [vmem:[#allocation5 + $0x68] ss:$16 sps:$4 sm:$0xff]   ;;  %v7386_v16 = vld [vmem:[#allocation5 + $0x84] ss:$16 sps:$4 sm:$0xff]  }
  0x86   :  { %4822 = vmatpush1.bf16.msra.mxu0 %v7372_v6  ;;  %5338 = vmatpush1.bf16.msra.mxu1 %v7373_v7  ;;  %v7388_v17 = vld [vmem:[#allocation5 + $0x8c] ss:$16 sps:$4 sm:$0xff]   ;;  %v7390_v18 = vld [vmem:[#allocation5 + $0x80] ss:$16 sps:$4 sm:$0xff]   ;;  %v7391_v19 = vld [vmem:[#allocation5 + $0x88] ss:$16 sps:$4 sm:$0xff]  }
  0x87   :  { %4823 = vmatprep.subr.bf16.mxu0 %v7374_v8  ;;  %5339 = vmatprep.subr.bf16.mxu1 %v7376_v9  ;;  %v7392_v20 = vld [vmem:[#allocation5 + $0xa4] ss:$16 sps:$4 sm:$0xff]   ;;  %v7394_v21 = vld [vmem:[#allocation5 + $0xac] ss:$16 sps:$4 sm:$0xff]   ;;  %v7396_v22 = vld [vmem:[#allocation5 + $0xa0] ss:$16 sps:$4 sm:$0xff]  }
  0x88   :  { %v7397_v23 = vld [vmem:[#allocation5 + $0xa8] ss:$16 sps:$4 sm:$0xff]   ;;  %v7398_v24 = vld [vmem:[#allocation5 + $0xc4] ss:$16 sps:$4 sm:$0xff]   ;;  %v7400_v25 = vld [vmem:[#allocation5 + $0xcc] ss:$16 sps:$4 sm:$0xff]  }
  0x89   :  { %v7402_v26 = vld [vmem:[#allocation5 + $0xc0] ss:$16 sps:$4 sm:$0xff]   ;;  %v7403_v27 = vld [vmem:[#allocation5 + $0xc8] ss:$16 sps:$4 sm:$0xff]   ;;  %v7404_v28 = vld [vmem:[#allocation5 + $0xe4] ss:$16 sps:$4 sm:$0xff]  }
  0x8a   :  { %4824 = vmatpush1.bf16.msra.mxu0 %v7378_v10  ;;  %5340 = vmatpush1.bf16.msra.mxu1 %v7379_v11  ;;  %v7406_v29 = vld [vmem:[#allocation5 + $0xec] ss:$16 sps:$4 sm:$0xff]   ;;  %v7408_v30 = vld [vmem:[#allocation5 + $0xe0] ss:$16 sps:$4 sm:$0xff]   ;;  %v7409_v31 = vld [vmem:[#allocation5 + $0xe8] ss:$16 sps:$4 sm:$0xff]  }
  0x8b   :  { %4825 = vmatprep.subr.bf16.mxu0 %v7380_v12  ;;  %5341 = vmatprep.subr.bf16.mxu1 %v7382_v13  ;;  %v7410_v32 = vld [vmem:[#allocation5 + $0x104] ss:$16 sps:$4 sm:$0xff]   ;;  %v7412_v33 = vld [vmem:[#allocation5 + $0x10c] ss:$16 sps:$4 sm:$0xff]   ;;  %v7414_v34 = vld [vmem:[#allocation5 + $0x100] ss:$16 sps:$4 sm:$0xff]  }
  0x8c   :  { %v7415_v35 = vld [vmem:[#allocation5 + $0x108] ss:$16 sps:$4 sm:$0xff]   ;;  %v7416_v36 = vld [vmem:[#allocation5 + $0x124] ss:$16 sps:$4 sm:$0xff]   ;;  %v7418_v37 = vld [vmem:[#allocation5 + $0x12c] ss:$16 sps:$4 sm:$0xff]  }
  0x8d   :  { %v7420_v38 = vld [vmem:[#allocation5 + $0x120] ss:$16 sps:$4 sm:$0xff]   ;;  %v7421_v39 = vld [vmem:[#allocation5 + $0x128] ss:$16 sps:$4 sm:$0xff]   ;;  %v7422_v40 = vld [vmem:[#allocation5 + $0x144] ss:$16 sps:$4 sm:$0xff]  }
  0x8e   :  { %4826 = vmatpush1.bf16.msra.mxu0 %v7384_v14  ;;  %5342 = vmatpush1.bf16.msra.mxu1 %v7385_v15  ;;  %v7424_v41 = vld [vmem:[#allocation5 + $0x14c] ss:$16 sps:$4 sm:$0xff]   ;;  %v7426_v42 = vld [vmem:[#allocation5 + $0x140] ss:$16 sps:$4 sm:$0xff]   ;;  %v7427_v43 = vld [vmem:[#allocation5 + $0x148] ss:$16 sps:$4 sm:$0xff]  }
  0x8f   :  { %4827 = vmatprep.subr.bf16.mxu0 %v7386_v16  ;;  %5343 = vmatprep.subr.bf16.mxu1 %v7388_v17  ;;  %v7428_v44 = vld [vmem:[#allocation5 + $0x164] ss:$16 sps:$4 sm:$0xff]   ;;  %v7430_v45 = vld [vmem:[#allocation5 + $0x16c] ss:$16 sps:$4 sm:$0xff]   ;;  %v7432_v48 = vld [vmem:[#allocation5 + $0x160] ss:$16 sps:$4 sm:$0xff]  }
  0x90   :  { %v118_v46 = vld [vmem:[#allocation2 + $0x8] sm:$0xff]  ;;  %v7434_v51 = vld [vmem:[#allocation5 + $0x184] ss:$16 sps:$4 sm:$0xff]   ;;  %v7438_v53 = vld [vmem:[#allocation5 + $0x180] ss:$16 sps:$4 sm:$0xff]   ;;  %vm8762_vm0 = vmmov 0  }
  0x91   :  { %v142_v47 = vld [vmem:[#allocation2 + $0xc8] sm:$0xff]  ;;  %v7440_v55 = vld [vmem:[#allocation5 + $0x1a4] ss:$16 sps:$4 sm:$0xff]   ;;  %v7444_v57 = vld [vmem:[#allocation5 + $0x1a0] ss:$16 sps:$4 sm:$0xff]   ;;  %s8763_s6 = smov [#allocation14]  }
  0x92   :  { %4828 = vmatpush1.bf16.msra.mxu0 %v7390_v18  ;;  %5344 = vmatpush1.bf16.msra.mxu1 %v7391_v19  ;;  %v7433_v49 = vld [vmem:[#allocation5 + $0x168] ss:$16 sps:$4 sm:$0xff]   ;;  %v166_v50 = vpack.c.bf16 %v142_v47, %v118_v46  ;;  %v7436_v52 = vld [vmem:[#allocation5 + $0x18c] ss:$16 sps:$4 sm:$0xff]   ;;  %v7446_v59 = vld [vmem:[#allocation5 + $0x1c4] ss:$16 sps:$4 sm:$0xff]  }
  0x93   :  { %4829 = vmatprep.subr.bf16.mxu0 %v7392_v20  ;;  %5345 = vmatprep.subr.bf16.mxu1 %v7394_v21  ;;  %v7439_v54 = vld [vmem:[#allocation5 + $0x188] ss:$16 sps:$4 sm:$0xff]   ;;  %v7442_v56 = vld [vmem:[#allocation5 + $0x1ac] ss:$16 sps:$4 sm:$0xff]   ;;  %v7450_v61 = vld [vmem:[#allocation5 + $0x1c0] ss:$16 sps:$4 sm:$0xff]  }
  0x94   :  { %4851 = vmatprep.mubr.bf16.mxu0 %v166_v50  ;;  %5367 = vmatprep.mubr.bf16.mxu1 %v166_v50  ;;  %v7445_v58 = vld [vmem:[#allocation5 + $0x1a8] ss:$16 sps:$4 sm:$0xff]   ;;  %v7448_v60 = vld [vmem:[#allocation5 + $0x1cc] ss:$16 sps:$4 sm:$0xff]   ;;  %v7452_v63 = vld [vmem:[#allocation5 + $0x1e4] ss:$16 sps:$4 sm:$0xff]  }
  0x95   :  { %v7451_v62 = vld [vmem:[#allocation5 + $0x1c8] ss:$16 sps:$4 sm:$0xff]   ;;  %v7454_v0 = vld [vmem:[#allocation5 + $0x1ec] ss:$16 sps:$4 sm:$0xff]   ;;  %v7456_v1 = vld [vmem:[#allocation5 + $0x1e0] ss:$16 sps:$4 sm:$0xff]  }
  0x96   :  { %4830 = vmatpush1.bf16.msra.mxu0 %v7396_v22  ;;  %5346 = vmatpush1.bf16.msra.mxu1 %v7397_v23  ;;  %v7457_v2 = vld [vmem:[#allocation5 + $0x1e8] ss:$16 sps:$4 sm:$0xff]   ;;  %v7460_v3 = vld [vmem:[#allocation5 + $0x204] ss:$16 sps:$4 sm:$0xff]   ;;  %v7463_v6 = vld [vmem:[#allocation5 + $0x20c] ss:$16 sps:$4 sm:$0xff]  }
  0x97   :  { %4831 = vmatprep.subr.bf16.mxu0 %v7398_v24  ;;  %5347 = vmatprep.subr.bf16.mxu1 %v7400_v25  ;;  %v117_v4 = vld [vmem:[#allocation2] sm:$0xff]  ;;  %v7461_v8 = vld [vmem:[#allocation5 + $0x208] ss:$16 sps:$4 sm:$0xff]   ;;  %v7469_v11 = vld [vmem:[#allocation5 + $0x22c] ss:$16 sps:$4 sm:$0xff]   ;;  %s6350_s15 = sshll.u32 %s8763_s6, 4  ;;  %s6351_s15 = int_to_ptr.vmem [resolvable:$true] %s6350_s15 }
  0x98   :  { %v141_v5 = vld [vmem:[#allocation2 + $0xc0] sm:$0xff]  ;;  %v7467_v13 = vld [vmem:[#allocation5 + $0x228] ss:$16 sps:$4 sm:$0xff]   ;;  %v7475_v15 = vld [vmem:[#allocation5 + $0x24c] ss:$16 sps:$4 sm:$0xff]   ;;  %s8716_s3 = scalar_lea.vmem %s6351_s15, 256  ;;  %p8721_p1 = scmp.lt.s32.totalorder %s6351_s15, %s6351_s15 }
  0x99   :  { %v7458_v7 = vld [vmem:[#allocation5 + $0x200] ss:$16 sps:$4 sm:$0xff]   ;;  %v165_v9 = vpack.c.bf16 %v141_v5, %v117_v4  ;;  %v7466_v10 = vld [vmem:[#allocation5 + $0x224] ss:$16 sps:$4 sm:$0xff]   ;;  %v7473_v17 = vld [vmem:[#allocation5 + $0x248] ss:$16 sps:$4 sm:$0xff]   ;;  %p8717_p0 = scmp.ne.s32.totalorder %s6351_s15, %s8716_s3  ;;  %p8722_p2 = scmp.lt.s32.totalorder %s8716_s3, %s8716_s3 }
  0x9a   :  { %4832 = vmatpush1.bf16.msra.mxu0 %v7402_v26  ;;  %5348 = vmatpush1.bf16.msra.mxu1 %v7403_v27  ;;  %v7464_v12 = vld [vmem:[#allocation5 + $0x220] ss:$16 sps:$4 sm:$0xff]   ;;  %v7472_v14 = vld [vmem:[#allocation5 + $0x244] ss:$16 sps:$4 sm:$0xff]   ;;  %v7481_v19 = vld [vmem:[#allocation5 + $0x26c] ss:$16 sps:$4 sm:$0xff]  }
  0x9b   :  { %4833 = vmatprep.subr.bf16.mxu0 %v7404_v28  ;;  %5349 = vmatprep.subr.bf16.mxu1 %v7406_v29  ;;  %v7470_v16 = vld [vmem:[#allocation5 + $0x240] ss:$16 sps:$4 sm:$0xff]   ;;  %v7478_v18 = vld [vmem:[#allocation5 + $0x264] ss:$16 sps:$4 sm:$0xff]   ;;  %v7479_v21 = vld [vmem:[#allocation5 + $0x268] ss:$16 sps:$4 sm:$0xff]   ;;  %p8723_p3 = por %p8722_p2, %p8721_p1 }
  0x9c   :  { %v7476_v20 = vld [vmem:[#allocation5 + $0x260] ss:$16 sps:$4 sm:$0xff]   ;;  %v7484_v22 = vld [vmem:[#allocation5 + $0x284] ss:$16 sps:$4 sm:$0xff]   ;;  %v7487_v23 = vld [vmem:[#allocation5 + $0x28c] ss:$16 sps:$4 sm:$0xff]  }
  0x9d   :  { %v7482_v24 = vld [vmem:[#allocation5 + $0x280] ss:$16 sps:$4 sm:$0xff]   ;;  %v7485_v25 = vld [vmem:[#allocation5 + $0x288] ss:$16 sps:$4 sm:$0xff]   ;;  %v7490_v26 = vld [vmem:[#allocation5 + $0x2a4] ss:$16 sps:$4 sm:$0xff]   ;;  %p8724_p4 = pnand %p8723_p3, %p8717_p0 }
  0x9e   :  { %4834 = vmatpush1.bf16.msra.mxu0 %v7408_v30  ;;  %5350 = vmatpush1.bf16.msra.mxu1 %v7409_v31  ;;  %v7493_v27 = vld [vmem:[#allocation5 + $0x2ac] ss:$16 sps:$4 sm:$0xff]   ;;  %v7488_v28 = vld [vmem:[#allocation5 + $0x2a0] ss:$16 sps:$4 sm:$0xff]   ;;  %v7491_v29 = vld [vmem:[#allocation5 + $0x2a8] ss:$16 sps:$4 sm:$0xff]  }
  0x9f   :  { %4835 = vmatprep.subr.bf16.mxu0 %v7410_v32  ;;  %5351 = vmatprep.subr.bf16.mxu1 %v7412_v33  ;;  %v7496_v30 = vld [vmem:[#allocation5 + $0x2c4] ss:$16 sps:$4 sm:$0xff]   ;;  %v7499_v31 = vld [vmem:[#allocation5 + $0x2cc] ss:$16 sps:$4 sm:$0xff]   ;;  %v7512_v47 = vld [vmem:[#allocation5 + $0x320] ss:$16 sps:$4 sm:$0xff]  }
  0xa0   :  { %v120_v32 = vld [vmem:[#allocation2 + $0x18] sm:$0xff]  ;;  %v7550_v5 = vld [vmem:[#allocation5 + $0x3e4] ss:$16 sps:$4 sm:$0xff]  }
  0xa1   :  { %v144_v33 = vld [vmem:[#allocation2 + $0xd8] sm:$0xff] }
  0xa2   :  { %4836 = vmatpush1.bf16.msra.mxu0 %v7414_v34  ;;  %5352 = vmatpush1.bf16.msra.mxu1 %v7415_v35  ;;  %v7494_v34 = vld [vmem:[#allocation5 + $0x2c0] ss:$16 sps:$4 sm:$0xff]   ;;  %v7497_v35 = vld [vmem:[#allocation5 + $0x2c8] ss:$16 sps:$4 sm:$0xff]   ;;  %v7517_v46 = vld [vmem:[#allocation5 + $0x32c] ss:$16 sps:$4 sm:$0xff]  }
  0xa3   :  { %4837 = vmatprep.subr.bf16.mxu0 %v7416_v36  ;;  %5353 = vmatprep.subr.bf16.mxu1 %v7418_v37  ;;  %v168_v36 = vpack.c.bf16 %v144_v33, %v120_v32  ;;  %v7502_v37 = vld [vmem:[#allocation5 + $0x2e4] ss:$16 sps:$4 sm:$0xff]   ;;  %v7523_v50 = vld [vmem:[#allocation5 + $0x34c] ss:$16 sps:$4 sm:$0xff]   ;;  %v7545_v4 = vld [vmem:[#allocation5 + $0x3c8] ss:$16 sps:$4 sm:$0xff]  }
  0xa4   :  { %v7583_v32 = vld [vmem:[#allocation5 + $0x48c] ss:$16 sps:$4 sm:$0xff]   ;;  %v7578_v33 = vld [vmem:[#allocation5 + $0x480] ss:$16 sps:$4 sm:$0xff]  }
  0xa6   :  { %4838 = vmatpush1.bf16.msra.mxu0 %v7420_v38  ;;  %5354 = vmatpush1.bf16.msra.mxu1 %v7421_v39  ;;  %v7505_v38 = vld [vmem:[#allocation5 + $0x2ec] ss:$16 sps:$4 sm:$0xff]   ;;  %v7500_v39 = vld [vmem:[#allocation5 + $0x2e0] ss:$16 sps:$4 sm:$0xff]  }
  0xa7   :  { %4839 = vmatprep.subr.bf16.mxu0 %v7422_v40  ;;  %5355 = vmatprep.subr.bf16.mxu1 %v7424_v41  ;;  %v7503_v40 = vld [vmem:[#allocation5 + $0x2e8] ss:$16 sps:$4 sm:$0xff]   ;;  %v7508_v41 = vld [vmem:[#allocation5 + $0x304] ss:$16 sps:$4 sm:$0xff]  }
  0xaa   :  { %4840 = vmatpush1.bf16.msra.mxu0 %v7426_v42  ;;  %5356 = vmatpush1.bf16.msra.mxu1 %v7427_v43  ;;  %v7511_v42 = vld [vmem:[#allocation5 + $0x30c] ss:$16 sps:$4 sm:$0xff]   ;;  %v7506_v43 = vld [vmem:[#allocation5 + $0x300] ss:$16 sps:$4 sm:$0xff]  }
  0xab   :  { %4841 = vmatprep.subr.bf16.mxu0 %v7428_v44  ;;  %5357 = vmatprep.subr.bf16.mxu1 %v7430_v45  ;;  %v7509_v44 = vld [vmem:[#allocation5 + $0x308] ss:$16 sps:$4 sm:$0xff]   ;;  %v7514_v45 = vld [vmem:[#allocation5 + $0x324] ss:$16 sps:$4 sm:$0xff]  }
  0xae   :  { %4842 = vmatpush1.bf16.msra.mxu0 %v7432_v48  ;;  %5358 = vmatpush1.bf16.msra.mxu1 %v7433_v49  ;;  %v7515_v48 = vld [vmem:[#allocation5 + $0x328] ss:$16 sps:$4 sm:$0xff]   ;;  %v7520_v49 = vld [vmem:[#allocation5 + $0x344] ss:$16 sps:$4 sm:$0xff]  }
  0xaf   :  { %4843 = vmatprep.subr.bf16.mxu0 %v7434_v51  ;;  %5359 = vmatprep.subr.bf16.mxu1 %v7436_v52  ;;  %v7518_v51 = vld [vmem:[#allocation5 + $0x340] ss:$16 sps:$4 sm:$0xff]   ;;  %v7521_v52 = vld [vmem:[#allocation5 + $0x348] ss:$16 sps:$4 sm:$0xff]  }
  0xb2   :  { %4844 = vmatpush1.bf16.msra.mxu0 %v7438_v53  ;;  %5360 = vmatpush1.bf16.msra.mxu1 %v7439_v54  ;;  %v7526_v53 = vld [vmem:[#allocation5 + $0x364] ss:$16 sps:$4 sm:$0xff]   ;;  %v7529_v54 = vld [vmem:[#allocation5 + $0x36c] ss:$16 sps:$4 sm:$0xff]  }
  0xb3   :  { %4845 = vmatprep.subr.bf16.mxu0 %v7440_v55  ;;  %5361 = vmatprep.subr.bf16.mxu1 %v7442_v56  ;;  %v7524_v55 = vld [vmem:[#allocation5 + $0x360] ss:$16 sps:$4 sm:$0xff]   ;;  %v7527_v56 = vld [vmem:[#allocation5 + $0x368] ss:$16 sps:$4 sm:$0xff]  }
  0xb6   :  { %4846 = vmatpush1.bf16.msra.mxu0 %v7444_v57  ;;  %5362 = vmatpush1.bf16.msra.mxu1 %v7445_v58  ;;  %v7532_v57 = vld [vmem:[#allocation5 + $0x384] ss:$16 sps:$4 sm:$0xff]   ;;  %v7535_v58 = vld [vmem:[#allocation5 + $0x38c] ss:$16 sps:$4 sm:$0xff]  }
  0xb7   :  { %4847 = vmatprep.subr.bf16.mxu0 %v7446_v59  ;;  %5363 = vmatprep.subr.bf16.mxu1 %v7448_v60  ;;  %v7530_v59 = vld [vmem:[#allocation5 + $0x380] ss:$16 sps:$4 sm:$0xff]   ;;  %v7533_v60 = vld [vmem:[#allocation5 + $0x388] ss:$16 sps:$4 sm:$0xff]  }
  0xba   :  { %4848 = vmatpush1.bf16.msra.mxu0 %v7450_v61  ;;  %5364 = vmatpush1.bf16.msra.mxu1 %v7451_v62  ;;  %v7538_v61 = vld [vmem:[#allocation5 + $0x3a4] ss:$16 sps:$4 sm:$0xff]   ;;  %v7541_v62 = vld [vmem:[#allocation5 + $0x3ac] ss:$16 sps:$4 sm:$0xff]  }
  0xbb   :  { %4849 = vmatprep.subr.bf16.mxu0 %v7452_v63  ;;  %5365 = vmatprep.subr.bf16.mxu1 %v7454_v0  ;;  %v7536_v63 = vld [vmem:[#allocation5 + $0x3a0] ss:$16 sps:$4 sm:$0xff]   ;;  %v7539_v0 = vld [vmem:[#allocation5 + $0x3a8] ss:$16 sps:$4 sm:$0xff]  }
  0xbe   :  { %4850 = vmatpush1.bf16.msra.mxu0 %v7456_v1  ;;  %5366 = vmatpush1.bf16.msra.mxu1 %v7457_v2  ;;  %v7544_v1 = vld [vmem:[#allocation5 + $0x3c4] ss:$16 sps:$4 sm:$0xff]   ;;  %v7547_v2 = vld [vmem:[#allocation5 + $0x3cc] ss:$16 sps:$4 sm:$0xff]  }
  0xbf   :  { %4862 = vmatprep.subr.bf16.mxu0 %v7460_v3  ;;  %5378 = vmatprep.subr.bf16.mxu1 %v7463_v6  ;;  %v7542_v3 = vld [vmem:[#allocation5 + $0x3c0] ss:$16 sps:$4 sm:$0xff]   ;;  %v7553_v6 = vld [vmem:[#allocation5 + $0x3ec] ss:$16 sps:$4 sm:$0xff]  }
  0xc1   :  { %4852 = vmatmul.mubr.bf16.vlgmr.msra.gmra.mrb[0].mxu0 %v165_v9  ;;  %5368 = vmatmul.mubr.bf16.vlgmr.msra.gmra.mrb[0].mxu1 %v165_v9  ;;  %v7556_v9 = vld [vmem:[#allocation5 + $0x404] ss:$16 sps:$4 sm:$0xff]  }
  0xc2   :  { %4863 = vmatpush1.bf16.msra.mxu0 %v7458_v7  ;;  %5379 = vmatpush1.bf16.msra.mxu1 %v7461_v8  ;;  %v7548_v7 = vld [vmem:[#allocation5 + $0x3e0] ss:$16 sps:$4 sm:$0xff]   ;;  %v7551_v8 = vld [vmem:[#allocation5 + $0x3e8] ss:$16 sps:$4 sm:$0xff]  }
  0xc3   :  { %4864 = vmatprep.subr.bf16.mxu0 %v7466_v10  ;;  %5380 = vmatprep.subr.bf16.mxu1 %v7469_v11  ;;  %v119_v10 = vld [vmem:[#allocation2 + $0x10] sm:$0xff] }
  0xc4   :  { %4894 = vmatprep.mubr.bf16.mxu0 %v168_v36  ;;  %5410 = vmatprep.mubr.bf16.mxu1 %v168_v36  ;;  %v143_v11 = vld [vmem:[#allocation2 + $0xd0] sm:$0xff]  ;;  %v7589_v36 = vld [vmem:[#allocation5 + $0x4ac] ss:$16 sps:$4 sm:$0xff]  }
  0xc6   :  { %4865 = vmatpush1.bf16.msra.mxu0 %v7464_v12  ;;  %5381 = vmatpush1.bf16.msra.mxu1 %v7467_v13  ;;  %v7559_v12 = vld [vmem:[#allocation5 + $0x40c] ss:$16 sps:$4 sm:$0xff]   ;;  %v7554_v13 = vld [vmem:[#allocation5 + $0x400] ss:$16 sps:$4 sm:$0xff]  }
  0xc7   :  { %4866 = vmatprep.subr.bf16.mxu0 %v7472_v14  ;;  %5382 = vmatprep.subr.bf16.mxu1 %v7475_v15  ;;  %v7557_v14 = vld [vmem:[#allocation5 + $0x408] ss:$16 sps:$4 sm:$0xff]   ;;  %v167_v15 = vpack.c.bf16 %v143_v11, %v119_v10  ;;  %v7646_v11 = vld [vmem:[#allocation5 + $0x5e4] ss:$16 sps:$4 sm:$0xff]  }
  0xc8   :  { %v7641_v10 = vld [vmem:[#allocation5 + $0x5c8] ss:$16 sps:$4 sm:$0xff]  }
  0xca   :  { %4867 = vmatpush1.bf16.msra.mxu0 %v7470_v16  ;;  %5383 = vmatpush1.bf16.msra.mxu1 %v7473_v17  ;;  %v7562_v16 = vld [vmem:[#allocation5 + $0x424] ss:$16 sps:$4 sm:$0xff]   ;;  %v7565_v17 = vld [vmem:[#allocation5 + $0x42c] ss:$16 sps:$4 sm:$0xff]  }
  0xcb   :  { %4868 = vmatprep.subr.bf16.mxu0 %v7478_v18  ;;  %5384 = vmatprep.subr.bf16.mxu1 %v7481_v19  ;;  %v122_v18 = vld [vmem:[#allocation2 + $0x28] sm:$0xff] }
  0xcc   :  { %v146_v19 = vld [vmem:[#allocation2 + $0xe8] sm:$0xff] }
  0xce   :  { %4869 = vmatpush1.bf16.msra.mxu0 %v7476_v20  ;;  %5385 = vmatpush1.bf16.msra.mxu1 %v7479_v21  ;;  %v7560_v20 = vld [vmem:[#allocation5 + $0x420] ss:$16 sps:$4 sm:$0xff]   ;;  %v7563_v21 = vld [vmem:[#allocation5 + $0x428] ss:$16 sps:$4 sm:$0xff]  }
  0xcf   :  { %4870 = vmatprep.subr.bf16.mxu0 %v7484_v22  ;;  %5386 = vmatprep.subr.bf16.mxu1 %v7487_v23  ;;  %v170_v22 = vpack.c.bf16 %v146_v19, %v122_v18  ;;  %v7568_v23 = vld [vmem:[#allocation5 + $0x444] ss:$16 sps:$4 sm:$0xff]   ;;  %v7655_v18 = vld [vmem:[#allocation5 + $0x60c] ss:$16 sps:$4 sm:$0xff]   ;;  %v7650_v19 = vld [vmem:[#allocation5 + $0x600] ss:$16 sps:$4 sm:$0xff]  }
  0xd2   :  { %4871 = vmatpush1.bf16.msra.mxu0 %v7482_v24  ;;  %5387 = vmatpush1.bf16.msra.mxu1 %v7485_v25  ;;  %v7571_v24 = vld [vmem:[#allocation5 + $0x44c] ss:$16 sps:$4 sm:$0xff]   ;;  %v7566_v25 = vld [vmem:[#allocation5 + $0x440] ss:$16 sps:$4 sm:$0xff]  }
  0xd3   :  { %4872 = vmatprep.subr.bf16.mxu0 %v7490_v26  ;;  %5388 = vmatprep.subr.bf16.mxu1 %v7493_v27  ;;  %v7569_v26 = vld [vmem:[#allocation5 + $0x448] ss:$16 sps:$4 sm:$0xff]   ;;  %v7574_v27 = vld [vmem:[#allocation5 + $0x464] ss:$16 sps:$4 sm:$0xff]  }
  0xd6   :  { %4873 = vmatpush1.bf16.msra.mxu0 %v7488_v28  ;;  %5389 = vmatpush1.bf16.msra.mxu1 %v7491_v29  ;;  %v7577_v28 = vld [vmem:[#allocation5 + $0x46c] ss:$16 sps:$4 sm:$0xff]   ;;  %v7572_v29 = vld [vmem:[#allocation5 + $0x460] ss:$16 sps:$4 sm:$0xff]  }
  0xd7   :  { %4874 = vmatprep.subr.bf16.mxu0 %v7496_v30  ;;  %5390 = vmatprep.subr.bf16.mxu1 %v7499_v31  ;;  %v7575_v30 = vld [vmem:[#allocation5 + $0x468] ss:$16 sps:$4 sm:$0xff]   ;;  %v7580_v31 = vld [vmem:[#allocation5 + $0x484] ss:$16 sps:$4 sm:$0xff]  }
  0xda   :  { %4875 = vmatpush1.bf16.msra.mxu0 %v7494_v34  ;;  %5391 = vmatpush1.bf16.msra.mxu1 %v7497_v35  ;;  %v7581_v34 = vld [vmem:[#allocation5 + $0x488] ss:$16 sps:$4 sm:$0xff]   ;;  %v7586_v35 = vld [vmem:[#allocation5 + $0x4a4] ss:$16 sps:$4 sm:$0xff]  }
  0xdb   :  { %4876 = vmatprep.subr.bf16.mxu0 %v7502_v37  ;;  %5392 = vmatprep.subr.bf16.mxu1 %v7505_v38  ;;  %v7584_v37 = vld [vmem:[#allocation5 + $0x4a0] ss:$16 sps:$4 sm:$0xff]   ;;  %v7587_v38 = vld [vmem:[#allocation5 + $0x4a8] ss:$16 sps:$4 sm:$0xff]  }
  0xde   :  { %4877 = vmatpush1.bf16.msra.mxu0 %v7500_v39  ;;  %5393 = vmatpush1.bf16.msra.mxu1 %v7503_v40  ;;  %v7592_v39 = vld [vmem:[#allocation5 + $0x4c4] ss:$16 sps:$4 sm:$0xff]   ;;  %v7595_v40 = vld [vmem:[#allocation5 + $0x4cc] ss:$16 sps:$4 sm:$0xff]  }
  0xdf   :  { %4878 = vmatprep.subr.bf16.mxu0 %v7508_v41  ;;  %5394 = vmatprep.subr.bf16.mxu1 %v7511_v42  ;;  %v7590_v41 = vld [vmem:[#allocation5 + $0x4c0] ss:$16 sps:$4 sm:$0xff]   ;;  %v7593_v42 = vld [vmem:[#allocation5 + $0x4c8] ss:$16 sps:$4 sm:$0xff]  }
  0xe2   :  { %4879 = vmatpush1.bf16.msra.mxu0 %v7506_v43  ;;  %5395 = vmatpush1.bf16.msra.mxu1 %v7509_v44  ;;  %v7598_v43 = vld [vmem:[#allocation5 + $0x4e4] ss:$16 sps:$4 sm:$0xff]   ;;  %v7601_v44 = vld [vmem:[#allocation5 + $0x4ec] ss:$16 sps:$4 sm:$0xff]  }
  0xe3   :  { %4880 = vmatprep.subr.bf16.mxu0 %v7514_v45  ;;  %5396 = vmatprep.subr.bf16.mxu1 %v7517_v46  ;;  %v7596_v45 = vld [vmem:[#allocation5 + $0x4e0] ss:$16 sps:$4 sm:$0xff]   ;;  %v7599_v46 = vld [vmem:[#allocation5 + $0x4e8] ss:$16 sps:$4 sm:$0xff]  }
  0xe6   :  { %4881 = vmatpush1.bf16.msra.mxu0 %v7512_v47  ;;  %5397 = vmatpush1.bf16.msra.mxu1 %v7515_v48  ;;  %v7604_v47 = vld [vmem:[#allocation5 + $0x504] ss:$16 sps:$4 sm:$0xff]   ;;  %v7607_v48 = vld [vmem:[#allocation5 + $0x50c] ss:$16 sps:$4 sm:$0xff]  }
  0xe7   :  { %4882 = vmatprep.subr.bf16.mxu0 %v7520_v49  ;;  %5398 = vmatprep.subr.bf16.mxu1 %v7523_v50  ;;  %v7602_v49 = vld [vmem:[#allocation5 + $0x500] ss:$16 sps:$4 sm:$0xff]   ;;  %v7605_v50 = vld [vmem:[#allocation5 + $0x508] ss:$16 sps:$4 sm:$0xff]  }
  0xea   :  { %4883 = vmatpush1.bf16.msra.mxu0 %v7518_v51  ;;  %5399 = vmatpush1.bf16.msra.mxu1 %v7521_v52  ;;  %v7610_v51 = vld [vmem:[#allocation5 + $0x524] ss:$16 sps:$4 sm:$0xff]   ;;  %v7613_v52 = vld [vmem:[#allocation5 + $0x52c] ss:$16 sps:$4 sm:$0xff]  }
  0xeb   :  { %4884 = vmatprep.subr.bf16.mxu0 %v7526_v53  ;;  %5400 = vmatprep.subr.bf16.mxu1 %v7529_v54  ;;  %v7608_v53 = vld [vmem:[#allocation5 + $0x520] ss:$16 sps:$4 sm:$0xff]   ;;  %v7611_v54 = vld [vmem:[#allocation5 + $0x528] ss:$16 sps:$4 sm:$0xff]  }
  0xee   :  { %4885 = vmatpush1.bf16.msra.mxu0 %v7524_v55  ;;  %5401 = vmatpush1.bf16.msra.mxu1 %v7527_v56  ;;  %v7616_v55 = vld [vmem:[#allocation5 + $0x544] ss:$16 sps:$4 sm:$0xff]   ;;  %v7619_v56 = vld [vmem:[#allocation5 + $0x54c] ss:$16 sps:$4 sm:$0xff]  }
  0xef   :  { %4886 = vmatprep.subr.bf16.mxu0 %v7532_v57  ;;  %5402 = vmatprep.subr.bf16.mxu1 %v7535_v58  ;;  %v7614_v57 = vld [vmem:[#allocation5 + $0x540] ss:$16 sps:$4 sm:$0xff]   ;;  %v7617_v58 = vld [vmem:[#allocation5 + $0x548] ss:$16 sps:$4 sm:$0xff]  }
  0xf2   :  { %4887 = vmatpush1.bf16.msra.mxu0 %v7530_v59  ;;  %5403 = vmatpush1.bf16.msra.mxu1 %v7533_v60  ;;  %v7622_v59 = vld [vmem:[#allocation5 + $0x564] ss:$16 sps:$4 sm:$0xff]   ;;  %v7625_v60 = vld [vmem:[#allocation5 + $0x56c] ss:$16 sps:$4 sm:$0xff]  }
  0xf3   :  { %4888 = vmatprep.subr.bf16.mxu0 %v7538_v61  ;;  %5404 = vmatprep.subr.bf16.mxu1 %v7541_v62  ;;  %v7620_v61 = vld [vmem:[#allocation5 + $0x560] ss:$16 sps:$4 sm:$0xff]   ;;  %v7623_v62 = vld [vmem:[#allocation5 + $0x568] ss:$16 sps:$4 sm:$0xff]  }
  0xf6   :  { %4889 = vmatpush1.bf16.msra.mxu0 %v7536_v63  ;;  %5405 = vmatpush1.bf16.msra.mxu1 %v7539_v0  ;;  %v7628_v63 = vld [vmem:[#allocation5 + $0x584] ss:$16 sps:$4 sm:$0xff]   ;;  %v7631_v0 = vld [vmem:[#allocation5 + $0x58c] ss:$16 sps:$4 sm:$0xff]  }
  0xf7   :  { %4890 = vmatprep.subr.bf16.mxu0 %v7544_v1  ;;  %5406 = vmatprep.subr.bf16.mxu1 %v7547_v2  ;;  %v7626_v1 = vld [vmem:[#allocation5 + $0x580] ss:$16 sps:$4 sm:$0xff]   ;;  %v7629_v2 = vld [vmem:[#allocation5 + $0x588] ss:$16 sps:$4 sm:$0xff]  }
  0xfa   :  { %4891 = vmatpush1.bf16.msra.mxu0 %v7542_v3  ;;  %5407 = vmatpush1.bf16.msra.mxu1 %v7545_v4  ;;  %v7634_v3 = vld [vmem:[#allocation5 + $0x5a4] ss:$16 sps:$4 sm:$0xff]   ;;  %v7637_v4 = vld [vmem:[#allocation5 + $0x5ac] ss:$16 sps:$4 sm:$0xff]  }
  0xfb   :  { %4892 = vmatprep.subr.bf16.mxu0 %v7550_v5  ;;  %5408 = vmatprep.subr.bf16.mxu1 %v7553_v6  ;;  %v7632_v5 = vld [vmem:[#allocation5 + $0x5a0] ss:$16 sps:$4 sm:$0xff]   ;;  %v7635_v6 = vld [vmem:[#allocation5 + $0x5a8] ss:$16 sps:$4 sm:$0xff]  }
  0xfe   :  { %4893 = vmatpush1.bf16.msra.mxu0 %v7548_v7  ;;  %5409 = vmatpush1.bf16.msra.mxu1 %v7551_v8  ;;  %v7640_v7 = vld [vmem:[#allocation5 + $0x5c4] ss:$16 sps:$4 sm:$0xff]   ;;  %v7643_v8 = vld [vmem:[#allocation5 + $0x5cc] ss:$16 sps:$4 sm:$0xff]  }
  0xff   :  { %4905 = vmatprep.subr.bf16.mxu0 %v7556_v9  ;;  %5421 = vmatprep.subr.bf16.mxu1 %v7559_v12  ;;  %v7638_v9 = vld [vmem:[#allocation5 + $0x5c0] ss:$16 sps:$4 sm:$0xff]   ;;  %v7649_v12 = vld [vmem:[#allocation5 + $0x5ec] ss:$16 sps:$4 sm:$0xff]  }
 0x101   :  { %4895 = vmatmul.mubr.bf16.vlgmr.msra.gmra.mrb[0].mxu0 %v167_v15  ;;  %5411 = vmatmul.mubr.bf16.vlgmr.msra.gmra.mrb[0].mxu1 %v167_v15  ;;  %v7652_v15 = vld [vmem:[#allocation5 + $0x604] ss:$16 sps:$4 sm:$0xff]  }
 0x102   :  { %4906 = vmatpush1.bf16.msra.mxu0 %v7554_v13  ;;  %5422 = vmatpush1.bf16.msra.mxu1 %v7557_v14  ;;  %v7644_v13 = vld [vmem:[#allocation5 + $0x5e0] ss:$16 sps:$4 sm:$0xff]   ;;  %v7647_v14 = vld [vmem:[#allocation5 + $0x5e8] ss:$16 sps:$4 sm:$0xff]  }
 0x103   :  { %4907 = vmatprep.subr.bf16.mxu0 %v7562_v16  ;;  %5423 = vmatprep.subr.bf16.mxu1 %v7565_v17  ;;  %v121_v16 = vld [vmem:[#allocation2 + $0x20] sm:$0xff] }
 0x104   :  { %4937 = vmatprep.mubr.bf16.mxu0 %v170_v22  ;;  %5453 = vmatprep.mubr.bf16.mxu1 %v170_v22  ;;  %v145_v17 = vld [vmem:[#allocation2 + $0xe0] sm:$0xff]  ;;  %v124_v22 = vld [vmem:[#allocation2 + $0x38] sm:$0xff] }
 0x106   :  { %4908 = vmatpush1.bf16.msra.mxu0 %v7560_v20  ;;  %5424 = vmatpush1.bf16.msra.mxu1 %v7563_v21  ;;  %v7653_v20 = vld [vmem:[#allocation5 + $0x608] ss:$16 sps:$4 sm:$0xff]   ;;  %v169_v21 = vpack.c.bf16 %v145_v17, %v121_v16  ;;  %v7742_v17 = vld [vmem:[#allocation5 + $0x7e4] ss:$16 sps:$4 sm:$0xff]  }
 0x107   :  { %4909 = vmatprep.subr.bf16.mxu0 %v7568_v23  ;;  %5425 = vmatprep.subr.bf16.mxu1 %v7571_v24  ;;  %v148_v23 = vld [vmem:[#allocation2 + $0xf8] sm:$0xff]  ;;  %v7658_v24 = vld [vmem:[#allocation5 + $0x624] ss:$16 sps:$4 sm:$0xff]  }
 0x108   :  { %v7737_v16 = vld [vmem:[#allocation5 + $0x7c8] ss:$16 sps:$4 sm:$0xff]  }
 0x10a   :  { %4910 = vmatpush1.bf16.msra.mxu0 %v7566_v25  ;;  %5426 = vmatpush1.bf16.msra.mxu1 %v7569_v26  ;;  %v7661_v25 = vld [vmem:[#allocation5 + $0x62c] ss:$16 sps:$4 sm:$0xff]   ;;  %v172_v26 = vpack.c.bf16 %v148_v23, %v124_v22  ;;  %v123_v22 = vld [vmem:[#allocation2 + $0x30] sm:$0xff] }
 0x10b   :  { %4911 = vmatprep.subr.bf16.mxu0 %v7574_v27  ;;  %5427 = vmatprep.subr.bf16.mxu1 %v7577_v28  ;;  %v7656_v27 = vld [vmem:[#allocation5 + $0x620] ss:$16 sps:$4 sm:$0xff]   ;;  %v7659_v28 = vld [vmem:[#allocation5 + $0x628] ss:$16 sps:$4 sm:$0xff]  }
 0x10c   :  { %v147_v23 = vld [vmem:[#allocation2 + $0xf0] sm:$0xff] }
 0x10e   :  { %4912 = vmatpush1.bf16.msra.mxu0 %v7572_v29  ;;  %5428 = vmatpush1.bf16.msra.mxu1 %v7575_v30  ;;  %v7664_v29 = vld [vmem:[#allocation5 + $0x644] ss:$16 sps:$4 sm:$0xff]   ;;  %v7667_v30 = vld [vmem:[#allocation5 + $0x64c] ss:$16 sps:$4 sm:$0xff]  }
 0x10f   :  { %4913 = vmatprep.subr.bf16.mxu0 %v7580_v31  ;;  %5429 = vmatprep.subr.bf16.mxu1 %v7583_v32  ;;  %v7662_v31 = vld [vmem:[#allocation5 + $0x640] ss:$16 sps:$4 sm:$0xff]   ;;  %v7665_v32 = vld [vmem:[#allocation5 + $0x648] ss:$16 sps:$4 sm:$0xff]  }
 0x112   :  { %4914 = vmatpush1.bf16.msra.mxu0 %v7578_v33  ;;  %5430 = vmatpush1.bf16.msra.mxu1 %v7581_v34  ;;  %v7670_v33 = vld [vmem:[#allocation5 + $0x664] ss:$16 sps:$4 sm:$0xff]   ;;  %v7673_v34 = vld [vmem:[#allocation5 + $0x66c] ss:$16 sps:$4 sm:$0xff]  }
 0x113   :  { %4915 = vmatprep.subr.bf16.mxu0 %v7586_v35  ;;  %5431 = vmatprep.subr.bf16.mxu1 %v7589_v36  ;;  %v7668_v35 = vld [vmem:[#allocation5 + $0x660] ss:$16 sps:$4 sm:$0xff]   ;;  %v7671_v36 = vld [vmem:[#allocation5 + $0x668] ss:$16 sps:$4 sm:$0xff]  }
 0x116   :  { %4916 = vmatpush1.bf16.msra.mxu0 %v7584_v37  ;;  %5432 = vmatpush1.bf16.msra.mxu1 %v7587_v38  ;;  %v7676_v37 = vld [vmem:[#allocation5 + $0x684] ss:$16 sps:$4 sm:$0xff]   ;;  %v7679_v38 = vld [vmem:[#allocation5 + $0x68c] ss:$16 sps:$4 sm:$0xff]  }
 0x117   :  { %4917 = vmatprep.subr.bf16.mxu0 %v7592_v39  ;;  %5433 = vmatprep.subr.bf16.mxu1 %v7595_v40  ;;  %v7674_v39 = vld [vmem:[#allocation5 + $0x680] ss:$16 sps:$4 sm:$0xff]   ;;  %v7677_v40 = vld [vmem:[#allocation5 + $0x688] ss:$16 sps:$4 sm:$0xff]  }
 0x11a   :  { %4918 = vmatpush1.bf16.msra.mxu0 %v7590_v41  ;;  %5434 = vmatpush1.bf16.msra.mxu1 %v7593_v42  ;;  %v7682_v41 = vld [vmem:[#allocation5 + $0x6a4] ss:$16 sps:$4 sm:$0xff]   ;;  %v7685_v42 = vld [vmem:[#allocation5 + $0x6ac] ss:$16 sps:$4 sm:$0xff]  }
 0x11b   :  { %4919 = vmatprep.subr.bf16.mxu0 %v7598_v43  ;;  %5435 = vmatprep.subr.bf16.mxu1 %v7601_v44  ;;  %v7680_v43 = vld [vmem:[#allocation5 + $0x6a0] ss:$16 sps:$4 sm:$0xff]   ;;  %v7683_v44 = vld [vmem:[#allocation5 + $0x6a8] ss:$16 sps:$4 sm:$0xff]  }
 0x11e   :  { %4920 = vmatpush1.bf16.msra.mxu0 %v7596_v45  ;;  %5436 = vmatpush1.bf16.msra.mxu1 %v7599_v46  ;;  %v7688_v45 = vld [vmem:[#allocation5 + $0x6c4] ss:$16 sps:$4 sm:$0xff]   ;;  %v7691_v46 = vld [vmem:[#allocation5 + $0x6cc] ss:$16 sps:$4 sm:$0xff]  }
 0x11f   :  { %4921 = vmatprep.subr.bf16.mxu0 %v7604_v47  ;;  %5437 = vmatprep.subr.bf16.mxu1 %v7607_v48  ;;  %v7686_v47 = vld [vmem:[#allocation5 + $0x6c0] ss:$16 sps:$4 sm:$0xff]   ;;  %v7689_v48 = vld [vmem:[#allocation5 + $0x6c8] ss:$16 sps:$4 sm:$0xff]  }
 0x122   :  { %4922 = vmatpush1.bf16.msra.mxu0 %v7602_v49  ;;  %5438 = vmatpush1.bf16.msra.mxu1 %v7605_v50  ;;  %v7694_v49 = vld [vmem:[#allocation5 + $0x6e4] ss:$16 sps:$4 sm:$0xff]   ;;  %v7697_v50 = vld [vmem:[#allocation5 + $0x6ec] ss:$16 sps:$4 sm:$0xff]  }
 0x123   :  { %4923 = vmatprep.subr.bf16.mxu0 %v7610_v51  ;;  %5439 = vmatprep.subr.bf16.mxu1 %v7613_v52  ;;  %v7692_v51 = vld [vmem:[#allocation5 + $0x6e0] ss:$16 sps:$4 sm:$0xff]   ;;  %v7695_v52 = vld [vmem:[#allocation5 + $0x6e8] ss:$16 sps:$4 sm:$0xff]  }
 0x126   :  { %4924 = vmatpush1.bf16.msra.mxu0 %v7608_v53  ;;  %5440 = vmatpush1.bf16.msra.mxu1 %v7611_v54  ;;  %v7700_v53 = vld [vmem:[#allocation5 + $0x704] ss:$16 sps:$4 sm:$0xff]   ;;  %v7703_v54 = vld [vmem:[#allocation5 + $0x70c] ss:$16 sps:$4 sm:$0xff]  }
 0x127   :  { %4925 = vmatprep.subr.bf16.mxu0 %v7616_v55  ;;  %5441 = vmatprep.subr.bf16.mxu1 %v7619_v56  ;;  %v7698_v55 = vld [vmem:[#allocation5 + $0x700] ss:$16 sps:$4 sm:$0xff]   ;;  %v7701_v56 = vld [vmem:[#allocation5 + $0x708] ss:$16 sps:$4 sm:$0xff]  }
 0x12a   :  { %4926 = vmatpush1.bf16.msra.mxu0 %v7614_v57  ;;  %5442 = vmatpush1.bf16.msra.mxu1 %v7617_v58  ;;  %v7706_v57 = vld [vmem:[#allocation5 + $0x724] ss:$16 sps:$4 sm:$0xff]   ;;  %v7709_v58 = vld [vmem:[#allocation5 + $0x72c] ss:$16 sps:$4 sm:$0xff]  }
 0x12b   :  { %4927 = vmatprep.subr.bf16.mxu0 %v7622_v59  ;;  %5443 = vmatprep.subr.bf16.mxu1 %v7625_v60  ;;  %v7704_v59 = vld [vmem:[#allocation5 + $0x720] ss:$16 sps:$4 sm:$0xff]   ;;  %v7707_v60 = vld [vmem:[#allocation5 + $0x728] ss:$16 sps:$4 sm:$0xff]  }
 0x12e   :  { %4928 = vmatpush1.bf16.msra.mxu0 %v7620_v61  ;;  %5444 = vmatpush1.bf16.msra.mxu1 %v7623_v62  ;;  %v7712_v61 = vld [vmem:[#allocation5 + $0x744] ss:$16 sps:$4 sm:$0xff]   ;;  %v7715_v62 = vld [vmem:[#allocation5 + $0x74c] ss:$16 sps:$4 sm:$0xff]  }
 0x12f   :  { %4929 = vmatprep.subr.bf16.mxu0 %v7628_v63  ;;  %5445 = vmatprep.subr.bf16.mxu1 %v7631_v0  ;;  %v7710_v63 = vld [vmem:[#allocation5 + $0x740] ss:$16 sps:$4 sm:$0xff]   ;;  %v7713_v0 = vld [vmem:[#allocation5 + $0x748] ss:$16 sps:$4 sm:$0xff]  }
 0x132   :  { %4930 = vmatpush1.bf16.msra.mxu0 %v7626_v1  ;;  %5446 = vmatpush1.bf16.msra.mxu1 %v7629_v2  ;;  %v7718_v1 = vld [vmem:[#allocation5 + $0x764] ss:$16 sps:$4 sm:$0xff]   ;;  %v7721_v2 = vld [vmem:[#allocation5 + $0x76c] ss:$16 sps:$4 sm:$0xff]  }
 0x133   :  { %4931 = vmatprep.subr.bf16.mxu0 %v7634_v3  ;;  %5447 = vmatprep.subr.bf16.mxu1 %v7637_v4  ;;  %v7716_v3 = vld [vmem:[#allocation5 + $0x760] ss:$16 sps:$4 sm:$0xff]   ;;  %v7719_v4 = vld [vmem:[#allocation5 + $0x768] ss:$16 sps:$4 sm:$0xff]  }
 0x136   :  { %4932 = vmatpush1.bf16.msra.mxu0 %v7632_v5  ;;  %5448 = vmatpush1.bf16.msra.mxu1 %v7635_v6  ;;  %v7724_v5 = vld [vmem:[#allocation5 + $0x784] ss:$16 sps:$4 sm:$0xff]   ;;  %v7727_v6 = vld [vmem:[#allocation5 + $0x78c] ss:$16 sps:$4 sm:$0xff]  }
 0x137   :  { %4933 = vmatprep.subr.bf16.mxu0 %v7640_v7  ;;  %5449 = vmatprep.subr.bf16.mxu1 %v7643_v8  ;;  %v7722_v7 = vld [vmem:[#allocation5 + $0x780] ss:$16 sps:$4 sm:$0xff]   ;;  %v7725_v8 = vld [vmem:[#allocation5 + $0x788] ss:$16 sps:$4 sm:$0xff]  }
 0x13a   :  { %4934 = vmatpush1.bf16.msra.mxu0 %v7638_v9  ;;  %5450 = vmatpush1.bf16.msra.mxu1 %v7641_v10  ;;  %v7730_v9 = vld [vmem:[#allocation5 + $0x7a4] ss:$16 sps:$4 sm:$0xff]   ;;  %v7733_v10 = vld [vmem:[#allocation5 + $0x7ac] ss:$16 sps:$4 sm:$0xff]  }
 0x13b   :  { %4935 = vmatprep.subr.bf16.mxu0 %v7646_v11  ;;  %5451 = vmatprep.subr.bf16.mxu1 %v7649_v12  ;;  %v7728_v11 = vld [vmem:[#allocation5 + $0x7a0] ss:$16 sps:$4 sm:$0xff]   ;;  %v7731_v12 = vld [vmem:[#allocation5 + $0x7a8] ss:$16 sps:$4 sm:$0xff]  }
 0x13e   :  { %4936 = vmatpush1.bf16.msra.mxu0 %v7644_v13  ;;  %5452 = vmatpush1.bf16.msra.mxu1 %v7647_v14  ;;  %v7736_v13 = vld [vmem:[#allocation5 + $0x7c4] ss:$16 sps:$4 sm:$0xff]   ;;  %v7739_v14 = vld [vmem:[#allocation5 + $0x7cc] ss:$16 sps:$4 sm:$0xff]  }
 0x13f   :  { %4948 = vmatprep.subr.bf16.mxu0 %v7652_v15  ;;  %5464 = vmatprep.subr.bf16.mxu1 %v7655_v18  ;;  %v7734_v15 = vld [vmem:[#allocation5 + $0x7c0] ss:$16 sps:$4 sm:$0xff]   ;;  %v7745_v18 = vld [vmem:[#allocation5 + $0x7ec] ss:$16 sps:$4 sm:$0xff]  }
 0x141   :  { %4938 = vmatmul.mubr.bf16.vlgmr.msra.gmra.mrb[0].mxu0 %v169_v21  ;;  %5454 = vmatmul.mubr.bf16.vlgmr.msra.gmra.mrb[0].mxu1 %v169_v21  ;;  %v7748_v21 = vld [vmem:[#allocation5 + $0x804] ss:$16 sps:$4 sm:$0xff]  }
 0x142   :  { %4949 = vmatpush1.bf16.msra.mxu0 %v7650_v19  ;;  %5465 = vmatpush1.bf16.msra.mxu1 %v7653_v20  ;;  %v7740_v19 = vld [vmem:[#allocation5 + $0x7e0] ss:$16 sps:$4 sm:$0xff]   ;;  %v7743_v20 = vld [vmem:[#allocation5 + $0x7e8] ss:$16 sps:$4 sm:$0xff]  }
 0x143   :  { %4950 = vmatprep.subr.bf16.mxu0 %v7658_v24  ;;  %5466 = vmatprep.subr.bf16.mxu1 %v7661_v25  ;;  %v7751_v24 = vld [vmem:[#allocation5 + $0x80c] ss:$16 sps:$4 sm:$0xff]   ;;  %v7746_v25 = vld [vmem:[#allocation5 + $0x800] ss:$16 sps:$4 sm:$0xff]  }
 0x144   :  { %4980 = vmatprep.mubr.bf16.mxu0 %v172_v26  ;;  %5496 = vmatprep.mubr.bf16.mxu1 %v172_v26  ;;  %v7749_v26 = vld [vmem:[#allocation5 + $0x808] ss:$16 sps:$4 sm:$0xff]  }
 0x146   :  { %4951 = vmatpush1.bf16.msra.mxu0 %v7656_v27  ;;  %5467 = vmatpush1.bf16.msra.mxu1 %v7659_v28  ;;  %v171_v27 = vpack.c.bf16 %v147_v23, %v123_v22  ;;  %v126_v28 = vld [vmem:[#allocation2 + $0x48] sm:$0xff]  ;;  %v7838_v23 = vld [vmem:[#allocation5 + $0x9e4] ss:$16 sps:$4 sm:$0xff]  }
 0x147   :  { %4952 = vmatprep.subr.bf16.mxu0 %v7664_v29  ;;  %5468 = vmatprep.subr.bf16.mxu1 %v7667_v30  ;;  %v150_v29 = vld [vmem:[#allocation2 + $0x108] sm:$0xff]  ;;  %v7754_v30 = vld [vmem:[#allocation5 + $0x824] ss:$16 sps:$4 sm:$0xff]  }
 0x148   :  { %v7833_v22 = vld [vmem:[#allocation5 + $0x9c8] ss:$16 sps:$4 sm:$0xff]  }
 0x14a   :  { %4953 = vmatpush1.bf16.msra.mxu0 %v7662_v31  ;;  %5469 = vmatpush1.bf16.msra.mxu1 %v7665_v32  ;;  %v7757_v31 = vld [vmem:[#allocation5 + $0x82c] ss:$16 sps:$4 sm:$0xff]   ;;  %v174_v32 = vpack.c.bf16 %v150_v29, %v126_v28  ;;  %v125_v29 = vld [vmem:[#allocation2 + $0x40] sm:$0xff] }
 0x14b   :  { %4954 = vmatprep.subr.bf16.mxu0 %v7670_v33  ;;  %5470 = vmatprep.subr.bf16.mxu1 %v7673_v34  ;;  %v7752_v33 = vld [vmem:[#allocation5 + $0x820] ss:$16 sps:$4 sm:$0xff]   ;;  %v7755_v34 = vld [vmem:[#allocation5 + $0x828] ss:$16 sps:$4 sm:$0xff]   ;;  %v7847_v28 = vld [vmem:[#allocation5 + $0xa0c] ss:$16 sps:$4 sm:$0xff]  }
 0x14e   :  { %4955 = vmatpush1.bf16.msra.mxu0 %v7668_v35  ;;  %5471 = vmatpush1.bf16.msra.mxu1 %v7671_v36  ;;  %v7760_v35 = vld [vmem:[#allocation5 + $0x844] ss:$16 sps:$4 sm:$0xff]   ;;  %v7763_v36 = vld [vmem:[#allocation5 + $0x84c] ss:$16 sps:$4 sm:$0xff]  }
 0x14f   :  { %4956 = vmatprep.subr.bf16.mxu0 %v7676_v37  ;;  %5472 = vmatprep.subr.bf16.mxu1 %v7679_v38  ;;  %v7758_v37 = vld [vmem:[#allocation5 + $0x840] ss:$16 sps:$4 sm:$0xff]   ;;  %v7761_v38 = vld [vmem:[#allocation5 + $0x848] ss:$16 sps:$4 sm:$0xff]  }
 0x152   :  { %4957 = vmatpush1.bf16.msra.mxu0 %v7674_v39  ;;  %5473 = vmatpush1.bf16.msra.mxu1 %v7677_v40  ;;  %v7766_v39 = vld [vmem:[#allocation5 + $0x864] ss:$16 sps:$4 sm:$0xff]   ;;  %v7769_v40 = vld [vmem:[#allocation5 + $0x86c] ss:$16 sps:$4 sm:$0xff]  }
 0x153   :  { %4958 = vmatprep.subr.bf16.mxu0 %v7682_v41  ;;  %5474 = vmatprep.subr.bf16.mxu1 %v7685_v42  ;;  %v7764_v41 = vld [vmem:[#allocation5 + $0x860] ss:$16 sps:$4 sm:$0xff]   ;;  %v7767_v42 = vld [vmem:[#allocation5 + $0x868] ss:$16 sps:$4 sm:$0xff]  }
 0x156   :  { %4959 = vmatpush1.bf16.msra.mxu0 %v7680_v43  ;;  %5475 = vmatpush1.bf16.msra.mxu1 %v7683_v44  ;;  %v7772_v43 = vld [vmem:[#allocation5 + $0x884] ss:$16 sps:$4 sm:$0xff]   ;;  %v7775_v44 = vld [vmem:[#allocation5 + $0x88c] ss:$16 sps:$4 sm:$0xff]  }
 0x157   :  { %4960 = vmatprep.subr.bf16.mxu0 %v7688_v45  ;;  %5476 = vmatprep.subr.bf16.mxu1 %v7691_v46  ;;  %v7770_v45 = vld [vmem:[#allocation5 + $0x880] ss:$16 sps:$4 sm:$0xff]   ;;  %v7773_v46 = vld [vmem:[#allocation5 + $0x888] ss:$16 sps:$4 sm:$0xff]  }
 0x15a   :  { %4961 = vmatpush1.bf16.msra.mxu0 %v7686_v47  ;;  %5477 = vmatpush1.bf16.msra.mxu1 %v7689_v48  ;;  %v7778_v47 = vld [vmem:[#allocation5 + $0x8a4] ss:$16 sps:$4 sm:$0xff]   ;;  %v7781_v48 = vld [vmem:[#allocation5 + $0x8ac] ss:$16 sps:$4 sm:$0xff]  }
 0x15b   :  { %4962 = vmatprep.subr.bf16.mxu0 %v7694_v49  ;;  %5478 = vmatprep.subr.bf16.mxu1 %v7697_v50  ;;  %v7776_v49 = vld [vmem:[#allocation5 + $0x8a0] ss:$16 sps:$4 sm:$0xff]   ;;  %v7779_v50 = vld [vmem:[#allocation5 + $0x8a8] ss:$16 sps:$4 sm:$0xff]  }
 0x15e   :  { %4963 = vmatpush1.bf16.msra.mxu0 %v7692_v51  ;;  %5479 = vmatpush1.bf16.msra.mxu1 %v7695_v52  ;;  %v7784_v51 = vld [vmem:[#allocation5 + $0x8c4] ss:$16 sps:$4 sm:$0xff]   ;;  %v7787_v52 = vld [vmem:[#allocation5 + $0x8cc] ss:$16 sps:$4 sm:$0xff]  }
 0x15f   :  { %4964 = vmatprep.subr.bf16.mxu0 %v7700_v53  ;;  %5480 = vmatprep.subr.bf16.mxu1 %v7703_v54  ;;  %v7782_v53 = vld [vmem:[#allocation5 + $0x8c0] ss:$16 sps:$4 sm:$0xff]   ;;  %v7785_v54 = vld [vmem:[#allocation5 + $0x8c8] ss:$16 sps:$4 sm:$0xff]  }
 0x162   :  { %4965 = vmatpush1.bf16.msra.mxu0 %v7698_v55  ;;  %5481 = vmatpush1.bf16.msra.mxu1 %v7701_v56  ;;  %v7790_v55 = vld [vmem:[#allocation5 + $0x8e4] ss:$16 sps:$4 sm:$0xff]   ;;  %v7793_v56 = vld [vmem:[#allocation5 + $0x8ec] ss:$16 sps:$4 sm:$0xff]  }
 0x163   :  { %4966 = vmatprep.subr.bf16.mxu0 %v7706_v57  ;;  %5482 = vmatprep.subr.bf16.mxu1 %v7709_v58  ;;  %v7788_v57 = vld [vmem:[#allocation5 + $0x8e0] ss:$16 sps:$4 sm:$0xff]   ;;  %v7791_v58 = vld [vmem:[#allocation5 + $0x8e8] ss:$16 sps:$4 sm:$0xff]  }
 0x166   :  { %4967 = vmatpush1.bf16.msra.mxu0 %v7704_v59  ;;  %5483 = vmatpush1.bf16.msra.mxu1 %v7707_v60  ;;  %v7796_v59 = vld [vmem:[#allocation5 + $0x904] ss:$16 sps:$4 sm:$0xff]   ;;  %v7799_v60 = vld [vmem:[#allocation5 + $0x90c] ss:$16 sps:$4 sm:$0xff]  }
 0x167   :  { %4968 = vmatprep.subr.bf16.mxu0 %v7712_v61  ;;  %5484 = vmatprep.subr.bf16.mxu1 %v7715_v62  ;;  %v7794_v61 = vld [vmem:[#allocation5 + $0x900] ss:$16 sps:$4 sm:$0xff]   ;;  %v7797_v62 = vld [vmem:[#allocation5 + $0x908] ss:$16 sps:$4 sm:$0xff]  }
 0x16a   :  { %4969 = vmatpush1.bf16.msra.mxu0 %v7710_v63  ;;  %5485 = vmatpush1.bf16.msra.mxu1 %v7713_v0  ;;  %v7802_v63 = vld [vmem:[#allocation5 + $0x924] ss:$16 sps:$4 sm:$0xff]   ;;  %v7805_v0 = vld [vmem:[#allocation5 + $0x92c] ss:$16 sps:$4 sm:$0xff]  }
 0x16b   :  { %4970 = vmatprep.subr.bf16.mxu0 %v7718_v1  ;;  %5486 = vmatprep.subr.bf16.mxu1 %v7721_v2  ;;  %v7800_v1 = vld [vmem:[#allocation5 + $0x920] ss:$16 sps:$4 sm:$0xff]   ;;  %v7803_v2 = vld [vmem:[#allocation5 + $0x928] ss:$16 sps:$4 sm:$0xff]  }
 0x16e   :  { %4971 = vmatpush1.bf16.msra.mxu0 %v7716_v3  ;;  %5487 = vmatpush1.bf16.msra.mxu1 %v7719_v4  ;;  %v7808_v3 = vld [vmem:[#allocation5 + $0x944] ss:$16 sps:$4 sm:$0xff]   ;;  %v7811_v4 = vld [vmem:[#allocation5 + $0x94c] ss:$16 sps:$4 sm:$0xff]  }
 0x16f   :  { %4972 = vmatprep.subr.bf16.mxu0 %v7724_v5  ;;  %5488 = vmatprep.subr.bf16.mxu1 %v7727_v6  ;;  %v7806_v5 = vld [vmem:[#allocation5 + $0x940] ss:$16 sps:$4 sm:$0xff]   ;;  %v7809_v6 = vld [vmem:[#allocation5 + $0x948] ss:$16 sps:$4 sm:$0xff]  }
 0x172   :  { %4973 = vmatpush1.bf16.msra.mxu0 %v7722_v7  ;;  %5489 = vmatpush1.bf16.msra.mxu1 %v7725_v8  ;;  %v7814_v7 = vld [vmem:[#allocation5 + $0x964] ss:$16 sps:$4 sm:$0xff]   ;;  %v7817_v8 = vld [vmem:[#allocation5 + $0x96c] ss:$16 sps:$4 sm:$0xff]  }
 0x173   :  { %4974 = vmatprep.subr.bf16.mxu0 %v7730_v9  ;;  %5490 = vmatprep.subr.bf16.mxu1 %v7733_v10  ;;  %v7812_v9 = vld [vmem:[#allocation5 + $0x960] ss:$16 sps:$4 sm:$0xff]   ;;  %v7815_v10 = vld [vmem:[#allocation5 + $0x968] ss:$16 sps:$4 sm:$0xff]  }
 0x176   :  { %4975 = vmatpush1.bf16.msra.mxu0 %v7728_v11  ;;  %5491 = vmatpush1.bf16.msra.mxu1 %v7731_v12  ;;  %v7820_v11 = vld [vmem:[#allocation5 + $0x984] ss:$16 sps:$4 sm:$0xff]   ;;  %v7823_v12 = vld [vmem:[#allocation5 + $0x98c] ss:$16 sps:$4 sm:$0xff]  }
 0x177   :  { %4976 = vmatprep.subr.bf16.mxu0 %v7736_v13  ;;  %5492 = vmatprep.subr.bf16.mxu1 %v7739_v14  ;;  %v7818_v13 = vld [vmem:[#allocation5 + $0x980] ss:$16 sps:$4 sm:$0xff]   ;;  %v7821_v14 = vld [vmem:[#allocation5 + $0x988] ss:$16 sps:$4 sm:$0xff]  }
 0x17a   :  { %4977 = vmatpush1.bf16.msra.mxu0 %v7734_v15  ;;  %5493 = vmatpush1.bf16.msra.mxu1 %v7737_v16  ;;  %v7826_v15 = vld [vmem:[#allocation5 + $0x9a4] ss:$16 sps:$4 sm:$0xff]   ;;  %v7829_v16 = vld [vmem:[#allocation5 + $0x9ac] ss:$16 sps:$4 sm:$0xff]  }
 0x17b   :  { %4978 = vmatprep.subr.bf16.mxu0 %v7742_v17  ;;  %5494 = vmatprep.subr.bf16.mxu1 %v7745_v18  ;;  %v7824_v17 = vld [vmem:[#allocation5 + $0x9a0] ss:$16 sps:$4 sm:$0xff]   ;;  %v7827_v18 = vld [vmem:[#allocation5 + $0x9a8] ss:$16 sps:$4 sm:$0xff]  }
 0x17e   :  { %4979 = vmatpush1.bf16.msra.mxu0 %v7740_v19  ;;  %5495 = vmatpush1.bf16.msra.mxu1 %v7743_v20  ;;  %v7832_v19 = vld [vmem:[#allocation5 + $0x9c4] ss:$16 sps:$4 sm:$0xff]   ;;  %v7835_v20 = vld [vmem:[#allocation5 + $0x9cc] ss:$16 sps:$4 sm:$0xff]  }
 0x17f   :  { %4991 = vmatprep.subr.bf16.mxu0 %v7748_v21  ;;  %5507 = vmatprep.subr.bf16.mxu1 %v7751_v24  ;;  %v7830_v21 = vld [vmem:[#allocation5 + $0x9c0] ss:$16 sps:$4 sm:$0xff]   ;;  %v7841_v24 = vld [vmem:[#allocation5 + $0x9ec] ss:$16 sps:$4 sm:$0xff]  }
 0x181   :  { %4981 = vmatmul.mubr.bf16.vlgmr.msra.gmra.mrb[0].mxu0 %v171_v27  ;;  %5497 = vmatmul.mubr.bf16.vlgmr.msra.gmra.mrb[0].mxu1 %v171_v27  ;;  %v7844_v27 = vld [vmem:[#allocation5 + $0xa04] ss:$16 sps:$4 sm:$0xff]  }
 0x182   :  { %4992 = vmatpush1.bf16.msra.mxu0 %v7746_v25  ;;  %5508 = vmatpush1.bf16.msra.mxu1 %v7749_v26  ;;  %v7836_v25 = vld [vmem:[#allocation5 + $0x9e0] ss:$16 sps:$4 sm:$0xff]   ;;  %v7839_v26 = vld [vmem:[#allocation5 + $0x9e8] ss:$16 sps:$4 sm:$0xff]  }
 0x183   :  { %4993 = vmatprep.subr.bf16.mxu0 %v7754_v30  ;;  %5509 = vmatprep.subr.bf16.mxu1 %v7757_v31  ;;  %v149_v30 = vld [vmem:[#allocation2 + $0x100] sm:$0xff]  ;;  %v128_v31 = vld [vmem:[#allocation2 + $0x58] sm:$0xff] }
 0x184   :  { %5023 = vmatprep.mubr.bf16.mxu0 %v174_v32  ;;  %5539 = vmatprep.mubr.bf16.mxu1 %v174_v32  ;;  %v152_v32 = vld [vmem:[#allocation2 + $0x118] sm:$0xff] }
 0x186   :  { %4994 = vmatpush1.bf16.msra.mxu0 %v7752_v33  ;;  %5510 = vmatpush1.bf16.msra.mxu1 %v7755_v34  ;;  %v173_v33 = vpack.c.bf16 %v149_v30, %v125_v29  ;;  %v7842_v34 = vld [vmem:[#allocation5 + $0xa00] ss:$16 sps:$4 sm:$0xff]   ;;  %v7934_v29 = vld [vmem:[#allocation5 + $0xbe4] ss:$16 sps:$4 sm:$0xff]   ;;  %v7937_v30 = vld [vmem:[#allocation5 + $0xbec] ss:$16 sps:$4 sm:$0xff]  }
 0x187   :  { %4995 = vmatprep.subr.bf16.mxu0 %v7760_v35  ;;  %5511 = vmatprep.subr.bf16.mxu1 %v7763_v36  ;;  %v7845_v35 = vld [vmem:[#allocation5 + $0xa08] ss:$16 sps:$4 sm:$0xff]   ;;  %v7850_v36 = vld [vmem:[#allocation5 + $0xa24] ss:$16 sps:$4 sm:$0xff]  }
 0x18a   :  { %4996 = vmatpush1.bf16.msra.mxu0 %v7758_v37  ;;  %5512 = vmatpush1.bf16.msra.mxu1 %v7761_v38  ;;  %v7853_v37 = vld [vmem:[#allocation5 + $0xa2c] ss:$16 sps:$4 sm:$0xff]   ;;  %v176_v38 = vpack.c.bf16 %v152_v32, %v128_v31  ;;  %v7932_v31 = vld [vmem:[#allocation5 + $0xbe0] ss:$16 sps:$4 sm:$0xff]   ;;  %v7935_v32 = vld [vmem:[#allocation5 + $0xbe8] ss:$16 sps:$4 sm:$0xff]  }
 0x18b   :  { %4997 = vmatprep.subr.bf16.mxu0 %v7766_v39  ;;  %5513 = vmatprep.subr.bf16.mxu1 %v7769_v40  ;;  %v7848_v39 = vld [vmem:[#allocation5 + $0xa20] ss:$16 sps:$4 sm:$0xff]   ;;  %v7851_v40 = vld [vmem:[#allocation5 + $0xa28] ss:$16 sps:$4 sm:$0xff]  }
 0x18e   :  { %4998 = vmatpush1.bf16.msra.mxu0 %v7764_v41  ;;  %5514 = vmatpush1.bf16.msra.mxu1 %v7767_v42  ;;  %v7856_v41 = vld [vmem:[#allocation5 + $0xa44] ss:$16 sps:$4 sm:$0xff]   ;;  %v7859_v42 = vld [vmem:[#allocation5 + $0xa4c] ss:$16 sps:$4 sm:$0xff]  }
 0x18f   :  { %4999 = vmatprep.subr.bf16.mxu0 %v7772_v43  ;;  %5515 = vmatprep.subr.bf16.mxu1 %v7775_v44  ;;  %v7854_v43 = vld [vmem:[#allocation5 + $0xa40] ss:$16 sps:$4 sm:$0xff]   ;;  %v7857_v44 = vld [vmem:[#allocation5 + $0xa48] ss:$16 sps:$4 sm:$0xff]  }
 0x192   :  { %5000 = vmatpush1.bf16.msra.mxu0 %v7770_v45  ;;  %5516 = vmatpush1.bf16.msra.mxu1 %v7773_v46  ;;  %v7862_v45 = vld [vmem:[#allocation5 + $0xa64] ss:$16 sps:$4 sm:$0xff]   ;;  %v7865_v46 = vld [vmem:[#allocation5 + $0xa6c] ss:$16 sps:$4 sm:$0xff]  }
 0x193   :  { %5001 = vmatprep.subr.bf16.mxu0 %v7778_v47  ;;  %5517 = vmatprep.subr.bf16.mxu1 %v7781_v48  ;;  %v7860_v47 = vld [vmem:[#allocation5 + $0xa60] ss:$16 sps:$4 sm:$0xff]   ;;  %v7863_v48 = vld [vmem:[#allocation5 + $0xa68] ss:$16 sps:$4 sm:$0xff]  }
 0x196   :  { %5002 = vmatpush1.bf16.msra.mxu0 %v7776_v49  ;;  %5518 = vmatpush1.bf16.msra.mxu1 %v7779_v50  ;;  %v7868_v49 = vld [vmem:[#allocation5 + $0xa84] ss:$16 sps:$4 sm:$0xff]   ;;  %v7871_v50 = vld [vmem:[#allocation5 + $0xa8c] ss:$16 sps:$4 sm:$0xff]  }
 0x197   :  { %5003 = vmatprep.subr.bf16.mxu0 %v7784_v51  ;;  %5519 = vmatprep.subr.bf16.mxu1 %v7787_v52  ;;  %v7866_v51 = vld [vmem:[#allocation5 + $0xa80] ss:$16 sps:$4 sm:$0xff]   ;;  %v7869_v52 = vld [vmem:[#allocation5 + $0xa88] ss:$16 sps:$4 sm:$0xff]  }
 0x19a   :  { %5004 = vmatpush1.bf16.msra.mxu0 %v7782_v53  ;;  %5520 = vmatpush1.bf16.msra.mxu1 %v7785_v54  ;;  %v7874_v53 = vld [vmem:[#allocation5 + $0xaa4] ss:$16 sps:$4 sm:$0xff]   ;;  %v7877_v54 = vld [vmem:[#allocation5 + $0xaac] ss:$16 sps:$4 sm:$0xff]  }
 0x19b   :  { %5005 = vmatprep.subr.bf16.mxu0 %v7790_v55  ;;  %5521 = vmatprep.subr.bf16.mxu1 %v7793_v56  ;;  %v7872_v55 = vld [vmem:[#allocation5 + $0xaa0] ss:$16 sps:$4 sm:$0xff]   ;;  %v7875_v56 = vld [vmem:[#allocation5 + $0xaa8] ss:$16 sps:$4 sm:$0xff]  }
 0x19e   :  { %5006 = vmatpush1.bf16.msra.mxu0 %v7788_v57  ;;  %5522 = vmatpush1.bf16.msra.mxu1 %v7791_v58  ;;  %v7880_v57 = vld [vmem:[#allocation5 + $0xac4] ss:$16 sps:$4 sm:$0xff]   ;;  %v7883_v58 = vld [vmem:[#allocation5 + $0xacc] ss:$16 sps:$4 sm:$0xff]  }
 0x19f   :  { %5007 = vmatprep.subr.bf16.mxu0 %v7796_v59  ;;  %5523 = vmatprep.subr.bf16.mxu1 %v7799_v60  ;;  %v7878_v59 = vld [vmem:[#allocation5 + $0xac0] ss:$16 sps:$4 sm:$0xff]   ;;  %v7881_v60 = vld [vmem:[#allocation5 + $0xac8] ss:$16 sps:$4 sm:$0xff]  }
 0x1a2   :  { %5008 = vmatpush1.bf16.msra.mxu0 %v7794_v61  ;;  %5524 = vmatpush1.bf16.msra.mxu1 %v7797_v62  ;;  %v7886_v61 = vld [vmem:[#allocation5 + $0xae4] ss:$16 sps:$4 sm:$0xff]   ;;  %v7889_v62 = vld [vmem:[#allocation5 + $0xaec] ss:$16 sps:$4 sm:$0xff]  }
 0x1a3   :  { %5009 = vmatprep.subr.bf16.mxu0 %v7802_v63  ;;  %5525 = vmatprep.subr.bf16.mxu1 %v7805_v0  ;;  %v7884_v63 = vld [vmem:[#allocation5 + $0xae0] ss:$16 sps:$4 sm:$0xff]   ;;  %v7887_v0 = vld [vmem:[#allocation5 + $0xae8] ss:$16 sps:$4 sm:$0xff]  }
 0x1a6   :  { %5010 = vmatpush1.bf16.msra.mxu0 %v7800_v1  ;;  %5526 = vmatpush1.bf16.msra.mxu1 %v7803_v2  ;;  %v7892_v1 = vld [vmem:[#allocation5 + $0xb04] ss:$16 sps:$4 sm:$0xff]   ;;  %v7895_v2 = vld [vmem:[#allocation5 + $0xb0c] ss:$16 sps:$4 sm:$0xff]  }
 0x1a7   :  { %5011 = vmatprep.subr.bf16.mxu0 %v7808_v3  ;;  %5527 = vmatprep.subr.bf16.mxu1 %v7811_v4  ;;  %v7890_v3 = vld [vmem:[#allocation5 + $0xb00] ss:$16 sps:$4 sm:$0xff]   ;;  %v7893_v4 = vld [vmem:[#allocation5 + $0xb08] ss:$16 sps:$4 sm:$0xff]  }
 0x1aa   :  { %5012 = vmatpush1.bf16.msra.mxu0 %v7806_v5  ;;  %5528 = vmatpush1.bf16.msra.mxu1 %v7809_v6  ;;  %v7898_v5 = vld [vmem:[#allocation5 + $0xb24] ss:$16 sps:$4 sm:$0xff]   ;;  %v7901_v6 = vld [vmem:[#allocation5 + $0xb2c] ss:$16 sps:$4 sm:$0xff]  }
 0x1ab   :  { %5013 = vmatprep.subr.bf16.mxu0 %v7814_v7  ;;  %5529 = vmatprep.subr.bf16.mxu1 %v7817_v8  ;;  %v7896_v7 = vld [vmem:[#allocation5 + $0xb20] ss:$16 sps:$4 sm:$0xff]   ;;  %v7899_v8 = vld [vmem:[#allocation5 + $0xb28] ss:$16 sps:$4 sm:$0xff]  }
 0x1ae   :  { %5014 = vmatpush1.bf16.msra.mxu0 %v7812_v9  ;;  %5530 = vmatpush1.bf16.msra.mxu1 %v7815_v10  ;;  %v7904_v9 = vld [vmem:[#allocation5 + $0xb44] ss:$16 sps:$4 sm:$0xff]   ;;  %v7907_v10 = vld [vmem:[#allocation5 + $0xb4c] ss:$16 sps:$4 sm:$0xff]  }
 0x1af   :  { %5015 = vmatprep.subr.bf16.mxu0 %v7820_v11  ;;  %5531 = vmatprep.subr.bf16.mxu1 %v7823_v12  ;;  %v7902_v11 = vld [vmem:[#allocation5 + $0xb40] ss:$16 sps:$4 sm:$0xff]   ;;  %v7905_v12 = vld [vmem:[#allocation5 + $0xb48] ss:$16 sps:$4 sm:$0xff]  }
 0x1b2   :  { %5016 = vmatpush1.bf16.msra.mxu0 %v7818_v13  ;;  %5532 = vmatpush1.bf16.msra.mxu1 %v7821_v14  ;;  %v7910_v13 = vld [vmem:[#allocation5 + $0xb64] ss:$16 sps:$4 sm:$0xff]   ;;  %v7913_v14 = vld [vmem:[#allocation5 + $0xb6c] ss:$16 sps:$4 sm:$0xff]  }
 0x1b3   :  { %5017 = vmatprep.subr.bf16.mxu0 %v7826_v15  ;;  %5533 = vmatprep.subr.bf16.mxu1 %v7829_v16  ;;  %v7908_v15 = vld [vmem:[#allocation5 + $0xb60] ss:$16 sps:$4 sm:$0xff]   ;;  %v7911_v16 = vld [vmem:[#allocation5 + $0xb68] ss:$16 sps:$4 sm:$0xff]  }
 0x1b6   :  { %5018 = vmatpush1.bf16.msra.mxu0 %v7824_v17  ;;  %5534 = vmatpush1.bf16.msra.mxu1 %v7827_v18  ;;  %v7916_v17 = vld [vmem:[#allocation5 + $0xb84] ss:$16 sps:$4 sm:$0xff]   ;;  %v7919_v18 = vld [vmem:[#allocation5 + $0xb8c] ss:$16 sps:$4 sm:$0xff]  }
 0x1b7   :  { %5019 = vmatprep.subr.bf16.mxu0 %v7832_v19  ;;  %5535 = vmatprep.subr.bf16.mxu1 %v7835_v20  ;;  %v7914_v19 = vld [vmem:[#allocation5 + $0xb80] ss:$16 sps:$4 sm:$0xff]   ;;  %v7917_v20 = vld [vmem:[#allocation5 + $0xb88] ss:$16 sps:$4 sm:$0xff]  }
 0x1ba   :  { %5020 = vmatpush1.bf16.msra.mxu0 %v7830_v21  ;;  %5536 = vmatpush1.bf16.msra.mxu1 %v7833_v22  ;;  %v7922_v21 = vld [vmem:[#allocation5 + $0xba4] ss:$16 sps:$4 sm:$0xff]   ;;  %v7925_v22 = vld [vmem:[#allocation5 + $0xbac] ss:$16 sps:$4 sm:$0xff]  }
 0x1bb   :  { %5021 = vmatprep.subr.bf16.mxu0 %v7838_v23  ;;  %5537 = vmatprep.subr.bf16.mxu1 %v7841_v24  ;;  %v7920_v23 = vld [vmem:[#allocation5 + $0xba0] ss:$16 sps:$4 sm:$0xff]   ;;  %v7923_v24 = vld [vmem:[#allocation5 + $0xba8] ss:$16 sps:$4 sm:$0xff]  }
 0x1be   :  { %5022 = vmatpush1.bf16.msra.mxu0 %v7836_v25  ;;  %5538 = vmatpush1.bf16.msra.mxu1 %v7839_v26  ;;  %v7928_v25 = vld [vmem:[#allocation5 + $0xbc4] ss:$16 sps:$4 sm:$0xff]   ;;  %v7931_v26 = vld [vmem:[#allocation5 + $0xbcc] ss:$16 sps:$4 sm:$0xff]  }
 0x1bf   :  { %5034 = vmatprep.subr.bf16.mxu0 %v7844_v27  ;;  %5550 = vmatprep.subr.bf16.mxu1 %v7847_v28  ;;  %v7926_v27 = vld [vmem:[#allocation5 + $0xbc0] ss:$16 sps:$4 sm:$0xff]   ;;  %v7929_v28 = vld [vmem:[#allocation5 + $0xbc8] ss:$16 sps:$4 sm:$0xff]  }
 0x1c1   :  { %5024 = vmatmul.mubr.bf16.vlgmr.msra.gmra.mrb[0].mxu0 %v173_v33  ;;  %5540 = vmatmul.mubr.bf16.vlgmr.msra.gmra.mrb[0].mxu1 %v173_v33  ;;  %v7940_v33 = vld [vmem:[#allocation5 + $0xc04] ss:$16 sps:$4 sm:$0xff]  }
 0x1c2   :  { %5035 = vmatpush1.bf16.msra.mxu0 %v7842_v34  ;;  %5551 = vmatpush1.bf16.msra.mxu1 %v7845_v35  ;;  %v7943_v34 = vld [vmem:[#allocation5 + $0xc0c] ss:$16 sps:$4 sm:$0xff]   ;;  %v127_v35 = vld [vmem:[#allocation2 + $0x50] sm:$0xff] }
 0x1c3   :  { %5036 = vmatprep.subr.bf16.mxu0 %v7850_v36  ;;  %5552 = vmatprep.subr.bf16.mxu1 %v7853_v37  ;;  %v151_v36 = vld [vmem:[#allocation2 + $0x110] sm:$0xff]  ;;  %v130_v37 = vld [vmem:[#allocation2 + $0x68] sm:$0xff] }
 0x1c4   :  { %5066 = vmatprep.mubr.bf16.mxu0 %v176_v38  ;;  %5582 = vmatprep.mubr.bf16.mxu1 %v176_v38  ;;  %v154_v38 = vld [vmem:[#allocation2 + $0x128] sm:$0xff] }
 0x1c6   :  { %5037 = vmatpush1.bf16.msra.mxu0 %v7848_v39  ;;  %5553 = vmatpush1.bf16.msra.mxu1 %v7851_v40  ;;  %v175_v39 = vpack.c.bf16 %v151_v36, %v127_v35  ;;  %v7938_v40 = vld [vmem:[#allocation5 + $0xc00] ss:$16 sps:$4 sm:$0xff]   ;;  %v8030_v35 = vld [vmem:[#allocation5 + $0xde4] ss:$16 sps:$4 sm:$0xff]   ;;  %v8033_v36 = vld [vmem:[#allocation5 + $0xdec] ss:$16 sps:$4 sm:$0xff]  }
 0x1c7   :  { %5038 = vmatprep.subr.bf16.mxu0 %v7856_v41  ;;  %5554 = vmatprep.subr.bf16.mxu1 %v7859_v42  ;;  %v7941_v41 = vld [vmem:[#allocation5 + $0xc08] ss:$16 sps:$4 sm:$0xff]   ;;  %v7946_v42 = vld [vmem:[#allocation5 + $0xc24] ss:$16 sps:$4 sm:$0xff]  }
 0x1ca   :  { %5039 = vmatpush1.bf16.msra.mxu0 %v7854_v43  ;;  %5555 = vmatpush1.bf16.msra.mxu1 %v7857_v44  ;;  %v7949_v43 = vld [vmem:[#allocation5 + $0xc2c] ss:$16 sps:$4 sm:$0xff]   ;;  %v178_v44 = vpack.c.bf16 %v154_v38, %v130_v37  ;;  %v8028_v37 = vld [vmem:[#allocation5 + $0xde0] ss:$16 sps:$4 sm:$0xff]   ;;  %v8031_v38 = vld [vmem:[#allocation5 + $0xde8] ss:$16 sps:$4 sm:$0xff]  }
 0x1cb   :  { %5040 = vmatprep.subr.bf16.mxu0 %v7862_v45  ;;  %5556 = vmatprep.subr.bf16.mxu1 %v7865_v46  ;;  %v7944_v45 = vld [vmem:[#allocation5 + $0xc20] ss:$16 sps:$4 sm:$0xff]   ;;  %v7947_v46 = vld [vmem:[#allocation5 + $0xc28] ss:$16 sps:$4 sm:$0xff]  }
 0x1ce   :  { %5041 = vmatpush1.bf16.msra.mxu0 %v7860_v47  ;;  %5557 = vmatpush1.bf16.msra.mxu1 %v7863_v48  ;;  %v7952_v47 = vld [vmem:[#allocation5 + $0xc44] ss:$16 sps:$4 sm:$0xff]   ;;  %v7955_v48 = vld [vmem:[#allocation5 + $0xc4c] ss:$16 sps:$4 sm:$0xff]  }
 0x1cf   :  { %5042 = vmatprep.subr.bf16.mxu0 %v7868_v49  ;;  %5558 = vmatprep.subr.bf16.mxu1 %v7871_v50  ;;  %v7950_v49 = vld [vmem:[#allocation5 + $0xc40] ss:$16 sps:$4 sm:$0xff]   ;;  %v7953_v50 = vld [vmem:[#allocation5 + $0xc48] ss:$16 sps:$4 sm:$0xff]  }
 0x1d2   :  { %5043 = vmatpush1.bf16.msra.mxu0 %v7866_v51  ;;  %5559 = vmatpush1.bf16.msra.mxu1 %v7869_v52  ;;  %v7958_v51 = vld [vmem:[#allocation5 + $0xc64] ss:$16 sps:$4 sm:$0xff]   ;;  %v7961_v52 = vld [vmem:[#allocation5 + $0xc6c] ss:$16 sps:$4 sm:$0xff]  }
 0x1d3   :  { %5044 = vmatprep.subr.bf16.mxu0 %v7874_v53  ;;  %5560 = vmatprep.subr.bf16.mxu1 %v7877_v54  ;;  %v7956_v53 = vld [vmem:[#allocation5 + $0xc60] ss:$16 sps:$4 sm:$0xff]   ;;  %v7959_v54 = vld [vmem:[#allocation5 + $0xc68] ss:$16 sps:$4 sm:$0xff]  }
 0x1d6   :  { %5045 = vmatpush1.bf16.msra.mxu0 %v7872_v55  ;;  %5561 = vmatpush1.bf16.msra.mxu1 %v7875_v56  ;;  %v7964_v55 = vld [vmem:[#allocation5 + $0xc84] ss:$16 sps:$4 sm:$0xff]   ;;  %v7967_v56 = vld [vmem:[#allocation5 + $0xc8c] ss:$16 sps:$4 sm:$0xff]  }
 0x1d7   :  { %5046 = vmatprep.subr.bf16.mxu0 %v7880_v57  ;;  %5562 = vmatprep.subr.bf16.mxu1 %v7883_v58  ;;  %v7962_v57 = vld [vmem:[#allocation5 + $0xc80] ss:$16 sps:$4 sm:$0xff]   ;;  %v7965_v58 = vld [vmem:[#allocation5 + $0xc88] ss:$16 sps:$4 sm:$0xff]  }
 0x1da   :  { %5047 = vmatpush1.bf16.msra.mxu0 %v7878_v59  ;;  %5563 = vmatpush1.bf16.msra.mxu1 %v7881_v60  ;;  %v7970_v59 = vld [vmem:[#allocation5 + $0xca4] ss:$16 sps:$4 sm:$0xff]   ;;  %v7973_v60 = vld [vmem:[#allocation5 + $0xcac] ss:$16 sps:$4 sm:$0xff]  }
 0x1db   :  { %5048 = vmatprep.subr.bf16.mxu0 %v7886_v61  ;;  %5564 = vmatprep.subr.bf16.mxu1 %v7889_v62  ;;  %v7968_v61 = vld [vmem:[#allocation5 + $0xca0] ss:$16 sps:$4 sm:$0xff]   ;;  %v7971_v62 = vld [vmem:[#allocation5 + $0xca8] ss:$16 sps:$4 sm:$0xff]  }
 0x1de   :  { %5049 = vmatpush1.bf16.msra.mxu0 %v7884_v63  ;;  %5565 = vmatpush1.bf16.msra.mxu1 %v7887_v0  ;;  %v7976_v63 = vld [vmem:[#allocation5 + $0xcc4] ss:$16 sps:$4 sm:$0xff]   ;;  %v7979_v0 = vld [vmem:[#allocation5 + $0xccc] ss:$16 sps:$4 sm:$0xff]  }
 0x1df   :  { %5050 = vmatprep.subr.bf16.mxu0 %v7892_v1  ;;  %5566 = vmatprep.subr.bf16.mxu1 %v7895_v2  ;;  %v7974_v1 = vld [vmem:[#allocation5 + $0xcc0] ss:$16 sps:$4 sm:$0xff]   ;;  %v7977_v2 = vld [vmem:[#allocation5 + $0xcc8] ss:$16 sps:$4 sm:$0xff]  }
 0x1e2   :  { %5051 = vmatpush1.bf16.msra.mxu0 %v7890_v3  ;;  %5567 = vmatpush1.bf16.msra.mxu1 %v7893_v4  ;;  %v7982_v3 = vld [vmem:[#allocation5 + $0xce4] ss:$16 sps:$4 sm:$0xff]   ;;  %v7985_v4 = vld [vmem:[#allocation5 + $0xcec] ss:$16 sps:$4 sm:$0xff]  }
 0x1e3   :  { %5052 = vmatprep.subr.bf16.mxu0 %v7898_v5  ;;  %5568 = vmatprep.subr.bf16.mxu1 %v7901_v6  ;;  %v7980_v5 = vld [vmem:[#allocation5 + $0xce0] ss:$16 sps:$4 sm:$0xff]   ;;  %v7983_v6 = vld [vmem:[#allocation5 + $0xce8] ss:$16 sps:$4 sm:$0xff]  }
 0x1e6   :  { %5053 = vmatpush1.bf16.msra.mxu0 %v7896_v7  ;;  %5569 = vmatpush1.bf16.msra.mxu1 %v7899_v8  ;;  %v7988_v7 = vld [vmem:[#allocation5 + $0xd04] ss:$16 sps:$4 sm:$0xff]   ;;  %v7991_v8 = vld [vmem:[#allocation5 + $0xd0c] ss:$16 sps:$4 sm:$0xff]  }
 0x1e7   :  { %5054 = vmatprep.subr.bf16.mxu0 %v7904_v9  ;;  %5570 = vmatprep.subr.bf16.mxu1 %v7907_v10  ;;  %v7986_v9 = vld [vmem:[#allocation5 + $0xd00] ss:$16 sps:$4 sm:$0xff]   ;;  %v7989_v10 = vld [vmem:[#allocation5 + $0xd08] ss:$16 sps:$4 sm:$0xff]  }
 0x1ea   :  { %5055 = vmatpush1.bf16.msra.mxu0 %v7902_v11  ;;  %5571 = vmatpush1.bf16.msra.mxu1 %v7905_v12  ;;  %v7994_v11 = vld [vmem:[#allocation5 + $0xd24] ss:$16 sps:$4 sm:$0xff]   ;;  %v7997_v12 = vld [vmem:[#allocation5 + $0xd2c] ss:$16 sps:$4 sm:$0xff]  }
 0x1eb   :  { %5056 = vmatprep.subr.bf16.mxu0 %v7910_v13  ;;  %5572 = vmatprep.subr.bf16.mxu1 %v7913_v14  ;;  %v7992_v13 = vld [vmem:[#allocation5 + $0xd20] ss:$16 sps:$4 sm:$0xff]   ;;  %v7995_v14 = vld [vmem:[#allocation5 + $0xd28] ss:$16 sps:$4 sm:$0xff]  }
 0x1ee   :  { %5057 = vmatpush1.bf16.msra.mxu0 %v7908_v15  ;;  %5573 = vmatpush1.bf16.msra.mxu1 %v7911_v16  ;;  %v8000_v15 = vld [vmem:[#allocation5 + $0xd44] ss:$16 sps:$4 sm:$0xff]   ;;  %v8003_v16 = vld [vmem:[#allocation5 + $0xd4c] ss:$16 sps:$4 sm:$0xff]  }
 0x1ef   :  { %5058 = vmatprep.subr.bf16.mxu0 %v7916_v17  ;;  %5574 = vmatprep.subr.bf16.mxu1 %v7919_v18  ;;  %v7998_v17 = vld [vmem:[#allocation5 + $0xd40] ss:$16 sps:$4 sm:$0xff]   ;;  %v8001_v18 = vld [vmem:[#allocation5 + $0xd48] ss:$16 sps:$4 sm:$0xff]  }
 0x1f2   :  { %5059 = vmatpush1.bf16.msra.mxu0 %v7914_v19  ;;  %5575 = vmatpush1.bf16.msra.mxu1 %v7917_v20  ;;  %v8006_v19 = vld [vmem:[#allocation5 + $0xd64] ss:$16 sps:$4 sm:$0xff]   ;;  %v8009_v20 = vld [vmem:[#allocation5 + $0xd6c] ss:$16 sps:$4 sm:$0xff]  }
 0x1f3   :  { %5060 = vmatprep.subr.bf16.mxu0 %v7922_v21  ;;  %5576 = vmatprep.subr.bf16.mxu1 %v7925_v22  ;;  %v8004_v21 = vld [vmem:[#allocation5 + $0xd60] ss:$16 sps:$4 sm:$0xff]   ;;  %v8007_v22 = vld [vmem:[#allocation5 + $0xd68] ss:$16 sps:$4 sm:$0xff]  }
 0x1f6   :  { %5061 = vmatpush1.bf16.msra.mxu0 %v7920_v23  ;;  %5577 = vmatpush1.bf16.msra.mxu1 %v7923_v24  ;;  %v8012_v23 = vld [vmem:[#allocation5 + $0xd84] ss:$16 sps:$4 sm:$0xff]   ;;  %v8015_v24 = vld [vmem:[#allocation5 + $0xd8c] ss:$16 sps:$4 sm:$0xff]  }
 0x1f7   :  { %5062 = vmatprep.subr.bf16.mxu0 %v7928_v25  ;;  %5578 = vmatprep.subr.bf16.mxu1 %v7931_v26  ;;  %v8010_v25 = vld [vmem:[#allocation5 + $0xd80] ss:$16 sps:$4 sm:$0xff]   ;;  %v8013_v26 = vld [vmem:[#allocation5 + $0xd88] ss:$16 sps:$4 sm:$0xff]  }
 0x1fa   :  { %5063 = vmatpush1.bf16.msra.mxu0 %v7926_v27  ;;  %5579 = vmatpush1.bf16.msra.mxu1 %v7929_v28  ;;  %v8018_v27 = vld [vmem:[#allocation5 + $0xda4] ss:$16 sps:$4 sm:$0xff]   ;;  %v8021_v28 = vld [vmem:[#allocation5 + $0xdac] ss:$16 sps:$4 sm:$0xff]  }
 0x1fb   :  { %5064 = vmatprep.subr.bf16.mxu0 %v7934_v29  ;;  %5580 = vmatprep.subr.bf16.mxu1 %v7937_v30  ;;  %v8016_v29 = vld [vmem:[#allocation5 + $0xda0] ss:$16 sps:$4 sm:$0xff]   ;;  %v8019_v30 = vld [vmem:[#allocation5 + $0xda8] ss:$16 sps:$4 sm:$0xff]  }
 0x1fe   :  { %5065 = vmatpush1.bf16.msra.mxu0 %v7932_v31  ;;  %5581 = vmatpush1.bf16.msra.mxu1 %v7935_v32  ;;  %v8024_v31 = vld [vmem:[#allocation5 + $0xdc4] ss:$16 sps:$4 sm:$0xff]   ;;  %v8027_v32 = vld [vmem:[#allocation5 + $0xdcc] ss:$16 sps:$4 sm:$0xff]  }
 0x1ff   :  { %5077 = vmatprep.subr.bf16.mxu0 %v7940_v33  ;;  %5593 = vmatprep.subr.bf16.mxu1 %v7943_v34  ;;  %v8022_v33 = vld [vmem:[#allocation5 + $0xdc0] ss:$16 sps:$4 sm:$0xff]   ;;  %v8025_v34 = vld [vmem:[#allocation5 + $0xdc8] ss:$16 sps:$4 sm:$0xff]  }
 0x201   :  { %5067 = vmatmul.mubr.bf16.vlgmr.msra.gmra.mrb[0].mxu0 %v175_v39  ;;  %5583 = vmatmul.mubr.bf16.vlgmr.msra.gmra.mrb[0].mxu1 %v175_v39  ;;  %v8036_v39 = vld [vmem:[#allocation5 + $0xe04] ss:$16 sps:$4 sm:$0xff]  }
 0x202   :  { %5078 = vmatpush1.bf16.msra.mxu0 %v7938_v40  ;;  %5594 = vmatpush1.bf16.msra.mxu1 %v7941_v41  ;;  %v8039_v40 = vld [vmem:[#allocation5 + $0xe0c] ss:$16 sps:$4 sm:$0xff]   ;;  %v129_v41 = vld [vmem:[#allocation2 + $0x60] sm:$0xff] }
 0x203   :  { %5079 = vmatprep.subr.bf16.mxu0 %v7946_v42  ;;  %5595 = vmatprep.subr.bf16.mxu1 %v7949_v43  ;;  %v153_v42 = vld [vmem:[#allocation2 + $0x120] sm:$0xff]  ;;  %v132_v43 = vld [vmem:[#allocation2 + $0x78] sm:$0xff] }
 0x204   :  { %5109 = vmatprep.mubr.bf16.mxu0 %v178_v44  ;;  %5625 = vmatprep.mubr.bf16.mxu1 %v178_v44  ;;  %v156_v44 = vld [vmem:[#allocation2 + $0x138] sm:$0xff] }
 0x206   :  { %5080 = vmatpush1.bf16.msra.mxu0 %v7944_v45  ;;  %5596 = vmatpush1.bf16.msra.mxu1 %v7947_v46  ;;  %v177_v45 = vpack.c.bf16 %v153_v42, %v129_v41  ;;  %v8034_v46 = vld [vmem:[#allocation5 + $0xe00] ss:$16 sps:$4 sm:$0xff]   ;;  %v8126_v41 = vld [vmem:[#allocation5 + $0xfe4] ss:$16 sps:$4 sm:$0xff]   ;;  %v8129_v42 = vld [vmem:[#allocation5 + $0xfec] ss:$16 sps:$4 sm:$0xff]  }
 0x207   :  { %5081 = vmatprep.subr.bf16.mxu0 %v7952_v47  ;;  %5597 = vmatprep.subr.bf16.mxu1 %v7955_v48  ;;  %v8037_v47 = vld [vmem:[#allocation5 + $0xe08] ss:$16 sps:$4 sm:$0xff]   ;;  %v8042_v48 = vld [vmem:[#allocation5 + $0xe24] ss:$16 sps:$4 sm:$0xff]  }
 0x20a   :  { %5082 = vmatpush1.bf16.msra.mxu0 %v7950_v49  ;;  %5598 = vmatpush1.bf16.msra.mxu1 %v7953_v50  ;;  %v8045_v49 = vld [vmem:[#allocation5 + $0xe2c] ss:$16 sps:$4 sm:$0xff]   ;;  %v180_v50 = vpack.c.bf16 %v156_v44, %v132_v43  ;;  %v8124_v43 = vld [vmem:[#allocation5 + $0xfe0] ss:$16 sps:$4 sm:$0xff]   ;;  %v8127_v44 = vld [vmem:[#allocation5 + $0xfe8] ss:$16 sps:$4 sm:$0xff]  }
 0x20b   :  { %5083 = vmatprep.subr.bf16.mxu0 %v7958_v51  ;;  %5599 = vmatprep.subr.bf16.mxu1 %v7961_v52  ;;  %v8040_v51 = vld [vmem:[#allocation5 + $0xe20] ss:$16 sps:$4 sm:$0xff]   ;;  %v8043_v52 = vld [vmem:[#allocation5 + $0xe28] ss:$16 sps:$4 sm:$0xff]  }
 0x20e   :  { %5084 = vmatpush1.bf16.msra.mxu0 %v7956_v53  ;;  %5600 = vmatpush1.bf16.msra.mxu1 %v7959_v54  ;;  %v8048_v53 = vld [vmem:[#allocation5 + $0xe44] ss:$16 sps:$4 sm:$0xff]   ;;  %v8051_v54 = vld [vmem:[#allocation5 + $0xe4c] ss:$16 sps:$4 sm:$0xff]  }
 0x20f   :  { %5085 = vmatprep.subr.bf16.mxu0 %v7964_v55  ;;  %5601 = vmatprep.subr.bf16.mxu1 %v7967_v56  ;;  %v8046_v55 = vld [vmem:[#allocation5 + $0xe40] ss:$16 sps:$4 sm:$0xff]   ;;  %v8049_v56 = vld [vmem:[#allocation5 + $0xe48] ss:$16 sps:$4 sm:$0xff]  }
 0x212   :  { %5086 = vmatpush1.bf16.msra.mxu0 %v7962_v57  ;;  %5602 = vmatpush1.bf16.msra.mxu1 %v7965_v58  ;;  %v8054_v57 = vld [vmem:[#allocation5 + $0xe64] ss:$16 sps:$4 sm:$0xff]   ;;  %v8057_v58 = vld [vmem:[#allocation5 + $0xe6c] ss:$16 sps:$4 sm:$0xff]  }
 0x213   :  { %5087 = vmatprep.subr.bf16.mxu0 %v7970_v59  ;;  %5603 = vmatprep.subr.bf16.mxu1 %v7973_v60  ;;  %v8052_v59 = vld [vmem:[#allocation5 + $0xe60] ss:$16 sps:$4 sm:$0xff]   ;;  %v8055_v60 = vld [vmem:[#allocation5 + $0xe68] ss:$16 sps:$4 sm:$0xff]  }
 0x216   :  { %5088 = vmatpush1.bf16.msra.mxu0 %v7968_v61  ;;  %5604 = vmatpush1.bf16.msra.mxu1 %v7971_v62  ;;  %v8060_v61 = vld [vmem:[#allocation5 + $0xe84] ss:$16 sps:$4 sm:$0xff]   ;;  %v8063_v62 = vld [vmem:[#allocation5 + $0xe8c] ss:$16 sps:$4 sm:$0xff]  }
 0x217   :  { %5089 = vmatprep.subr.bf16.mxu0 %v7976_v63  ;;  %5605 = vmatprep.subr.bf16.mxu1 %v7979_v0  ;;  %v8058_v63 = vld [vmem:[#allocation5 + $0xe80] ss:$16 sps:$4 sm:$0xff]   ;;  %v8061_v0 = vld [vmem:[#allocation5 + $0xe88] ss:$16 sps:$4 sm:$0xff]  }
 0x21a   :  { %5090 = vmatpush1.bf16.msra.mxu0 %v7974_v1  ;;  %5606 = vmatpush1.bf16.msra.mxu1 %v7977_v2  ;;  %v8066_v1 = vld [vmem:[#allocation5 + $0xea4] ss:$16 sps:$4 sm:$0xff]   ;;  %v8069_v2 = vld [vmem:[#allocation5 + $0xeac] ss:$16 sps:$4 sm:$0xff]  }
 0x21b   :  { %5091 = vmatprep.subr.bf16.mxu0 %v7982_v3  ;;  %5607 = vmatprep.subr.bf16.mxu1 %v7985_v4  ;;  %v8064_v3 = vld [vmem:[#allocation5 + $0xea0] ss:$16 sps:$4 sm:$0xff]   ;;  %v8067_v4 = vld [vmem:[#allocation5 + $0xea8] ss:$16 sps:$4 sm:$0xff]  }
 0x21e   :  { %5092 = vmatpush1.bf16.msra.mxu0 %v7980_v5  ;;  %5608 = vmatpush1.bf16.msra.mxu1 %v7983_v6  ;;  %v8072_v5 = vld [vmem:[#allocation5 + $0xec4] ss:$16 sps:$4 sm:$0xff]   ;;  %v8075_v6 = vld [vmem:[#allocation5 + $0xecc] ss:$16 sps:$4 sm:$0xff]  }
 0x21f   :  { %5093 = vmatprep.subr.bf16.mxu0 %v7988_v7  ;;  %5609 = vmatprep.subr.bf16.mxu1 %v7991_v8  ;;  %v8070_v7 = vld [vmem:[#allocation5 + $0xec0] ss:$16 sps:$4 sm:$0xff]   ;;  %v8073_v8 = vld [vmem:[#allocation5 + $0xec8] ss:$16 sps:$4 sm:$0xff]  }
 0x222   :  { %5094 = vmatpush1.bf16.msra.mxu0 %v7986_v9  ;;  %5610 = vmatpush1.bf16.msra.mxu1 %v7989_v10  ;;  %v8078_v9 = vld [vmem:[#allocation5 + $0xee4] ss:$16 sps:$4 sm:$0xff]   ;;  %v8081_v10 = vld [vmem:[#allocation5 + $0xeec] ss:$16 sps:$4 sm:$0xff]  }
 0x223   :  { %5095 = vmatprep.subr.bf16.mxu0 %v7994_v11  ;;  %5611 = vmatprep.subr.bf16.mxu1 %v7997_v12  ;;  %v8076_v11 = vld [vmem:[#allocation5 + $0xee0] ss:$16 sps:$4 sm:$0xff]   ;;  %v8079_v12 = vld [vmem:[#allocation5 + $0xee8] ss:$16 sps:$4 sm:$0xff]  }
 0x226   :  { %5096 = vmatpush1.bf16.msra.mxu0 %v7992_v13  ;;  %5612 = vmatpush1.bf16.msra.mxu1 %v7995_v14  ;;  %v8084_v13 = vld [vmem:[#allocation5 + $0xf04] ss:$16 sps:$4 sm:$0xff]   ;;  %v8087_v14 = vld [vmem:[#allocation5 + $0xf0c] ss:$16 sps:$4 sm:$0xff]  }
 0x227   :  { %5097 = vmatprep.subr.bf16.mxu0 %v8000_v15  ;;  %5613 = vmatprep.subr.bf16.mxu1 %v8003_v16  ;;  %v8082_v15 = vld [vmem:[#allocation5 + $0xf00] ss:$16 sps:$4 sm:$0xff]   ;;  %v8085_v16 = vld [vmem:[#allocation5 + $0xf08] ss:$16 sps:$4 sm:$0xff]  }
 0x22a   :  { %5098 = vmatpush1.bf16.msra.mxu0 %v7998_v17  ;;  %5614 = vmatpush1.bf16.msra.mxu1 %v8001_v18  ;;  %v8090_v17 = vld [vmem:[#allocation5 + $0xf24] ss:$16 sps:$4 sm:$0xff]   ;;  %v8093_v18 = vld [vmem:[#allocation5 + $0xf2c] ss:$16 sps:$4 sm:$0xff]  }
 0x22b   :  { %5099 = vmatprep.subr.bf16.mxu0 %v8006_v19  ;;  %5615 = vmatprep.subr.bf16.mxu1 %v8009_v20  ;;  %v8088_v19 = vld [vmem:[#allocation5 + $0xf20] ss:$16 sps:$4 sm:$0xff]   ;;  %v8091_v20 = vld [vmem:[#allocation5 + $0xf28] ss:$16 sps:$4 sm:$0xff]  }
 0x22e   :  { %5100 = vmatpush1.bf16.msra.mxu0 %v8004_v21  ;;  %5616 = vmatpush1.bf16.msra.mxu1 %v8007_v22  ;;  %v8096_v21 = vld [vmem:[#allocation5 + $0xf44] ss:$16 sps:$4 sm:$0xff]   ;;  %v8099_v22 = vld [vmem:[#allocation5 + $0xf4c] ss:$16 sps:$4 sm:$0xff]  }
 0x22f   :  { %5101 = vmatprep.subr.bf16.mxu0 %v8012_v23  ;;  %5617 = vmatprep.subr.bf16.mxu1 %v8015_v24  ;;  %v8094_v23 = vld [vmem:[#allocation5 + $0xf40] ss:$16 sps:$4 sm:$0xff]   ;;  %v8097_v24 = vld [vmem:[#allocation5 + $0xf48] ss:$16 sps:$4 sm:$0xff]  }
 0x232   :  { %5102 = vmatpush1.bf16.msra.mxu0 %v8010_v25  ;;  %5618 = vmatpush1.bf16.msra.mxu1 %v8013_v26  ;;  %v8102_v25 = vld [vmem:[#allocation5 + $0xf64] ss:$16 sps:$4 sm:$0xff]   ;;  %v8105_v26 = vld [vmem:[#allocation5 + $0xf6c] ss:$16 sps:$4 sm:$0xff]  }
 0x233   :  { %5103 = vmatprep.subr.bf16.mxu0 %v8018_v27  ;;  %5619 = vmatprep.subr.bf16.mxu1 %v8021_v28  ;;  %v8100_v27 = vld [vmem:[#allocation5 + $0xf60] ss:$16 sps:$4 sm:$0xff]   ;;  %v8103_v28 = vld [vmem:[#allocation5 + $0xf68] ss:$16 sps:$4 sm:$0xff]  }
 0x236   :  { %5104 = vmatpush1.bf16.msra.mxu0 %v8016_v29  ;;  %5620 = vmatpush1.bf16.msra.mxu1 %v8019_v30  ;;  %v8108_v29 = vld [vmem:[#allocation5 + $0xf84] ss:$16 sps:$4 sm:$0xff]   ;;  %v8111_v30 = vld [vmem:[#allocation5 + $0xf8c] ss:$16 sps:$4 sm:$0xff]  }
 0x237   :  { %5105 = vmatprep.subr.bf16.mxu0 %v8024_v31  ;;  %5621 = vmatprep.subr.bf16.mxu1 %v8027_v32  ;;  %v8106_v31 = vld [vmem:[#allocation5 + $0xf80] ss:$16 sps:$4 sm:$0xff]   ;;  %v8109_v32 = vld [vmem:[#allocation5 + $0xf88] ss:$16 sps:$4 sm:$0xff]  }
 0x23a   :  { %5106 = vmatpush1.bf16.msra.mxu0 %v8022_v33  ;;  %5622 = vmatpush1.bf16.msra.mxu1 %v8025_v34  ;;  %v8114_v33 = vld [vmem:[#allocation5 + $0xfa4] ss:$16 sps:$4 sm:$0xff]   ;;  %v8117_v34 = vld [vmem:[#allocation5 + $0xfac] ss:$16 sps:$4 sm:$0xff]  }
 0x23b   :  { %5107 = vmatprep.subr.bf16.mxu0 %v8030_v35  ;;  %5623 = vmatprep.subr.bf16.mxu1 %v8033_v36  ;;  %v8112_v35 = vld [vmem:[#allocation5 + $0xfa0] ss:$16 sps:$4 sm:$0xff]   ;;  %v8115_v36 = vld [vmem:[#allocation5 + $0xfa8] ss:$16 sps:$4 sm:$0xff]  }
 0x23e   :  { %5108 = vmatpush1.bf16.msra.mxu0 %v8028_v37  ;;  %5624 = vmatpush1.bf16.msra.mxu1 %v8031_v38  ;;  %v8120_v37 = vld [vmem:[#allocation5 + $0xfc4] ss:$16 sps:$4 sm:$0xff]   ;;  %v8123_v38 = vld [vmem:[#allocation5 + $0xfcc] ss:$16 sps:$4 sm:$0xff]  }
 0x23f   :  { %5120 = vmatprep.subr.bf16.mxu0 %v8036_v39  ;;  %5636 = vmatprep.subr.bf16.mxu1 %v8039_v40  ;;  %v8118_v39 = vld [vmem:[#allocation5 + $0xfc0] ss:$16 sps:$4 sm:$0xff]   ;;  %v8121_v40 = vld [vmem:[#allocation5 + $0xfc8] ss:$16 sps:$4 sm:$0xff]  }
 0x241   :  { %5110 = vmatmul.mubr.bf16.vlgmr.msra.gmra.mrb[0].mxu0 %v177_v45  ;;  %5626 = vmatmul.mubr.bf16.vlgmr.msra.gmra.mrb[0].mxu1 %v177_v45  ;;  %v131_v45 = vld [vmem:[#allocation2 + $0x70] sm:$0xff] }
 0x242   :  { %5121 = vmatpush1.bf16.msra.mxu0 %v8034_v46  ;;  %5637 = vmatpush1.bf16.msra.mxu1 %v8037_v47  ;;  %v155_v46 = vld [vmem:[#allocation2 + $0x130] sm:$0xff] }
 0x243   :  { %5122 = vmatprep.subr.bf16.mxu0 %v8042_v48  ;;  %5638 = vmatprep.subr.bf16.mxu1 %v8045_v49  ;;  %v8132_v47 = vld [vmem:[#allocation5 + $0x1004] ss:$16 sps:$4 sm:$0xff]   ;;  %v8135_v48 = vld [vmem:[#allocation5 + $0x100c] ss:$16 sps:$4 sm:$0xff]   ;;  %v179_v49 = vpack.c.bf16 %v155_v46, %v131_v45  ;;  %v8214_v45 = vld [vmem:[#allocation5 + $0x11c0] ss:$16 sps:$4 sm:$0xff]  }
 0x244   :  { %5152 = vmatprep.mubr.bf16.mxu0 %v180_v50  ;;  %5668 = vmatprep.mubr.bf16.mxu1 %v180_v50  ;;  %v134_v50 = vld [vmem:[#allocation2 + $0x88] sm:$0xff] }
 0x245   :  { %v8217_v46 = vld [vmem:[#allocation5 + $0x11c8] ss:$16 sps:$4 sm:$0xff]  }
 0x246   :  { %5123 = vmatpush1.bf16.msra.mxu0 %v8040_v51  ;;  %5639 = vmatpush1.bf16.msra.mxu1 %v8043_v52  ;;  %v158_v51 = vld [vmem:[#allocation2 + $0x148] sm:$0xff]  ;;  %v8130_v52 = vld [vmem:[#allocation5 + $0x1000] ss:$16 sps:$4 sm:$0xff]  }
 0x247   :  { %5124 = vmatprep.subr.bf16.mxu0 %v8048_v53  ;;  %5640 = vmatprep.subr.bf16.mxu1 %v8051_v54  ;;  %v8133_v53 = vld [vmem:[#allocation5 + $0x1008] ss:$16 sps:$4 sm:$0xff]   ;;  %v8138_v54 = vld [vmem:[#allocation5 + $0x1024] ss:$16 sps:$4 sm:$0xff]  }
 0x24a   :  { %5125 = vmatpush1.bf16.msra.mxu0 %v8046_v55  ;;  %5641 = vmatpush1.bf16.msra.mxu1 %v8049_v56  ;;  %v8141_v55 = vld [vmem:[#allocation5 + $0x102c] ss:$16 sps:$4 sm:$0xff]   ;;  %v182_v56 = vpack.c.bf16 %v158_v51, %v134_v50  ;;  %v8223_v50 = vld [vmem:[#allocation5 + $0x11e8] ss:$16 sps:$4 sm:$0xff]   ;;  %v133_v51 = vld [vmem:[#allocation2 + $0x80] sm:$0xff] }
 0x24b   :  { %5126 = vmatprep.subr.bf16.mxu0 %v8054_v57  ;;  %5642 = vmatprep.subr.bf16.mxu1 %v8057_v58  ;;  %v8136_v57 = vld [vmem:[#allocation5 + $0x1020] ss:$16 sps:$4 sm:$0xff]   ;;  %v8139_v58 = vld [vmem:[#allocation5 + $0x1028] ss:$16 sps:$4 sm:$0xff]  }
 0x24e   :  { %5127 = vmatpush1.bf16.msra.mxu0 %v8052_v59  ;;  %5643 = vmatpush1.bf16.msra.mxu1 %v8055_v60  ;;  %v8144_v59 = vld [vmem:[#allocation5 + $0x1044] ss:$16 sps:$4 sm:$0xff]   ;;  %v8147_v60 = vld [vmem:[#allocation5 + $0x104c] ss:$16 sps:$4 sm:$0xff]  }
 0x24f   :  { %5128 = vmatprep.subr.bf16.mxu0 %v8060_v61  ;;  %5644 = vmatprep.subr.bf16.mxu1 %v8063_v62  ;;  %v8142_v61 = vld [vmem:[#allocation5 + $0x1040] ss:$16 sps:$4 sm:$0xff]   ;;  %v8145_v62 = vld [vmem:[#allocation5 + $0x1048] ss:$16 sps:$4 sm:$0xff]  }
 0x252   :  { %5129 = vmatpush1.bf16.msra.mxu0 %v8058_v63  ;;  %5645 = vmatpush1.bf16.msra.mxu1 %v8061_v0  ;;  %v8150_v63 = vld [vmem:[#allocation5 + $0x1064] ss:$16 sps:$4 sm:$0xff]   ;;  %v8153_v0 = vld [vmem:[#allocation5 + $0x106c] ss:$16 sps:$4 sm:$0xff]  }
 0x253   :  { %5130 = vmatprep.subr.bf16.mxu0 %v8066_v1  ;;  %5646 = vmatprep.subr.bf16.mxu1 %v8069_v2  ;;  %v8148_v1 = vld [vmem:[#allocation5 + $0x1060] ss:$16 sps:$4 sm:$0xff]   ;;  %v8151_v2 = vld [vmem:[#allocation5 + $0x1068] ss:$16 sps:$4 sm:$0xff]  }
 0x256   :  { %5131 = vmatpush1.bf16.msra.mxu0 %v8064_v3  ;;  %5647 = vmatpush1.bf16.msra.mxu1 %v8067_v4  ;;  %v8156_v3 = vld [vmem:[#allocation5 + $0x1084] ss:$16 sps:$4 sm:$0xff]   ;;  %v8159_v4 = vld [vmem:[#allocation5 + $0x108c] ss:$16 sps:$4 sm:$0xff]  }
 0x257   :  { %5132 = vmatprep.subr.bf16.mxu0 %v8072_v5  ;;  %5648 = vmatprep.subr.bf16.mxu1 %v8075_v6  ;;  %v8154_v5 = vld [vmem:[#allocation5 + $0x1080] ss:$16 sps:$4 sm:$0xff]   ;;  %v8157_v6 = vld [vmem:[#allocation5 + $0x1088] ss:$16 sps:$4 sm:$0xff]  }
 0x25a   :  { %5133 = vmatpush1.bf16.msra.mxu0 %v8070_v7  ;;  %5649 = vmatpush1.bf16.msra.mxu1 %v8073_v8  ;;  %v8162_v7 = vld [vmem:[#allocation5 + $0x10a4] ss:$16 sps:$4 sm:$0xff]   ;;  %v8165_v8 = vld [vmem:[#allocation5 + $0x10ac] ss:$16 sps:$4 sm:$0xff]  }
 0x25b   :  { %5134 = vmatprep.subr.bf16.mxu0 %v8078_v9  ;;  %5650 = vmatprep.subr.bf16.mxu1 %v8081_v10  ;;  %v8160_v9 = vld [vmem:[#allocation5 + $0x10a0] ss:$16 sps:$4 sm:$0xff]   ;;  %v8163_v10 = vld [vmem:[#allocation5 + $0x10a8] ss:$16 sps:$4 sm:$0xff]  }
 0x25e   :  { %5135 = vmatpush1.bf16.msra.mxu0 %v8076_v11  ;;  %5651 = vmatpush1.bf16.msra.mxu1 %v8079_v12  ;;  %v8168_v11 = vld [vmem:[#allocation5 + $0x10c4] ss:$16 sps:$4 sm:$0xff]   ;;  %v8171_v12 = vld [vmem:[#allocation5 + $0x10cc] ss:$16 sps:$4 sm:$0xff]  }
 0x25f   :  { %5136 = vmatprep.subr.bf16.mxu0 %v8084_v13  ;;  %5652 = vmatprep.subr.bf16.mxu1 %v8087_v14  ;;  %v8166_v13 = vld [vmem:[#allocation5 + $0x10c0] ss:$16 sps:$4 sm:$0xff]   ;;  %v8169_v14 = vld [vmem:[#allocation5 + $0x10c8] ss:$16 sps:$4 sm:$0xff]  }
 0x262   :  { %5137 = vmatpush1.bf16.msra.mxu0 %v8082_v15  ;;  %5653 = vmatpush1.bf16.msra.mxu1 %v8085_v16  ;;  %v8174_v15 = vld [vmem:[#allocation5 + $0x10e4] ss:$16 sps:$4 sm:$0xff]   ;;  %v8177_v16 = vld [vmem:[#allocation5 + $0x10ec] ss:$16 sps:$4 sm:$0xff]  }
 0x263   :  { %5138 = vmatprep.subr.bf16.mxu0 %v8090_v17  ;;  %5654 = vmatprep.subr.bf16.mxu1 %v8093_v18  ;;  %v8172_v17 = vld [vmem:[#allocation5 + $0x10e0] ss:$16 sps:$4 sm:$0xff]   ;;  %v8175_v18 = vld [vmem:[#allocation5 + $0x10e8] ss:$16 sps:$4 sm:$0xff]  }
 0x266   :  { %5139 = vmatpush1.bf16.msra.mxu0 %v8088_v19  ;;  %5655 = vmatpush1.bf16.msra.mxu1 %v8091_v20  ;;  %v8180_v19 = vld [vmem:[#allocation5 + $0x1104] ss:$16 sps:$4 sm:$0xff]   ;;  %v8183_v20 = vld [vmem:[#allocation5 + $0x110c] ss:$16 sps:$4 sm:$0xff]  }
 0x267   :  { %5140 = vmatprep.subr.bf16.mxu0 %v8096_v21  ;;  %5656 = vmatprep.subr.bf16.mxu1 %v8099_v22  ;;  %v8178_v21 = vld [vmem:[#allocation5 + $0x1100] ss:$16 sps:$4 sm:$0xff]   ;;  %v8181_v22 = vld [vmem:[#allocation5 + $0x1108] ss:$16 sps:$4 sm:$0xff]  }
 0x26a   :  { %5141 = vmatpush1.bf16.msra.mxu0 %v8094_v23  ;;  %5657 = vmatpush1.bf16.msra.mxu1 %v8097_v24  ;;  %v8186_v23 = vld [vmem:[#allocation5 + $0x1124] ss:$16 sps:$4 sm:$0xff]   ;;  %v8189_v24 = vld [vmem:[#allocation5 + $0x112c] ss:$16 sps:$4 sm:$0xff]  }
 0x26b   :  { %5142 = vmatprep.subr.bf16.mxu0 %v8102_v25  ;;  %5658 = vmatprep.subr.bf16.mxu1 %v8105_v26  ;;  %v8184_v25 = vld [vmem:[#allocation5 + $0x1120] ss:$16 sps:$4 sm:$0xff]   ;;  %v8187_v26 = vld [vmem:[#allocation5 + $0x1128] ss:$16 sps:$4 sm:$0xff]  }
 0x26e   :  { %5143 = vmatpush1.bf16.msra.mxu0 %v8100_v27  ;;  %5659 = vmatpush1.bf16.msra.mxu1 %v8103_v28  ;;  %v8192_v27 = vld [vmem:[#allocation5 + $0x1144] ss:$16 sps:$4 sm:$0xff]   ;;  %v8195_v28 = vld [vmem:[#allocation5 + $0x114c] ss:$16 sps:$4 sm:$0xff]  }
 0x26f   :  { %5144 = vmatprep.subr.bf16.mxu0 %v8108_v29  ;;  %5660 = vmatprep.subr.bf16.mxu1 %v8111_v30  ;;  %v8190_v29 = vld [vmem:[#allocation5 + $0x1140] ss:$16 sps:$4 sm:$0xff]   ;;  %v8193_v30 = vld [vmem:[#allocation5 + $0x1148] ss:$16 sps:$4 sm:$0xff]  }
 0x272   :  { %5145 = vmatpush1.bf16.msra.mxu0 %v8106_v31  ;;  %5661 = vmatpush1.bf16.msra.mxu1 %v8109_v32  ;;  %v8198_v31 = vld [vmem:[#allocation5 + $0x1164] ss:$16 sps:$4 sm:$0xff]   ;;  %v8201_v32 = vld [vmem:[#allocation5 + $0x116c] ss:$16 sps:$4 sm:$0xff]  }
 0x273   :  { %5146 = vmatprep.subr.bf16.mxu0 %v8114_v33  ;;  %5662 = vmatprep.subr.bf16.mxu1 %v8117_v34  ;;  %v8196_v33 = vld [vmem:[#allocation5 + $0x1160] ss:$16 sps:$4 sm:$0xff]   ;;  %v8199_v34 = vld [vmem:[#allocation5 + $0x1168] ss:$16 sps:$4 sm:$0xff]  }
 0x276   :  { %5147 = vmatpush1.bf16.msra.mxu0 %v8112_v35  ;;  %5663 = vmatpush1.bf16.msra.mxu1 %v8115_v36  ;;  %v8204_v35 = vld [vmem:[#allocation5 + $0x1184] ss:$16 sps:$4 sm:$0xff]   ;;  %v8207_v36 = vld [vmem:[#allocation5 + $0x118c] ss:$16 sps:$4 sm:$0xff]  }
 0x277   :  { %5148 = vmatprep.subr.bf16.mxu0 %v8120_v37  ;;  %5664 = vmatprep.subr.bf16.mxu1 %v8123_v38  ;;  %v8202_v37 = vld [vmem:[#allocation5 + $0x1180] ss:$16 sps:$4 sm:$0xff]   ;;  %v8205_v38 = vld [vmem:[#allocation5 + $0x1188] ss:$16 sps:$4 sm:$0xff]  }
 0x27a   :  { %5149 = vmatpush1.bf16.msra.mxu0 %v8118_v39  ;;  %5665 = vmatpush1.bf16.msra.mxu1 %v8121_v40  ;;  %v8210_v39 = vld [vmem:[#allocation5 + $0x11a4] ss:$16 sps:$4 sm:$0xff]   ;;  %v8213_v40 = vld [vmem:[#allocation5 + $0x11ac] ss:$16 sps:$4 sm:$0xff]  }
 0x27b   :  { %5150 = vmatprep.subr.bf16.mxu0 %v8126_v41  ;;  %5666 = vmatprep.subr.bf16.mxu1 %v8129_v42  ;;  %v8208_v41 = vld [vmem:[#allocation5 + $0x11a0] ss:$16 sps:$4 sm:$0xff]   ;;  %v8211_v42 = vld [vmem:[#allocation5 + $0x11a8] ss:$16 sps:$4 sm:$0xff]  }
 0x27e   :  { %5151 = vmatpush1.bf16.msra.mxu0 %v8124_v43  ;;  %5667 = vmatpush1.bf16.msra.mxu1 %v8127_v44  ;;  %v8216_v43 = vld [vmem:[#allocation5 + $0x11c4] ss:$16 sps:$4 sm:$0xff]   ;;  %v8219_v44 = vld [vmem:[#allocation5 + $0x11cc] ss:$16 sps:$4 sm:$0xff]  }
 0x27f   :  { %5163 = vmatprep.subr.bf16.mxu0 %v8132_v47  ;;  %5679 = vmatprep.subr.bf16.mxu1 %v8135_v48  ;;  %v8222_v47 = vld [vmem:[#allocation5 + $0x11e4] ss:$16 sps:$4 sm:$0xff]   ;;  %v8225_v48 = vld [vmem:[#allocation5 + $0x11ec] ss:$16 sps:$4 sm:$0xff]  }
 0x281   :  { %5153 = vmatmul.mubr.bf16.vlgmr.msra.gmra.mrb[0].mxu0 %v179_v49  ;;  %5669 = vmatmul.mubr.bf16.vlgmr.msra.gmra.mrb[0].mxu1 %v179_v49  ;;  %v8220_v49 = vld [vmem:[#allocation5 + $0x11e0] ss:$16 sps:$4 sm:$0xff]  }
 0x282   :  { %5164 = vmatpush1.bf16.msra.mxu0 %v8130_v52  ;;  %5680 = vmatpush1.bf16.msra.mxu1 %v8133_v53  ;;  %v157_v52 = vld [vmem:[#allocation2 + $0x140] sm:$0xff] }
 0x283   :  { %5165 = vmatprep.subr.bf16.mxu0 %v8138_v54  ;;  %5681 = vmatprep.subr.bf16.mxu1 %v8141_v55  ;;  %v8228_v53 = vld [vmem:[#allocation5 + $0x1204] ss:$16 sps:$4 sm:$0xff]   ;;  %v8231_v54 = vld [vmem:[#allocation5 + $0x120c] ss:$16 sps:$4 sm:$0xff]   ;;  %v181_v55 = vpack.c.bf16 %v157_v52, %v133_v51  ;;  %v8310_v51 = vld [vmem:[#allocation5 + $0x13c0] ss:$16 sps:$4 sm:$0xff]  }
 0x284   :  { %5195 = vmatprep.mubr.bf16.mxu0 %v182_v56  ;;  %5711 = vmatprep.mubr.bf16.mxu1 %v182_v56  ;;  %v136_v56 = vld [vmem:[#allocation2 + $0x98] sm:$0xff] }
 0x285   :  { %v8313_v52 = vld [vmem:[#allocation5 + $0x13c8] ss:$16 sps:$4 sm:$0xff]  }
 0x286   :  { %5166 = vmatpush1.bf16.msra.mxu0 %v8136_v57  ;;  %5682 = vmatpush1.bf16.msra.mxu1 %v8139_v58  ;;  %v160_v57 = vld [vmem:[#allocation2 + $0x158] sm:$0xff]  ;;  %v8226_v58 = vld [vmem:[#allocation5 + $0x1200] ss:$16 sps:$4 sm:$0xff]  }
 0x287   :  { %5167 = vmatprep.subr.bf16.mxu0 %v8144_v59  ;;  %5683 = vmatprep.subr.bf16.mxu1 %v8147_v60  ;;  %v8229_v59 = vld [vmem:[#allocation5 + $0x1208] ss:$16 sps:$4 sm:$0xff]   ;;  %v8234_v60 = vld [vmem:[#allocation5 + $0x1224] ss:$16 sps:$4 sm:$0xff]  }
 0x28a   :  { %5168 = vmatpush1.bf16.msra.mxu0 %v8142_v61  ;;  %5684 = vmatpush1.bf16.msra.mxu1 %v8145_v62  ;;  %v8237_v61 = vld [vmem:[#allocation5 + $0x122c] ss:$16 sps:$4 sm:$0xff]   ;;  %v184_v62 = vpack.c.bf16 %v160_v57, %v136_v56  ;;  %v8319_v56 = vld [vmem:[#allocation5 + $0x13e8] ss:$16 sps:$4 sm:$0xff]   ;;  %v135_v57 = vld [vmem:[#allocation2 + $0x90] sm:$0xff] }
 0x28b   :  { %5169 = vmatprep.subr.bf16.mxu0 %v8150_v63  ;;  %5685 = vmatprep.subr.bf16.mxu1 %v8153_v0  ;;  %v8232_v63 = vld [vmem:[#allocation5 + $0x1220] ss:$16 sps:$4 sm:$0xff]   ;;  %v8235_v0 = vld [vmem:[#allocation5 + $0x1228] ss:$16 sps:$4 sm:$0xff]  }
 0x28e   :  { %5170 = vmatpush1.bf16.msra.mxu0 %v8148_v1  ;;  %5686 = vmatpush1.bf16.msra.mxu1 %v8151_v2  ;;  %v8240_v1 = vld [vmem:[#allocation5 + $0x1244] ss:$16 sps:$4 sm:$0xff]   ;;  %v8243_v2 = vld [vmem:[#allocation5 + $0x124c] ss:$16 sps:$4 sm:$0xff]  }
 0x28f   :  { %5171 = vmatprep.subr.bf16.mxu0 %v8156_v3  ;;  %5687 = vmatprep.subr.bf16.mxu1 %v8159_v4  ;;  %v8238_v3 = vld [vmem:[#allocation5 + $0x1240] ss:$16 sps:$4 sm:$0xff]   ;;  %v8241_v4 = vld [vmem:[#allocation5 + $0x1248] ss:$16 sps:$4 sm:$0xff]  }
 0x292   :  { %5172 = vmatpush1.bf16.msra.mxu0 %v8154_v5  ;;  %5688 = vmatpush1.bf16.msra.mxu1 %v8157_v6  ;;  %v8246_v5 = vld [vmem:[#allocation5 + $0x1264] ss:$16 sps:$4 sm:$0xff]   ;;  %v8249_v6 = vld [vmem:[#allocation5 + $0x126c] ss:$16 sps:$4 sm:$0xff]  }
 0x293   :  { %5173 = vmatprep.subr.bf16.mxu0 %v8162_v7  ;;  %5689 = vmatprep.subr.bf16.mxu1 %v8165_v8  ;;  %v8244_v7 = vld [vmem:[#allocation5 + $0x1260] ss:$16 sps:$4 sm:$0xff]   ;;  %v8247_v8 = vld [vmem:[#allocation5 + $0x1268] ss:$16 sps:$4 sm:$0xff]  }
 0x296   :  { %5174 = vmatpush1.bf16.msra.mxu0 %v8160_v9  ;;  %5690 = vmatpush1.bf16.msra.mxu1 %v8163_v10  ;;  %v8252_v9 = vld [vmem:[#allocation5 + $0x1284] ss:$16 sps:$4 sm:$0xff]   ;;  %v8255_v10 = vld [vmem:[#allocation5 + $0x128c] ss:$16 sps:$4 sm:$0xff]  }
 0x297   :  { %5175 = vmatprep.subr.bf16.mxu0 %v8168_v11  ;;  %5691 = vmatprep.subr.bf16.mxu1 %v8171_v12  ;;  %v8250_v11 = vld [vmem:[#allocation5 + $0x1280] ss:$16 sps:$4 sm:$0xff]   ;;  %v8253_v12 = vld [vmem:[#allocation5 + $0x1288] ss:$16 sps:$4 sm:$0xff]  }
 0x29a   :  { %5176 = vmatpush1.bf16.msra.mxu0 %v8166_v13  ;;  %5692 = vmatpush1.bf16.msra.mxu1 %v8169_v14  ;;  %v8258_v13 = vld [vmem:[#allocation5 + $0x12a4] ss:$16 sps:$4 sm:$0xff]   ;;  %v8261_v14 = vld [vmem:[#allocation5 + $0x12ac] ss:$16 sps:$4 sm:$0xff]  }
 0x29b   :  { %5177 = vmatprep.subr.bf16.mxu0 %v8174_v15  ;;  %5693 = vmatprep.subr.bf16.mxu1 %v8177_v16  ;;  %v8256_v15 = vld [vmem:[#allocation5 + $0x12a0] ss:$16 sps:$4 sm:$0xff]   ;;  %v8259_v16 = vld [vmem:[#allocation5 + $0x12a8] ss:$16 sps:$4 sm:$0xff]  }
 0x29e   :  { %5178 = vmatpush1.bf16.msra.mxu0 %v8172_v17  ;;  %5694 = vmatpush1.bf16.msra.mxu1 %v8175_v18  ;;  %v8264_v17 = vld [vmem:[#allocation5 + $0x12c4] ss:$16 sps:$4 sm:$0xff]   ;;  %v8267_v18 = vld [vmem:[#allocation5 + $0x12cc] ss:$16 sps:$4 sm:$0xff]  }
 0x29f   :  { %5179 = vmatprep.subr.bf16.mxu0 %v8180_v19  ;;  %5695 = vmatprep.subr.bf16.mxu1 %v8183_v20  ;;  %v8262_v19 = vld [vmem:[#allocation5 + $0x12c0] ss:$16 sps:$4 sm:$0xff]   ;;  %v8265_v20 = vld [vmem:[#allocation5 + $0x12c8] ss:$16 sps:$4 sm:$0xff]  }
 0x2a2   :  { %5180 = vmatpush1.bf16.msra.mxu0 %v8178_v21  ;;  %5696 = vmatpush1.bf16.msra.mxu1 %v8181_v22  ;;  %v8270_v21 = vld [vmem:[#allocation5 + $0x12e4] ss:$16 sps:$4 sm:$0xff]   ;;  %v8273_v22 = vld [vmem:[#allocation5 + $0x12ec] ss:$16 sps:$4 sm:$0xff]  }
 0x2a3   :  { %5181 = vmatprep.subr.bf16.mxu0 %v8186_v23  ;;  %5697 = vmatprep.subr.bf16.mxu1 %v8189_v24  ;;  %v8268_v23 = vld [vmem:[#allocation5 + $0x12e0] ss:$16 sps:$4 sm:$0xff]   ;;  %v8271_v24 = vld [vmem:[#allocation5 + $0x12e8] ss:$16 sps:$4 sm:$0xff]  }
 0x2a6   :  { %5182 = vmatpush1.bf16.msra.mxu0 %v8184_v25  ;;  %5698 = vmatpush1.bf16.msra.mxu1 %v8187_v26  ;;  %v8276_v25 = vld [vmem:[#allocation5 + $0x1304] ss:$16 sps:$4 sm:$0xff]   ;;  %v8279_v26 = vld [vmem:[#allocation5 + $0x130c] ss:$16 sps:$4 sm:$0xff]  }
 0x2a7   :  { %5183 = vmatprep.subr.bf16.mxu0 %v8192_v27  ;;  %5699 = vmatprep.subr.bf16.mxu1 %v8195_v28  ;;  %v8274_v27 = vld [vmem:[#allocation5 + $0x1300] ss:$16 sps:$4 sm:$0xff]   ;;  %v8277_v28 = vld [vmem:[#allocation5 + $0x1308] ss:$16 sps:$4 sm:$0xff]  }
 0x2aa   :  { %5184 = vmatpush1.bf16.msra.mxu0 %v8190_v29  ;;  %5700 = vmatpush1.bf16.msra.mxu1 %v8193_v30  ;;  %v8282_v29 = vld [vmem:[#allocation5 + $0x1324] ss:$16 sps:$4 sm:$0xff]   ;;  %v8285_v30 = vld [vmem:[#allocation5 + $0x132c] ss:$16 sps:$4 sm:$0xff]  }
 0x2ab   :  { %5185 = vmatprep.subr.bf16.mxu0 %v8198_v31  ;;  %5701 = vmatprep.subr.bf16.mxu1 %v8201_v32  ;;  %v8280_v31 = vld [vmem:[#allocation5 + $0x1320] ss:$16 sps:$4 sm:$0xff]   ;;  %v8283_v32 = vld [vmem:[#allocation5 + $0x1328] ss:$16 sps:$4 sm:$0xff]  }
 0x2ae   :  { %5186 = vmatpush1.bf16.msra.mxu0 %v8196_v33  ;;  %5702 = vmatpush1.bf16.msra.mxu1 %v8199_v34  ;;  %v8288_v33 = vld [vmem:[#allocation5 + $0x1344] ss:$16 sps:$4 sm:$0xff]   ;;  %v8291_v34 = vld [vmem:[#allocation5 + $0x134c] ss:$16 sps:$4 sm:$0xff]  }
 0x2af   :  { %5187 = vmatprep.subr.bf16.mxu0 %v8204_v35  ;;  %5703 = vmatprep.subr.bf16.mxu1 %v8207_v36  ;;  %v8286_v35 = vld [vmem:[#allocation5 + $0x1340] ss:$16 sps:$4 sm:$0xff]   ;;  %v8289_v36 = vld [vmem:[#allocation5 + $0x1348] ss:$16 sps:$4 sm:$0xff]  }
 0x2b2   :  { %5188 = vmatpush1.bf16.msra.mxu0 %v8202_v37  ;;  %5704 = vmatpush1.bf16.msra.mxu1 %v8205_v38  ;;  %v8294_v37 = vld [vmem:[#allocation5 + $0x1364] ss:$16 sps:$4 sm:$0xff]   ;;  %v8297_v38 = vld [vmem:[#allocation5 + $0x136c] ss:$16 sps:$4 sm:$0xff]  }
 0x2b3   :  { %5189 = vmatprep.subr.bf16.mxu0 %v8210_v39  ;;  %5705 = vmatprep.subr.bf16.mxu1 %v8213_v40  ;;  %v8292_v39 = vld [vmem:[#allocation5 + $0x1360] ss:$16 sps:$4 sm:$0xff]   ;;  %v8295_v40 = vld [vmem:[#allocation5 + $0x1368] ss:$16 sps:$4 sm:$0xff]  }
 0x2b6   :  { %5190 = vmatpush1.bf16.msra.mxu0 %v8208_v41  ;;  %5706 = vmatpush1.bf16.msra.mxu1 %v8211_v42  ;;  %v8300_v41 = vld [vmem:[#allocation5 + $0x1384] ss:$16 sps:$4 sm:$0xff]   ;;  %v8303_v42 = vld [vmem:[#allocation5 + $0x138c] ss:$16 sps:$4 sm:$0xff]  }
 0x2b7   :  { %5191 = vmatprep.subr.bf16.mxu0 %v8216_v43  ;;  %5707 = vmatprep.subr.bf16.mxu1 %v8219_v44  ;;  %v8298_v43 = vld [vmem:[#allocation5 + $0x1380] ss:$16 sps:$4 sm:$0xff]   ;;  %v8301_v44 = vld [vmem:[#allocation5 + $0x1388] ss:$16 sps:$4 sm:$0xff]  }
 0x2ba   :  { %5192 = vmatpush1.bf16.msra.mxu0 %v8214_v45  ;;  %5708 = vmatpush1.bf16.msra.mxu1 %v8217_v46  ;;  %v8306_v45 = vld [vmem:[#allocation5 + $0x13a4] ss:$16 sps:$4 sm:$0xff]   ;;  %v8309_v46 = vld [vmem:[#allocation5 + $0x13ac] ss:$16 sps:$4 sm:$0xff]  }
 0x2bb   :  { %5193 = vmatprep.subr.bf16.mxu0 %v8222_v47  ;;  %5709 = vmatprep.subr.bf16.mxu1 %v8225_v48  ;;  %v8304_v47 = vld [vmem:[#allocation5 + $0x13a0] ss:$16 sps:$4 sm:$0xff]   ;;  %v8307_v48 = vld [vmem:[#allocation5 + $0x13a8] ss:$16 sps:$4 sm:$0xff]  }
 0x2be   :  { %5194 = vmatpush1.bf16.msra.mxu0 %v8220_v49  ;;  %5710 = vmatpush1.bf16.msra.mxu1 %v8223_v50  ;;  %v8312_v49 = vld [vmem:[#allocation5 + $0x13c4] ss:$16 sps:$4 sm:$0xff]   ;;  %v8315_v50 = vld [vmem:[#allocation5 + $0x13cc] ss:$16 sps:$4 sm:$0xff]  }
 0x2bf   :  { %5206 = vmatprep.subr.bf16.mxu0 %v8228_v53  ;;  %5722 = vmatprep.subr.bf16.mxu1 %v8231_v54  ;;  %v8318_v53 = vld [vmem:[#allocation5 + $0x13e4] ss:$16 sps:$4 sm:$0xff]   ;;  %v8321_v54 = vld [vmem:[#allocation5 + $0x13ec] ss:$16 sps:$4 sm:$0xff]  }
 0x2c1   :  { %5196 = vmatmul.mubr.bf16.vlgmr.msra.gmra.mrb[0].mxu0 %v181_v55  ;;  %5712 = vmatmul.mubr.bf16.vlgmr.msra.gmra.mrb[0].mxu1 %v181_v55  ;;  %v8316_v55 = vld [vmem:[#allocation5 + $0x13e0] ss:$16 sps:$4 sm:$0xff]  }
 0x2c2   :  { %5207 = vmatpush1.bf16.msra.mxu0 %v8226_v58  ;;  %5723 = vmatpush1.bf16.msra.mxu1 %v8229_v59  ;;  %v159_v58 = vld [vmem:[#allocation2 + $0x150] sm:$0xff] }
 0x2c3   :  { %5208 = vmatprep.subr.bf16.mxu0 %v8234_v60  ;;  %5724 = vmatprep.subr.bf16.mxu1 %v8237_v61  ;;  %v8324_v59 = vld [vmem:[#allocation5 + $0x1404] ss:$16 sps:$4 sm:$0xff]   ;;  %v8327_v60 = vld [vmem:[#allocation5 + $0x140c] ss:$16 sps:$4 sm:$0xff]   ;;  %v183_v61 = vpack.c.bf16 %v159_v58, %v135_v57  ;;  %v8406_v57 = vld [vmem:[#allocation5 + $0x15c0] ss:$16 sps:$4 sm:$0xff]  }
 0x2c4   :  { %5238 = vmatprep.mubr.bf16.mxu0 %v184_v62  ;;  %5754 = vmatprep.mubr.bf16.mxu1 %v184_v62  ;;  %v138_v62 = vld [vmem:[#allocation2 + $0xa8] sm:$0xff] }
 0x2c5   :  { %v8409_v58 = vld [vmem:[#allocation5 + $0x15c8] ss:$16 sps:$4 sm:$0xff]  }
 0x2c6   :  { %5209 = vmatpush1.bf16.msra.mxu0 %v8232_v63  ;;  %5725 = vmatpush1.bf16.msra.mxu1 %v8235_v0  ;;  %v162_v63 = vld [vmem:[#allocation2 + $0x168] sm:$0xff]  ;;  %v8322_v0 = vld [vmem:[#allocation5 + $0x1400] ss:$16 sps:$4 sm:$0xff]  }
 0x2c7   :  { %5210 = vmatprep.subr.bf16.mxu0 %v8240_v1  ;;  %5726 = vmatprep.subr.bf16.mxu1 %v8243_v2  ;;  %v8325_v1 = vld [vmem:[#allocation5 + $0x1408] ss:$16 sps:$4 sm:$0xff]   ;;  %v8330_v2 = vld [vmem:[#allocation5 + $0x1424] ss:$16 sps:$4 sm:$0xff]  }
 0x2ca   :  { %5211 = vmatpush1.bf16.msra.mxu0 %v8238_v3  ;;  %5727 = vmatpush1.bf16.msra.mxu1 %v8241_v4  ;;  %v8333_v3 = vld [vmem:[#allocation5 + $0x142c] ss:$16 sps:$4 sm:$0xff]   ;;  %v186_v4 = vpack.c.bf16 %v162_v63, %v138_v62  ;;  %v8415_v62 = vld [vmem:[#allocation5 + $0x15e8] ss:$16 sps:$4 sm:$0xff]   ;;  %v137_v63 = vld [vmem:[#allocation2 + $0xa0] sm:$0xff] }
 0x2cb   :  { %5212 = vmatprep.subr.bf16.mxu0 %v8246_v5  ;;  %5728 = vmatprep.subr.bf16.mxu1 %v8249_v6  ;;  %v8328_v5 = vld [vmem:[#allocation5 + $0x1420] ss:$16 sps:$4 sm:$0xff]   ;;  %v8331_v6 = vld [vmem:[#allocation5 + $0x1428] ss:$16 sps:$4 sm:$0xff]  }
 0x2ce   :  { %5213 = vmatpush1.bf16.msra.mxu0 %v8244_v7  ;;  %5729 = vmatpush1.bf16.msra.mxu1 %v8247_v8  ;;  %v8336_v7 = vld [vmem:[#allocation5 + $0x1444] ss:$16 sps:$4 sm:$0xff]   ;;  %v8339_v8 = vld [vmem:[#allocation5 + $0x144c] ss:$16 sps:$4 sm:$0xff]  }
 0x2cf   :  { %5214 = vmatprep.subr.bf16.mxu0 %v8252_v9  ;;  %5730 = vmatprep.subr.bf16.mxu1 %v8255_v10  ;;  %v8334_v9 = vld [vmem:[#allocation5 + $0x1440] ss:$16 sps:$4 sm:$0xff]   ;;  %v8337_v10 = vld [vmem:[#allocation5 + $0x1448] ss:$16 sps:$4 sm:$0xff]  }
 0x2d2   :  { %5215 = vmatpush1.bf16.msra.mxu0 %v8250_v11  ;;  %5731 = vmatpush1.bf16.msra.mxu1 %v8253_v12  ;;  %v8342_v11 = vld [vmem:[#allocation5 + $0x1464] ss:$16 sps:$4 sm:$0xff]   ;;  %v8345_v12 = vld [vmem:[#allocation5 + $0x146c] ss:$16 sps:$4 sm:$0xff]  }
 0x2d3   :  { %5216 = vmatprep.subr.bf16.mxu0 %v8258_v13  ;;  %5732 = vmatprep.subr.bf16.mxu1 %v8261_v14  ;;  %v8340_v13 = vld [vmem:[#allocation5 + $0x1460] ss:$16 sps:$4 sm:$0xff]   ;;  %v8343_v14 = vld [vmem:[#allocation5 + $0x1468] ss:$16 sps:$4 sm:$0xff]  }
 0x2d6   :  { %5217 = vmatpush1.bf16.msra.mxu0 %v8256_v15  ;;  %5733 = vmatpush1.bf16.msra.mxu1 %v8259_v16  ;;  %v8348_v15 = vld [vmem:[#allocation5 + $0x1484] ss:$16 sps:$4 sm:$0xff]   ;;  %v8351_v16 = vld [vmem:[#allocation5 + $0x148c] ss:$16 sps:$4 sm:$0xff]  }
 0x2d7   :  { %5218 = vmatprep.subr.bf16.mxu0 %v8264_v17  ;;  %5734 = vmatprep.subr.bf16.mxu1 %v8267_v18  ;;  %v8346_v17 = vld [vmem:[#allocation5 + $0x1480] ss:$16 sps:$4 sm:$0xff]   ;;  %v8349_v18 = vld [vmem:[#allocation5 + $0x1488] ss:$16 sps:$4 sm:$0xff]  }
 0x2da   :  { %5219 = vmatpush1.bf16.msra.mxu0 %v8262_v19  ;;  %5735 = vmatpush1.bf16.msra.mxu1 %v8265_v20  ;;  %v8354_v19 = vld [vmem:[#allocation5 + $0x14a4] ss:$16 sps:$4 sm:$0xff]   ;;  %v8357_v20 = vld [vmem:[#allocation5 + $0x14ac] ss:$16 sps:$4 sm:$0xff]  }
 0x2db   :  { %5220 = vmatprep.subr.bf16.mxu0 %v8270_v21  ;;  %5736 = vmatprep.subr.bf16.mxu1 %v8273_v22  ;;  %v8352_v21 = vld [vmem:[#allocation5 + $0x14a0] ss:$16 sps:$4 sm:$0xff]   ;;  %v8355_v22 = vld [vmem:[#allocation5 + $0x14a8] ss:$16 sps:$4 sm:$0xff]  }
 0x2de   :  { %5221 = vmatpush1.bf16.msra.mxu0 %v8268_v23  ;;  %5737 = vmatpush1.bf16.msra.mxu1 %v8271_v24  ;;  %v8360_v23 = vld [vmem:[#allocation5 + $0x14c4] ss:$16 sps:$4 sm:$0xff]   ;;  %v8363_v24 = vld [vmem:[#allocation5 + $0x14cc] ss:$16 sps:$4 sm:$0xff]  }
 0x2df   :  { %5222 = vmatprep.subr.bf16.mxu0 %v8276_v25  ;;  %5738 = vmatprep.subr.bf16.mxu1 %v8279_v26  ;;  %v8358_v25 = vld [vmem:[#allocation5 + $0x14c0] ss:$16 sps:$4 sm:$0xff]   ;;  %v8361_v26 = vld [vmem:[#allocation5 + $0x14c8] ss:$16 sps:$4 sm:$0xff]  }
 0x2e2   :  { %5223 = vmatpush1.bf16.msra.mxu0 %v8274_v27  ;;  %5739 = vmatpush1.bf16.msra.mxu1 %v8277_v28  ;;  %v8366_v27 = vld [vmem:[#allocation5 + $0x14e4] ss:$16 sps:$4 sm:$0xff]   ;;  %v8369_v28 = vld [vmem:[#allocation5 + $0x14ec] ss:$16 sps:$4 sm:$0xff]  }
 0x2e3   :  { %5224 = vmatprep.subr.bf16.mxu0 %v8282_v29  ;;  %5740 = vmatprep.subr.bf16.mxu1 %v8285_v30  ;;  %v8364_v29 = vld [vmem:[#allocation5 + $0x14e0] ss:$16 sps:$4 sm:$0xff]   ;;  %v8367_v30 = vld [vmem:[#allocation5 + $0x14e8] ss:$16 sps:$4 sm:$0xff]  }
 0x2e6   :  { %5225 = vmatpush1.bf16.msra.mxu0 %v8280_v31  ;;  %5741 = vmatpush1.bf16.msra.mxu1 %v8283_v32  ;;  %v8372_v31 = vld [vmem:[#allocation5 + $0x1504] ss:$16 sps:$4 sm:$0xff]   ;;  %v8375_v32 = vld [vmem:[#allocation5 + $0x150c] ss:$16 sps:$4 sm:$0xff]  }
 0x2e7   :  { %5226 = vmatprep.subr.bf16.mxu0 %v8288_v33  ;;  %5742 = vmatprep.subr.bf16.mxu1 %v8291_v34  ;;  %v8370_v33 = vld [vmem:[#allocation5 + $0x1500] ss:$16 sps:$4 sm:$0xff]   ;;  %v8373_v34 = vld [vmem:[#allocation5 + $0x1508] ss:$16 sps:$4 sm:$0xff]  }
 0x2ea   :  { %5227 = vmatpush1.bf16.msra.mxu0 %v8286_v35  ;;  %5743 = vmatpush1.bf16.msra.mxu1 %v8289_v36  ;;  %v8378_v35 = vld [vmem:[#allocation5 + $0x1524] ss:$16 sps:$4 sm:$0xff]   ;;  %v8381_v36 = vld [vmem:[#allocation5 + $0x152c] ss:$16 sps:$4 sm:$0xff]  }
 0x2eb   :  { %5228 = vmatprep.subr.bf16.mxu0 %v8294_v37  ;;  %5744 = vmatprep.subr.bf16.mxu1 %v8297_v38  ;;  %v8376_v37 = vld [vmem:[#allocation5 + $0x1520] ss:$16 sps:$4 sm:$0xff]   ;;  %v8379_v38 = vld [vmem:[#allocation5 + $0x1528] ss:$16 sps:$4 sm:$0xff]  }
 0x2ee   :  { %5229 = vmatpush1.bf16.msra.mxu0 %v8292_v39  ;;  %5745 = vmatpush1.bf16.msra.mxu1 %v8295_v40  ;;  %v8384_v39 = vld [vmem:[#allocation5 + $0x1544] ss:$16 sps:$4 sm:$0xff]   ;;  %v8387_v40 = vld [vmem:[#allocation5 + $0x154c] ss:$16 sps:$4 sm:$0xff]  }
 0x2ef   :  { %5230 = vmatprep.subr.bf16.mxu0 %v8300_v41  ;;  %5746 = vmatprep.subr.bf16.mxu1 %v8303_v42  ;;  %v8382_v41 = vld [vmem:[#allocation5 + $0x1540] ss:$16 sps:$4 sm:$0xff]   ;;  %v8385_v42 = vld [vmem:[#allocation5 + $0x1548] ss:$16 sps:$4 sm:$0xff]  }
 0x2f2   :  { %5231 = vmatpush1.bf16.msra.mxu0 %v8298_v43  ;;  %5747 = vmatpush1.bf16.msra.mxu1 %v8301_v44  ;;  %v8390_v43 = vld [vmem:[#allocation5 + $0x1564] ss:$16 sps:$4 sm:$0xff]   ;;  %v8393_v44 = vld [vmem:[#allocation5 + $0x156c] ss:$16 sps:$4 sm:$0xff]  }
 0x2f3   :  { %5232 = vmatprep.subr.bf16.mxu0 %v8306_v45  ;;  %5748 = vmatprep.subr.bf16.mxu1 %v8309_v46  ;;  %v8388_v45 = vld [vmem:[#allocation5 + $0x1560] ss:$16 sps:$4 sm:$0xff]   ;;  %v8391_v46 = vld [vmem:[#allocation5 + $0x1568] ss:$16 sps:$4 sm:$0xff]  }
 0x2f6   :  { %5233 = vmatpush1.bf16.msra.mxu0 %v8304_v47  ;;  %5749 = vmatpush1.bf16.msra.mxu1 %v8307_v48  ;;  %v8396_v47 = vld [vmem:[#allocation5 + $0x1584] ss:$16 sps:$4 sm:$0xff]   ;;  %v8399_v48 = vld [vmem:[#allocation5 + $0x158c] ss:$16 sps:$4 sm:$0xff]  }
 0x2f7   :  { %5234 = vmatprep.subr.bf16.mxu0 %v8312_v49  ;;  %5750 = vmatprep.subr.bf16.mxu1 %v8315_v50  ;;  %v8394_v49 = vld [vmem:[#allocation5 + $0x1580] ss:$16 sps:$4 sm:$0xff]   ;;  %v8397_v50 = vld [vmem:[#allocation5 + $0x1588] ss:$16 sps:$4 sm:$0xff]  }
 0x2fa   :  { %5235 = vmatpush1.bf16.msra.mxu0 %v8310_v51  ;;  %5751 = vmatpush1.bf16.msra.mxu1 %v8313_v52  ;;  %v8402_v51 = vld [vmem:[#allocation5 + $0x15a4] ss:$16 sps:$4 sm:$0xff]   ;;  %v8405_v52 = vld [vmem:[#allocation5 + $0x15ac] ss:$16 sps:$4 sm:$0xff]  }
 0x2fb   :  { %5236 = vmatprep.subr.bf16.mxu0 %v8318_v53  ;;  %5752 = vmatprep.subr.bf16.mxu1 %v8321_v54  ;;  %v8400_v53 = vld [vmem:[#allocation5 + $0x15a0] ss:$16 sps:$4 sm:$0xff]   ;;  %v8403_v54 = vld [vmem:[#allocation5 + $0x15a8] ss:$16 sps:$4 sm:$0xff]  }
 0x2fe   :  { %5237 = vmatpush1.bf16.msra.mxu0 %v8316_v55  ;;  %5753 = vmatpush1.bf16.msra.mxu1 %v8319_v56  ;;  %v8408_v55 = vld [vmem:[#allocation5 + $0x15c4] ss:$16 sps:$4 sm:$0xff]   ;;  %v8411_v56 = vld [vmem:[#allocation5 + $0x15cc] ss:$16 sps:$4 sm:$0xff]  }
 0x2ff   :  { %5249 = vmatprep.subr.bf16.mxu0 %v8324_v59  ;;  %5765 = vmatprep.subr.bf16.mxu1 %v8327_v60  ;;  %v8414_v59 = vld [vmem:[#allocation5 + $0x15e4] ss:$16 sps:$4 sm:$0xff]   ;;  %v8417_v60 = vld [vmem:[#allocation5 + $0x15ec] ss:$16 sps:$4 sm:$0xff]  }
 0x301   :  { %5239 = vmatmul.mubr.bf16.vlgmr.msra.gmra.mrb[0].mxu0 %v183_v61  ;;  %5755 = vmatmul.mubr.bf16.vlgmr.msra.gmra.mrb[0].mxu1 %v183_v61  ;;  %v8412_v61 = vld [vmem:[#allocation5 + $0x15e0] ss:$16 sps:$4 sm:$0xff]  }
 0x302   :  { %5250 = vmatpush1.bf16.msra.mxu0 %v8322_v0  ;;  %5766 = vmatpush1.bf16.msra.mxu1 %v8325_v1  ;;  %v161_v0 = vld [vmem:[#allocation2 + $0x160] sm:$0xff] }
 0x303   :  { %5251 = vmatprep.subr.bf16.mxu0 %v8330_v2  ;;  %5767 = vmatprep.subr.bf16.mxu1 %v8333_v3  ;;  %v8420_v1 = vld [vmem:[#allocation5 + $0x1604] ss:$16 sps:$4 sm:$0xff]   ;;  %v8423_v2 = vld [vmem:[#allocation5 + $0x160c] ss:$16 sps:$4 sm:$0xff]   ;;  %v185_v3 = vpack.c.bf16 %v161_v0, %v137_v63  ;;  %v8502_v63 = vld [vmem:[#allocation5 + $0x17c0] ss:$16 sps:$4 sm:$0xff]  }
 0x304   :  { %5281 = vmatprep.mubr.bf16.mxu0 %v186_v4  ;;  %5797 = vmatprep.mubr.bf16.mxu1 %v186_v4  ;;  %v140_v4 = vld [vmem:[#allocation2 + $0xb8] sm:$0xff] }
 0x305   :  { %v8505_v0 = vld [vmem:[#allocation5 + $0x17c8] ss:$16 sps:$4 sm:$0xff]  }
 0x306   :  { %5252 = vmatpush1.bf16.msra.mxu0 %v8328_v5  ;;  %5768 = vmatpush1.bf16.msra.mxu1 %v8331_v6  ;;  %v164_v5 = vld [vmem:[#allocation2 + $0x178] sm:$0xff]  ;;  %v8418_v6 = vld [vmem:[#allocation5 + $0x1600] ss:$16 sps:$4 sm:$0xff]  }
 0x307   :  { %5253 = vmatprep.subr.bf16.mxu0 %v8336_v7  ;;  %5769 = vmatprep.subr.bf16.mxu1 %v8339_v8  ;;  %v8421_v7 = vld [vmem:[#allocation5 + $0x1608] ss:$16 sps:$4 sm:$0xff]   ;;  %v8426_v8 = vld [vmem:[#allocation5 + $0x1624] ss:$16 sps:$4 sm:$0xff]  }
 0x30a   :  { %5254 = vmatpush1.bf16.msra.mxu0 %v8334_v9  ;;  %5770 = vmatpush1.bf16.msra.mxu1 %v8337_v10  ;;  %v8429_v9 = vld [vmem:[#allocation5 + $0x162c] ss:$16 sps:$4 sm:$0xff]   ;;  %v188_v10 = vpack.c.bf16 %v164_v5, %v140_v4  ;;  %v8511_v4 = vld [vmem:[#allocation5 + $0x17e8] ss:$16 sps:$4 sm:$0xff]   ;;  %v139_v5 = vld [vmem:[#allocation2 + $0xb0] sm:$0xff] }
 0x30b   :  { %5255 = vmatprep.subr.bf16.mxu0 %v8342_v11  ;;  %5771 = vmatprep.subr.bf16.mxu1 %v8345_v12  ;;  %v8424_v11 = vld [vmem:[#allocation5 + $0x1620] ss:$16 sps:$4 sm:$0xff]   ;;  %v8427_v12 = vld [vmem:[#allocation5 + $0x1628] ss:$16 sps:$4 sm:$0xff]  }
 0x30e   :  { %5256 = vmatpush1.bf16.msra.mxu0 %v8340_v13  ;;  %5772 = vmatpush1.bf16.msra.mxu1 %v8343_v14  ;;  %v8432_v13 = vld [vmem:[#allocation5 + $0x1644] ss:$16 sps:$4 sm:$0xff]   ;;  %v8435_v14 = vld [vmem:[#allocation5 + $0x164c] ss:$16 sps:$4 sm:$0xff]  }
 0x30f   :  { %5257 = vmatprep.subr.bf16.mxu0 %v8348_v15  ;;  %5773 = vmatprep.subr.bf16.mxu1 %v8351_v16  ;;  %v8430_v15 = vld [vmem:[#allocation5 + $0x1640] ss:$16 sps:$4 sm:$0xff]   ;;  %v8433_v16 = vld [vmem:[#allocation5 + $0x1648] ss:$16 sps:$4 sm:$0xff]  }
 0x312   :  { %5258 = vmatpush1.bf16.msra.mxu0 %v8346_v17  ;;  %5774 = vmatpush1.bf16.msra.mxu1 %v8349_v18  ;;  %v8438_v17 = vld [vmem:[#allocation5 + $0x1664] ss:$16 sps:$4 sm:$0xff]   ;;  %v8441_v18 = vld [vmem:[#allocation5 + $0x166c] ss:$16 sps:$4 sm:$0xff]  }
 0x313   :  { %5259 = vmatprep.subr.bf16.mxu0 %v8354_v19  ;;  %5775 = vmatprep.subr.bf16.mxu1 %v8357_v20  ;;  %v8436_v19 = vld [vmem:[#allocation5 + $0x1660] ss:$16 sps:$4 sm:$0xff]   ;;  %v8439_v20 = vld [vmem:[#allocation5 + $0x1668] ss:$16 sps:$4 sm:$0xff]  }
 0x316   :  { %5260 = vmatpush1.bf16.msra.mxu0 %v8352_v21  ;;  %5776 = vmatpush1.bf16.msra.mxu1 %v8355_v22  ;;  %v8444_v21 = vld [vmem:[#allocation5 + $0x1684] ss:$16 sps:$4 sm:$0xff]   ;;  %v8447_v22 = vld [vmem:[#allocation5 + $0x168c] ss:$16 sps:$4 sm:$0xff]  }
 0x317   :  { %5261 = vmatprep.subr.bf16.mxu0 %v8360_v23  ;;  %5777 = vmatprep.subr.bf16.mxu1 %v8363_v24  ;;  %v8442_v23 = vld [vmem:[#allocation5 + $0x1680] ss:$16 sps:$4 sm:$0xff]   ;;  %v8445_v24 = vld [vmem:[#allocation5 + $0x1688] ss:$16 sps:$4 sm:$0xff]  }
 0x31a   :  { %5262 = vmatpush1.bf16.msra.mxu0 %v8358_v25  ;;  %5778 = vmatpush1.bf16.msra.mxu1 %v8361_v26  ;;  %v8450_v25 = vld [vmem:[#allocation5 + $0x16a4] ss:$16 sps:$4 sm:$0xff]   ;;  %v8453_v26 = vld [vmem:[#allocation5 + $0x16ac] ss:$16 sps:$4 sm:$0xff]  }
 0x31b   :  { %5263 = vmatprep.subr.bf16.mxu0 %v8366_v27  ;;  %5779 = vmatprep.subr.bf16.mxu1 %v8369_v28  ;;  %v8448_v27 = vld [vmem:[#allocation5 + $0x16a0] ss:$16 sps:$4 sm:$0xff]   ;;  %v8451_v28 = vld [vmem:[#allocation5 + $0x16a8] ss:$16 sps:$4 sm:$0xff]  }
 0x31e   :  { %5264 = vmatpush1.bf16.msra.mxu0 %v8364_v29  ;;  %5780 = vmatpush1.bf16.msra.mxu1 %v8367_v30  ;;  %v8456_v29 = vld [vmem:[#allocation5 + $0x16c4] ss:$16 sps:$4 sm:$0xff]   ;;  %v8459_v30 = vld [vmem:[#allocation5 + $0x16cc] ss:$16 sps:$4 sm:$0xff]  }
 0x31f   :  { %5265 = vmatprep.subr.bf16.mxu0 %v8372_v31  ;;  %5781 = vmatprep.subr.bf16.mxu1 %v8375_v32  ;;  %v8454_v31 = vld [vmem:[#allocation5 + $0x16c0] ss:$16 sps:$4 sm:$0xff]   ;;  %v8457_v32 = vld [vmem:[#allocation5 + $0x16c8] ss:$16 sps:$4 sm:$0xff]  }
 0x322   :  { %5266 = vmatpush1.bf16.msra.mxu0 %v8370_v33  ;;  %5782 = vmatpush1.bf16.msra.mxu1 %v8373_v34  ;;  %v8462_v33 = vld [vmem:[#allocation5 + $0x16e4] ss:$16 sps:$4 sm:$0xff]   ;;  %v8465_v34 = vld [vmem:[#allocation5 + $0x16ec] ss:$16 sps:$4 sm:$0xff]  }
 0x323   :  { %5267 = vmatprep.subr.bf16.mxu0 %v8378_v35  ;;  %5783 = vmatprep.subr.bf16.mxu1 %v8381_v36  ;;  %v8460_v35 = vld [vmem:[#allocation5 + $0x16e0] ss:$16 sps:$4 sm:$0xff]   ;;  %v8463_v36 = vld [vmem:[#allocation5 + $0x16e8] ss:$16 sps:$4 sm:$0xff]  }
 0x326   :  { %5268 = vmatpush1.bf16.msra.mxu0 %v8376_v37  ;;  %5784 = vmatpush1.bf16.msra.mxu1 %v8379_v38  ;;  %v8468_v37 = vld [vmem:[#allocation5 + $0x1704] ss:$16 sps:$4 sm:$0xff]   ;;  %v8471_v38 = vld [vmem:[#allocation5 + $0x170c] ss:$16 sps:$4 sm:$0xff]  }
 0x327   :  { %5269 = vmatprep.subr.bf16.mxu0 %v8384_v39  ;;  %5785 = vmatprep.subr.bf16.mxu1 %v8387_v40  ;;  %v8466_v39 = vld [vmem:[#allocation5 + $0x1700] ss:$16 sps:$4 sm:$0xff]   ;;  %v8469_v40 = vld [vmem:[#allocation5 + $0x1708] ss:$16 sps:$4 sm:$0xff]  }
 0x32a   :  { %5270 = vmatpush1.bf16.msra.mxu0 %v8382_v41  ;;  %5786 = vmatpush1.bf16.msra.mxu1 %v8385_v42  ;;  %v8474_v41 = vld [vmem:[#allocation5 + $0x1724] ss:$16 sps:$4 sm:$0xff]   ;;  %v8477_v42 = vld [vmem:[#allocation5 + $0x172c] ss:$16 sps:$4 sm:$0xff]  }
 0x32b   :  { %5271 = vmatprep.subr.bf16.mxu0 %v8390_v43  ;;  %5787 = vmatprep.subr.bf16.mxu1 %v8393_v44  ;;  %v8472_v43 = vld [vmem:[#allocation5 + $0x1720] ss:$16 sps:$4 sm:$0xff]   ;;  %v8475_v44 = vld [vmem:[#allocation5 + $0x1728] ss:$16 sps:$4 sm:$0xff]  }
 0x32e   :  { %5272 = vmatpush1.bf16.msra.mxu0 %v8388_v45  ;;  %5788 = vmatpush1.bf16.msra.mxu1 %v8391_v46  ;;  %v8480_v45 = vld [vmem:[#allocation5 + $0x1744] ss:$16 sps:$4 sm:$0xff]   ;;  %v8483_v46 = vld [vmem:[#allocation5 + $0x174c] ss:$16 sps:$4 sm:$0xff]  }
 0x32f   :  { %5273 = vmatprep.subr.bf16.mxu0 %v8396_v47  ;;  %5789 = vmatprep.subr.bf16.mxu1 %v8399_v48  ;;  %v8478_v47 = vld [vmem:[#allocation5 + $0x1740] ss:$16 sps:$4 sm:$0xff]   ;;  %v8481_v48 = vld [vmem:[#allocation5 + $0x1748] ss:$16 sps:$4 sm:$0xff]  }
 0x332   :  { %5274 = vmatpush1.bf16.msra.mxu0 %v8394_v49  ;;  %5790 = vmatpush1.bf16.msra.mxu1 %v8397_v50  ;;  %v8486_v49 = vld [vmem:[#allocation5 + $0x1764] ss:$16 sps:$4 sm:$0xff]   ;;  %v8489_v50 = vld [vmem:[#allocation5 + $0x176c] ss:$16 sps:$4 sm:$0xff]  }
 0x333   :  { %5275 = vmatprep.subr.bf16.mxu0 %v8402_v51  ;;  %5791 = vmatprep.subr.bf16.mxu1 %v8405_v52  ;;  %v8484_v51 = vld [vmem:[#allocation5 + $0x1760] ss:$16 sps:$4 sm:$0xff]   ;;  %v8487_v52 = vld [vmem:[#allocation5 + $0x1768] ss:$16 sps:$4 sm:$0xff]  }
 0x336   :  { %5276 = vmatpush1.bf16.msra.mxu0 %v8400_v53  ;;  %5792 = vmatpush1.bf16.msra.mxu1 %v8403_v54  ;;  %v8492_v53 = vld [vmem:[#allocation5 + $0x1784] ss:$16 sps:$4 sm:$0xff]   ;;  %v8495_v54 = vld [vmem:[#allocation5 + $0x178c] ss:$16 sps:$4 sm:$0xff]  }
 0x337   :  { %5277 = vmatprep.subr.bf16.mxu0 %v8408_v55  ;;  %5793 = vmatprep.subr.bf16.mxu1 %v8411_v56  ;;  %v8490_v55 = vld [vmem:[#allocation5 + $0x1780] ss:$16 sps:$4 sm:$0xff]   ;;  %v8493_v56 = vld [vmem:[#allocation5 + $0x1788] ss:$16 sps:$4 sm:$0xff]  }
 0x33a   :  { %5278 = vmatpush1.bf16.msra.mxu0 %v8406_v57  ;;  %5794 = vmatpush1.bf16.msra.mxu1 %v8409_v58  ;;  %v8498_v57 = vld [vmem:[#allocation5 + $0x17a4] ss:$16 sps:$4 sm:$0xff]   ;;  %v8501_v58 = vld [vmem:[#allocation5 + $0x17ac] ss:$16 sps:$4 sm:$0xff]  }
 0x33b   :  { %5279 = vmatprep.subr.bf16.mxu0 %v8414_v59  ;;  %5795 = vmatprep.subr.bf16.mxu1 %v8417_v60  ;;  %v8496_v59 = vld [vmem:[#allocation5 + $0x17a0] ss:$16 sps:$4 sm:$0xff]   ;;  %v8499_v60 = vld [vmem:[#allocation5 + $0x17a8] ss:$16 sps:$4 sm:$0xff]  }
 0x33e   :  { %5280 = vmatpush1.bf16.msra.mxu0 %v8412_v61  ;;  %5796 = vmatpush1.bf16.msra.mxu1 %v8415_v62  ;;  %v8504_v61 = vld [vmem:[#allocation5 + $0x17c4] ss:$16 sps:$4 sm:$0xff]   ;;  %v8507_v62 = vld [vmem:[#allocation5 + $0x17cc] ss:$16 sps:$4 sm:$0xff]  }
 0x33f   :  { %5292 = vmatprep.subr.bf16.mxu0 %v8420_v1  ;;  %5808 = vmatprep.subr.bf16.mxu1 %v8423_v2  ;;  %v8510_v1 = vld [vmem:[#allocation5 + $0x17e4] ss:$16 sps:$4 sm:$0xff]   ;;  %v8513_v2 = vld [vmem:[#allocation5 + $0x17ec] ss:$16 sps:$4 sm:$0xff]  }
 0x341   :  { %5282 = vmatmul.mubr.bf16.vlgmr.msra.gmra.mrb[0].mxu0 %v185_v3  ;;  %5798 = vmatmul.mubr.bf16.vlgmr.msra.gmra.mrb[0].mxu1 %v185_v3  ;;  %v8508_v3 = vld [vmem:[#allocation5 + $0x17e0] ss:$16 sps:$4 sm:$0xff]  }
 0x342   :  { %5293 = vmatpush1.bf16.msra.mxu0 %v8418_v6  ;;  %5809 = vmatpush1.bf16.msra.mxu1 %v8421_v7  ;;  %v163_v6 = vld [vmem:[#allocation2 + $0x170] sm:$0xff]  ;;  %v8514_v7 = vld [vmem:[#allocation8 + $0x40] sm:$0xff]  }
 0x343   :  { %5294 = vmatprep.subr.bf16.mxu0 %v8426_v8  ;;  %5810 = vmatprep.subr.bf16.mxu1 %v8429_v9  ;;  %v8515_v8 = vld [vmem:[#allocation8 + $0xc0] sm:$0xff]   ;;  %v187_v9 = vpack.c.bf16 %v163_v6, %v139_v5 }
 0x344   :  { %5324 = vmatprep.mubr.bf16.mxu0 %v188_v10  ;;  %5840 = vmatprep.mubr.bf16.mxu1 %v188_v10  ;;  %v8516_v10 = vld [vmem:[#allocation8] sm:$0xff]  }
 0x346   :  { %5295 = vmatpush1.bf16.msra.mxu0 %v8424_v11  ;;  %5811 = vmatpush1.bf16.msra.mxu1 %v8427_v12  ;;  %v8517_v11 = vld [vmem:[#allocation8 + $0x80] sm:$0xff]   ;;  %v8518_v12 = vld [vmem:[#allocation8 + $0x48] sm:$0xff]  }
 0x347   :  { %5296 = vmatprep.subr.bf16.mxu0 %v8432_v13  ;;  %5812 = vmatprep.subr.bf16.mxu1 %v8435_v14  ;;  %v8519_v13 = vld [vmem:[#allocation8 + $0xc8] sm:$0xff]  }
 0x348   :  { %v8520_v14 = vld [vmem:[#allocation8 + $0x8] sm:$0xff]  }
 0x34a   :  { %5297 = vmatpush1.bf16.msra.mxu0 %v8430_v15  ;;  %5813 = vmatpush1.bf16.msra.mxu1 %v8433_v16  ;;  %v8521_v15 = vld [vmem:[#allocation8 + $0x88] sm:$0xff]   ;;  %v8522_v16 = vld [vmem:[#allocation8 + $0x50] sm:$0xff]  }
 0x34b   :  { %5298 = vmatprep.subr.bf16.mxu0 %v8438_v17  ;;  %5814 = vmatprep.subr.bf16.mxu1 %v8441_v18  ;;  %v8523_v17 = vld [vmem:[#allocation8 + $0xd0] sm:$0xff]  }
 0x34c   :  { %v8524_v18 = vld [vmem:[#allocation8 + $0x10] sm:$0xff]  }
 0x34e   :  { %5299 = vmatpush1.bf16.msra.mxu0 %v8436_v19  ;;  %5815 = vmatpush1.bf16.msra.mxu1 %v8439_v20  ;;  %v8525_v19 = vld [vmem:[#allocation8 + $0x90] sm:$0xff]   ;;  %v8526_v20 = vld [vmem:[#allocation8 + $0x58] sm:$0xff]  }
 0x34f   :  { %5300 = vmatprep.subr.bf16.mxu0 %v8444_v21  ;;  %5816 = vmatprep.subr.bf16.mxu1 %v8447_v22  ;;  %v8527_v21 = vld [vmem:[#allocation8 + $0xd8] sm:$0xff]  }
 0x350   :  { %v8528_v22 = vld [vmem:[#allocation8 + $0x18] sm:$0xff]  }
 0x352   :  { %5301 = vmatpush1.bf16.msra.mxu0 %v8442_v23  ;;  %5817 = vmatpush1.bf16.msra.mxu1 %v8445_v24  ;;  %v8529_v23 = vld [vmem:[#allocation8 + $0x98] sm:$0xff]   ;;  %v8530_v24 = vld [vmem:[#allocation8 + $0x60] sm:$0xff]  }
 0x353   :  { %5302 = vmatprep.subr.bf16.mxu0 %v8450_v25  ;;  %5818 = vmatprep.subr.bf16.mxu1 %v8453_v26  ;;  %v8531_v25 = vld [vmem:[#allocation8 + $0xe0] sm:$0xff]  }
 0x354   :  { %v8532_v26 = vld [vmem:[#allocation8 + $0x20] sm:$0xff]  }
 0x356   :  { %5303 = vmatpush1.bf16.msra.mxu0 %v8448_v27  ;;  %5819 = vmatpush1.bf16.msra.mxu1 %v8451_v28  ;;  %v8533_v27 = vld [vmem:[#allocation8 + $0xa0] sm:$0xff]   ;;  %v8534_v28 = vld [vmem:[#allocation8 + $0x68] sm:$0xff]  }
 0x357   :  { %5304 = vmatprep.subr.bf16.mxu0 %v8456_v29  ;;  %5820 = vmatprep.subr.bf16.mxu1 %v8459_v30  ;;  %v8535_v29 = vld [vmem:[#allocation8 + $0xe8] sm:$0xff]  }
 0x358   :  { %v8536_v30 = vld [vmem:[#allocation8 + $0x28] sm:$0xff]  }
 0x35a   :  { %5305 = vmatpush1.bf16.msra.mxu0 %v8454_v31  ;;  %5821 = vmatpush1.bf16.msra.mxu1 %v8457_v32  ;;  %v8537_v31 = vld [vmem:[#allocation8 + $0xa8] sm:$0xff]   ;;  %v8538_v32 = vld [vmem:[#allocation8 + $0x70] sm:$0xff]  }
 0x35b   :  { %5306 = vmatprep.subr.bf16.mxu0 %v8462_v33  ;;  %5822 = vmatprep.subr.bf16.mxu1 %v8465_v34  ;;  %v8539_v33 = vld [vmem:[#allocation8 + $0xf0] sm:$0xff]  }
 0x35c   :  { %v8540_v34 = vld [vmem:[#allocation8 + $0x30] sm:$0xff]  }
 0x35e   :  { %5307 = vmatpush1.bf16.msra.mxu0 %v8460_v35  ;;  %5823 = vmatpush1.bf16.msra.mxu1 %v8463_v36  ;;  %v8541_v35 = vld [vmem:[#allocation8 + $0xb0] sm:$0xff]   ;;  %v8542_v36 = vld [vmem:[#allocation8 + $0x78] sm:$0xff]  }
 0x35f   :  { %5308 = vmatprep.subr.bf16.mxu0 %v8468_v37  ;;  %5824 = vmatprep.subr.bf16.mxu1 %v8471_v38  ;;  %v8543_v37 = vld [vmem:[#allocation8 + $0xf8] sm:$0xff]  }
 0x360   :  { %v8544_v38 = vld [vmem:[#allocation8 + $0x38] sm:$0xff]  }
 0x362   :  { %5309 = vmatpush1.bf16.msra.mxu0 %v8466_v39  ;;  %5825 = vmatpush1.bf16.msra.mxu1 %v8469_v40  ;;  %v8545_v39 = vld [vmem:[#allocation8 + $0xb8] sm:$0xff]   ;;  %v8761_v40 = vmov 0.0  }
 0x363   :  { %5310 = vmatprep.subr.bf16.mxu0 %v8474_v41  ;;  %5826 = vmatprep.subr.bf16.mxu1 %v8477_v42  ;;  %v959_v41 = vlaneseq }
 0x365   :  { %v960_v42 = vshrl.u32 %v959_v41, 7 }
 0x366   :  { %5311 = vmatpush1.bf16.msra.mxu0 %v8472_v43  ;;  %5827 = vmatpush1.bf16.msra.mxu1 %v8475_v44 }
 0x367   :  { %5312 = vmatprep.subr.bf16.mxu0 %v8480_v45  ;;  %5828 = vmatprep.subr.bf16.mxu1 %v8483_v46  ;;  %v961_v43 = vsub.s32 0, %v960_v42  ;;  %v969_v44 = vsub.s32 2, %v960_v42  ;;  %v957_v45 = vld [vmem:[#allocation7] sm:$0xf]  ;;  %v965_v46 = vsub.s32 1, %v960_v42 }
 0x36a   :  { %5313 = vmatpush1.bf16.msra.mxu0 %v8478_v47  ;;  %5829 = vmatpush1.bf16.msra.mxu1 %v8481_v48  ;;  %v973_v47 = vsub.s32 3, %v960_v42  ;;  %v962_v48 = vrot.slane %v957_v45, %v961_v43 }
 0x36b   :  { %5314 = vmatprep.subr.bf16.mxu0 %v8486_v49  ;;  %5830 = vmatprep.subr.bf16.mxu1 %v8489_v50  ;;  %v970_v49 = vrot.slane %v957_v45, %v969_v44  ;;  %v966_v50 = vrot.slane %v957_v45, %v965_v46  ;;  %v7166_v44 = vld [vmem:[#allocation13] ss:$0 sm:$0xff] }
 0x36e   :  { %5315 = vmatpush1.bf16.msra.mxu0 %v8484_v51  ;;  %5831 = vmatpush1.bf16.msra.mxu1 %v8487_v52  ;;  %v974_v51 = vrot.slane %v957_v45, %v973_v47 }
 0x36f   :  { %5316 = vmatprep.subr.bf16.mxu0 %v8492_v53  ;;  %5832 = vmatprep.subr.bf16.mxu1 %v8495_v54 }
 0x372   :  { %5317 = vmatpush1.bf16.msra.mxu0 %v8490_v55  ;;  %5833 = vmatpush1.bf16.msra.mxu1 %v8493_v56 }
 0x373   :  { %5318 = vmatprep.subr.bf16.mxu0 %v8498_v57  ;;  %5834 = vmatprep.subr.bf16.mxu1 %v8501_v58 }
 0x376   :  { %5319 = vmatpush1.bf16.msra.mxu0 %v8496_v59  ;;  %5835 = vmatpush1.bf16.msra.mxu1 %v8499_v60 }
 0x377   :  { %5320 = vmatprep.subr.bf16.mxu0 %v8504_v61  ;;  %5836 = vmatprep.subr.bf16.mxu1 %v8507_v62 }
 0x37a   :  { %5321 = vmatpush1.bf16.msra.mxu0 %v8502_v63  ;;  %5837 = vmatpush1.bf16.msra.mxu1 %v8505_v0 }
 0x37b   :  { %5322 = vmatprep.subr.bf16.mxu0 %v8510_v1  ;;  %5838 = vmatprep.subr.bf16.mxu1 %v8513_v2 }
 0x37e   :  { %5323 = vmatpush1.bf16.msra.mxu0 %v8508_v3  ;;  %5839 = vmatpush1.bf16.msra.mxu1 %v8511_v4 }
 0x37f   :  { %7175 = vmatprep.subr.bf16.mxu0 %v8514_v7  ;;  %7197 = vmatprep.subr.bf16.mxu1 %v8515_v8 }
 0x381   :  { %5325 = vmatmul.mubr.bf16.vlgmr.msra.gmra.mrb[0].mxu0 %v187_v9  ;;  %5841 = vmatmul.mubr.bf16.vlgmr.msra.gmra.mrb[0].mxu1 %v187_v9 }
 0x382   :  { %7176 = vmatpush3.bf16.msra.mxu0 %v8516_v10  ;;  %7198 = vmatpush3.bf16.msra.mxu1 %v8517_v11 }
 0x383   :  { %7177 = vmatprep.subr.bf16.mxu0 %v8518_v12  ;;  %7199 = vmatprep.subr.bf16.mxu1 %v8519_v13 }
 0x386   :  { %7178 = vmatpush3.bf16.msra.mxu0 %v8520_v14  ;;  %7200 = vmatpush3.bf16.msra.mxu1 %v8521_v15 }
 0x387   :  { %7179 = vmatprep.subr.bf16.mxu0 %v8522_v16  ;;  %7201 = vmatprep.subr.bf16.mxu1 %v8523_v17  ;;  %v8546_v16 = vld [vmem:[#allocation11] sm:$0xff]   ;;  %v8547_v17 = vld [vmem:[#allocation11 + $0x8] sm:$0xff]  }
 0x38a   :  { %7180 = vmatpush3.bf16.msra.mxu0 %v8524_v18  ;;  %7202 = vmatpush3.bf16.msra.mxu1 %v8525_v19  ;;  %v8548_v18 = vld [vmem:[#allocation11 + $0x10] sm:$0xff]   ;;  %v8549_v19 = vld [vmem:[#allocation11 + $0x18] sm:$0xff]  }
 0x38b   :  { %7181 = vmatprep.subr.bf16.mxu0 %v8526_v20  ;;  %7203 = vmatprep.subr.bf16.mxu1 %v8527_v21  ;;  %v8550_v20 = vld [vmem:[#allocation11 + $0x20] sm:$0xff]   ;;  %v8551_v21 = vld [vmem:[#allocation11 + $0x28] sm:$0xff]  }
 0x38e   :  { %7182 = vmatpush3.bf16.msra.mxu0 %v8528_v22  ;;  %7204 = vmatpush3.bf16.msra.mxu1 %v8529_v23  ;;  %v8552_v22 = vld [vmem:[#allocation11 + $0x30] sm:$0xff]   ;;  %v8553_v23 = vld [vmem:[#allocation11 + $0x38] sm:$0xff]  }
 0x38f   :  { %7183 = vmatprep.subr.bf16.mxu0 %v8530_v24  ;;  %7205 = vmatprep.subr.bf16.mxu1 %v8531_v25 }
 0x392   :  { %7184 = vmatpush3.bf16.msra.mxu0 %v8532_v26  ;;  %7206 = vmatpush3.bf16.msra.mxu1 %v8533_v27  ;;  %v7133_v26 = vld [vmem:[#allocation10] ss:$0 sm:$0xff] }
 0x393   :  { %7185 = vmatprep.subr.bf16.mxu0 %v8534_v28  ;;  %7207 = vmatprep.subr.bf16.mxu1 %v8535_v29 }
 0x396   :  { %7186 = vmatpush3.bf16.msra.mxu0 %v8536_v30  ;;  %7208 = vmatpush3.bf16.msra.mxu1 %v8537_v31 }
 0x397   :  { %7187 = vmatprep.subr.bf16.mxu0 %v8538_v32  ;;  %7209 = vmatprep.subr.bf16.mxu1 %v8539_v33 }
 0x39a   :  { %7188 = vmatpush3.bf16.msra.mxu0 %v8540_v34  ;;  %7210 = vmatpush3.bf16.msra.mxu1 %v8541_v35 }
 0x39b   :  { %7189 = vmatprep.subr.bf16.mxu0 %v8542_v36  ;;  %7211 = vmatprep.subr.bf16.mxu1 %v8543_v37 }
 0x39e   :  { %7190 = vmatpush3.bf16.msra.mxu0 %v8544_v38  ;;  %7212 = vmatpush3.bf16.msra.mxu1 %v8545_v39 }
 0x39f   :  { %7228 = vmatprep.subr.bf16.mxu0 %v8761_v40 }
 0x454   :  { %v5326_v52 = vpop.f32.mrb[0].mxu0  ;;  %v5842_v53 = vpop.f32.mrb[0].mxu1 }
 0x455   :  { %v7248_v54 = vadd.f32 %v5326_v52, %v962_v48  ;;  %v7252_v55 = vadd.f32 %v5842_v53, %v970_v49  ;;  %v5328_v56 = vpop.f32.mrb[1].mxu0  ;;  %v5844_v57 = vpop.f32.mrb[1].mxu1 }
 0x456   :  { %v7249_v58 = vadd.f32 %v5328_v56, %v966_v50  ;;  %v7253_v59 = vadd.f32 %v5844_v57, %v974_v51  ;;  %v5330_v60 = vpop.f32.mrb[2].mxu0  ;;  %v5846_v61 = vpop.f32.mrb[2].mxu1 }
 0x457   :  { %v7250_v62 = vadd.f32 %v5330_v60, %v962_v48  ;;  %v7254_v63 = vadd.f32 %v5846_v61, %v970_v49  ;;  %v5332_v0 = vpop.f32.mrb[3].mxu0  ;;  %v5848_v1 = vpop.f32.mrb[3].mxu1  ;;  %v5851_v4 = vmax.f32 %v7248_v54, 0.0  ;;  %v5853_v5 = vmax.f32 %v7252_v55, 0.0 }
 0x458   :  { %v7251_v2 = vadd.f32 %v5332_v0, %v966_v50  ;;  %v7255_v3 = vadd.f32 %v5848_v1, %v974_v51  ;;  %v5852_v8 = vmax.f32 %v7249_v58, 0.0  ;;  %v5854_v9 = vmax.f32 %v7253_v59, 0.0 }
 0x459   :  { %v5855_v6 = vmax.f32 %v7250_v62, 0.0  ;;  %v5857_v7 = vmax.f32 %v7254_v63, 0.0 }
 0x45a   :  { %v5856_v10 = vmax.f32 %v7251_v2, 0.0  ;;  %v5858_v11 = vmax.f32 %v7255_v3, 0.0 }
 0x45b   :  { %v5859_v12 = vpack.c.bf16 %v5855_v6, %v5851_v4  ;;  %v5861_v13 = vpack.c.bf16 %v5857_v7, %v5853_v5 }
 0x45c   :  { %v5860_v14 = vpack.c.bf16 %v5856_v10, %v5852_v8  ;;  %v5862_v15 = vpack.c.bf16 %v5858_v11, %v5854_v9 }
 0x45e   :  { %6158 = vmatprep.mubr.bf16.mxu0 %v5860_v14  ;;  %6199 = vmatprep.mubr.bf16.mxu1 %v5862_v15 }
 0x45f   :  { %6159 = vmatmul.mubr.bf16.vlgmr.msra.gmra.mrb[4].mxu0 %v5859_v12  ;;  %6200 = vmatmul.mubr.bf16.vlgmr.msra.gmra.mrb[4].mxu1 %v5861_v13 }
 0x460   :  { %7229 = vmatpush3.bf16.msra.mxu0 %v8546_v16  ;;  %7244 = vmatprep.mubr.msk.bf16.mxu0 %vm8762_vm0, %v8761_v40 }
 0x461   :  { %7230 = vmatprep.subr.bf16.mxu0 %v8761_v40 }
 0x464   :  { %7231 = vmatpush3.bf16.msra.mxu0 %v8547_v17 }
 0x465   :  { %7232 = vmatprep.subr.bf16.mxu0 %v8761_v40 }
 0x468   :  { %7233 = vmatpush3.bf16.msra.mxu0 %v8548_v18 }
 0x469   :  { %7234 = vmatprep.subr.bf16.mxu0 %v8761_v40 }
 0x46c   :  { %7235 = vmatpush3.bf16.msra.mxu0 %v8549_v19 }
 0x46d   :  { %7236 = vmatprep.subr.bf16.mxu0 %v8761_v40 }
 0x470   :  { %7237 = vmatpush3.bf16.msra.mxu0 %v8550_v20 }
 0x471   :  { %7238 = vmatprep.subr.bf16.mxu0 %v8761_v40 }
 0x474   :  { %7239 = vmatpush3.bf16.msra.mxu0 %v8551_v21 }
 0x475   :  { %7240 = vmatprep.subr.bf16.mxu0 %v8761_v40 }
 0x478   :  { %7241 = vmatpush3.bf16.msra.mxu0 %v8552_v22 }
 0x479   :  { %7242 = vmatprep.subr.bf16.mxu0 %v8761_v40 }
 0x47c   :  { %7243 = vmatpush3.bf16.msra.mxu0 %v8553_v23 }
 0x532   :  { %v7191_v24 = vpop.f32.mrb[4].mxu0  ;;  %v7213_v25 = vpop.f32.mrb[4].mxu1 }
 0x533   :  { %v7192_v27 = vpop.f32.mrb[5].mxu0  ;;  %v7214_v28 = vpop.f32.mrb[5].mxu1 }
 0x534   :  { %v7193_v29 = vadd.f32 %v7192_v27, %v7191_v24  ;;  %v7215_v30 = vadd.f32 %v7214_v28, %v7213_v25  ;;  %v7194_v31 = vpop.f32.mrb[6].mxu0  ;;  %v7216_v32 = vpop.f32.mrb[6].mxu1 }
 0x535   :  { %v7195_v33 = vpop.f32.mrb[7].mxu0  ;;  %v7217_v34 = vpop.f32.mrb[7].mxu1 }
 0x536   :  { %v6161_v35 = vadd.f32 %v7193_v29, %v7133_v26  ;;  %v7196_v36 = vadd.f32 %v7195_v33, %v7194_v31  ;;  %v7218_v37 = vadd.f32 %v7217_v34, %v7216_v32 }
 0x538   :  { %v6202_v38 = vadd.f32 %v7215_v30, %v6161_v35  ;;  %v6164_v39 = vadd.f32 %v7196_v36, %v7133_v26 }
 0x53a   :  { %v6205_v41 = vadd.f32 %v7218_v37, %v6164_v39  ;;  %v6208_v42 = vmax.f32 %v6202_v38, 0.0 }
 0x53c   :  { %v6209_v43 = vmax.f32 %v6205_v41, 0.0 }
 0x53e   :  { %v6210_v40 = vpack.c.bf16 %v6209_v43, %v6208_v42 }
 0x540   :  { %7245 = vmatmul.mubr.bf16.vlgmr.msra.gmra.mrb[8].mxu0 %v6210_v40 }
 0x613   :  { %v6316_v45 = vpop.f32.mrb[8].mxu0 }
 0x614   :  { %v6317_v46 = vadd.f32 %v7166_v44, %v6316_v45  ;;  %v7246_v47 = vpop.f32.mrb[9].mxu0 }
 0x615   :  { %v6319_v48 = vpop.f32.mrb[10].mxu0 }
 0x616   :  { %6323 = vmax.xlane.f32.xlu0 %v6317_v46  ;;  %v7247_v49 = vpop.f32.mrb[11].mxu0  ;;  %v6320_v50 = vadd.f32 %v7166_v44, %v6319_v48 }
 0x61a   :  { %6325 = vmax.xlane.f32.xlu0 %v6320_v50 }
 0x6a3   :  { %v6324_v51 = vpop.xlane.xlu0 %6323 }
 0x6a4   :  { %v6327_v52 = vsub.f32 %v6317_v46, %v6324_v51 }
 0x6a6   :  { %v6329_v53 = vmul.f32 1.442695, %v6327_v52 }
 0x6a7   :  { %v6326_v54 = vpop.xlane.xlu0 %6325 }
 0x6a8   :  { %v6328_v55 = vsub.f32 %v6320_v50, %v6326_v54  ;;  %8554 = vpow2.f32 %v6329_v53 }
 0x6aa   :  { %v6331_v56 = vmul.f32 1.442695, %v6328_v55 }
 0x6ac   :  { %8556 = vpow2.f32 %v6331_v56 }
 0x6b2   :  { %v8555_v57 = vpop.eup %8554 }
 0x6b3   :  { %6333 = vadd.xlane.f32.xlu1 %v8555_v57 }
 0x6b6   :  { %v8557_v58 = vpop.eup %8556 }
 0x6b7   :  { %6335 = vadd.xlane.f32.xlu1 %v8557_v58 }
 0x740   :  { %v6334_v59 = vpop.xlane.xlu1 %6333 }
 0x741   :  { %8558 = vlog2.f32 %v6334_v59 }
 0x744   :  { %v6336_v60 = vpop.xlane.xlu1 %6335 }
 0x745   :  { %8560 = vlog2.f32 %v6336_v60 }
 0x74b   :  { %v8559_v61 = vpop.eup %8558 }
 0x74c   :  { %v6338_v62 = vmul.f32 0.6931472, %v8559_v61 }
 0x74e   :  { %v6341_v63 = vsub.f32 %v6327_v52, %v6338_v62 }
 0x74f   :  { %v8561_v0 = vpop.eup %8560 }
 0x750   :  { %6343 = vst [vmem:[#allocation14] sm:$0xff] %v6341_v63  ;;  %v6340_v1 = vmul.f32 0.6931472, %v8561_v0 }
 0x752   :  { %v6342_v2 = vsub.f32 %v6328_v55, %v6340_v1 }
 0x754   :  { %6344 = vst [vmem:[#allocation14 + $0x8] sm:$0xff] %v6342_v2 }
 0x755   :  { %8727 = shalt.err (!%p8724_p4)
}
 0x756   :  { %s8728_s16 = scalar_lea.hbm %s8925_s7, 256 }
 0x757   :  { %p8729_p5 = scmp.ne.s32.totalorder %s8925_s7, %s8728_s16  ;;  %p8732_p6 = scmp.lt.u32.totalorder %s8728_s16, %s8925_s7 }
 0x759   :  { %p8734_p7 = pnand %p8732_p6, %p8729_p5 }
 0x75b   :  { %8737 = shalt.err (!%p8734_p7)
}
 0x75c   :  { %s8764_s21 = smov 128   ;;  %s8765_s22 = smov 8  }
 0x75d   :  { %6356 = dma.vmem_to_hbm [thread:$0]  %s6351_s15, 256, %s8925_s7, [#allocation4], %s8764_s21, %s8764_s21, %s8765_s22  }
 0x75e   :  { %8746 = dma.done.wait [#allocation4], 256  }
 0x75f   :  { %8747 = vsyncadd [#allocation4], 4294967040 }
 0x760   :  { %6360 = vsyncpa [#allocation3], 1 }
 0x761   :  { %6361 = vsyncpa [#allocation6], 1 }
 0x762   :  { %6362 = vsyncpa [#allocation9], 1 }
 0x763   :  { %6363 = vsyncpa [#allocation12], 1 }
 0x764   :  { %6364 = vsyncpa [#allocation4], 1 }

</bundles_post_ra>
